<compile_context>
chip_gen: v7x
topology: tpu7x:2x2x1
jax: 0.10.0
libtpu: 0.0.40
codegen_flags: <defaults>
</compile_context>

<pallas_src>
import jax
import jax.numpy as jnp
from jax import lax
from jax.experimental import pallas as pl
from jax.experimental.pallas import tpu as pltpu

WORD_VECTOR_LENGTH = 300   # GRU input size (layer 0)
HIDDEN = 50                # GRU hidden size / Linear in&out features
NUM_LAYERS = 3

HP = 128                   # hidden padded to one full lane group
BP = 8                     # batch padded to f32 sublane tile
EPAD = 384                 # layer-0 feature dim padded to 3*128 lanes


# --------------------------------- Pallas kernel ---------------------------------
def encoder_kernel(emb_ref,
                   wih0_ref, whh0_ref, bc0_ref, bhn0_ref,
                   wih1_ref, whh1_ref, bc1_ref, bhn1_ref,
                   wih2_ref, whh2_ref, bc2_ref, bhn2_ref,
                   wout_ref, bout_ref,
                   hid_ref,
                   gi0_scr, hcat_scr):
    """GRU(3 layers, wavefront-scheduled) + Linear + Tanh on final hidden states.

    emb_ref : (S*bp, EPAD)     time-major embedded input (padded batch & features)
    wihX    : (Din_pad, 3*HP)  gate blocks r/z/n at lane offsets 0/128/256
    whhX    : (HP, 3*HP)
    bcX     : (1, 3*HP)        folded bias: [bih_r+bhh_r, bih_z+bhh_z, bih_n]
    bhnX    : (1, HP)          bhh_n (applied inside r*(gh_n + bhh_n))
    wout    : (HP, HP), bout: (1, HP)
    hid_ref : (NUM_LAYERS*bp, HP) output
    scratch : gi0_scr (S*bp, 3*HP), hcat_scr (NUM_LAYERS*bp, HP)
    """
    bp = hcat_scr.shape[0] // NUM_LAYERS
    S = gi0_scr.shape[0] // bp

    # Batched input-to-hidden projection for layer 0 over ALL timesteps
    # (one big MXU matmul, biases folded in once).
    gi0_scr[...] = (jnp.dot(emb_ref[...], wih0_ref[...],
                            preferred_element_type=jnp.float32) + bc0_ref[...])

    # Hoist loop-invariant weight reads / bias broadcasts out of the recurrence.
    whh0 = whh0_ref[...]
    whh1 = whh1_ref[...]
    whh2 = whh2_ref[...]
    wih1 = wih1_ref[...]
    wih2 = wih2_ref[...]
    bc1 = jnp.broadcast_to(bc1_ref[...], (bp, 3 * HP))
    bc2 = jnp.broadcast_to(bc2_ref[...], (bp, 3 * HP))
    bhn0 = jnp.broadcast_to(bhn0_ref[...], (bp, HP))
    bhn1 = jnp.broadcast_to(bhn1_ref[...], (bp, HP))
    bhn2 = jnp.broadcast_to(bhn2_ref[...], (bp, HP))

    def gru_cell(gi, gh, h, bhn):
        # Fused r/z sigmoid over the contiguous lane-aligned (bp, 2*HP) slice.
        rz = jax.nn.sigmoid(gi[:, :2 * HP] + gh[:, :2 * HP])
        r = rz[:, :HP]
        z = rz[:, HP:2 * HP]
        n = jnp.tanh(gi[:, 2 * HP:] + r * (gh[:, 2 * HP:] + bhn))
        return (1.0 - z) * n + z * h

    # TODO(synk): hold whhX in MXU weight registers across supersteps via
    # pltpu.matmul_push_rhs / matmul_acc_lhs / matmul_pop (loop-invariant RHS);
    # skipped here to keep lowering robust across v5e/v6e/v7x.
    def superstep(t, carry):
        h0, h1, h2 = carry
        # ---- layer 0 at step t (precomputed gi; clamp index, mask inactive) ----
        t0 = jnp.minimum(t, S - 1)
        off = pl.multiple_of(t0 * bp, bp)
        gi0 = gi0_scr[pl.ds(off, bp), :]
        gh0 = jnp.dot(h0, whh0, preferred_element_type=jnp.float32)
        h0n = gru_cell(gi0, gh0, h0, bhn0)
        # ---- layer 1 at step t-1 (input = h0 entering this superstep) ----
        gi1 = jnp.dot(h0, wih1, preferred_element_type=jnp.float32) + bc1
        gh1 = jnp.dot(h1, whh1, preferred_element_type=jnp.float32)
        h1n = gru_cell(gi1, gh1, h1, bhn1)
        # ---- layer 2 at step t-2 (input = h1 entering this superstep) ----
        gi2 = jnp.dot(h1, wih2, preferred_element_type=jnp.float32) + bc2
        gh2 = jnp.dot(h2, whh2, preferred_element_type=jnp.float32)
        h2n = gru_cell(gi2, gh2, h2, bhn2)
        # Activity masks (wavefront ramp-up / ramp-down).
        h0 = jnp.where(t < S, h0n, h0)
        h1 = jnp.where((t >= 1) & (t < S + 1), h1n, h1)
        h2 = jnp.where(t >= 2, h2n, h2)
        return (h0, h1, h2)

    zeros = jnp.zeros((bp, HP), jnp.float32)
    n_steps = S + NUM_LAYERS - 1
    unroll = True if n_steps <= 32 else 8
    h0, h1, h2 = lax.fori_loop(0, n_steps, superstep, (zeros, zeros, zeros),
                               unroll=unroll)

    # Final Linear + Tanh over all three layers' final hidden states:
    # write rows directly (no concatenate), one (3*bp, HP) x (HP, HP) matmul,
    # single lane-dense store.
    hcat_scr[pl.ds(0, bp), :] = h0
    hcat_scr[pl.ds(bp, bp), :] = h1
    hcat_scr[pl.ds(2 * bp, bp), :] = h2
    hid_ref[...] = jnp.tanh(
        jnp.dot(hcat_scr[...], wout_ref[...], preferred_element_type=jnp.float32)
        + bout_ref[...])


# ------------------------------ wrapper-side packing ------------------------------
def _pad_gate_matrix(w_t, din_pad):
    """(Din, 3H) PyTorch-transposed gate weight -> (din_pad, 3*HP), gates lane-aligned."""
    din = w_t.shape[0]
    out = jnp.zeros((din_pad, 3 * HP), jnp.float32)
    for g in range(3):
        out = out.at[:din, g * HP:g * HP + HIDDEN].set(
            w_t[:, g * HIDDEN:(g + 1) * HIDDEN])
    return out


def _combined_bias(bih, bhh):
    """Folded bias (1, 3*HP): bih+bhh for r,z; bih only for n."""
    bc = jnp.zeros((1, 3 * HP), jnp.float32)
    bc = bc.at[0, 0 * HP:0 * HP + HIDDEN].set(bih[:HIDDEN] + bhh[:HIDDEN])
    bc = bc.at[0, 1 * HP:1 * HP + HIDDEN].set(bih[HIDDEN:2 * HIDDEN] + bhh[HIDDEN:2 * HIDDEN])
    bc = bc.at[0, 2 * HP:2 * HP + HIDDEN].set(bih[2 * HIDDEN:3 * HIDDEN])
    return bc


def _pad_vec(v):
    return jnp.zeros((1, HP), jnp.float32).at[0, :v.shape[0]].set(v)


def _pad_square(w_t):
    return jnp.zeros((HP, HP), jnp.float32).at[:HIDDEN, :HIDDEN].set(w_t)


def encoder_forward(x_idx, embedding, params):
    """x_idx: (B, S) int32 token indices. Returns hidden (NUM_LAYERS, B, HIDDEN)."""
    B, S = x_idx.shape
    bp = max(BP, ((B + 7) // 8) * 8)

    # Embedding gather kept as wrapper glue (cold path at these sizes).
    # TODO(synk): for large B*S, move the gather in-kernel via scalar-prefetched
    # indices + per-row DMA to avoid the HBM round-trip of the embedded sequence.
    emb = jnp.take(embedding, x_idx, axis=0).astype(jnp.float32)       # (B, S, 300)

    # Pad batch to sublane tile and features to 384 lanes; time-major flat layout
    # (row = t*bp + b) so every per-timestep slice is a sublane-aligned block.
    emb_p = jnp.zeros((bp, S, EPAD), jnp.float32).at[:B, :, :WORD_VECTOR_LENGTH].set(emb)
    emb_tm = emb_p.transpose(1, 0, 2).reshape(S * bp, EPAD)

    ins = [emb_tm]
    for l in range(NUM_LAYERS):
        wih, whh, bih, bhh = params[f"l{l}"]
        din_pad = EPAD if l == 0 else HP
        ins += [_pad_gate_matrix(wih.T, din_pad),
                _pad_gate_matrix(whh.T, HP),
                _combined_bias(bih, bhh),
                _pad_vec(bhh[2 * HIDDEN:3 * HIDDEN])]
    ins += [_pad_square(params["wout"].T), _pad_vec(params["bout"])]

    # VMEM residency: emb + gi0 scratch dominate (linear in S); raise the scoped
    # limit accordingly but stay within v7x's 64 MiB physical VMEM.
    # TODO(synk): for very long S, chunk emb/gi0 over time (double-buffered) so
    # VMEM stays flat in S; and for B >= 16 add a batch grid with
    # dimension_semantics=("parallel",) to use both v7x TensorCores.
    resident = 4 * (S * bp * EPAD + S * bp * 3 * HP
                    + EPAD * 3 * HP + 2 * NUM_LAYERS * HP * 3 * HP
                    + HP * HP + 2 * NUM_LAYERS * bp * HP)
    vmem_limit = int(min(64 << 20, max(32 << 20, 2 * resident + (8 << 20))))

    out = pl.pallas_call(
        encoder_kernel,
        out_shape=jax.ShapeDtypeStruct((NUM_LAYERS * bp, HP), jnp.float32),
        in_specs=[pl.BlockSpec(memory_space=pltpu.MemorySpace.VMEM)] * len(ins),
        out_specs=pl.BlockSpec(memory_space=pltpu.MemorySpace.VMEM),
        scratch_shapes=[
            pltpu.VMEM((S * bp, 3 * HP), jnp.float32),        # batched gi, layer 0
            pltpu.VMEM((NUM_LAYERS * bp, HP), jnp.float32),   # final hidden slab
        ],
        compiler_params=pltpu.CompilerParams(vmem_limit_bytes=vmem_limit),
    )(*ins)

    return out.reshape(NUM_LAYERS, bp, HP)[:, :B, :HIDDEN]


# ------------------------- pure-JAX reference (for checking) -------------------------
def encoder_reference(x_idx, embedding, params):
    emb = embedding[x_idx].astype(jnp.float32)
    B, S, _ = emb.shape
    H = HIDDEN
    inp = emb
    finals = []
    for l in range(NUM_LAYERS):
        wih, whh, bih, bhh = params[f"l{l}"]
        h = jnp.zeros((B, H), jnp.float32)
        outs = []
        for t in range(S):
            xt = inp[:, t, :]
            gi = xt @ wih.T + bih
            gh = h @ whh.T + bhh
            r = jax.nn.sigmoid(gi[:, :H] + gh[:, :H])
            z = jax.nn.sigmoid(gi[:, H:2 * H] + gh[:, H:2 * H])
            n = jnp.tanh(gi[:, 2 * H:] + r * gh[:, 2 * H:])
            h = (1.0 - z) * n + z * h
            outs.append(h)
        inp = jnp.stack(outs, axis=1)
        finals.append(h)
    hid = jnp.stack(finals, axis=0)                      # (L, B, H)
    return jnp.tanh(hid @ params["wout"].T + params["bout"])


# ------------------------------ deterministic params ---------------------------------
def make_params(key, vocab_size):
    keys = jax.random.split(key, 32)
    ki = iter(keys)
    k_gru = 1.0 / jnp.sqrt(jnp.float32(HIDDEN))
    params = {}
    embedding = jax.random.normal(next(ki), (vocab_size, WORD_VECTOR_LENGTH), jnp.float32)
    for l in range(NUM_LAYERS):
        din = WORD_VECTOR_LENGTH if l == 0 else HIDDEN
        wih = jax.random.uniform(next(ki), (3 * HIDDEN, din), jnp.float32, -k_gru, k_gru)
        whh = jax.random.uniform(next(ki), (3 * HIDDEN, HIDDEN), jnp.float32, -k_gru, k_gru)
        bih = jax.random.uniform(next(ki), (3 * HIDDEN,), jnp.float32, -k_gru, k_gru)
        bhh = jax.random.uniform(next(ki), (3 * HIDDEN,), jnp.float32, -k_gru, k_gru)
        params[f"l{l}"] = (wih, whh, bih, bhh)
    k_lin = 1.0 / jnp.sqrt(jnp.float32(HIDDEN))
    params["wout"] = jax.random.uniform(next(ki), (HIDDEN, HIDDEN), jnp.float32, -k_lin, k_lin)
    params["bout"] = jax.random.uniform(next(ki), (HIDDEN,), jnp.float32, -k_lin, k_lin)
    return embedding, params


if __name__ == "__main__":
    key = jax.random.PRNGKey(0)
    k_param, k_idx = jax.random.split(key)

    VOCAB = 100
    B, S = 2, 8
    embedding, params = make_params(k_param, VOCAB)
    x_idx = jax.random.randint(k_idx, (B, S), 0, VOCAB, dtype=jnp.int32)

    hidden = encoder_forward(x_idx, embedding, params)
    hidden = jax.block_until_ready(hidden)

    ref = encoder_reference(x_idx, embedding, params)
    assert hidden.shape == (NUM_LAYERS, B, HIDDEN), hidden.shape
    assert jnp.allclose(hidden, ref, atol=1e-4, rtol=1e-4), "mismatch vs JAX reference"

    print("KERNEL_OK")
</pallas_src>

<mosaic_0001>
module attributes {stable_mosaic.version = 11 : i64} {
  func.func @encoder_kernel(%arg0: memref<64x384xf32, #tpu.memory_space<vmem>>, %arg1: memref<384x384xf32, #tpu.memory_space<vmem>>, %arg2: memref<128x384xf32, #tpu.memory_space<vmem>>, %arg3: memref<1x384xf32, #tpu.memory_space<vmem>>, %arg4: memref<1x128xf32, #tpu.memory_space<vmem>>, %arg5: memref<128x384xf32, #tpu.memory_space<vmem>>, %arg6: memref<128x384xf32, #tpu.memory_space<vmem>>, %arg7: memref<1x384xf32, #tpu.memory_space<vmem>>, %arg8: memref<1x128xf32, #tpu.memory_space<vmem>>, %arg9: memref<128x384xf32, #tpu.memory_space<vmem>>, %arg10: memref<128x384xf32, #tpu.memory_space<vmem>>, %arg11: memref<1x384xf32, #tpu.memory_space<vmem>>, %arg12: memref<1x128xf32, #tpu.memory_space<vmem>>, %arg13: memref<128x128xf32, #tpu.memory_space<vmem>>, %arg14: memref<1x128xf32, #tpu.memory_space<vmem>>, %arg15: memref<24x128xf32, #tpu.memory_space<vmem>>, %arg16: memref<64x384xf32, #tpu.memory_space<vmem>>, %arg17: memref<24x128xf32, #tpu.memory_space<vmem>>) attributes {dimension_semantics = [], scalar_prefetch = 0 : i64, scratch_operands = 2 : i64, tpu.core_type = #tpu.core_type<tc>} {
    %c0 = arith.constant 0 : index
    %c0_0 = arith.constant 0 : index
    %0 = vector.load %arg0[%c0, %c0_0] : memref<64x384xf32, #tpu.memory_space<vmem>>, vector<64x384xf32>
    %c0_1 = arith.constant 0 : index
    %c0_2 = arith.constant 0 : index
    %1 = vector.load %arg1[%c0_1, %c0_2] : memref<384x384xf32, #tpu.memory_space<vmem>>, vector<384x384xf32>
    %cst = arith.constant dense<0.000000e+00> : vector<64x384xf32>
    %2 = tpu.matmul %0, %1, %cst {dimension_numbers = #tpu.dot_dimension_numbers<[1], [0], [0], [1], [0, 0, 1, 1], [], []>} : vector<64x384xf32>, vector<384x384xf32>, vector<64x384xf32> -> vector<64x384xf32>
    %c0_3 = arith.constant 0 : index
    %c0_4 = arith.constant 0 : index
    %3 = vector.load %arg3[%c0_3, %c0_4] : memref<1x384xf32, #tpu.memory_space<vmem>>, vector<1x384xf32>
    %4 = vector.broadcast %3 : vector<1x384xf32> to vector<64x384xf32>
    %5 = arith.addf %2, %4 : vector<64x384xf32>
    %c0_5 = arith.constant 0 : index
    %c0_6 = arith.constant 0 : index
    %6 = vector.load %arg16[%c0_5, %c0_6] : memref<64x384xf32, #tpu.memory_space<vmem>>, vector<64x384xf32>
    tpu.vector_store %arg16[%c0_5, %c0_6], %5 {strides = array<i32>} : memref<64x384xf32, #tpu.memory_space<vmem>>, vector<64x384xf32>,
    %c0_7 = arith.constant 0 : index
    %c0_8 = arith.constant 0 : index
    %7 = vector.load %arg2[%c0_7, %c0_8] : memref<128x384xf32, #tpu.memory_space<vmem>>, vector<128x384xf32>
    %c0_9 = arith.constant 0 : index
    %c0_10 = arith.constant 0 : index
    %8 = vector.load %arg6[%c0_9, %c0_10] : memref<128x384xf32, #tpu.memory_space<vmem>>, vector<128x384xf32>
    %c0_11 = arith.constant 0 : index
    %c0_12 = arith.constant 0 : index
    %9 = vector.load %arg10[%c0_11, %c0_12] : memref<128x384xf32, #tpu.memory_space<vmem>>, vector<128x384xf32>
    %c0_13 = arith.constant 0 : index
    %c0_14 = arith.constant 0 : index
    %10 = vector.load %arg5[%c0_13, %c0_14] : memref<128x384xf32, #tpu.memory_space<vmem>>, vector<128x384xf32>
    %c0_15 = arith.constant 0 : index
    %c0_16 = arith.constant 0 : index
    %11 = vector.load %arg9[%c0_15, %c0_16] : memref<128x384xf32, #tpu.memory_space<vmem>>, vector<128x384xf32>
    %c0_17 = arith.constant 0 : index
    %c0_18 = arith.constant 0 : index
    %12 = vector.load %arg7[%c0_17, %c0_18] : memref<1x384xf32, #tpu.memory_space<vmem>>, vector<1x384xf32>
    %13 = vector.shape_cast %12 : vector<1x384xf32> to vector<1x384xf32>
    %14 = vector.broadcast %13 : vector<1x384xf32> to vector<8x384xf32>
    %c0_19 = arith.constant 0 : index
    %c0_20 = arith.constant 0 : index
    %15 = vector.load %arg11[%c0_19, %c0_20] : memref<1x384xf32, #tpu.memory_space<vmem>>, vector<1x384xf32>
    %16 = vector.shape_cast %15 : vector<1x384xf32> to vector<1x384xf32>
    %17 = vector.broadcast %16 : vector<1x384xf32> to vector<8x384xf32>
    %c0_21 = arith.constant 0 : index
    %c0_22 = arith.constant 0 : index
    %18 = vector.load %arg4[%c0_21, %c0_22] : memref<1x128xf32, #tpu.memory_space<vmem>>, vector<1x128xf32>
    %19 = vector.shape_cast %18 : vector<1x128xf32> to vector<1x128xf32>
    %20 = vector.broadcast %19 : vector<1x128xf32> to vector<8x128xf32>
    %c0_23 = arith.constant 0 : index
    %c0_24 = arith.constant 0 : index
    %21 = vector.load %arg8[%c0_23, %c0_24] : memref<1x128xf32, #tpu.memory_space<vmem>>, vector<1x128xf32>
    %22 = vector.shape_cast %21 : vector<1x128xf32> to vector<1x128xf32>
    %23 = vector.broadcast %22 : vector<1x128xf32> to vector<8x128xf32>
    %c0_25 = arith.constant 0 : index
    %c0_26 = arith.constant 0 : index
    %24 = vector.load %arg12[%c0_25, %c0_26] : memref<1x128xf32, #tpu.memory_space<vmem>>, vector<1x128xf32>
    %25 = vector.shape_cast %24 : vector<1x128xf32> to vector<1x128xf32>
    %26 = vector.broadcast %25 : vector<1x128xf32> to vector<8x128xf32>
    %cst_27 = arith.constant 0.000000e+00 : f32
    %27 = vector.broadcast %cst_27 : f32 to vector<8x128xf32>
    %c0_i32 = arith.constant 0 : i32
    %c7_i32 = arith.constant 7 : i32
    %28 = arith.minsi %c0_i32, %c7_i32 : i32
    %c8_i32 = arith.constant 8 : i32
    %29 = arith.muli %28, %c8_i32 : i32
    %30 = tpu.assume_multiple %29, 8 : i32
    %31 = arith.index_cast %30 : i32 to index
    %c0_28 = arith.constant 0 : index
    %32 = vector.load %arg16[%31, %c0_28] : memref<64x384xf32, #tpu.memory_space<vmem>>, vector<8x384xf32>
    %cst_29 = arith.constant dense<0.000000e+00> : vector<8x384xf32>
    %33 = tpu.matmul %27, %7, %cst_29 {dimension_numbers = #tpu.dot_dimension_numbers<[1], [0], [0], [1], [0, 0, 1, 1], [], []>} : vector<8x128xf32>, vector<128x384xf32>, vector<8x384xf32> -> vector<8x384xf32>
    %34 = vector.extract_strided_slice %32 {offsets = [0, 0], sizes = [8, 256], strides = [1, 1]} : vector<8x384xf32> to vector<8x256xf32>
    %35 = vector.extract_strided_slice %33 {offsets = [0, 0], sizes = [8, 256], strides = [1, 1]} : vector<8x384xf32> to vector<8x256xf32>
    %36 = arith.addf %34, %35 : vector<8x256xf32>
    %37 = arith.negf %36 : vector<8x256xf32>
    %38 = math.exp %37 : vector<8x256xf32>
    %cst_30 = arith.constant 1.000000e+00 : f32
    %39 = vector.broadcast %cst_30 : f32 to vector<8x256xf32>
    %40 = arith.addf %39, %38 : vector<8x256xf32>
    %41 = arith.divf %39, %40 : vector<8x256xf32>
    %42 = vector.extract_strided_slice %41 {offsets = [0, 0], sizes = [8, 128], strides = [1, 1]} : vector<8x256xf32> to vector<8x128xf32>
    %43 = vector.extract_strided_slice %41 {offsets = [0, 128], sizes = [8, 128], strides = [1, 1]} : vector<8x256xf32> to vector<8x128xf32>
    %44 = vector.extract_strided_slice %32 {offsets = [0, 256], sizes = [8, 128], strides = [1, 1]} : vector<8x384xf32> to vector<8x128xf32>
    %45 = vector.extract_strided_slice %33 {offsets = [0, 256], sizes = [8, 128], strides = [1, 1]} : vector<8x384xf32> to vector<8x128xf32>
    %46 = arith.addf %45, %20 : vector<8x128xf32>
    %47 = arith.mulf %42, %46 : vector<8x128xf32>
    %48 = arith.addf %44, %47 : vector<8x128xf32>
    %49 = math.tanh %48 : vector<8x128xf32>
    %cst_31 = arith.constant 1.000000e+00 : f32
    %50 = vector.broadcast %cst_31 : f32 to vector<8x128xf32>
    %51 = arith.subf %50, %43 : vector<8x128xf32>
    %52 = arith.mulf %51, %49 : vector<8x128xf32>
    %53 = arith.mulf %43, %27 : vector<8x128xf32>
    %54 = arith.addf %52, %53 : vector<8x128xf32>
    %cst_32 = arith.constant dense<0.000000e+00> : vector<8x384xf32>
    %55 = tpu.matmul %27, %10, %cst_32 {dimension_numbers = #tpu.dot_dimension_numbers<[1], [0], [0], [1], [0, 0, 1, 1], [], []>} : vector<8x128xf32>, vector<128x384xf32>, vector<8x384xf32> -> vector<8x384xf32>
    %56 = arith.addf %55, %14 : vector<8x384xf32>
    %cst_33 = arith.constant dense<0.000000e+00> : vector<8x384xf32>
    %57 = tpu.matmul %27, %8, %cst_33 {dimension_numbers = #tpu.dot_dimension_numbers<[1], [0], [0], [1], [0, 0, 1, 1], [], []>} : vector<8x128xf32>, vector<128x384xf32>, vector<8x384xf32> -> vector<8x384xf32>
    %58 = vector.extract_strided_slice %56 {offsets = [0, 0], sizes = [8, 256], strides = [1, 1]} : vector<8x384xf32> to vector<8x256xf32>
    %59 = vector.extract_strided_slice %57 {offsets = [0, 0], sizes = [8, 256], strides = [1, 1]} : vector<8x384xf32> to vector<8x256xf32>
    %60 = arith.addf %58, %59 : vector<8x256xf32>
    %61 = arith.negf %60 : vector<8x256xf32>
    %62 = math.exp %61 : vector<8x256xf32>
    %cst_34 = arith.constant 1.000000e+00 : f32
    %63 = vector.broadcast %cst_34 : f32 to vector<8x256xf32>
    %64 = arith.addf %63, %62 : vector<8x256xf32>
    %65 = arith.divf %63, %64 : vector<8x256xf32>
    %66 = vector.extract_strided_slice %65 {offsets = [0, 0], sizes = [8, 128], strides = [1, 1]} : vector<8x256xf32> to vector<8x128xf32>
    %67 = vector.extract_strided_slice %65 {offsets = [0, 128], sizes = [8, 128], strides = [1, 1]} : vector<8x256xf32> to vector<8x128xf32>
    %68 = vector.extract_strided_slice %56 {offsets = [0, 256], sizes = [8, 128], strides = [1, 1]} : vector<8x384xf32> to vector<8x128xf32>
    %69 = vector.extract_strided_slice %57 {offsets = [0, 256], sizes = [8, 128], strides = [1, 1]} : vector<8x384xf32> to vector<8x128xf32>
    %70 = arith.addf %69, %23 : vector<8x128xf32>
    %71 = arith.mulf %66, %70 : vector<8x128xf32>
    %72 = arith.addf %68, %71 : vector<8x128xf32>
    %73 = math.tanh %72 : vector<8x128xf32>
    %cst_35 = arith.constant 1.000000e+00 : f32
    %74 = vector.broadcast %cst_35 : f32 to vector<8x128xf32>
    %75 = arith.subf %74, %67 : vector<8x128xf32>
    %76 = arith.mulf %75, %73 : vector<8x128xf32>
    %77 = arith.mulf %67, %27 : vector<8x128xf32>
    %78 = arith.addf %76, %77 : vector<8x128xf32>
    %cst_36 = arith.constant dense<0.000000e+00> : vector<8x384xf32>
    %79 = tpu.matmul %27, %11, %cst_36 {dimension_numbers = #tpu.dot_dimension_numbers<[1], [0], [0], [1], [0, 0, 1, 1], [], []>} : vector<8x128xf32>, vector<128x384xf32>, vector<8x384xf32> -> vector<8x384xf32>
    %80 = arith.addf %79, %17 : vector<8x384xf32>
    %cst_37 = arith.constant dense<0.000000e+00> : vector<8x384xf32>
    %81 = tpu.matmul %27, %9, %cst_37 {dimension_numbers = #tpu.dot_dimension_numbers<[1], [0], [0], [1], [0, 0, 1, 1], [], []>} : vector<8x128xf32>, vector<128x384xf32>, vector<8x384xf32> -> vector<8x384xf32>
    %82 = vector.extract_strided_slice %80 {offsets = [0, 0], sizes = [8, 256], strides = [1, 1]} : vector<8x384xf32> to vector<8x256xf32>
    %83 = vector.extract_strided_slice %81 {offsets = [0, 0], sizes = [8, 256], strides = [1, 1]} : vector<8x384xf32> to vector<8x256xf32>
    %84 = arith.addf %82, %83 : vector<8x256xf32>
    %85 = arith.negf %84 : vector<8x256xf32>
    %86 = math.exp %85 : vector<8x256xf32>
    %cst_38 = arith.constant 1.000000e+00 : f32
    %87 = vector.broadcast %cst_38 : f32 to vector<8x256xf32>
    %88 = arith.addf %87, %86 : vector<8x256xf32>
    %89 = arith.divf %87, %88 : vector<8x256xf32>
    %90 = vector.extract_strided_slice %89 {offsets = [0, 0], sizes = [8, 128], strides = [1, 1]} : vector<8x256xf32> to vector<8x128xf32>
    %91 = vector.extract_strided_slice %89 {offsets = [0, 128], sizes = [8, 128], strides = [1, 1]} : vector<8x256xf32> to vector<8x128xf32>
    %92 = vector.extract_strided_slice %80 {offsets = [0, 256], sizes = [8, 128], strides = [1, 1]} : vector<8x384xf32> to vector<8x128xf32>
    %93 = vector.extract_strided_slice %81 {offsets = [0, 256], sizes = [8, 128], strides = [1, 1]} : vector<8x384xf32> to vector<8x128xf32>
    %94 = arith.addf %93, %26 : vector<8x128xf32>
    %95 = arith.mulf %90, %94 : vector<8x128xf32>
    %96 = arith.addf %92, %95 : vector<8x128xf32>
    %97 = math.tanh %96 : vector<8x128xf32>
    %cst_39 = arith.constant 1.000000e+00 : f32
    %98 = vector.broadcast %cst_39 : f32 to vector<8x128xf32>
    %99 = arith.subf %98, %91 : vector<8x128xf32>
    %100 = arith.mulf %99, %97 : vector<8x128xf32>
    %101 = arith.mulf %91, %27 : vector<8x128xf32>
    %102 = arith.addf %100, %101 : vector<8x128xf32>
    %c8_i32_40 = arith.constant 8 : i32
    %103 = arith.cmpi slt, %c0_i32, %c8_i32_40 : i32
    %104 = arith.select %103, %54, %27 : vector<8x128xf32>
    %c1_i32 = arith.constant 1 : i32
    %105 = arith.cmpi sge, %c0_i32, %c1_i32 : i32
    %c9_i32 = arith.constant 9 : i32
    %106 = arith.cmpi slt, %c0_i32, %c9_i32 : i32
    %107 = arith.andi %105, %106 : i1
    %108 = arith.select %107, %78, %27 : vector<8x128xf32>
    %c2_i32 = arith.constant 2 : i32
    %109 = arith.cmpi sge, %c0_i32, %c2_i32 : i32
    %110 = arith.select %109, %102, %27 : vector<8x128xf32>
    %c1_i32_41 = arith.constant 1 : i32
    %c7_i32_42 = arith.constant 7 : i32
    %111 = arith.minsi %c1_i32_41, %c7_i32_42 : i32
    %c8_i32_43 = arith.constant 8 : i32
    %112 = arith.muli %111, %c8_i32_43 : i32
    %113 = tpu.assume_multiple %112, 8 : i32
    %114 = arith.index_cast %113 : i32 to index
    %c0_44 = arith.constant 0 : index
    %115 = vector.load %arg16[%114, %c0_44] : memref<64x384xf32, #tpu.memory_space<vmem>>, vector<8x384xf32>
    %cst_45 = arith.constant dense<0.000000e+00> : vector<8x384xf32>
    %116 = tpu.matmul %104, %7, %cst_45 {dimension_numbers = #tpu.dot_dimension_numbers<[1], [0], [0], [1], [0, 0, 1, 1], [], []>} : vector<8x128xf32>, vector<128x384xf32>, vector<8x384xf32> -> vector<8x384xf32>
    %117 = vector.extract_strided_slice %115 {offsets = [0, 0], sizes = [8, 256], strides = [1, 1]} : vector<8x384xf32> to vector<8x256xf32>
    %118 = vector.extract_strided_slice %116 {offsets = [0, 0], sizes = [8, 256], strides = [1, 1]} : vector<8x384xf32> to vector<8x256xf32>
    %119 = arith.addf %117, %118 : vector<8x256xf32>
    %120 = arith.negf %119 : vector<8x256xf32>
    %121 = math.exp %120 : vector<8x256xf32>
    %cst_46 = arith.constant 1.000000e+00 : f32
    %122 = vector.broadcast %cst_46 : f32 to vector<8x256xf32>
    %123 = arith.addf %122, %121 : vector<8x256xf32>
    %124 = arith.divf %122, %123 : vector<8x256xf32>
    %125 = vector.extract_strided_slice %124 {offsets = [0, 0], sizes = [8, 128], strides = [1, 1]} : vector<8x256xf32> to vector<8x128xf32>
    %126 = vector.extract_strided_slice %124 {offsets = [0, 128], sizes = [8, 128], strides = [1, 1]} : vector<8x256xf32> to vector<8x128xf32>
    %127 = vector.extract_strided_slice %115 {offsets = [0, 256], sizes = [8, 128], strides = [1, 1]} : vector<8x384xf32> to vector<8x128xf32>
    %128 = vector.extract_strided_slice %116 {offsets = [0, 256], sizes = [8, 128], strides = [1, 1]} : vector<8x384xf32> to vector<8x128xf32>
    %129 = arith.addf %128, %20 : vector<8x128xf32>
    %130 = arith.mulf %125, %129 : vector<8x128xf32>
    %131 = arith.addf %127, %130 : vector<8x128xf32>
    %132 = math.tanh %131 : vector<8x128xf32>
    %cst_47 = arith.constant 1.000000e+00 : f32
    %133 = vector.broadcast %cst_47 : f32 to vector<8x128xf32>
    %134 = arith.subf %133, %126 : vector<8x128xf32>
    %135 = arith.mulf %134, %132 : vector<8x128xf32>
    %136 = arith.mulf %126, %104 : vector<8x128xf32>
    %137 = arith.addf %135, %136 : vector<8x128xf32>
    %cst_48 = arith.constant dense<0.000000e+00> : vector<8x384xf32>
    %138 = tpu.matmul %104, %10, %cst_48 {dimension_numbers = #tpu.dot_dimension_numbers<[1], [0], [0], [1], [0, 0, 1, 1], [], []>} : vector<8x128xf32>, vector<128x384xf32>, vector<8x384xf32> -> vector<8x384xf32>
    %139 = arith.addf %138, %14 : vector<8x384xf32>
    %cst_49 = arith.constant dense<0.000000e+00> : vector<8x384xf32>
    %140 = tpu.matmul %108, %8, %cst_49 {dimension_numbers = #tpu.dot_dimension_numbers<[1], [0], [0], [1], [0, 0, 1, 1], [], []>} : vector<8x128xf32>, vector<128x384xf32>, vector<8x384xf32> -> vector<8x384xf32>
    %141 = vector.extract_strided_slice %139 {offsets = [0, 0], sizes = [8, 256], strides = [1, 1]} : vector<8x384xf32> to vector<8x256xf32>
    %142 = vector.extract_strided_slice %140 {offsets = [0, 0], sizes = [8, 256], strides = [1, 1]} : vector<8x384xf32> to vector<8x256xf32>
    %143 = arith.addf %141, %142 : vector<8x256xf32>
    %144 = arith.negf %143 : vector<8x256xf32>
    %145 = math.exp %144 : vector<8x256xf32>
    %cst_50 = arith.constant 1.000000e+00 : f32
    %146 = vector.broadcast %cst_50 : f32 to vector<8x256xf32>
    %147 = arith.addf %146, %145 : vector<8x256xf32>
    %148 = arith.divf %146, %147 : vector<8x256xf32>
    %149 = vector.extract_strided_slice %148 {offsets = [0, 0], sizes = [8, 128], strides = [1, 1]} : vector<8x256xf32> to vector<8x128xf32>
    %150 = vector.extract_strided_slice %148 {offsets = [0, 128], sizes = [8, 128], strides = [1, 1]} : vector<8x256xf32> to vector<8x128xf32>
    %151 = vector.extract_strided_slice %139 {offsets = [0, 256], sizes = [8, 128], strides = [1, 1]} : vector<8x384xf32> to vector<8x128xf32>
    %152 = vector.extract_strided_slice %140 {offsets = [0, 256], sizes = [8, 128], strides = [1, 1]} : vector<8x384xf32> to vector<8x128xf32>
    %153 = arith.addf %152, %23 : vector<8x128xf32>
    %154 = arith.mulf %149, %153 : vector<8x128xf32>
    %155 = arith.addf %151, %154 : vector<8x128xf32>
    %156 = math.tanh %155 : vector<8x128xf32>
    %cst_51 = arith.constant 1.000000e+00 : f32
    %157 = vector.broadcast %cst_51 : f32 to vector<8x128xf32>
    %158 = arith.subf %157, %150 : vector<8x128xf32>
    %159 = arith.mulf %158, %156 : vector<8x128xf32>
    %160 = arith.mulf %150, %108 : vector<8x128xf32>
    %161 = arith.addf %159, %160 : vector<8x128xf32>
    %cst_52 = arith.constant dense<0.000000e+00> : vector<8x384xf32>
    %162 = tpu.matmul %108, %11, %cst_52 {dimension_numbers = #tpu.dot_dimension_numbers<[1], [0], [0], [1], [0, 0, 1, 1], [], []>} : vector<8x128xf32>, vector<128x384xf32>, vector<8x384xf32> -> vector<8x384xf32>
    %163 = arith.addf %162, %17 : vector<8x384xf32>
    %cst_53 = arith.constant dense<0.000000e+00> : vector<8x384xf32>
    %164 = tpu.matmul %110, %9, %cst_53 {dimension_numbers = #tpu.dot_dimension_numbers<[1], [0], [0], [1], [0, 0, 1, 1], [], []>} : vector<8x128xf32>, vector<128x384xf32>, vector<8x384xf32> -> vector<8x384xf32>
    %165 = vector.extract_strided_slice %163 {offsets = [0, 0], sizes = [8, 256], strides = [1, 1]} : vector<8x384xf32> to vector<8x256xf32>
    %166 = vector.extract_strided_slice %164 {offsets = [0, 0], sizes = [8, 256], strides = [1, 1]} : vector<8x384xf32> to vector<8x256xf32>
    %167 = arith.addf %165, %166 : vector<8x256xf32>
    %168 = arith.negf %167 : vector<8x256xf32>
    %169 = math.exp %168 : vector<8x256xf32>
    %cst_54 = arith.constant 1.000000e+00 : f32
    %170 = vector.broadcast %cst_54 : f32 to vector<8x256xf32>
    %171 = arith.addf %170, %169 : vector<8x256xf32>
    %172 = arith.divf %170, %171 : vector<8x256xf32>
    %173 = vector.extract_strided_slice %172 {offsets = [0, 0], sizes = [8, 128], strides = [1, 1]} : vector<8x256xf32> to vector<8x128xf32>
    %174 = vector.extract_strided_slice %172 {offsets = [0, 128], sizes = [8, 128], strides = [1, 1]} : vector<8x256xf32> to vector<8x128xf32>
    %175 = vector.extract_strided_slice %163 {offsets = [0, 256], sizes = [8, 128], strides = [1, 1]} : vector<8x384xf32> to vector<8x128xf32>
    %176 = vector.extract_strided_slice %164 {offsets = [0, 256], sizes = [8, 128], strides = [1, 1]} : vector<8x384xf32> to vector<8x128xf32>
    %177 = arith.addf %176, %26 : vector<8x128xf32>
    %178 = arith.mulf %173, %177 : vector<8x128xf32>
    %179 = arith.addf %175, %178 : vector<8x128xf32>
    %180 = math.tanh %179 : vector<8x128xf32>
    %cst_55 = arith.constant 1.000000e+00 : f32
    %181 = vector.broadcast %cst_55 : f32 to vector<8x128xf32>
    %182 = arith.subf %181, %174 : vector<8x128xf32>
    %183 = arith.mulf %182, %180 : vector<8x128xf32>
    %184 = arith.mulf %174, %110 : vector<8x128xf32>
    %185 = arith.addf %183, %184 : vector<8x128xf32>
    %c8_i32_56 = arith.constant 8 : i32
    %186 = arith.cmpi slt, %c1_i32_41, %c8_i32_56 : i32
    %187 = arith.select %186, %137, %104 : vector<8x128xf32>
    %c1_i32_57 = arith.constant 1 : i32
    %188 = arith.cmpi sge, %c1_i32_41, %c1_i32_57 : i32
    %c9_i32_58 = arith.constant 9 : i32
    %189 = arith.cmpi slt, %c1_i32_41, %c9_i32_58 : i32
    %190 = arith.andi %188, %189 : i1
    %191 = arith.select %190, %161, %108 : vector<8x128xf32>
    %c2_i32_59 = arith.constant 2 : i32
    %192 = arith.cmpi sge, %c1_i32_41, %c2_i32_59 : i32
    %193 = arith.select %192, %185, %110 : vector<8x128xf32>
    %c2_i32_60 = arith.constant 2 : i32
    %c7_i32_61 = arith.constant 7 : i32
    %194 = arith.minsi %c2_i32_60, %c7_i32_61 : i32
    %c8_i32_62 = arith.constant 8 : i32
    %195 = arith.muli %194, %c8_i32_62 : i32
    %196 = tpu.assume_multiple %195, 8 : i32
    %197 = arith.index_cast %196 : i32 to index
    %c0_63 = arith.constant 0 : index
    %198 = vector.load %arg16[%197, %c0_63] : memref<64x384xf32, #tpu.memory_space<vmem>>, vector<8x384xf32>
    %cst_64 = arith.constant dense<0.000000e+00> : vector<8x384xf32>
    %199 = tpu.matmul %187, %7, %cst_64 {dimension_numbers = #tpu.dot_dimension_numbers<[1], [0], [0], [1], [0, 0, 1, 1], [], []>} : vector<8x128xf32>, vector<128x384xf32>, vector<8x384xf32> -> vector<8x384xf32>
    %200 = vector.extract_strided_slice %198 {offsets = [0, 0], sizes = [8, 256], strides = [1, 1]} : vector<8x384xf32> to vector<8x256xf32>
    %201 = vector.extract_strided_slice %199 {offsets = [0, 0], sizes = [8, 256], strides = [1, 1]} : vector<8x384xf32> to vector<8x256xf32>
    %202 = arith.addf %200, %201 : vector<8x256xf32>
    %203 = arith.negf %202 : vector<8x256xf32>
    %204 = math.exp %203 : vector<8x256xf32>
    %cst_65 = arith.constant 1.000000e+00 : f32
    %205 = vector.broadcast %cst_65 : f32 to vector<8x256xf32>
    %206 = arith.addf %205, %204 : vector<8x256xf32>
    %207 = arith.divf %205, %206 : vector<8x256xf32>
    %208 = vector.extract_strided_slice %207 {offsets = [0, 0], sizes = [8, 128], strides = [1, 1]} : vector<8x256xf32> to vector<8x128xf32>
    %209 = vector.extract_strided_slice %207 {offsets = [0, 128], sizes = [8, 128], strides = [1, 1]} : vector<8x256xf32> to vector<8x128xf32>
    %210 = vector.extract_strided_slice %198 {offsets = [0, 256], sizes = [8, 128], strides = [1, 1]} : vector<8x384xf32> to vector<8x128xf32>
    %211 = vector.extract_strided_slice %199 {offsets = [0, 256], sizes = [8, 128], strides = [1, 1]} : vector<8x384xf32> to vector<8x128xf32>
    %212 = arith.addf %211, %20 : vector<8x128xf32>
    %213 = arith.mulf %208, %212 : vector<8x128xf32>
    %214 = arith.addf %210, %213 : vector<8x128xf32>
    %215 = math.tanh %214 : vector<8x128xf32>
    %cst_66 = arith.constant 1.000000e+00 : f32
    %216 = vector.broadcast %cst_66 : f32 to vector<8x128xf32>
    %217 = arith.subf %216, %209 : vector<8x128xf32>
    %218 = arith.mulf %217, %215 : vector<8x128xf32>
    %219 = arith.mulf %209, %187 : vector<8x128xf32>
    %220 = arith.addf %218, %219 : vector<8x128xf32>
    %cst_67 = arith.constant dense<0.000000e+00> : vector<8x384xf32>
    %221 = tpu.matmul %187, %10, %cst_67 {dimension_numbers = #tpu.dot_dimension_numbers<[1], [0], [0], [1], [0, 0, 1, 1], [], []>} : vector<8x128xf32>, vector<128x384xf32>, vector<8x384xf32> -> vector<8x384xf32>
    %222 = arith.addf %221, %14 : vector<8x384xf32>
    %cst_68 = arith.constant dense<0.000000e+00> : vector<8x384xf32>
    %223 = tpu.matmul %191, %8, %cst_68 {dimension_numbers = #tpu.dot_dimension_numbers<[1], [0], [0], [1], [0, 0, 1, 1], [], []>} : vector<8x128xf32>, vector<128x384xf32>, vector<8x384xf32> -> vector<8x384xf32>
    %224 = vector.extract_strided_slice %222 {offsets = [0, 0], sizes = [8, 256], strides = [1, 1]} : vector<8x384xf32> to vector<8x256xf32>
    %225 = vector.extract_strided_slice %223 {offsets = [0, 0], sizes = [8, 256], strides = [1, 1]} : vector<8x384xf32> to vector<8x256xf32>
    %226 = arith.addf %224, %225 : vector<8x256xf32>
    %227 = arith.negf %226 : vector<8x256xf32>
    %228 = math.exp %227 : vector<8x256xf32>
    %cst_69 = arith.constant 1.000000e+00 : f32
    %229 = vector.broadcast %cst_69 : f32 to vector<8x256xf32>
    %230 = arith.addf %229, %228 : vector<8x256xf32>
    %231 = arith.divf %229, %230 : vector<8x256xf32>
    %232 = vector.extract_strided_slice %231 {offsets = [0, 0], sizes = [8, 128], strides = [1, 1]} : vector<8x256xf32> to vector<8x128xf32>
    %233 = vector.extract_strided_slice %231 {offsets = [0, 128], sizes = [8, 128], strides = [1, 1]} : vector<8x256xf32> to vector<8x128xf32>
    %234 = vector.extract_strided_slice %222 {offsets = [0, 256], sizes = [8, 128], strides = [1, 1]} : vector<8x384xf32> to vector<8x128xf32>
    %235 = vector.extract_strided_slice %223 {offsets = [0, 256], sizes = [8, 128], strides = [1, 1]} : vector<8x384xf32> to vector<8x128xf32>
    %236 = arith.addf %235, %23 : vector<8x128xf32>
    %237 = arith.mulf %232, %236 : vector<8x128xf32>
    %238 = arith.addf %234, %237 : vector<8x128xf32>
    %239 = math.tanh %238 : vector<8x128xf32>
    %cst_70 = arith.constant 1.000000e+00 : f32
    %240 = vector.broadcast %cst_70 : f32 to vector<8x128xf32>
    %241 = arith.subf %240, %233 : vector<8x128xf32>
    %242 = arith.mulf %241, %239 : vector<8x128xf32>
    %243 = arith.mulf %233, %191 : vector<8x128xf32>
    %244 = arith.addf %242, %243 : vector<8x128xf32>
    %cst_71 = arith.constant dense<0.000000e+00> : vector<8x384xf32>
    %245 = tpu.matmul %191, %11, %cst_71 {dimension_numbers = #tpu.dot_dimension_numbers<[1], [0], [0], [1], [0, 0, 1, 1], [], []>} : vector<8x128xf32>, vector<128x384xf32>, vector<8x384xf32> -> vector<8x384xf32>
    %246 = arith.addf %245, %17 : vector<8x384xf32>
    %cst_72 = arith.constant dense<0.000000e+00> : vector<8x384xf32>
    %247 = tpu.matmul %193, %9, %cst_72 {dimension_numbers = #tpu.dot_dimension_numbers<[1], [0], [0], [1], [0, 0, 1, 1], [], []>} : vector<8x128xf32>, vector<128x384xf32>, vector<8x384xf32> -> vector<8x384xf32>
    %248 = vector.extract_strided_slice %246 {offsets = [0, 0], sizes = [8, 256], strides = [1, 1]} : vector<8x384xf32> to vector<8x256xf32>
    %249 = vector.extract_strided_slice %247 {offsets = [0, 0], sizes = [8, 256], strides = [1, 1]} : vector<8x384xf32> to vector<8x256xf32>
    %250 = arith.addf %248, %249 : vector<8x256xf32>
    %251 = arith.negf %250 : vector<8x256xf32>
    %252 = math.exp %251 : vector<8x256xf32>
    %cst_73 = arith.constant 1.000000e+00 : f32
    %253 = vector.broadcast %cst_73 : f32 to vector<8x256xf32>
    %254 = arith.addf %253, %252 : vector<8x256xf32>
    %255 = arith.divf %253, %254 : vector<8x256xf32>
    %256 = vector.extract_strided_slice %255 {offsets = [0, 0], sizes = [8, 128], strides = [1, 1]} : vector<8x256xf32> to vector<8x128xf32>
    %257 = vector.extract_strided_slice %255 {offsets = [0, 128], sizes = [8, 128], strides = [1, 1]} : vector<8x256xf32> to vector<8x128xf32>
    %258 = vector.extract_strided_slice %246 {offsets = [0, 256], sizes = [8, 128], strides = [1, 1]} : vector<8x384xf32> to vector<8x128xf32>
    %259 = vector.extract_strided_slice %247 {offsets = [0, 256], sizes = [8, 128], strides = [1, 1]} : vector<8x384xf32> to vector<8x128xf32>
    %260 = arith.addf %259, %26 : vector<8x128xf32>
    %261 = arith.mulf %256, %260 : vector<8x128xf32>
    %262 = arith.addf %258, %261 : vector<8x128xf32>
    %263 = math.tanh %262 : vector<8x128xf32>
    %cst_74 = arith.constant 1.000000e+00 : f32
    %264 = vector.broadcast %cst_74 : f32 to vector<8x128xf32>
    %265 = arith.subf %264, %257 : vector<8x128xf32>
    %266 = arith.mulf %265, %263 : vector<8x128xf32>
    %267 = arith.mulf %257, %193 : vector<8x128xf32>
    %268 = arith.addf %266, %267 : vector<8x128xf32>
    %c8_i32_75 = arith.constant 8 : i32
    %269 = arith.cmpi slt, %c2_i32_60, %c8_i32_75 : i32
    %270 = arith.select %269, %220, %187 : vector<8x128xf32>
    %c1_i32_76 = arith.constant 1 : i32
    %271 = arith.cmpi sge, %c2_i32_60, %c1_i32_76 : i32
    %c9_i32_77 = arith.constant 9 : i32
    %272 = arith.cmpi slt, %c2_i32_60, %c9_i32_77 : i32
    %273 = arith.andi %271, %272 : i1
    %274 = arith.select %273, %244, %191 : vector<8x128xf32>
    %c2_i32_78 = arith.constant 2 : i32
    %275 = arith.cmpi sge, %c2_i32_60, %c2_i32_78 : i32
    %276 = arith.select %275, %268, %193 : vector<8x128xf32>
    %c3_i32 = arith.constant 3 : i32
    %c7_i32_79 = arith.constant 7 : i32
    %277 = arith.minsi %c3_i32, %c7_i32_79 : i32
    %c8_i32_80 = arith.constant 8 : i32
    %278 = arith.muli %277, %c8_i32_80 : i32
    %279 = tpu.assume_multiple %278, 8 : i32
    %280 = arith.index_cast %279 : i32 to index
    %c0_81 = arith.constant 0 : index
    %281 = vector.load %arg16[%280, %c0_81] : memref<64x384xf32, #tpu.memory_space<vmem>>, vector<8x384xf32>
    %cst_82 = arith.constant dense<0.000000e+00> : vector<8x384xf32>
    %282 = tpu.matmul %270, %7, %cst_82 {dimension_numbers = #tpu.dot_dimension_numbers<[1], [0], [0], [1], [0, 0, 1, 1], [], []>} : vector<8x128xf32>, vector<128x384xf32>, vector<8x384xf32> -> vector<8x384xf32>
    %283 = vector.extract_strided_slice %281 {offsets = [0, 0], sizes = [8, 256], strides = [1, 1]} : vector<8x384xf32> to vector<8x256xf32>
    %284 = vector.extract_strided_slice %282 {offsets = [0, 0], sizes = [8, 256], strides = [1, 1]} : vector<8x384xf32> to vector<8x256xf32>
    %285 = arith.addf %283, %284 : vector<8x256xf32>
    %286 = arith.negf %285 : vector<8x256xf32>
    %287 = math.exp %286 : vector<8x256xf32>
    %cst_83 = arith.constant 1.000000e+00 : f32
    %288 = vector.broadcast %cst_83 : f32 to vector<8x256xf32>
    %289 = arith.addf %288, %287 : vector<8x256xf32>
    %290 = arith.divf %288, %289 : vector<8x256xf32>
    %291 = vector.extract_strided_slice %290 {offsets = [0, 0], sizes = [8, 128], strides = [1, 1]} : vector<8x256xf32> to vector<8x128xf32>
    %292 = vector.extract_strided_slice %290 {offsets = [0, 128], sizes = [8, 128], strides = [1, 1]} : vector<8x256xf32> to vector<8x128xf32>
    %293 = vector.extract_strided_slice %281 {offsets = [0, 256], sizes = [8, 128], strides = [1, 1]} : vector<8x384xf32> to vector<8x128xf32>
    %294 = vector.extract_strided_slice %282 {offsets = [0, 256], sizes = [8, 128], strides = [1, 1]} : vector<8x384xf32> to vector<8x128xf32>
    %295 = arith.addf %294, %20 : vector<8x128xf32>
    %296 = arith.mulf %291, %295 : vector<8x128xf32>
    %297 = arith.addf %293, %296 : vector<8x128xf32>
    %298 = math.tanh %297 : vector<8x128xf32>
    %cst_84 = arith.constant 1.000000e+00 : f32
    %299 = vector.broadcast %cst_84 : f32 to vector<8x128xf32>
    %300 = arith.subf %299, %292 : vector<8x128xf32>
    %301 = arith.mulf %300, %298 : vector<8x128xf32>
    %302 = arith.mulf %292, %270 : vector<8x128xf32>
    %303 = arith.addf %301, %302 : vector<8x128xf32>
    %cst_85 = arith.constant dense<0.000000e+00> : vector<8x384xf32>
    %304 = tpu.matmul %270, %10, %cst_85 {dimension_numbers = #tpu.dot_dimension_numbers<[1], [0], [0], [1], [0, 0, 1, 1], [], []>} : vector<8x128xf32>, vector<128x384xf32>, vector<8x384xf32> -> vector<8x384xf32>
    %305 = arith.addf %304, %14 : vector<8x384xf32>
    %cst_86 = arith.constant dense<0.000000e+00> : vector<8x384xf32>
    %306 = tpu.matmul %274, %8, %cst_86 {dimension_numbers = #tpu.dot_dimension_numbers<[1], [0], [0], [1], [0, 0, 1, 1], [], []>} : vector<8x128xf32>, vector<128x384xf32>, vector<8x384xf32> -> vector<8x384xf32>
    %307 = vector.extract_strided_slice %305 {offsets = [0, 0], sizes = [8, 256], strides = [1, 1]} : vector<8x384xf32> to vector<8x256xf32>
    %308 = vector.extract_strided_slice %306 {offsets = [0, 0], sizes = [8, 256], strides = [1, 1]} : vector<8x384xf32> to vector<8x256xf32>
    %309 = arith.addf %307, %308 : vector<8x256xf32>
    %310 = arith.negf %309 : vector<8x256xf32>
    %311 = math.exp %310 : vector<8x256xf32>
    %cst_87 = arith.constant 1.000000e+00 : f32
    %312 = vector.broadcast %cst_87 : f32 to vector<8x256xf32>
    %313 = arith.addf %312, %311 : vector<8x256xf32>
    %314 = arith.divf %312, %313 : vector<8x256xf32>
    %315 = vector.extract_strided_slice %314 {offsets = [0, 0], sizes = [8, 128], strides = [1, 1]} : vector<8x256xf32> to vector<8x128xf32>
    %316 = vector.extract_strided_slice %314 {offsets = [0, 128], sizes = [8, 128], strides = [1, 1]} : vector<8x256xf32> to vector<8x128xf32>
    %317 = vector.extract_strided_slice %305 {offsets = [0, 256], sizes = [8, 128], strides = [1, 1]} : vector<8x384xf32> to vector<8x128xf32>
    %318 = vector.extract_strided_slice %306 {offsets = [0, 256], sizes = [8, 128], strides = [1, 1]} : vector<8x384xf32> to vector<8x128xf32>
    %319 = arith.addf %318, %23 : vector<8x128xf32>
    %320 = arith.mulf %315, %319 : vector<8x128xf32>
    %321 = arith.addf %317, %320 : vector<8x128xf32>
    %322 = math.tanh %321 : vector<8x128xf32>
    %cst_88 = arith.constant 1.000000e+00 : f32
    %323 = vector.broadcast %cst_88 : f32 to vector<8x128xf32>
    %324 = arith.subf %323, %316 : vector<8x128xf32>
    %325 = arith.mulf %324, %322 : vector<8x128xf32>
    %326 = arith.mulf %316, %274 : vector<8x128xf32>
    %327 = arith.addf %325, %326 : vector<8x128xf32>
    %cst_89 = arith.constant dense<0.000000e+00> : vector<8x384xf32>
    %328 = tpu.matmul %274, %11, %cst_89 {dimension_numbers = #tpu.dot_dimension_numbers<[1], [0], [0], [1], [0, 0, 1, 1], [], []>} : vector<8x128xf32>, vector<128x384xf32>, vector<8x384xf32> -> vector<8x384xf32>
    %329 = arith.addf %328, %17 : vector<8x384xf32>
    %cst_90 = arith.constant dense<0.000000e+00> : vector<8x384xf32>
    %330 = tpu.matmul %276, %9, %cst_90 {dimension_numbers = #tpu.dot_dimension_numbers<[1], [0], [0], [1], [0, 0, 1, 1], [], []>} : vector<8x128xf32>, vector<128x384xf32>, vector<8x384xf32> -> vector<8x384xf32>
    %331 = vector.extract_strided_slice %329 {offsets = [0, 0], sizes = [8, 256], strides = [1, 1]} : vector<8x384xf32> to vector<8x256xf32>
    %332 = vector.extract_strided_slice %330 {offsets = [0, 0], sizes = [8, 256], strides = [1, 1]} : vector<8x384xf32> to vector<8x256xf32>
    %333 = arith.addf %331, %332 : vector<8x256xf32>
    %334 = arith.negf %333 : vector<8x256xf32>
    %335 = math.exp %334 : vector<8x256xf32>
    %cst_91 = arith.constant 1.000000e+00 : f32
    %336 = vector.broadcast %cst_91 : f32 to vector<8x256xf32>
    %337 = arith.addf %336, %335 : vector<8x256xf32>
    %338 = arith.divf %336, %337 : vector<8x256xf32>
    %339 = vector.extract_strided_slice %338 {offsets = [0, 0], sizes = [8, 128], strides = [1, 1]} : vector<8x256xf32> to vector<8x128xf32>
    %340 = vector.extract_strided_slice %338 {offsets = [0, 128], sizes = [8, 128], strides = [1, 1]} : vector<8x256xf32> to vector<8x128xf32>
    %341 = vector.extract_strided_slice %329 {offsets = [0, 256], sizes = [8, 128], strides = [1, 1]} : vector<8x384xf32> to vector<8x128xf32>
    %342 = vector.extract_strided_slice %330 {offsets = [0, 256], sizes = [8, 128], strides = [1, 1]} : vector<8x384xf32> to vector<8x128xf32>
    %343 = arith.addf %342, %26 : vector<8x128xf32>
    %344 = arith.mulf %339, %343 : vector<8x128xf32>
    %345 = arith.addf %341, %344 : vector<8x128xf32>
    %346 = math.tanh %345 : vector<8x128xf32>
    %cst_92 = arith.constant 1.000000e+00 : f32
    %347 = vector.broadcast %cst_92 : f32 to vector<8x128xf32>
    %348 = arith.subf %347, %340 : vector<8x128xf32>
    %349 = arith.mulf %348, %346 : vector<8x128xf32>
    %350 = arith.mulf %340, %276 : vector<8x128xf32>
    %351 = arith.addf %349, %350 : vector<8x128xf32>
    %c8_i32_93 = arith.constant 8 : i32
    %352 = arith.cmpi slt, %c3_i32, %c8_i32_93 : i32
    %353 = arith.select %352, %303, %270 : vector<8x128xf32>
    %c1_i32_94 = arith.constant 1 : i32
    %354 = arith.cmpi sge, %c3_i32, %c1_i32_94 : i32
    %c9_i32_95 = arith.constant 9 : i32
    %355 = arith.cmpi slt, %c3_i32, %c9_i32_95 : i32
    %356 = arith.andi %354, %355 : i1
    %357 = arith.select %356, %327, %274 : vector<8x128xf32>
    %c2_i32_96 = arith.constant 2 : i32
    %358 = arith.cmpi sge, %c3_i32, %c2_i32_96 : i32
    %359 = arith.select %358, %351, %276 : vector<8x128xf32>
    %c4_i32 = arith.constant 4 : i32
    %c7_i32_97 = arith.constant 7 : i32
    %360 = arith.minsi %c4_i32, %c7_i32_97 : i32
    %c8_i32_98 = arith.constant 8 : i32
    %361 = arith.muli %360, %c8_i32_98 : i32
    %362 = tpu.assume_multiple %361, 8 : i32
    %363 = arith.index_cast %362 : i32 to index
    %c0_99 = arith.constant 0 : index
    %364 = vector.load %arg16[%363, %c0_99] : memref<64x384xf32, #tpu.memory_space<vmem>>, vector<8x384xf32>
    %cst_100 = arith.constant dense<0.000000e+00> : vector<8x384xf32>
    %365 = tpu.matmul %353, %7, %cst_100 {dimension_numbers = #tpu.dot_dimension_numbers<[1], [0], [0], [1], [0, 0, 1, 1], [], []>} : vector<8x128xf32>, vector<128x384xf32>, vector<8x384xf32> -> vector<8x384xf32>
    %366 = vector.extract_strided_slice %364 {offsets = [0, 0], sizes = [8, 256], strides = [1, 1]} : vector<8x384xf32> to vector<8x256xf32>
    %367 = vector.extract_strided_slice %365 {offsets = [0, 0], sizes = [8, 256], strides = [1, 1]} : vector<8x384xf32> to vector<8x256xf32>
    %368 = arith.addf %366, %367 : vector<8x256xf32>
    %369 = arith.negf %368 : vector<8x256xf32>
    %370 = math.exp %369 : vector<8x256xf32>
    %cst_101 = arith.constant 1.000000e+00 : f32
    %371 = vector.broadcast %cst_101 : f32 to vector<8x256xf32>
    %372 = arith.addf %371, %370 : vector<8x256xf32>
    %373 = arith.divf %371, %372 : vector<8x256xf32>
    %374 = vector.extract_strided_slice %373 {offsets = [0, 0], sizes = [8, 128], strides = [1, 1]} : vector<8x256xf32> to vector<8x128xf32>
    %375 = vector.extract_strided_slice %373 {offsets = [0, 128], sizes = [8, 128], strides = [1, 1]} : vector<8x256xf32> to vector<8x128xf32>
    %376 = vector.extract_strided_slice %364 {offsets = [0, 256], sizes = [8, 128], strides = [1, 1]} : vector<8x384xf32> to vector<8x128xf32>
    %377 = vector.extract_strided_slice %365 {offsets = [0, 256], sizes = [8, 128], strides = [1, 1]} : vector<8x384xf32> to vector<8x128xf32>
    %378 = arith.addf %377, %20 : vector<8x128xf32>
    %379 = arith.mulf %374, %378 : vector<8x128xf32>
    %380 = arith.addf %376, %379 : vector<8x128xf32>
    %381 = math.tanh %380 : vector<8x128xf32>
    %cst_102 = arith.constant 1.000000e+00 : f32
    %382 = vector.broadcast %cst_102 : f32 to vector<8x128xf32>
    %383 = arith.subf %382, %375 : vector<8x128xf32>
    %384 = arith.mulf %383, %381 : vector<8x128xf32>
    %385 = arith.mulf %375, %353 : vector<8x128xf32>
    %386 = arith.addf %384, %385 : vector<8x128xf32>
    %cst_103 = arith.constant dense<0.000000e+00> : vector<8x384xf32>
    %387 = tpu.matmul %353, %10, %cst_103 {dimension_numbers = #tpu.dot_dimension_numbers<[1], [0], [0], [1], [0, 0, 1, 1], [], []>} : vector<8x128xf32>, vector<128x384xf32>, vector<8x384xf32> -> vector<8x384xf32>
    %388 = arith.addf %387, %14 : vector<8x384xf32>
    %cst_104 = arith.constant dense<0.000000e+00> : vector<8x384xf32>
    %389 = tpu.matmul %357, %8, %cst_104 {dimension_numbers = #tpu.dot_dimension_numbers<[1], [0], [0], [1], [0, 0, 1, 1], [], []>} : vector<8x128xf32>, vector<128x384xf32>, vector<8x384xf32> -> vector<8x384xf32>
    %390 = vector.extract_strided_slice %388 {offsets = [0, 0], sizes = [8, 256], strides = [1, 1]} : vector<8x384xf32> to vector<8x256xf32>
    %391 = vector.extract_strided_slice %389 {offsets = [0, 0], sizes = [8, 256], strides = [1, 1]} : vector<8x384xf32> to vector<8x256xf32>
    %392 = arith.addf %390, %391 : vector<8x256xf32>
    %393 = arith.negf %392 : vector<8x256xf32>
    %394 = math.exp %393 : vector<8x256xf32>
    %cst_105 = arith.constant 1.000000e+00 : f32
    %395 = vector.broadcast %cst_105 : f32 to vector<8x256xf32>
    %396 = arith.addf %395, %394 : vector<8x256xf32>
    %397 = arith.divf %395, %396 : vector<8x256xf32>
    %398 = vector.extract_strided_slice %397 {offsets = [0, 0], sizes = [8, 128], strides = [1, 1]} : vector<8x256xf32> to vector<8x128xf32>
    %399 = vector.extract_strided_slice %397 {offsets = [0, 128], sizes = [8, 128], strides = [1, 1]} : vector<8x256xf32> to vector<8x128xf32>
    %400 = vector.extract_strided_slice %388 {offsets = [0, 256], sizes = [8, 128], strides = [1, 1]} : vector<8x384xf32> to vector<8x128xf32>
    %401 = vector.extract_strided_slice %389 {offsets = [0, 256], sizes = [8, 128], strides = [1, 1]} : vector<8x384xf32> to vector<8x128xf32>
    %402 = arith.addf %401, %23 : vector<8x128xf32>
    %403 = arith.mulf %398, %402 : vector<8x128xf32>
    %404 = arith.addf %400, %403 : vector<8x128xf32>
    %405 = math.tanh %404 : vector<8x128xf32>
    %cst_106 = arith.constant 1.000000e+00 : f32
    %406 = vector.broadcast %cst_106 : f32 to vector<8x128xf32>
    %407 = arith.subf %406, %399 : vector<8x128xf32>
    %408 = arith.mulf %407, %405 : vector<8x128xf32>
    %409 = arith.mulf %399, %357 : vector<8x128xf32>
    %410 = arith.addf %408, %409 : vector<8x128xf32>
    %cst_107 = arith.constant dense<0.000000e+00> : vector<8x384xf32>
    %411 = tpu.matmul %357, %11, %cst_107 {dimension_numbers = #tpu.dot_dimension_numbers<[1], [0], [0], [1], [0, 0, 1, 1], [], []>} : vector<8x128xf32>, vector<128x384xf32>, vector<8x384xf32> -> vector<8x384xf32>
    %412 = arith.addf %411, %17 : vector<8x384xf32>
    %cst_108 = arith.constant dense<0.000000e+00> : vector<8x384xf32>
    %413 = tpu.matmul %359, %9, %cst_108 {dimension_numbers = #tpu.dot_dimension_numbers<[1], [0], [0], [1], [0, 0, 1, 1], [], []>} : vector<8x128xf32>, vector<128x384xf32>, vector<8x384xf32> -> vector<8x384xf32>
    %414 = vector.extract_strided_slice %412 {offsets = [0, 0], sizes = [8, 256], strides = [1, 1]} : vector<8x384xf32> to vector<8x256xf32>
    %415 = vector.extract_strided_slice %413 {offsets = [0, 0], sizes = [8, 256], strides = [1, 1]} : vector<8x384xf32> to vector<8x256xf32>
    %416 = arith.addf %414, %415 : vector<8x256xf32>
    %417 = arith.negf %416 : vector<8x256xf32>
    %418 = math.exp %417 : vector<8x256xf32>
    %cst_109 = arith.constant 1.000000e+00 : f32
    %419 = vector.broadcast %cst_109 : f32 to vector<8x256xf32>
    %420 = arith.addf %419, %418 : vector<8x256xf32>
    %421 = arith.divf %419, %420 : vector<8x256xf32>
    %422 = vector.extract_strided_slice %421 {offsets = [0, 0], sizes = [8, 128], strides = [1, 1]} : vector<8x256xf32> to vector<8x128xf32>
    %423 = vector.extract_strided_slice %421 {offsets = [0, 128], sizes = [8, 128], strides = [1, 1]} : vector<8x256xf32> to vector<8x128xf32>
    %424 = vector.extract_strided_slice %412 {offsets = [0, 256], sizes = [8, 128], strides = [1, 1]} : vector<8x384xf32> to vector<8x128xf32>
    %425 = vector.extract_strided_slice %413 {offsets = [0, 256], sizes = [8, 128], strides = [1, 1]} : vector<8x384xf32> to vector<8x128xf32>
    %426 = arith.addf %425, %26 : vector<8x128xf32>
    %427 = arith.mulf %422, %426 : vector<8x128xf32>
    %428 = arith.addf %424, %427 : vector<8x128xf32>
    %429 = math.tanh %428 : vector<8x128xf32>
    %cst_110 = arith.constant 1.000000e+00 : f32
    %430 = vector.broadcast %cst_110 : f32 to vector<8x128xf32>
    %431 = arith.subf %430, %423 : vector<8x128xf32>
    %432 = arith.mulf %431, %429 : vector<8x128xf32>
    %433 = arith.mulf %423, %359 : vector<8x128xf32>
    %434 = arith.addf %432, %433 : vector<8x128xf32>
    %c8_i32_111 = arith.constant 8 : i32
    %435 = arith.cmpi slt, %c4_i32, %c8_i32_111 : i32
    %436 = arith.select %435, %386, %353 : vector<8x128xf32>
    %c1_i32_112 = arith.constant 1 : i32
    %437 = arith.cmpi sge, %c4_i32, %c1_i32_112 : i32
    %c9_i32_113 = arith.constant 9 : i32
    %438 = arith.cmpi slt, %c4_i32, %c9_i32_113 : i32
    %439 = arith.andi %437, %438 : i1
    %440 = arith.select %439, %410, %357 : vector<8x128xf32>
    %c2_i32_114 = arith.constant 2 : i32
    %441 = arith.cmpi sge, %c4_i32, %c2_i32_114 : i32
    %442 = arith.select %441, %434, %359 : vector<8x128xf32>
    %c5_i32 = arith.constant 5 : i32
    %c7_i32_115 = arith.constant 7 : i32
    %443 = arith.minsi %c5_i32, %c7_i32_115 : i32
    %c8_i32_116 = arith.constant 8 : i32
    %444 = arith.muli %443, %c8_i32_116 : i32
    %445 = tpu.assume_multiple %444, 8 : i32
    %446 = arith.index_cast %445 : i32 to index
    %c0_117 = arith.constant 0 : index
    %447 = vector.load %arg16[%446, %c0_117] : memref<64x384xf32, #tpu.memory_space<vmem>>, vector<8x384xf32>
    %cst_118 = arith.constant dense<0.000000e+00> : vector<8x384xf32>
    %448 = tpu.matmul %436, %7, %cst_118 {dimension_numbers = #tpu.dot_dimension_numbers<[1], [0], [0], [1], [0, 0, 1, 1], [], []>} : vector<8x128xf32>, vector<128x384xf32>, vector<8x384xf32> -> vector<8x384xf32>
    %449 = vector.extract_strided_slice %447 {offsets = [0, 0], sizes = [8, 256], strides = [1, 1]} : vector<8x384xf32> to vector<8x256xf32>
    %450 = vector.extract_strided_slice %448 {offsets = [0, 0], sizes = [8, 256], strides = [1, 1]} : vector<8x384xf32> to vector<8x256xf32>
    %451 = arith.addf %449, %450 : vector<8x256xf32>
    %452 = arith.negf %451 : vector<8x256xf32>
    %453 = math.exp %452 : vector<8x256xf32>
    %cst_119 = arith.constant 1.000000e+00 : f32
    %454 = vector.broadcast %cst_119 : f32 to vector<8x256xf32>
    %455 = arith.addf %454, %453 : vector<8x256xf32>
    %456 = arith.divf %454, %455 : vector<8x256xf32>
    %457 = vector.extract_strided_slice %456 {offsets = [0, 0], sizes = [8, 128], strides = [1, 1]} : vector<8x256xf32> to vector<8x128xf32>
    %458 = vector.extract_strided_slice %456 {offsets = [0, 128], sizes = [8, 128], strides = [1, 1]} : vector<8x256xf32> to vector<8x128xf32>
    %459 = vector.extract_strided_slice %447 {offsets = [0, 256], sizes = [8, 128], strides = [1, 1]} : vector<8x384xf32> to vector<8x128xf32>
    %460 = vector.extract_strided_slice %448 {offsets = [0, 256], sizes = [8, 128], strides = [1, 1]} : vector<8x384xf32> to vector<8x128xf32>
    %461 = arith.addf %460, %20 : vector<8x128xf32>
    %462 = arith.mulf %457, %461 : vector<8x128xf32>
    %463 = arith.addf %459, %462 : vector<8x128xf32>
    %464 = math.tanh %463 : vector<8x128xf32>
    %cst_120 = arith.constant 1.000000e+00 : f32
    %465 = vector.broadcast %cst_120 : f32 to vector<8x128xf32>
    %466 = arith.subf %465, %458 : vector<8x128xf32>
    %467 = arith.mulf %466, %464 : vector<8x128xf32>
    %468 = arith.mulf %458, %436 : vector<8x128xf32>
    %469 = arith.addf %467, %468 : vector<8x128xf32>
    %cst_121 = arith.constant dense<0.000000e+00> : vector<8x384xf32>
    %470 = tpu.matmul %436, %10, %cst_121 {dimension_numbers = #tpu.dot_dimension_numbers<[1], [0], [0], [1], [0, 0, 1, 1], [], []>} : vector<8x128xf32>, vector<128x384xf32>, vector<8x384xf32> -> vector<8x384xf32>
    %471 = arith.addf %470, %14 : vector<8x384xf32>
    %cst_122 = arith.constant dense<0.000000e+00> : vector<8x384xf32>
    %472 = tpu.matmul %440, %8, %cst_122 {dimension_numbers = #tpu.dot_dimension_numbers<[1], [0], [0], [1], [0, 0, 1, 1], [], []>} : vector<8x128xf32>, vector<128x384xf32>, vector<8x384xf32> -> vector<8x384xf32>
    %473 = vector.extract_strided_slice %471 {offsets = [0, 0], sizes = [8, 256], strides = [1, 1]} : vector<8x384xf32> to vector<8x256xf32>
    %474 = vector.extract_strided_slice %472 {offsets = [0, 0], sizes = [8, 256], strides = [1, 1]} : vector<8x384xf32> to vector<8x256xf32>
    %475 = arith.addf %473, %474 : vector<8x256xf32>
    %476 = arith.negf %475 : vector<8x256xf32>
    %477 = math.exp %476 : vector<8x256xf32>
    %cst_123 = arith.constant 1.000000e+00 : f32
    %478 = vector.broadcast %cst_123 : f32 to vector<8x256xf32>
    %479 = arith.addf %478, %477 : vector<8x256xf32>
    %480 = arith.divf %478, %479 : vector<8x256xf32>
    %481 = vector.extract_strided_slice %480 {offsets = [0, 0], sizes = [8, 128], strides = [1, 1]} : vector<8x256xf32> to vector<8x128xf32>
    %482 = vector.extract_strided_slice %480 {offsets = [0, 128], sizes = [8, 128], strides = [1, 1]} : vector<8x256xf32> to vector<8x128xf32>
    %483 = vector.extract_strided_slice %471 {offsets = [0, 256], sizes = [8, 128], strides = [1, 1]} : vector<8x384xf32> to vector<8x128xf32>
    %484 = vector.extract_strided_slice %472 {offsets = [0, 256], sizes = [8, 128], strides = [1, 1]} : vector<8x384xf32> to vector<8x128xf32>
    %485 = arith.addf %484, %23 : vector<8x128xf32>
    %486 = arith.mulf %481, %485 : vector<8x128xf32>
    %487 = arith.addf %483, %486 : vector<8x128xf32>
    %488 = math.tanh %487 : vector<8x128xf32>
    %cst_124 = arith.constant 1.000000e+00 : f32
    %489 = vector.broadcast %cst_124 : f32 to vector<8x128xf32>
    %490 = arith.subf %489, %482 : vector<8x128xf32>
    %491 = arith.mulf %490, %488 : vector<8x128xf32>
    %492 = arith.mulf %482, %440 : vector<8x128xf32>
    %493 = arith.addf %491, %492 : vector<8x128xf32>
    %cst_125 = arith.constant dense<0.000000e+00> : vector<8x384xf32>
    %494 = tpu.matmul %440, %11, %cst_125 {dimension_numbers = #tpu.dot_dimension_numbers<[1], [0], [0], [1], [0, 0, 1, 1], [], []>} : vector<8x128xf32>, vector<128x384xf32>, vector<8x384xf32> -> vector<8x384xf32>
    %495 = arith.addf %494, %17 : vector<8x384xf32>
    %cst_126 = arith.constant dense<0.000000e+00> : vector<8x384xf32>
    %496 = tpu.matmul %442, %9, %cst_126 {dimension_numbers = #tpu.dot_dimension_numbers<[1], [0], [0], [1], [0, 0, 1, 1], [], []>} : vector<8x128xf32>, vector<128x384xf32>, vector<8x384xf32> -> vector<8x384xf32>
    %497 = vector.extract_strided_slice %495 {offsets = [0, 0], sizes = [8, 256], strides = [1, 1]} : vector<8x384xf32> to vector<8x256xf32>
    %498 = vector.extract_strided_slice %496 {offsets = [0, 0], sizes = [8, 256], strides = [1, 1]} : vector<8x384xf32> to vector<8x256xf32>
    %499 = arith.addf %497, %498 : vector<8x256xf32>
    %500 = arith.negf %499 : vector<8x256xf32>
    %501 = math.exp %500 : vector<8x256xf32>
    %cst_127 = arith.constant 1.000000e+00 : f32
    %502 = vector.broadcast %cst_127 : f32 to vector<8x256xf32>
    %503 = arith.addf %502, %501 : vector<8x256xf32>
    %504 = arith.divf %502, %503 : vector<8x256xf32>
    %505 = vector.extract_strided_slice %504 {offsets = [0, 0], sizes = [8, 128], strides = [1, 1]} : vector<8x256xf32> to vector<8x128xf32>
    %506 = vector.extract_strided_slice %504 {offsets = [0, 128], sizes = [8, 128], strides = [1, 1]} : vector<8x256xf32> to vector<8x128xf32>
    %507 = vector.extract_strided_slice %495 {offsets = [0, 256], sizes = [8, 128], strides = [1, 1]} : vector<8x384xf32> to vector<8x128xf32>
    %508 = vector.extract_strided_slice %496 {offsets = [0, 256], sizes = [8, 128], strides = [1, 1]} : vector<8x384xf32> to vector<8x128xf32>
    %509 = arith.addf %508, %26 : vector<8x128xf32>
    %510 = arith.mulf %505, %509 : vector<8x128xf32>
    %511 = arith.addf %507, %510 : vector<8x128xf32>
    %512 = math.tanh %511 : vector<8x128xf32>
    %cst_128 = arith.constant 1.000000e+00 : f32
    %513 = vector.broadcast %cst_128 : f32 to vector<8x128xf32>
    %514 = arith.subf %513, %506 : vector<8x128xf32>
    %515 = arith.mulf %514, %512 : vector<8x128xf32>
    %516 = arith.mulf %506, %442 : vector<8x128xf32>
    %517 = arith.addf %515, %516 : vector<8x128xf32>
    %c8_i32_129 = arith.constant 8 : i32
    %518 = arith.cmpi slt, %c5_i32, %c8_i32_129 : i32
    %519 = arith.select %518, %469, %436 : vector<8x128xf32>
    %c1_i32_130 = arith.constant 1 : i32
    %520 = arith.cmpi sge, %c5_i32, %c1_i32_130 : i32
    %c9_i32_131 = arith.constant 9 : i32
    %521 = arith.cmpi slt, %c5_i32, %c9_i32_131 : i32
    %522 = arith.andi %520, %521 : i1
    %523 = arith.select %522, %493, %440 : vector<8x128xf32>
    %c2_i32_132 = arith.constant 2 : i32
    %524 = arith.cmpi sge, %c5_i32, %c2_i32_132 : i32
    %525 = arith.select %524, %517, %442 : vector<8x128xf32>
    %c6_i32 = arith.constant 6 : i32
    %c7_i32_133 = arith.constant 7 : i32
    %526 = arith.minsi %c6_i32, %c7_i32_133 : i32
    %c8_i32_134 = arith.constant 8 : i32
    %527 = arith.muli %526, %c8_i32_134 : i32
    %528 = tpu.assume_multiple %527, 8 : i32
    %529 = arith.index_cast %528 : i32 to index
    %c0_135 = arith.constant 0 : index
    %530 = vector.load %arg16[%529, %c0_135] : memref<64x384xf32, #tpu.memory_space<vmem>>, vector<8x384xf32>
    %cst_136 = arith.constant dense<0.000000e+00> : vector<8x384xf32>
    %531 = tpu.matmul %519, %7, %cst_136 {dimension_numbers = #tpu.dot_dimension_numbers<[1], [0], [0], [1], [0, 0, 1, 1], [], []>} : vector<8x128xf32>, vector<128x384xf32>, vector<8x384xf32> -> vector<8x384xf32>
    %532 = vector.extract_strided_slice %530 {offsets = [0, 0], sizes = [8, 256], strides = [1, 1]} : vector<8x384xf32> to vector<8x256xf32>
    %533 = vector.extract_strided_slice %531 {offsets = [0, 0], sizes = [8, 256], strides = [1, 1]} : vector<8x384xf32> to vector<8x256xf32>
    %534 = arith.addf %532, %533 : vector<8x256xf32>
    %535 = arith.negf %534 : vector<8x256xf32>
    %536 = math.exp %535 : vector<8x256xf32>
    %cst_137 = arith.constant 1.000000e+00 : f32
    %537 = vector.broadcast %cst_137 : f32 to vector<8x256xf32>
    %538 = arith.addf %537, %536 : vector<8x256xf32>
    %539 = arith.divf %537, %538 : vector<8x256xf32>
    %540 = vector.extract_strided_slice %539 {offsets = [0, 0], sizes = [8, 128], strides = [1, 1]} : vector<8x256xf32> to vector<8x128xf32>
    %541 = vector.extract_strided_slice %539 {offsets = [0, 128], sizes = [8, 128], strides = [1, 1]} : vector<8x256xf32> to vector<8x128xf32>
    %542 = vector.extract_strided_slice %530 {offsets = [0, 256], sizes = [8, 128], strides = [1, 1]} : vector<8x384xf32> to vector<8x128xf32>
    %543 = vector.extract_strided_slice %531 {offsets = [0, 256], sizes = [8, 128], strides = [1, 1]} : vector<8x384xf32> to vector<8x128xf32>
    %544 = arith.addf %543, %20 : vector<8x128xf32>
    %545 = arith.mulf %540, %544 : vector<8x128xf32>
    %546 = arith.addf %542, %545 : vector<8x128xf32>
    %547 = math.tanh %546 : vector<8x128xf32>
    %cst_138 = arith.constant 1.000000e+00 : f32
    %548 = vector.broadcast %cst_138 : f32 to vector<8x128xf32>
    %549 = arith.subf %548, %541 : vector<8x128xf32>
    %550 = arith.mulf %549, %547 : vector<8x128xf32>
    %551 = arith.mulf %541, %519 : vector<8x128xf32>
    %552 = arith.addf %550, %551 : vector<8x128xf32>
    %cst_139 = arith.constant dense<0.000000e+00> : vector<8x384xf32>
    %553 = tpu.matmul %519, %10, %cst_139 {dimension_numbers = #tpu.dot_dimension_numbers<[1], [0], [0], [1], [0, 0, 1, 1], [], []>} : vector<8x128xf32>, vector<128x384xf32>, vector<8x384xf32> -> vector<8x384xf32>
    %554 = arith.addf %553, %14 : vector<8x384xf32>
    %cst_140 = arith.constant dense<0.000000e+00> : vector<8x384xf32>
    %555 = tpu.matmul %523, %8, %cst_140 {dimension_numbers = #tpu.dot_dimension_numbers<[1], [0], [0], [1], [0, 0, 1, 1], [], []>} : vector<8x128xf32>, vector<128x384xf32>, vector<8x384xf32> -> vector<8x384xf32>
    %556 = vector.extract_strided_slice %554 {offsets = [0, 0], sizes = [8, 256], strides = [1, 1]} : vector<8x384xf32> to vector<8x256xf32>
    %557 = vector.extract_strided_slice %555 {offsets = [0, 0], sizes = [8, 256], strides = [1, 1]} : vector<8x384xf32> to vector<8x256xf32>
    %558 = arith.addf %556, %557 : vector<8x256xf32>
    %559 = arith.negf %558 : vector<8x256xf32>
    %560 = math.exp %559 : vector<8x256xf32>
    %cst_141 = arith.constant 1.000000e+00 : f32
    %561 = vector.broadcast %cst_141 : f32 to vector<8x256xf32>
    %562 = arith.addf %561, %560 : vector<8x256xf32>
    %563 = arith.divf %561, %562 : vector<8x256xf32>
    %564 = vector.extract_strided_slice %563 {offsets = [0, 0], sizes = [8, 128], strides = [1, 1]} : vector<8x256xf32> to vector<8x128xf32>
    %565 = vector.extract_strided_slice %563 {offsets = [0, 128], sizes = [8, 128], strides = [1, 1]} : vector<8x256xf32> to vector<8x128xf32>
    %566 = vector.extract_strided_slice %554 {offsets = [0, 256], sizes = [8, 128], strides = [1, 1]} : vector<8x384xf32> to vector<8x128xf32>
    %567 = vector.extract_strided_slice %555 {offsets = [0, 256], sizes = [8, 128], strides = [1, 1]} : vector<8x384xf32> to vector<8x128xf32>
    %568 = arith.addf %567, %23 : vector<8x128xf32>
    %569 = arith.mulf %564, %568 : vector<8x128xf32>
    %570 = arith.addf %566, %569 : vector<8x128xf32>
    %571 = math.tanh %570 : vector<8x128xf32>
    %cst_142 = arith.constant 1.000000e+00 : f32
    %572 = vector.broadcast %cst_142 : f32 to vector<8x128xf32>
    %573 = arith.subf %572, %565 : vector<8x128xf32>
    %574 = arith.mulf %573, %571 : vector<8x128xf32>
    %575 = arith.mulf %565, %523 : vector<8x128xf32>
    %576 = arith.addf %574, %575 : vector<8x128xf32>
    %cst_143 = arith.constant dense<0.000000e+00> : vector<8x384xf32>
    %577 = tpu.matmul %523, %11, %cst_143 {dimension_numbers = #tpu.dot_dimension_numbers<[1], [0], [0], [1], [0, 0, 1, 1], [], []>} : vector<8x128xf32>, vector<128x384xf32>, vector<8x384xf32> -> vector<8x384xf32>
    %578 = arith.addf %577, %17 : vector<8x384xf32>
    %cst_144 = arith.constant dense<0.000000e+00> : vector<8x384xf32>
    %579 = tpu.matmul %525, %9, %cst_144 {dimension_numbers = #tpu.dot_dimension_numbers<[1], [0], [0], [1], [0, 0, 1, 1], [], []>} : vector<8x128xf32>, vector<128x384xf32>, vector<8x384xf32> -> vector<8x384xf32>
    %580 = vector.extract_strided_slice %578 {offsets = [0, 0], sizes = [8, 256], strides = [1, 1]} : vector<8x384xf32> to vector<8x256xf32>
    %581 = vector.extract_strided_slice %579 {offsets = [0, 0], sizes = [8, 256], strides = [1, 1]} : vector<8x384xf32> to vector<8x256xf32>
    %582 = arith.addf %580, %581 : vector<8x256xf32>
    %583 = arith.negf %582 : vector<8x256xf32>
    %584 = math.exp %583 : vector<8x256xf32>
    %cst_145 = arith.constant 1.000000e+00 : f32
    %585 = vector.broadcast %cst_145 : f32 to vector<8x256xf32>
    %586 = arith.addf %585, %584 : vector<8x256xf32>
    %587 = arith.divf %585, %586 : vector<8x256xf32>
    %588 = vector.extract_strided_slice %587 {offsets = [0, 0], sizes = [8, 128], strides = [1, 1]} : vector<8x256xf32> to vector<8x128xf32>
    %589 = vector.extract_strided_slice %587 {offsets = [0, 128], sizes = [8, 128], strides = [1, 1]} : vector<8x256xf32> to vector<8x128xf32>
    %590 = vector.extract_strided_slice %578 {offsets = [0, 256], sizes = [8, 128], strides = [1, 1]} : vector<8x384xf32> to vector<8x128xf32>
    %591 = vector.extract_strided_slice %579 {offsets = [0, 256], sizes = [8, 128], strides = [1, 1]} : vector<8x384xf32> to vector<8x128xf32>
    %592 = arith.addf %591, %26 : vector<8x128xf32>
    %593 = arith.mulf %588, %592 : vector<8x128xf32>
    %594 = arith.addf %590, %593 : vector<8x128xf32>
    %595 = math.tanh %594 : vector<8x128xf32>
    %cst_146 = arith.constant 1.000000e+00 : f32
    %596 = vector.broadcast %cst_146 : f32 to vector<8x128xf32>
    %597 = arith.subf %596, %589 : vector<8x128xf32>
    %598 = arith.mulf %597, %595 : vector<8x128xf32>
    %599 = arith.mulf %589, %525 : vector<8x128xf32>
    %600 = arith.addf %598, %599 : vector<8x128xf32>
    %c8_i32_147 = arith.constant 8 : i32
    %601 = arith.cmpi slt, %c6_i32, %c8_i32_147 : i32
    %602 = arith.select %601, %552, %519 : vector<8x128xf32>
    %c1_i32_148 = arith.constant 1 : i32
    %603 = arith.cmpi sge, %c6_i32, %c1_i32_148 : i32
    %c9_i32_149 = arith.constant 9 : i32
    %604 = arith.cmpi slt, %c6_i32, %c9_i32_149 : i32
    %605 = arith.andi %603, %604 : i1
    %606 = arith.select %605, %576, %523 : vector<8x128xf32>
    %c2_i32_150 = arith.constant 2 : i32
    %607 = arith.cmpi sge, %c6_i32, %c2_i32_150 : i32
    %608 = arith.select %607, %600, %525 : vector<8x128xf32>
    %c7_i32_151 = arith.constant 7 : i32
    %c7_i32_152 = arith.constant 7 : i32
    %609 = arith.minsi %c7_i32_151, %c7_i32_152 : i32
    %c8_i32_153 = arith.constant 8 : i32
    %610 = arith.muli %609, %c8_i32_153 : i32
    %611 = tpu.assume_multiple %610, 8 : i32
    %612 = arith.index_cast %611 : i32 to index
    %c0_154 = arith.constant 0 : index
    %613 = vector.load %arg16[%612, %c0_154] : memref<64x384xf32, #tpu.memory_space<vmem>>, vector<8x384xf32>
    %cst_155 = arith.constant dense<0.000000e+00> : vector<8x384xf32>
    %614 = tpu.matmul %602, %7, %cst_155 {dimension_numbers = #tpu.dot_dimension_numbers<[1], [0], [0], [1], [0, 0, 1, 1], [], []>} : vector<8x128xf32>, vector<128x384xf32>, vector<8x384xf32> -> vector<8x384xf32>
    %615 = vector.extract_strided_slice %613 {offsets = [0, 0], sizes = [8, 256], strides = [1, 1]} : vector<8x384xf32> to vector<8x256xf32>
    %616 = vector.extract_strided_slice %614 {offsets = [0, 0], sizes = [8, 256], strides = [1, 1]} : vector<8x384xf32> to vector<8x256xf32>
    %617 = arith.addf %615, %616 : vector<8x256xf32>
    %618 = arith.negf %617 : vector<8x256xf32>
    %619 = math.exp %618 : vector<8x256xf32>
    %cst_156 = arith.constant 1.000000e+00 : f32
    %620 = vector.broadcast %cst_156 : f32 to vector<8x256xf32>
    %621 = arith.addf %620, %619 : vector<8x256xf32>
    %622 = arith.divf %620, %621 : vector<8x256xf32>
    %623 = vector.extract_strided_slice %622 {offsets = [0, 0], sizes = [8, 128], strides = [1, 1]} : vector<8x256xf32> to vector<8x128xf32>
    %624 = vector.extract_strided_slice %622 {offsets = [0, 128], sizes = [8, 128], strides = [1, 1]} : vector<8x256xf32> to vector<8x128xf32>
    %625 = vector.extract_strided_slice %613 {offsets = [0, 256], sizes = [8, 128], strides = [1, 1]} : vector<8x384xf32> to vector<8x128xf32>
    %626 = vector.extract_strided_slice %614 {offsets = [0, 256], sizes = [8, 128], strides = [1, 1]} : vector<8x384xf32> to vector<8x128xf32>
    %627 = arith.addf %626, %20 : vector<8x128xf32>
    %628 = arith.mulf %623, %627 : vector<8x128xf32>
    %629 = arith.addf %625, %628 : vector<8x128xf32>
    %630 = math.tanh %629 : vector<8x128xf32>
    %cst_157 = arith.constant 1.000000e+00 : f32
    %631 = vector.broadcast %cst_157 : f32 to vector<8x128xf32>
    %632 = arith.subf %631, %624 : vector<8x128xf32>
    %633 = arith.mulf %632, %630 : vector<8x128xf32>
    %634 = arith.mulf %624, %602 : vector<8x128xf32>
    %635 = arith.addf %633, %634 : vector<8x128xf32>
    %cst_158 = arith.constant dense<0.000000e+00> : vector<8x384xf32>
    %636 = tpu.matmul %602, %10, %cst_158 {dimension_numbers = #tpu.dot_dimension_numbers<[1], [0], [0], [1], [0, 0, 1, 1], [], []>} : vector<8x128xf32>, vector<128x384xf32>, vector<8x384xf32> -> vector<8x384xf32>
    %637 = arith.addf %636, %14 : vector<8x384xf32>
    %cst_159 = arith.constant dense<0.000000e+00> : vector<8x384xf32>
    %638 = tpu.matmul %606, %8, %cst_159 {dimension_numbers = #tpu.dot_dimension_numbers<[1], [0], [0], [1], [0, 0, 1, 1], [], []>} : vector<8x128xf32>, vector<128x384xf32>, vector<8x384xf32> -> vector<8x384xf32>
    %639 = vector.extract_strided_slice %637 {offsets = [0, 0], sizes = [8, 256], strides = [1, 1]} : vector<8x384xf32> to vector<8x256xf32>
    %640 = vector.extract_strided_slice %638 {offsets = [0, 0], sizes = [8, 256], strides = [1, 1]} : vector<8x384xf32> to vector<8x256xf32>
    %641 = arith.addf %639, %640 : vector<8x256xf32>
    %642 = arith.negf %641 : vector<8x256xf32>
    %643 = math.exp %642 : vector<8x256xf32>
    %cst_160 = arith.constant 1.000000e+00 : f32
    %644 = vector.broadcast %cst_160 : f32 to vector<8x256xf32>
    %645 = arith.addf %644, %643 : vector<8x256xf32>
    %646 = arith.divf %644, %645 : vector<8x256xf32>
    %647 = vector.extract_strided_slice %646 {offsets = [0, 0], sizes = [8, 128], strides = [1, 1]} : vector<8x256xf32> to vector<8x128xf32>
    %648 = vector.extract_strided_slice %646 {offsets = [0, 128], sizes = [8, 128], strides = [1, 1]} : vector<8x256xf32> to vector<8x128xf32>
    %649 = vector.extract_strided_slice %637 {offsets = [0, 256], sizes = [8, 128], strides = [1, 1]} : vector<8x384xf32> to vector<8x128xf32>
    %650 = vector.extract_strided_slice %638 {offsets = [0, 256], sizes = [8, 128], strides = [1, 1]} : vector<8x384xf32> to vector<8x128xf32>
    %651 = arith.addf %650, %23 : vector<8x128xf32>
    %652 = arith.mulf %647, %651 : vector<8x128xf32>
    %653 = arith.addf %649, %652 : vector<8x128xf32>
    %654 = math.tanh %653 : vector<8x128xf32>
    %cst_161 = arith.constant 1.000000e+00 : f32
    %655 = vector.broadcast %cst_161 : f32 to vector<8x128xf32>
    %656 = arith.subf %655, %648 : vector<8x128xf32>
    %657 = arith.mulf %656, %654 : vector<8x128xf32>
    %658 = arith.mulf %648, %606 : vector<8x128xf32>
    %659 = arith.addf %657, %658 : vector<8x128xf32>
    %cst_162 = arith.constant dense<0.000000e+00> : vector<8x384xf32>
    %660 = tpu.matmul %606, %11, %cst_162 {dimension_numbers = #tpu.dot_dimension_numbers<[1], [0], [0], [1], [0, 0, 1, 1], [], []>} : vector<8x128xf32>, vector<128x384xf32>, vector<8x384xf32> -> vector<8x384xf32>
    %661 = arith.addf %660, %17 : vector<8x384xf32>
    %cst_163 = arith.constant dense<0.000000e+00> : vector<8x384xf32>
    %662 = tpu.matmul %608, %9, %cst_163 {dimension_numbers = #tpu.dot_dimension_numbers<[1], [0], [0], [1], [0, 0, 1, 1], [], []>} : vector<8x128xf32>, vector<128x384xf32>, vector<8x384xf32> -> vector<8x384xf32>
    %663 = vector.extract_strided_slice %661 {offsets = [0, 0], sizes = [8, 256], strides = [1, 1]} : vector<8x384xf32> to vector<8x256xf32>
    %664 = vector.extract_strided_slice %662 {offsets = [0, 0], sizes = [8, 256], strides = [1, 1]} : vector<8x384xf32> to vector<8x256xf32>
    %665 = arith.addf %663, %664 : vector<8x256xf32>
    %666 = arith.negf %665 : vector<8x256xf32>
    %667 = math.exp %666 : vector<8x256xf32>
    %cst_164 = arith.constant 1.000000e+00 : f32
    %668 = vector.broadcast %cst_164 : f32 to vector<8x256xf32>
    %669 = arith.addf %668, %667 : vector<8x256xf32>
    %670 = arith.divf %668, %669 : vector<8x256xf32>
    %671 = vector.extract_strided_slice %670 {offsets = [0, 0], sizes = [8, 128], strides = [1, 1]} : vector<8x256xf32> to vector<8x128xf32>
    %672 = vector.extract_strided_slice %670 {offsets = [0, 128], sizes = [8, 128], strides = [1, 1]} : vector<8x256xf32> to vector<8x128xf32>
    %673 = vector.extract_strided_slice %661 {offsets = [0, 256], sizes = [8, 128], strides = [1, 1]} : vector<8x384xf32> to vector<8x128xf32>
    %674 = vector.extract_strided_slice %662 {offsets = [0, 256], sizes = [8, 128], strides = [1, 1]} : vector<8x384xf32> to vector<8x128xf32>
    %675 = arith.addf %674, %26 : vector<8x128xf32>
    %676 = arith.mulf %671, %675 : vector<8x128xf32>
    %677 = arith.addf %673, %676 : vector<8x128xf32>
    %678 = math.tanh %677 : vector<8x128xf32>
    %cst_165 = arith.constant 1.000000e+00 : f32
    %679 = vector.broadcast %cst_165 : f32 to vector<8x128xf32>
    %680 = arith.subf %679, %672 : vector<8x128xf32>
    %681 = arith.mulf %680, %678 : vector<8x128xf32>
    %682 = arith.mulf %672, %608 : vector<8x128xf32>
    %683 = arith.addf %681, %682 : vector<8x128xf32>
    %c8_i32_166 = arith.constant 8 : i32
    %684 = arith.cmpi slt, %c7_i32_151, %c8_i32_166 : i32
    %685 = arith.select %684, %635, %602 : vector<8x128xf32>
    %c1_i32_167 = arith.constant 1 : i32
    %686 = arith.cmpi sge, %c7_i32_151, %c1_i32_167 : i32
    %c9_i32_168 = arith.constant 9 : i32
    %687 = arith.cmpi slt, %c7_i32_151, %c9_i32_168 : i32
    %688 = arith.andi %686, %687 : i1
    %689 = arith.select %688, %659, %606 : vector<8x128xf32>
    %c2_i32_169 = arith.constant 2 : i32
    %690 = arith.cmpi sge, %c7_i32_151, %c2_i32_169 : i32
    %691 = arith.select %690, %683, %608 : vector<8x128xf32>
    %c8_i32_170 = arith.constant 8 : i32
    %c7_i32_171 = arith.constant 7 : i32
    %692 = arith.minsi %c8_i32_170, %c7_i32_171 : i32
    %c8_i32_172 = arith.constant 8 : i32
    %693 = arith.muli %692, %c8_i32_172 : i32
    %694 = tpu.assume_multiple %693, 8 : i32
    %695 = arith.index_cast %694 : i32 to index
    %c0_173 = arith.constant 0 : index
    %696 = vector.load %arg16[%695, %c0_173] : memref<64x384xf32, #tpu.memory_space<vmem>>, vector<8x384xf32>
    %cst_174 = arith.constant dense<0.000000e+00> : vector<8x384xf32>
    %697 = tpu.matmul %685, %7, %cst_174 {dimension_numbers = #tpu.dot_dimension_numbers<[1], [0], [0], [1], [0, 0, 1, 1], [], []>} : vector<8x128xf32>, vector<128x384xf32>, vector<8x384xf32> -> vector<8x384xf32>
    %698 = vector.extract_strided_slice %696 {offsets = [0, 0], sizes = [8, 256], strides = [1, 1]} : vector<8x384xf32> to vector<8x256xf32>
    %699 = vector.extract_strided_slice %697 {offsets = [0, 0], sizes = [8, 256], strides = [1, 1]} : vector<8x384xf32> to vector<8x256xf32>
    %700 = arith.addf %698, %699 : vector<8x256xf32>
    %701 = arith.negf %700 : vector<8x256xf32>
    %702 = math.exp %701 : vector<8x256xf32>
    %cst_175 = arith.constant 1.000000e+00 : f32
    %703 = vector.broadcast %cst_175 : f32 to vector<8x256xf32>
    %704 = arith.addf %703, %702 : vector<8x256xf32>
    %705 = arith.divf %703, %704 : vector<8x256xf32>
    %706 = vector.extract_strided_slice %705 {offsets = [0, 0], sizes = [8, 128], strides = [1, 1]} : vector<8x256xf32> to vector<8x128xf32>
    %707 = vector.extract_strided_slice %705 {offsets = [0, 128], sizes = [8, 128], strides = [1, 1]} : vector<8x256xf32> to vector<8x128xf32>
    %708 = vector.extract_strided_slice %696 {offsets = [0, 256], sizes = [8, 128], strides = [1, 1]} : vector<8x384xf32> to vector<8x128xf32>
    %709 = vector.extract_strided_slice %697 {offsets = [0, 256], sizes = [8, 128], strides = [1, 1]} : vector<8x384xf32> to vector<8x128xf32>
    %710 = arith.addf %709, %20 : vector<8x128xf32>
    %711 = arith.mulf %706, %710 : vector<8x128xf32>
    %712 = arith.addf %708, %711 : vector<8x128xf32>
    %713 = math.tanh %712 : vector<8x128xf32>
    %cst_176 = arith.constant 1.000000e+00 : f32
    %714 = vector.broadcast %cst_176 : f32 to vector<8x128xf32>
    %715 = arith.subf %714, %707 : vector<8x128xf32>
    %716 = arith.mulf %715, %713 : vector<8x128xf32>
    %717 = arith.mulf %707, %685 : vector<8x128xf32>
    %718 = arith.addf %716, %717 : vector<8x128xf32>
    %cst_177 = arith.constant dense<0.000000e+00> : vector<8x384xf32>
    %719 = tpu.matmul %685, %10, %cst_177 {dimension_numbers = #tpu.dot_dimension_numbers<[1], [0], [0], [1], [0, 0, 1, 1], [], []>} : vector<8x128xf32>, vector<128x384xf32>, vector<8x384xf32> -> vector<8x384xf32>
    %720 = arith.addf %719, %14 : vector<8x384xf32>
    %cst_178 = arith.constant dense<0.000000e+00> : vector<8x384xf32>
    %721 = tpu.matmul %689, %8, %cst_178 {dimension_numbers = #tpu.dot_dimension_numbers<[1], [0], [0], [1], [0, 0, 1, 1], [], []>} : vector<8x128xf32>, vector<128x384xf32>, vector<8x384xf32> -> vector<8x384xf32>
    %722 = vector.extract_strided_slice %720 {offsets = [0, 0], sizes = [8, 256], strides = [1, 1]} : vector<8x384xf32> to vector<8x256xf32>
    %723 = vector.extract_strided_slice %721 {offsets = [0, 0], sizes = [8, 256], strides = [1, 1]} : vector<8x384xf32> to vector<8x256xf32>
    %724 = arith.addf %722, %723 : vector<8x256xf32>
    %725 = arith.negf %724 : vector<8x256xf32>
    %726 = math.exp %725 : vector<8x256xf32>
    %cst_179 = arith.constant 1.000000e+00 : f32
    %727 = vector.broadcast %cst_179 : f32 to vector<8x256xf32>
    %728 = arith.addf %727, %726 : vector<8x256xf32>
    %729 = arith.divf %727, %728 : vector<8x256xf32>
    %730 = vector.extract_strided_slice %729 {offsets = [0, 0], sizes = [8, 128], strides = [1, 1]} : vector<8x256xf32> to vector<8x128xf32>
    %731 = vector.extract_strided_slice %729 {offsets = [0, 128], sizes = [8, 128], strides = [1, 1]} : vector<8x256xf32> to vector<8x128xf32>
    %732 = vector.extract_strided_slice %720 {offsets = [0, 256], sizes = [8, 128], strides = [1, 1]} : vector<8x384xf32> to vector<8x128xf32>
    %733 = vector.extract_strided_slice %721 {offsets = [0, 256], sizes = [8, 128], strides = [1, 1]} : vector<8x384xf32> to vector<8x128xf32>
    %734 = arith.addf %733, %23 : vector<8x128xf32>
    %735 = arith.mulf %730, %734 : vector<8x128xf32>
    %736 = arith.addf %732, %735 : vector<8x128xf32>
    %737 = math.tanh %736 : vector<8x128xf32>
    %cst_180 = arith.constant 1.000000e+00 : f32
    %738 = vector.broadcast %cst_180 : f32 to vector<8x128xf32>
    %739 = arith.subf %738, %731 : vector<8x128xf32>
    %740 = arith.mulf %739, %737 : vector<8x128xf32>
    %741 = arith.mulf %731, %689 : vector<8x128xf32>
    %742 = arith.addf %740, %741 : vector<8x128xf32>
    %cst_181 = arith.constant dense<0.000000e+00> : vector<8x384xf32>
    %743 = tpu.matmul %689, %11, %cst_181 {dimension_numbers = #tpu.dot_dimension_numbers<[1], [0], [0], [1], [0, 0, 1, 1], [], []>} : vector<8x128xf32>, vector<128x384xf32>, vector<8x384xf32> -> vector<8x384xf32>
    %744 = arith.addf %743, %17 : vector<8x384xf32>
    %cst_182 = arith.constant dense<0.000000e+00> : vector<8x384xf32>
    %745 = tpu.matmul %691, %9, %cst_182 {dimension_numbers = #tpu.dot_dimension_numbers<[1], [0], [0], [1], [0, 0, 1, 1], [], []>} : vector<8x128xf32>, vector<128x384xf32>, vector<8x384xf32> -> vector<8x384xf32>
    %746 = vector.extract_strided_slice %744 {offsets = [0, 0], sizes = [8, 256], strides = [1, 1]} : vector<8x384xf32> to vector<8x256xf32>
    %747 = vector.extract_strided_slice %745 {offsets = [0, 0], sizes = [8, 256], strides = [1, 1]} : vector<8x384xf32> to vector<8x256xf32>
    %748 = arith.addf %746, %747 : vector<8x256xf32>
    %749 = arith.negf %748 : vector<8x256xf32>
    %750 = math.exp %749 : vector<8x256xf32>
    %cst_183 = arith.constant 1.000000e+00 : f32
    %751 = vector.broadcast %cst_183 : f32 to vector<8x256xf32>
    %752 = arith.addf %751, %750 : vector<8x256xf32>
    %753 = arith.divf %751, %752 : vector<8x256xf32>
    %754 = vector.extract_strided_slice %753 {offsets = [0, 0], sizes = [8, 128], strides = [1, 1]} : vector<8x256xf32> to vector<8x128xf32>
    %755 = vector.extract_strided_slice %753 {offsets = [0, 128], sizes = [8, 128], strides = [1, 1]} : vector<8x256xf32> to vector<8x128xf32>
    %756 = vector.extract_strided_slice %744 {offsets = [0, 256], sizes = [8, 128], strides = [1, 1]} : vector<8x384xf32> to vector<8x128xf32>
    %757 = vector.extract_strided_slice %745 {offsets = [0, 256], sizes = [8, 128], strides = [1, 1]} : vector<8x384xf32> to vector<8x128xf32>
    %758 = arith.addf %757, %26 : vector<8x128xf32>
    %759 = arith.mulf %754, %758 : vector<8x128xf32>
    %760 = arith.addf %756, %759 : vector<8x128xf32>
    %761 = math.tanh %760 : vector<8x128xf32>
    %cst_184 = arith.constant 1.000000e+00 : f32
    %762 = vector.broadcast %cst_184 : f32 to vector<8x128xf32>
    %763 = arith.subf %762, %755 : vector<8x128xf32>
    %764 = arith.mulf %763, %761 : vector<8x128xf32>
    %765 = arith.mulf %755, %691 : vector<8x128xf32>
    %766 = arith.addf %764, %765 : vector<8x128xf32>
    %c8_i32_185 = arith.constant 8 : i32
    %767 = arith.cmpi slt, %c8_i32_170, %c8_i32_185 : i32
    %768 = arith.select %767, %718, %685 : vector<8x128xf32>
    %c1_i32_186 = arith.constant 1 : i32
    %769 = arith.cmpi sge, %c8_i32_170, %c1_i32_186 : i32
    %c9_i32_187 = arith.constant 9 : i32
    %770 = arith.cmpi slt, %c8_i32_170, %c9_i32_187 : i32
    %771 = arith.andi %769, %770 : i1
    %772 = arith.select %771, %742, %689 : vector<8x128xf32>
    %c2_i32_188 = arith.constant 2 : i32
    %773 = arith.cmpi sge, %c8_i32_170, %c2_i32_188 : i32
    %774 = arith.select %773, %766, %691 : vector<8x128xf32>
    %c9_i32_189 = arith.constant 9 : i32
    %c7_i32_190 = arith.constant 7 : i32
    %775 = arith.minsi %c9_i32_189, %c7_i32_190 : i32
    %c8_i32_191 = arith.constant 8 : i32
    %776 = arith.muli %775, %c8_i32_191 : i32
    %777 = tpu.assume_multiple %776, 8 : i32
    %778 = arith.index_cast %777 : i32 to index
    %c0_192 = arith.constant 0 : index
    %779 = vector.load %arg16[%778, %c0_192] : memref<64x384xf32, #tpu.memory_space<vmem>>, vector<8x384xf32>
    %cst_193 = arith.constant dense<0.000000e+00> : vector<8x384xf32>
    %780 = tpu.matmul %768, %7, %cst_193 {dimension_numbers = #tpu.dot_dimension_numbers<[1], [0], [0], [1], [0, 0, 1, 1], [], []>} : vector<8x128xf32>, vector<128x384xf32>, vector<8x384xf32> -> vector<8x384xf32>
    %781 = vector.extract_strided_slice %779 {offsets = [0, 0], sizes = [8, 256], strides = [1, 1]} : vector<8x384xf32> to vector<8x256xf32>
    %782 = vector.extract_strided_slice %780 {offsets = [0, 0], sizes = [8, 256], strides = [1, 1]} : vector<8x384xf32> to vector<8x256xf32>
    %783 = arith.addf %781, %782 : vector<8x256xf32>
    %784 = arith.negf %783 : vector<8x256xf32>
    %785 = math.exp %784 : vector<8x256xf32>
    %cst_194 = arith.constant 1.000000e+00 : f32
    %786 = vector.broadcast %cst_194 : f32 to vector<8x256xf32>
    %787 = arith.addf %786, %785 : vector<8x256xf32>
    %788 = arith.divf %786, %787 : vector<8x256xf32>
    %789 = vector.extract_strided_slice %788 {offsets = [0, 0], sizes = [8, 128], strides = [1, 1]} : vector<8x256xf32> to vector<8x128xf32>
    %790 = vector.extract_strided_slice %788 {offsets = [0, 128], sizes = [8, 128], strides = [1, 1]} : vector<8x256xf32> to vector<8x128xf32>
    %791 = vector.extract_strided_slice %779 {offsets = [0, 256], sizes = [8, 128], strides = [1, 1]} : vector<8x384xf32> to vector<8x128xf32>
    %792 = vector.extract_strided_slice %780 {offsets = [0, 256], sizes = [8, 128], strides = [1, 1]} : vector<8x384xf32> to vector<8x128xf32>
    %793 = arith.addf %792, %20 : vector<8x128xf32>
    %794 = arith.mulf %789, %793 : vector<8x128xf32>
    %795 = arith.addf %791, %794 : vector<8x128xf32>
    %796 = math.tanh %795 : vector<8x128xf32>
    %cst_195 = arith.constant 1.000000e+00 : f32
    %797 = vector.broadcast %cst_195 : f32 to vector<8x128xf32>
    %798 = arith.subf %797, %790 : vector<8x128xf32>
    %799 = arith.mulf %798, %796 : vector<8x128xf32>
    %800 = arith.mulf %790, %768 : vector<8x128xf32>
    %801 = arith.addf %799, %800 : vector<8x128xf32>
    %cst_196 = arith.constant dense<0.000000e+00> : vector<8x384xf32>
    %802 = tpu.matmul %768, %10, %cst_196 {dimension_numbers = #tpu.dot_dimension_numbers<[1], [0], [0], [1], [0, 0, 1, 1], [], []>} : vector<8x128xf32>, vector<128x384xf32>, vector<8x384xf32> -> vector<8x384xf32>
    %803 = arith.addf %802, %14 : vector<8x384xf32>
    %cst_197 = arith.constant dense<0.000000e+00> : vector<8x384xf32>
    %804 = tpu.matmul %772, %8, %cst_197 {dimension_numbers = #tpu.dot_dimension_numbers<[1], [0], [0], [1], [0, 0, 1, 1], [], []>} : vector<8x128xf32>, vector<128x384xf32>, vector<8x384xf32> -> vector<8x384xf32>
    %805 = vector.extract_strided_slice %803 {offsets = [0, 0], sizes = [8, 256], strides = [1, 1]} : vector<8x384xf32> to vector<8x256xf32>
    %806 = vector.extract_strided_slice %804 {offsets = [0, 0], sizes = [8, 256], strides = [1, 1]} : vector<8x384xf32> to vector<8x256xf32>
    %807 = arith.addf %805, %806 : vector<8x256xf32>
    %808 = arith.negf %807 : vector<8x256xf32>
    %809 = math.exp %808 : vector<8x256xf32>
    %cst_198 = arith.constant 1.000000e+00 : f32
    %810 = vector.broadcast %cst_198 : f32 to vector<8x256xf32>
    %811 = arith.addf %810, %809 : vector<8x256xf32>
    %812 = arith.divf %810, %811 : vector<8x256xf32>
    %813 = vector.extract_strided_slice %812 {offsets = [0, 0], sizes = [8, 128], strides = [1, 1]} : vector<8x256xf32> to vector<8x128xf32>
    %814 = vector.extract_strided_slice %812 {offsets = [0, 128], sizes = [8, 128], strides = [1, 1]} : vector<8x256xf32> to vector<8x128xf32>
    %815 = vector.extract_strided_slice %803 {offsets = [0, 256], sizes = [8, 128], strides = [1, 1]} : vector<8x384xf32> to vector<8x128xf32>
    %816 = vector.extract_strided_slice %804 {offsets = [0, 256], sizes = [8, 128], strides = [1, 1]} : vector<8x384xf32> to vector<8x128xf32>
    %817 = arith.addf %816, %23 : vector<8x128xf32>
    %818 = arith.mulf %813, %817 : vector<8x128xf32>
    %819 = arith.addf %815, %818 : vector<8x128xf32>
    %820 = math.tanh %819 : vector<8x128xf32>
    %cst_199 = arith.constant 1.000000e+00 : f32
    %821 = vector.broadcast %cst_199 : f32 to vector<8x128xf32>
    %822 = arith.subf %821, %814 : vector<8x128xf32>
    %823 = arith.mulf %822, %820 : vector<8x128xf32>
    %824 = arith.mulf %814, %772 : vector<8x128xf32>
    %825 = arith.addf %823, %824 : vector<8x128xf32>
    %cst_200 = arith.constant dense<0.000000e+00> : vector<8x384xf32>
    %826 = tpu.matmul %772, %11, %cst_200 {dimension_numbers = #tpu.dot_dimension_numbers<[1], [0], [0], [1], [0, 0, 1, 1], [], []>} : vector<8x128xf32>, vector<128x384xf32>, vector<8x384xf32> -> vector<8x384xf32>
    %827 = arith.addf %826, %17 : vector<8x384xf32>
    %cst_201 = arith.constant dense<0.000000e+00> : vector<8x384xf32>
    %828 = tpu.matmul %774, %9, %cst_201 {dimension_numbers = #tpu.dot_dimension_numbers<[1], [0], [0], [1], [0, 0, 1, 1], [], []>} : vector<8x128xf32>, vector<128x384xf32>, vector<8x384xf32> -> vector<8x384xf32>
    %829 = vector.extract_strided_slice %827 {offsets = [0, 0], sizes = [8, 256], strides = [1, 1]} : vector<8x384xf32> to vector<8x256xf32>
    %830 = vector.extract_strided_slice %828 {offsets = [0, 0], sizes = [8, 256], strides = [1, 1]} : vector<8x384xf32> to vector<8x256xf32>
    %831 = arith.addf %829, %830 : vector<8x256xf32>
    %832 = arith.negf %831 : vector<8x256xf32>
    %833 = math.exp %832 : vector<8x256xf32>
    %cst_202 = arith.constant 1.000000e+00 : f32
    %834 = vector.broadcast %cst_202 : f32 to vector<8x256xf32>
    %835 = arith.addf %834, %833 : vector<8x256xf32>
    %836 = arith.divf %834, %835 : vector<8x256xf32>
    %837 = vector.extract_strided_slice %836 {offsets = [0, 0], sizes = [8, 128], strides = [1, 1]} : vector<8x256xf32> to vector<8x128xf32>
    %838 = vector.extract_strided_slice %836 {offsets = [0, 128], sizes = [8, 128], strides = [1, 1]} : vector<8x256xf32> to vector<8x128xf32>
    %839 = vector.extract_strided_slice %827 {offsets = [0, 256], sizes = [8, 128], strides = [1, 1]} : vector<8x384xf32> to vector<8x128xf32>
    %840 = vector.extract_strided_slice %828 {offsets = [0, 256], sizes = [8, 128], strides = [1, 1]} : vector<8x384xf32> to vector<8x128xf32>
    %841 = arith.addf %840, %26 : vector<8x128xf32>
    %842 = arith.mulf %837, %841 : vector<8x128xf32>
    %843 = arith.addf %839, %842 : vector<8x128xf32>
    %844 = math.tanh %843 : vector<8x128xf32>
    %cst_203 = arith.constant 1.000000e+00 : f32
    %845 = vector.broadcast %cst_203 : f32 to vector<8x128xf32>
    %846 = arith.subf %845, %838 : vector<8x128xf32>
    %847 = arith.mulf %846, %844 : vector<8x128xf32>
    %848 = arith.mulf %838, %774 : vector<8x128xf32>
    %849 = arith.addf %847, %848 : vector<8x128xf32>
    %c8_i32_204 = arith.constant 8 : i32
    %850 = arith.cmpi slt, %c9_i32_189, %c8_i32_204 : i32
    %851 = arith.select %850, %801, %768 : vector<8x128xf32>
    %c1_i32_205 = arith.constant 1 : i32
    %852 = arith.cmpi sge, %c9_i32_189, %c1_i32_205 : i32
    %c9_i32_206 = arith.constant 9 : i32
    %853 = arith.cmpi slt, %c9_i32_189, %c9_i32_206 : i32
    %854 = arith.andi %852, %853 : i1
    %855 = arith.select %854, %825, %772 : vector<8x128xf32>
    %c2_i32_207 = arith.constant 2 : i32
    %856 = arith.cmpi sge, %c9_i32_189, %c2_i32_207 : i32
    %857 = arith.select %856, %849, %774 : vector<8x128xf32>
    %c10_i32 = arith.constant 10 : i32
    %c0_208 = arith.constant 0 : index
    %c0_209 = arith.constant 0 : index
    %858 = vector.load %arg17[%c0_208, %c0_209] : memref<24x128xf32, #tpu.memory_space<vmem>>, vector<8x128xf32>
    tpu.vector_store %arg17[%c0_208, %c0_209], %851 {strides = array<i32>} : memref<24x128xf32, #tpu.memory_space<vmem>>, vector<8x128xf32>,
    %c8 = arith.constant 8 : index
    %c0_210 = arith.constant 0 : index
    %859 = vector.load %arg17[%c8, %c0_210] : memref<24x128xf32, #tpu.memory_space<vmem>>, vector<8x128xf32>
    tpu.vector_store %arg17[%c8, %c0_210], %855 {strides = array<i32>} : memref<24x128xf32, #tpu.memory_space<vmem>>, vector<8x128xf32>,
    %c16 = arith.constant 16 : index
    %c0_211 = arith.constant 0 : index
    %860 = vector.load %arg17[%c16, %c0_211] : memref<24x128xf32, #tpu.memory_space<vmem>>, vector<8x128xf32>
    tpu.vector_store %arg17[%c16, %c0_211], %857 {strides = array<i32>} : memref<24x128xf32, #tpu.memory_space<vmem>>, vector<8x128xf32>,
    %c0_212 = arith.constant 0 : index
    %c0_213 = arith.constant 0 : index
    %861 = vector.load %arg17[%c0_212, %c0_213] : memref<24x128xf32, #tpu.memory_space<vmem>>, vector<24x128xf32>
    %c0_214 = arith.constant 0 : index
    %c0_215 = arith.constant 0 : index
    %862 = vector.load %arg13[%c0_214, %c0_215] : memref<128x128xf32, #tpu.memory_space<vmem>>, vector<128x128xf32>
    %cst_216 = arith.constant dense<0.000000e+00> : vector<24x128xf32>
    %863 = tpu.matmul %861, %862, %cst_216 {dimension_numbers = #tpu.dot_dimension_numbers<[1], [0], [0], [1], [0, 0, 1, 1], [], []>} : vector<24x128xf32>, vector<128x128xf32>, vector<24x128xf32> -> vector<24x128xf32>
    %c0_217 = arith.constant 0 : index
    %c0_218 = arith.constant 0 : index
    %864 = vector.load %arg14[%c0_217, %c0_218] : memref<1x128xf32, #tpu.memory_space<vmem>>, vector<1x128xf32>
    %865 = vector.broadcast %864 : vector<1x128xf32> to vector<24x128xf32>
    %866 = arith.addf %863, %865 : vector<24x128xf32>
    %867 = math.tanh %866 : vector<24x128xf32>
    %c0_219 = arith.constant 0 : index
    %c0_220 = arith.constant 0 : index
    %868 = vector.load %arg15[%c0_219, %c0_220] : memref<24x128xf32, #tpu.memory_space<vmem>>, vector<24x128xf32>
    tpu.vector_store %arg15[%c0_219, %c0_220], %867 {strides = array<i32>} : memref<24x128xf32, #tpu.memory_space<vmem>>, vector<24x128xf32>,
    return
  }
}

</mosaic_0001>

<bundles_post_ra>
// kernel: tpu_custom_call.1
= control target key start
LH: loop header
LB: loop body
LE: loop exit
PB: predicated region body
PF: predicated region fallthrough
CT: control target
= control target key end

     0   :  { %20 = vsyncpa [#allocation5], 0  ;;  %s15199_s0 = inlined_call_operand.hbm [shape: f32[64,384], index: 0, kind: input, shape index: {}]   ;;  %s15200_s1 = inlined_call_operand.hbm [shape: f32[384,384], index: 1, kind: input, shape index: {}]   ;;  %s15201_s2 = inlined_call_operand.hbm [shape: f32[128,384], index: 2, kind: input, shape index: {}]   ;;  %s15202_s3 = inlined_call_operand.vmem [shape: f32[1,384], index: 3, kind: input, shape index: {}]   ;;  %s15203_s4 = inlined_call_operand.vmem [shape: f32[1,128], index: 4, kind: input, shape index: {}]   ;;  %s15204_s5 = inlined_call_operand.hbm [shape: f32[128,384], index: 5, kind: input, shape index: {}]   ;;  %s15205_s6 = inlined_call_operand.hbm [shape: f32[128,384], index: 6, kind: input, shape index: {}]   ;;  %s15206_s7 = inlined_call_operand.vmem [shape: f32[1,384], index: 7, kind: input, shape index: {}]   ;;  %s15207_s8 = inlined_call_operand.vmem [shape: f32[1,128], index: 8, kind: input, shape index: {}]   ;;  %s15208_s9 = inlined_call_operand.hbm [shape: f32[128,384], index: 9, kind: input, shape index: {}]   ;;  %s15209_s10 = inlined_call_operand.hbm [shape: f32[128,384], index: 10, kind: input, shape index: {}]   ;;  %s15210_s11 = inlined_call_operand.vmem [shape: f32[1,384], index: 11, kind: input, shape index: {}]   ;;  %s15211_s12 = inlined_call_operand.vmem [shape: f32[1,128], index: 12, kind: input, shape index: {}]   ;;  %s15212_s13 = inlined_call_operand.hbm [shape: f32[128,128], index: 13, kind: input, shape index: {}]   ;;  %s15213_s14 = inlined_call_operand.vmem [shape: f32[1,128], index: 14, kind: input, shape index: {}]   ;;  %s15214_s15 = inlined_call_operand.hbm [shape: f32[24,128], index: 15, kind: output, shape index: {}]  }
   0x1   :  { %21 = vsyncpa [#allocation8], 0 }
   0x2   :  { %22 = vsyncpa [#allocation11], 0 }
   0x3   :  { %23 = vsyncpa [#allocation14], 0 }
   0x4   :  { %24 = vsyncpa [#allocation17], 0 }
   0x5   :  { %25 = vsyncpa [#allocation6], 0  ;;  %s12791_s18 = smov [#allocation7]   ;;  %s12792_s20 = smov [#allocation10]  }
   0x6   :  { %s43_s19 = sshll.u32 %s12791_s18, 4  ;;  %s71_s21 = sshll.u32 %s12792_s20, 4  ;;  %s44_s19 = int_to_ptr.vmem [resolvable:$true] %s43_s19  ;;  %s12887_s21 = int_to_ptr.vmem [resolvable:$true] %s71_s21 }
   0x7   :  { %s12581_s24 = scalar_lea.hbm %s15200_s1, 18432 }
   0x8   :  { %p12582_p0 = scmp.ne.s32.totalorder %s15200_s1, %s12581_s24  ;;  %p12585_p1 = scmp.lt.u32.totalorder %s12581_s24, %s15200_s1 }
   0xa   :  { %p12587_p2 = pnand %p12585_p1, %p12582_p0 }
   0xc   :  { %12590 = shalt.err (!%p12587_p2)
}
   0xd   :  { %s12591_s29 = scalar_lea.vmem %s44_s19, 18432  ;;  %p12596_p4 = scmp.lt.s32.totalorder %s44_s19, %s44_s19 }
   0xe   :  { %p12592_p3 = scmp.ne.s32.totalorder %s44_s19, %s12591_s29  ;;  %p12597_p5 = scmp.lt.s32.totalorder %s12591_s29, %s12591_s29 }
  0x10   :  { %p12598_p6 = por %p12597_p5, %p12596_p4 }
  0x12   :  { %p12599_p7 = pnand %p12598_p6, %p12592_p3 }
  0x14   :  { %12602 = shalt.err (!%p12599_p7)
}
  0x15   :  { %s12793_s30 = smov 384   ;;  %s12794_s16 = smov 24  }
  0x16   :  { %49 = dma.hbm_to_vmem [thread:$0]  %s15200_s1, 18432, %s44_s19, [#allocation8], %s12793_s30, %s12793_s30, %s12794_s16  }
  0x17   :  { %s12603_s23 = scalar_lea.hbm %s15204_s5, 6144 }
  0x18   :  { %p12604_p8 = scmp.ne.s32.totalorder %s15204_s5, %s12603_s23  ;;  %p12607_p9 = scmp.lt.u32.totalorder %s12603_s23, %s15204_s5 }
  0x1a   :  { %p12609_p10 = pnand %p12607_p9, %p12604_p8 }
  0x1c   :  { %12612 = shalt.err (!%p12609_p10)
}
  0x1d   :  { %s12613_s28 = scalar_lea.vmem %s12887_s21, 6144  ;;  %p12618_p12 = scmp.lt.s32.totalorder %s12887_s21, %s12887_s21 }
  0x1e   :  { %p12614_p11 = scmp.ne.s32.totalorder %s12887_s21, %s12613_s28  ;;  %p12619_p13 = scmp.lt.s32.totalorder %s12613_s28, %s12613_s28 }
  0x20   :  { %p12620_p0 = por %p12619_p13, %p12618_p12 }
  0x22   :  { %p12621_p1 = pnand %p12620_p0, %p12614_p11 }
  0x24   :  { %12624 = shalt.err (!%p12621_p1)
}
  0x25   :  { %77 = dma.hbm_to_vmem [thread:$0]  %s15204_s5, 6144, %s12887_s21, [#allocation11], %s12793_s30, %s12793_s30, %s12794_s16  }
  0x26   :  { %s12795_s29 = smov [#allocation13]   ;;  %s12796_s18 = smov [#allocation4]  }
  0x27   :  { %s99_s17 = sshll.u32 %s12795_s29, 4  ;;  %s31_s20 = sshll.u32 %s12796_s18, 4  ;;  %s100_s17 = int_to_ptr.vmem [resolvable:$true] %s99_s17  ;;  %s12924_s20 = int_to_ptr.vmem [resolvable:$true] %s31_s20 }
  0x28   :  { %s12625_s24 = scalar_lea.hbm %s15208_s9, 6144 }
  0x29   :  { %p12626_p2 = scmp.ne.s32.totalorder %s15208_s9, %s12625_s24  ;;  %p12629_p3 = scmp.lt.u32.totalorder %s12625_s24, %s15208_s9 }
  0x2b   :  { %p12631_p4 = pnand %p12629_p3, %p12626_p2 }
  0x2d   :  { %12634 = shalt.err (!%p12631_p4)
}
  0x2e   :  { %s12635_s5 = scalar_lea.vmem %s100_s17, 6144  ;;  %p12640_p6 = scmp.lt.s32.totalorder %s100_s17, %s100_s17 }
  0x2f   :  { %p12636_p5 = scmp.ne.s32.totalorder %s100_s17, %s12635_s5  ;;  %p12641_p7 = scmp.lt.s32.totalorder %s12635_s5, %s12635_s5 }
  0x31   :  { %p12642_p8 = por %p12641_p7, %p12640_p6 }
  0x33   :  { %p12643_p9 = pnand %p12642_p8, %p12636_p5 }
  0x35   :  { %12646 = shalt.err (!%p12643_p9)
}
  0x36   :  { %105 = dma.hbm_to_vmem [thread:$0]  %s15208_s9, 6144, %s100_s17, [#allocation14], %s12793_s30, %s12793_s30, %s12794_s16  }
  0x37   :  { %s12647_s18 = scalar_lea.hbm %s15199_s0, 3072 }
  0x38   :  { %p12648_p10 = scmp.ne.s32.totalorder %s15199_s0, %s12647_s18  ;;  %p12651_p11 = scmp.lt.u32.totalorder %s12647_s18, %s15199_s0 }
  0x3a   :  { %p12653_p12 = pnand %p12651_p11, %p12648_p10 }
  0x3c   :  { %12656 = shalt.err (!%p12653_p12)
}
  0x3d   :  { %s12657_s26 = scalar_lea.vmem %s12924_s20, 3072  ;;  %p12662_p0 = scmp.lt.s32.totalorder %s12924_s20, %s12924_s20 }
  0x3e   :  { %p12658_p13 = scmp.ne.s32.totalorder %s12924_s20, %s12657_s26  ;;  %p12663_p1 = scmp.lt.s32.totalorder %s12657_s26, %s12657_s26 }
  0x40   :  { %p12664_p2 = por %p12663_p1, %p12662_p0 }
  0x42   :  { %p12665_p3 = pnand %p12664_p2, %p12658_p13 }
  0x44   :  { %12668 = shalt.err (!%p12665_p3)
}
  0x45   :  { %37 = dma.hbm_to_vmem [thread:$0]  %s15199_s0, 3072, %s12924_s20, [#allocation5], %s12793_s30, %s12793_s30, %s12794_s16  }
  0x46   :  { %s12797_s27 = smov [#allocation9]   ;;  %s12798_s5 = smov [#allocation12]  }
  0x47   :  { %s55_s28 = sshll.u32 %s12797_s27, 4  ;;  %s83_s21 = sshll.u32 %s12798_s5, 4  ;;  %s56_s28 = int_to_ptr.vmem [resolvable:$true] %s55_s28  ;;  %s12961_s21 = int_to_ptr.vmem [resolvable:$true] %s83_s21 }
  0x48   :  { %s12669_s29 = scalar_lea.hbm %s15201_s2, 6144 }
  0x49   :  { %p12670_p4 = scmp.ne.s32.totalorder %s15201_s2, %s12669_s29  ;;  %p12673_p5 = scmp.lt.u32.totalorder %s12669_s29, %s15201_s2 }
  0x4b   :  { %p12675_p6 = pnand %p12673_p5, %p12670_p4 }
  0x4d   :  { %12678 = shalt.err (!%p12675_p6)
}
  0x4e   :  { %s12679_s0 = scalar_lea.vmem %s56_s28, 6144  ;;  %p12684_p8 = scmp.lt.s32.totalorder %s56_s28, %s56_s28 }
  0x4f   :  { %p12680_p7 = scmp.ne.s32.totalorder %s56_s28, %s12679_s0  ;;  %p12685_p9 = scmp.lt.s32.totalorder %s12679_s0, %s12679_s0 }
  0x51   :  { %p12686_p10 = por %p12685_p9, %p12684_p8 }
  0x53   :  { %p12687_p11 = pnand %p12686_p10, %p12680_p7 }
  0x55   :  { %12690 = shalt.err (!%p12687_p11)
}
  0x56   :  { %61 = dma.hbm_to_vmem [thread:$0]  %s15201_s2, 6144, %s56_s28, [#allocation8], %s12793_s30, %s12793_s30, %s12794_s16  }
  0x57   :  { %s12691_s17 = scalar_lea.hbm %s15205_s6, 6144 }
  0x58   :  { %p12692_p12 = scmp.ne.s32.totalorder %s15205_s6, %s12691_s17  ;;  %p12695_p13 = scmp.lt.u32.totalorder %s12691_s17, %s15205_s6 }
  0x5a   :  { %p12697_p0 = pnand %p12695_p13, %p12692_p12 }
  0x5c   :  { %12700 = shalt.err (!%p12697_p0)
}
  0x5d   :  { %s12701_s29 = scalar_lea.vmem %s12961_s21, 6144  ;;  %p12706_p2 = scmp.lt.s32.totalorder %s12961_s21, %s12961_s21 }
  0x5e   :  { %p12702_p1 = scmp.ne.s32.totalorder %s12961_s21, %s12701_s29  ;;  %p12707_p3 = scmp.lt.s32.totalorder %s12701_s29, %s12701_s29 }
  0x60   :  { %p12708_p4 = por %p12707_p3, %p12706_p2 }
  0x62   :  { %p12709_p5 = pnand %p12708_p4, %p12702_p1 }
  0x64   :  { %12712 = shalt.err (!%p12709_p5)
}
  0x65   :  { %89 = dma.hbm_to_vmem [thread:$0]  %s15205_s6, 6144, %s12961_s21, [#allocation11], %s12793_s30, %s12793_s30, %s12794_s16  }
  0x66   :  { %s12799_s18 = smov [#allocation15]   ;;  %s12800_s23 = smov [#allocation16]  }
  0x67   :  { %s111_s22 = sshll.u32 %s12799_s18, 4  ;;  %s127_s24 = sshll.u32 %s12800_s23, 4  ;;  %s112_s22 = int_to_ptr.vmem [resolvable:$true] %s111_s22  ;;  %s12998_s24 = int_to_ptr.vmem [resolvable:$true] %s127_s24 }
  0x68   :  { %s12713_s25 = scalar_lea.hbm %s15209_s10, 6144 }
  0x69   :  { %p12714_p6 = scmp.ne.s32.totalorder %s15209_s10, %s12713_s25  ;;  %p12717_p7 = scmp.lt.u32.totalorder %s12713_s25, %s15209_s10 }
  0x6b   :  { %p12719_p8 = pnand %p12717_p7, %p12714_p6 }
  0x6d   :  { %12722 = shalt.err (!%p12719_p8)
}
  0x6e   :  { %s12723_s6 = scalar_lea.vmem %s112_s22, 6144  ;;  %p12728_p10 = scmp.lt.s32.totalorder %s112_s22, %s112_s22 }
  0x6f   :  { %p12724_p9 = scmp.ne.s32.totalorder %s112_s22, %s12723_s6  ;;  %p12729_p11 = scmp.lt.s32.totalorder %s12723_s6, %s12723_s6 }
  0x71   :  { %p12730_p12 = por %p12729_p11, %p12728_p10 }
  0x73   :  { %p12731_p13 = pnand %p12730_p12, %p12724_p9 }
  0x75   :  { %12734 = shalt.err (!%p12731_p13)
}
  0x76   :  { %117 = dma.hbm_to_vmem [thread:$0]  %s15209_s10, 6144, %s112_s22, [#allocation14], %s12793_s30, %s12793_s30, %s12794_s16  }
  0x77   :  { %s12735_s29 = scalar_lea.hbm %s15212_s13, 2048 }
  0x78   :  { %p12736_p0 = scmp.ne.s32.totalorder %s15212_s13, %s12735_s29  ;;  %p12739_p1 = scmp.lt.u32.totalorder %s12735_s29, %s15212_s13 }
  0x7a   :  { %p12741_p2 = pnand %p12739_p1, %p12736_p0 }
  0x7c   :  { %12744 = shalt.err (!%p12741_p2)
}
  0x7d   :  { %s12745_s0 = scalar_lea.vmem %s12998_s24, 2048  ;;  %p12750_p4 = scmp.lt.s32.totalorder %s12998_s24, %s12998_s24 }
  0x7e   :  { %p12746_p3 = scmp.ne.s32.totalorder %s12998_s24, %s12745_s0  ;;  %p12751_p5 = scmp.lt.s32.totalorder %s12745_s0, %s12745_s0 }
  0x80   :  { %p12752_p6 = por %p12751_p5, %p12750_p4 }
  0x82   :  { %p12753_p7 = pnand %p12752_p6, %p12746_p3 }
  0x84   :  { %12756 = shalt.err (!%p12753_p7)
}
  0x85   :  { %s12801_s10 = smov 128   ;;  %s12802_s30 = smov 8  }
  0x86   :  { %133 = dma.hbm_to_vmem [thread:$0]  %s15212_s13, 2048, %s12998_s24, [#allocation17], %s12801_s10, %s12801_s10, %s12802_s30  }
  0x87   :  { %12779 = dma.done.wait [#allocation5], 3072  }
  0x88   :  { %12780 = vsyncadd [#allocation5], 4294964224 }
  0x89   :  { %12781 = dma.done.wait [#allocation8], 24576  }
  0x8a   :  { %12782 = vsyncadd [#allocation8], 4294942720 }
  0x8b   :  { %12783 = dma.done.wait [#allocation11], 12288  }
  0x8c   :  { %12784 = vsyncadd [#allocation11], 4294955008 }
  0x8d   :  { %12785 = dma.done.wait [#allocation14], 12288  }
  0x8e   :  { %12786 = vsyncadd [#allocation14], 4294955008 }
  0x8f   :  { %12787 = dma.done.wait [#allocation17], 2048  }
  0x90   :  { %12788 = vsyncadd [#allocation17], 4294965248  ;;  %v185_v0 = vld [vmem:[#allocation7 + $0x8] sm:$0xff]  ;;  %v188_v1 = vld [vmem:[#allocation7 + $0x20] sm:$0xff]  ;;  %vm12804_vm0 = vmmov 0  }
  0x91   :  { %v184_v2 = vld [vmem:[#allocation7] sm:$0xff]  ;;  %v9775_v3 = vpack.c.bf16 %v188_v1, %v185_v0  ;;  %v187_v4 = vld [vmem:[#allocation7 + $0x18] sm:$0xff]  ;;  %v194_v6 = vld [vmem:[#allocation7 + $0x50] sm:$0xff] }
  0x92   :  { %v191_v5 = vld [vmem:[#allocation7 + $0x38] sm:$0xff]  ;;  %v9777_v7 = vpack.c.bf16 %v187_v4, %v184_v2  ;;  %v190_v9 = vld [vmem:[#allocation7 + $0x30] sm:$0xff]  ;;  %v193_v10 = vld [vmem:[#allocation7 + $0x48] sm:$0xff] }
  0x93   :  { %v9779_v8 = vpack.c.bf16 %v194_v6, %v191_v5  ;;  %v197_v11 = vld [vmem:[#allocation7 + $0x68] sm:$0xff]  ;;  %9776 = vmatprep.subr.bf16.mxu0 %v9775_v3  ;;  %v200_v12 = vld [vmem:[#allocation7 + $0x80] sm:$0xff]  ;;  %v9781_v13 = vpack.c.bf16 %v193_v10, %v190_v9  ;;  %v199_v16 = vld [vmem:[#allocation7 + $0x78] sm:$0xff] }
  0x94   :  { %9778 = vmatpush1.bf16.msra.mxu0 %v9777_v7  ;;  %v9783_v14 = vpack.c.bf16 %v200_v12, %v197_v11  ;;  %v196_v15 = vld [vmem:[#allocation7 + $0x60] sm:$0xff]  ;;  %v203_v17 = vld [vmem:[#allocation7 + $0x98] sm:$0xff]  ;;  %v206_v18 = vld [vmem:[#allocation7 + $0xb0] sm:$0xff] }
  0x95   :  { %9780 = vmatprep.subr.bf16.mxu0 %v9779_v8  ;;  %v9785_v19 = vpack.c.bf16 %v199_v16, %v196_v15  ;;  %v9787_v20 = vpack.c.bf16 %v206_v18, %v203_v17  ;;  %v202_v21 = vld [vmem:[#allocation7 + $0x90] sm:$0xff]  ;;  %v205_v22 = vld [vmem:[#allocation7 + $0xa8] sm:$0xff]  ;;  %v212_v24 = vld [vmem:[#allocation7 + $0xe0] sm:$0xff] }
  0x96   :  { %v209_v23 = vld [vmem:[#allocation7 + $0xc8] sm:$0xff]  ;;  %v234_v25 = vld [vmem:[#allocation7 + $0x190] sm:$0xff]  ;;  %v9789_v27 = vpack.c.bf16 %v205_v22, %v202_v21  ;;  %v208_v28 = vld [vmem:[#allocation7 + $0xc0] sm:$0xff] }
  0x97   :  { %v237_v26 = vld [vmem:[#allocation7 + $0x1a8] sm:$0xff]  ;;  %v186_v30 = vld [vmem:[#allocation7 + $0x10] sm:$0xff]  ;;  %v9791_v32 = vpack.c.bf16 %v212_v24, %v209_v23  ;;  %v211_v33 = vld [vmem:[#allocation7 + $0xd8] sm:$0xff] }
  0x98   :  { %9782 = vmatpush1.bf16.msra.mxu0 %v9781_v13  ;;  %v9871_v29 = vpack.c.bf16 %v237_v26, %v234_v25  ;;  %v189_v31 = vld [vmem:[#allocation7 + $0x28] sm:$0xff]  ;;  %v240_v35 = vld [vmem:[#allocation7 + $0x1c0] sm:$0xff]  ;;  %v243_v36 = vld [vmem:[#allocation7 + $0x1d8] sm:$0xff]  ;;  %v9793_v42 = vpack.c.bf16 %v211_v33, %v208_v28 }
  0x99   :  { %9784 = vmatprep.subr.bf16.mxu0 %v9783_v14  ;;  %v9873_v34 = vpack.c.bf16 %v189_v31, %v186_v30  ;;  %v215_v37 = vld [vmem:[#allocation7 + $0xf8] sm:$0xff]  ;;  %v218_v38 = vld [vmem:[#allocation7 + $0x110] sm:$0xff]  ;;  %v9875_v39 = vpack.c.bf16 %v243_v36, %v240_v35  ;;  %v192_v40 = vld [vmem:[#allocation7 + $0x40] sm:$0xff] }
  0x9a   :  { %9872 = vmatprep.subr.bf16.mxu1 %v9871_v29  ;;  %v195_v41 = vld [vmem:[#allocation7 + $0x58] sm:$0xff]  ;;  %v214_v43 = vld [vmem:[#allocation7 + $0xf0] sm:$0xff]  ;;  %v249_v46 = vld [vmem:[#allocation7 + $0x208] sm:$0xff]  ;;  %v9795_v47 = vpack.c.bf16 %v218_v38, %v215_v37 }
  0x9b   :  { %9874 = vmatpush3.bf16.msra.mxu1 %v9873_v34  ;;  %v9877_v44 = vpack.c.bf16 %v195_v41, %v192_v40  ;;  %v246_v45 = vld [vmem:[#allocation7 + $0x1f0] sm:$0xff]  ;;  %v217_v48 = vld [vmem:[#allocation7 + $0x108] sm:$0xff]  ;;  %v224_v53 = vld [vmem:[#allocation7 + $0x140] sm:$0xff] }
  0x9c   :  { %9786 = vmatpush1.bf16.msra.mxu0 %v9785_v19  ;;  %9876 = vmatprep.subr.bf16.mxu1 %v9875_v39  ;;  %v9879_v49 = vpack.c.bf16 %v249_v46, %v246_v45  ;;  %v198_v50 = vld [vmem:[#allocation7 + $0x70] sm:$0xff]  ;;  %v201_v51 = vld [vmem:[#allocation7 + $0x88] sm:$0xff]  ;;  %v252_v54 = vld [vmem:[#allocation7 + $0x220] sm:$0xff]  ;;  %v9797_v57 = vpack.c.bf16 %v217_v48, %v214_v43 }
  0x9d   :  { %9788 = vmatprep.subr.bf16.mxu0 %v9787_v20  ;;  %v221_v52 = vld [vmem:[#allocation7 + $0x128] sm:$0xff]  ;;  %v9881_v55 = vpack.c.bf16 %v201_v51, %v198_v50  ;;  %v255_v56 = vld [vmem:[#allocation7 + $0x238] sm:$0xff]  ;;  %v220_v58 = vld [vmem:[#allocation7 + $0x120] sm:$0xff] }
  0x9e   :  { %v9883_v59 = vpack.c.bf16 %v255_v56, %v252_v54  ;;  %v204_v60 = vld [vmem:[#allocation7 + $0xa0] sm:$0xff]  ;;  %v207_v61 = vld [vmem:[#allocation7 + $0xb8] sm:$0xff]  ;;  %v9799_v62 = vpack.c.bf16 %v224_v53, %v221_v52  ;;  %v258_v0 = vld [vmem:[#allocation7 + $0x250] sm:$0xff] }
  0x9f   :  { %9878 = vmatpush3.bf16.msra.mxu1 %v9877_v44  ;;  %v223_v63 = vld [vmem:[#allocation7 + $0x138] sm:$0xff]  ;;  %v261_v1 = vld [vmem:[#allocation7 + $0x268] sm:$0xff]  ;;  %v230_v3 = vld [vmem:[#allocation7 + $0x170] sm:$0xff]  ;;  %v9885_v4 = vpack.c.bf16 %v207_v61, %v204_v60 }
  0xa0   :  { %9790 = vmatpush1.bf16.msra.mxu0 %v9789_v27  ;;  %9880 = vmatprep.subr.bf16.mxu1 %v9879_v49  ;;  %v227_v2 = vld [vmem:[#allocation7 + $0x158] sm:$0xff]  ;;  %v9801_v5 = vpack.c.bf16 %v223_v63, %v220_v58  ;;  %v226_v6 = vld [vmem:[#allocation7 + $0x150] sm:$0xff]  ;;  %v9887_v7 = vpack.c.bf16 %v261_v1, %v258_v0  ;;  %v213_v9 = vld [vmem:[#allocation7 + $0xe8] sm:$0xff] }
  0xa1   :  { %9792 = vmatprep.subr.bf16.mxu0 %v9791_v32  ;;  %v210_v8 = vld [vmem:[#allocation7 + $0xd0] sm:$0xff]  ;;  %v9803_v10 = vpack.c.bf16 %v230_v3, %v227_v2  ;;  %v229_v11 = vld [vmem:[#allocation7 + $0x168] sm:$0xff]  ;;  %v264_v12 = vld [vmem:[#allocation7 + $0x280] sm:$0xff] }
  0xa2   :  { %v267_v13 = vld [vmem:[#allocation7 + $0x298] sm:$0xff]  ;;  %v233_v14 = vld [vmem:[#allocation7 + $0x188] sm:$0xff]  ;;  %v236_v15 = vld [vmem:[#allocation7 + $0x1a0] sm:$0xff]  ;;  %v9889_v16 = vpack.c.bf16 %v213_v9, %v210_v8  ;;  %v9805_v17 = vpack.c.bf16 %v229_v11, %v226_v6 }
  0xa3   :  { %9882 = vmatpush3.bf16.msra.mxu1 %v9881_v55  ;;  %v232_v18 = vld [vmem:[#allocation7 + $0x180] sm:$0xff]  ;;  %v9891_v19 = vpack.c.bf16 %v267_v13, %v264_v12  ;;  %v219_v21 = vld [vmem:[#allocation7 + $0x118] sm:$0xff]  ;;  %v9807_v22 = vpack.c.bf16 %v236_v15, %v233_v14  ;;  %v270_v24 = vld [vmem:[#allocation7 + $0x2b0] sm:$0xff] }
  0xa4   :  { %9794 = vmatpush1.bf16.msra.mxu0 %v9793_v42  ;;  %9884 = vmatprep.subr.bf16.mxu1 %v9883_v59  ;;  %v216_v20 = vld [vmem:[#allocation7 + $0x100] sm:$0xff]  ;;  %v235_v23 = vld [vmem:[#allocation7 + $0x198] sm:$0xff]  ;;  %v273_v25 = vld [vmem:[#allocation7 + $0x2c8] sm:$0xff] }
  0xa5   :  { %9796 = vmatprep.subr.bf16.mxu0 %v9795_v47  ;;  %v239_v26 = vld [vmem:[#allocation7 + $0x1b8] sm:$0xff]  ;;  %v242_v27 = vld [vmem:[#allocation7 + $0x1d0] sm:$0xff]  ;;  %v9893_v29 = vpack.c.bf16 %v219_v21, %v216_v20  ;;  %v9809_v30 = vpack.c.bf16 %v235_v23, %v232_v18  ;;  %v9895_v31 = vpack.c.bf16 %v273_v25, %v270_v24  ;;  %v225_v33 = vld [vmem:[#allocation7 + $0x148] sm:$0xff] }
  0xa6   :  { %v238_v28 = vld [vmem:[#allocation7 + $0x1b0] sm:$0xff]  ;;  %v161_v34 = vld [vmem:[#allocation4 + $0x8] sm:$0xff]  ;;  %v9811_v35 = vpack.c.bf16 %v242_v27, %v239_v26  ;;  %v276_v37 = vld [vmem:[#allocation7 + $0x2e0] sm:$0xff] }
  0xa7   :  { %9886 = vmatpush3.bf16.msra.mxu1 %v9885_v4  ;;  %v222_v32 = vld [vmem:[#allocation7 + $0x130] sm:$0xff]  ;;  %v241_v36 = vld [vmem:[#allocation7 + $0x1c8] sm:$0xff]  ;;  %v279_v38 = vld [vmem:[#allocation7 + $0x2f8] sm:$0xff]  ;;  %635 = vmatprep.mubr.f32.mxu1 %v161_v34 }
  0xa8   :  { %9798 = vmatpush1.bf16.msra.mxu0 %v9797_v57  ;;  %9888 = vmatprep.subr.bf16.mxu1 %v9887_v7  ;;  %v245_v39 = vld [vmem:[#allocation7 + $0x1e8] sm:$0xff]  ;;  %v248_v40 = vld [vmem:[#allocation7 + $0x200] sm:$0xff]  ;;  %v9897_v41 = vpack.c.bf16 %v225_v33, %v222_v32  ;;  %v9813_v42 = vpack.c.bf16 %v241_v36, %v238_v28  ;;  %v9899_v44 = vpack.c.bf16 %v279_v38, %v276_v37  ;;  %v231_v46 = vld [vmem:[#allocation7 + $0x178] sm:$0xff] }
  0xa9   :  { %9800 = vmatprep.subr.bf16.mxu0 %v9799_v62  ;;  %409 = vmatprep.mubr.f32.mxu0 %v161_v34  ;;  %v244_v43 = vld [vmem:[#allocation7 + $0x1e0] sm:$0xff]  ;;  %v9815_v47 = vpack.c.bf16 %v248_v40, %v245_v39  ;;  %v247_v48 = vld [vmem:[#allocation7 + $0x1f8] sm:$0xff]  ;;  %v282_v49 = vld [vmem:[#allocation7 + $0x310] sm:$0xff] }
  0xaa   :  { %v228_v45 = vld [vmem:[#allocation7 + $0x160] sm:$0xff]  ;;  %v285_v50 = vld [vmem:[#allocation7 + $0x328] sm:$0xff]  ;;  %v251_v51 = vld [vmem:[#allocation7 + $0x218] sm:$0xff]  ;;  %v9817_v54 = vpack.c.bf16 %v247_v48, %v244_v43 }
  0xab   :  { %9890 = vmatpush3.bf16.msra.mxu1 %v9889_v16  ;;  %v254_v52 = vld [vmem:[#allocation7 + $0x230] sm:$0xff]  ;;  %v9901_v53 = vpack.c.bf16 %v231_v46, %v228_v45  ;;  %v9903_v56 = vpack.c.bf16 %v285_v50, %v282_v49  ;;  %v253_v58 = vld [vmem:[#allocation7 + $0x228] sm:$0xff]  ;;  %v288_v59 = vld [vmem:[#allocation7 + $0x340] sm:$0xff] }
  0xac   :  { %9802 = vmatpush1.bf16.msra.mxu0 %v9801_v5  ;;  %9892 = vmatprep.subr.bf16.mxu1 %v9891_v19  ;;  %v250_v55 = vld [vmem:[#allocation7 + $0x210] sm:$0xff]  ;;  %v9819_v57 = vpack.c.bf16 %v254_v52, %v251_v51  ;;  %v291_v60 = vld [vmem:[#allocation7 + $0x358] sm:$0xff]  ;;  %v257_v61 = vld [vmem:[#allocation7 + $0x248] sm:$0xff] }
  0xad   :  { %9804 = vmatprep.subr.bf16.mxu0 %v9803_v10  ;;  %v260_v62 = vld [vmem:[#allocation7 + $0x260] sm:$0xff]  ;;  %v9821_v0 = vpack.c.bf16 %v253_v58, %v250_v55  ;;  %v9907_v3 = vpack.c.bf16 %v291_v60, %v288_v59  ;;  %v259_v5 = vld [vmem:[#allocation7 + $0x258] sm:$0xff]  ;;  %v294_v6 = vld [vmem:[#allocation7 + $0x370] sm:$0xff] }
  0xae   :  { %v13035_v63 = vld [vmem:[#allocation4] sm:$0xff]  ;;  %v9823_v4 = vpack.c.bf16 %v260_v62, %v257_v61  ;;  %v297_v7 = vld [vmem:[#allocation7 + $0x388] sm:$0xff]  ;;  %v263_v8 = vld [vmem:[#allocation7 + $0x278] sm:$0xff] }
  0xaf   :  { %9894 = vmatpush3.bf16.msra.mxu1 %v9893_v29  ;;  %v256_v1 = vld [vmem:[#allocation7 + $0x240] sm:$0xff]  ;;  %v266_v9 = vld [vmem:[#allocation7 + $0x290] sm:$0xff]  ;;  %v13041_v10 = vld [vmem:[#allocation4 + $0x18] sm:$0xff]  ;;  %v9911_v14 = vpack.c.bf16 %v297_v7, %v294_v6 }
  0xb0   :  { %9806 = vmatpush1.bf16.msra.mxu0 %v9805_v17  ;;  %9896 = vmatprep.subr.bf16.mxu1 %v9895_v31  ;;  %v13037_v2 = vld [vmem:[#allocation4 + $0x20] sm:$0xff]  ;;  %v9825_v11 = vpack.c.bf16 %v259_v5, %v256_v1  ;;  %v262_v12 = vld [vmem:[#allocation7 + $0x270] sm:$0xff]  ;;  %v13043_v13 = vld [vmem:[#allocation4 + $0x38] sm:$0xff]  ;;  %v9827_v15 = vpack.c.bf16 %v266_v9, %v263_v8 }
  0xb1   :  { %9808 = vmatprep.subr.bf16.mxu0 %v9807_v22  ;;  %v265_v16 = vld [vmem:[#allocation7 + $0x288] sm:$0xff]  ;;  %v300_v17 = vld [vmem:[#allocation7 + $0x3a0] sm:$0xff]  ;;  %v303_v18 = vld [vmem:[#allocation7 + $0x3b8] sm:$0xff] }
  0xb2   :  { %v269_v19 = vld [vmem:[#allocation7 + $0x2a8] sm:$0xff]  ;;  %v272_v20 = vld [vmem:[#allocation7 + $0x2c0] sm:$0xff]  ;;  %v13047_v21 = vld [vmem:[#allocation4 + $0x30] sm:$0xff]  ;;  %v9829_v22 = vpack.c.bf16 %v265_v16, %v262_v12  ;;  %v9915_v25 = vpack.c.bf16 %v303_v18, %v300_v17 }
  0xb3   :  { %9898 = vmatpush3.bf16.msra.mxu1 %v9897_v41  ;;  %v268_v23 = vld [vmem:[#allocation7 + $0x2a0] sm:$0xff]  ;;  %v13049_v24 = vld [vmem:[#allocation4 + $0x50] sm:$0xff]  ;;  %v9831_v26 = vpack.c.bf16 %v272_v20, %v269_v19  ;;  %v271_v27 = vld [vmem:[#allocation7 + $0x2b8] sm:$0xff] }
  0xb4   :  { %9810 = vmatpush1.bf16.msra.mxu0 %v9809_v30  ;;  %9900 = vmatprep.subr.bf16.mxu1 %v9899_v44  ;;  %v306_v28 = vld [vmem:[#allocation7 + $0x3d0] sm:$0xff]  ;;  %v309_v29 = vld [vmem:[#allocation7 + $0x3e8] sm:$0xff]  ;;  %v275_v30 = vld [vmem:[#allocation7 + $0x2d8] sm:$0xff]  ;;  %v9833_v33 = vpack.c.bf16 %v271_v27, %v268_v23 }
  0xb5   :  { %9812 = vmatprep.subr.bf16.mxu0 %v9811_v35  ;;  %v278_v31 = vld [vmem:[#allocation7 + $0x2f0] sm:$0xff]  ;;  %v13053_v32 = vld [vmem:[#allocation4 + $0x48] sm:$0xff]  ;;  %v9919_v36 = vpack.c.bf16 %v309_v29, %v306_v28  ;;  %v312_v39 = vld [vmem:[#allocation7 + $0x400] sm:$0xff] }
  0xb6   :  { %v274_v34 = vld [vmem:[#allocation7 + $0x2d0] sm:$0xff]  ;;  %v13055_v35 = vld [vmem:[#allocation4 + $0x68] sm:$0xff]  ;;  %v9835_v37 = vpack.c.bf16 %v278_v31, %v275_v30  ;;  %v315_v40 = vld [vmem:[#allocation7 + $0x418] sm:$0xff] }
  0xb7   :  { %9902 = vmatpush3.bf16.msra.mxu1 %v9901_v53  ;;  %v277_v38 = vld [vmem:[#allocation7 + $0x2e8] sm:$0xff]  ;;  %v13059_v43 = vld [vmem:[#allocation4 + $0x60] sm:$0xff]  ;;  %v9923_v46 = vpack.c.bf16 %v315_v40, %v312_v39  ;;  %v283_v49 = vld [vmem:[#allocation7 + $0x318] sm:$0xff] }
  0xb8   :  { %9814 = vmatpush1.bf16.msra.mxu0 %v9813_v42  ;;  %9904 = vmatprep.subr.bf16.mxu1 %v9903_v56  ;;  %v281_v41 = vld [vmem:[#allocation7 + $0x308] sm:$0xff]  ;;  %v284_v42 = vld [vmem:[#allocation7 + $0x320] sm:$0xff]  ;;  %v9837_v44 = vpack.c.bf16 %v277_v38, %v274_v34  ;;  %v287_v50 = vld [vmem:[#allocation7 + $0x338] sm:$0xff] }
  0xb9   :  { %9816 = vmatprep.subr.bf16.mxu0 %v9815_v47  ;;  %v13061_v45 = vld [vmem:[#allocation4 + $0x80] sm:$0xff]  ;;  %v9839_v47 = vpack.c.bf16 %v284_v42, %v281_v41  ;;  %v290_v51 = vld [vmem:[#allocation7 + $0x350] sm:$0xff]  ;;  %v13065_v52 = vld [vmem:[#allocation4 + $0x78] sm:$0xff] }
  0xba   :  { %636 = vmatmul.mubr.f32.vlgmr.msra.gmra.mrb[0].mxu1 %v13035_v63  ;;  %v280_v48 = vld [vmem:[#allocation7 + $0x300] sm:$0xff]  ;;  %v318_v53 = vld [vmem:[#allocation7 + $0x430] sm:$0xff]  ;;  %v289_v58 = vld [vmem:[#allocation7 + $0x348] sm:$0xff] }
  0xbb   :  { %9906 = vmatpush3.bf16.msra.mxu1 %v9903_v56  ;;  %640 = vmatprep.mubr.f32.mxu1 %v13037_v2  ;;  %v9841_v55 = vpack.c.bf16 %v283_v49, %v280_v48  ;;  %v9843_v56 = vpack.c.bf16 %v290_v51, %v287_v50  ;;  %v293_v59 = vld [vmem:[#allocation7 + $0x368] sm:$0xff]  ;;  %v296_v60 = vld [vmem:[#allocation7 + $0x380] sm:$0xff]  ;;  %v13068_v61 = vld [vmem:[#allocation4 + $0x98] sm:$0xff] }
  0xbc   :  { %9818 = vmatpush1.bf16.msra.mxu0 %v9817_v54  ;;  %9908 = vmatprep.subr.bf16.mxu1 %v9907_v3  ;;  %v321_v54 = vld [vmem:[#allocation7 + $0x448] sm:$0xff]  ;;  %v324_v1 = vld [vmem:[#allocation7 + $0x460] sm:$0xff]  ;;  %v9847_v5 = vpack.c.bf16 %v296_v60, %v293_v59  ;;  %v295_v7 = vld [vmem:[#allocation7 + $0x378] sm:$0xff] }
  0xbd   :  { %9820 = vmatprep.subr.bf16.mxu0 %v9819_v57  ;;  %v286_v57 = vld [vmem:[#allocation7 + $0x330] sm:$0xff]  ;;  %v9927_v62 = vpack.c.bf16 %v321_v54, %v318_v53  ;;  %v292_v6 = vld [vmem:[#allocation7 + $0x360] sm:$0xff]  ;;  %v299_v8 = vld [vmem:[#allocation7 + $0x398] sm:$0xff] }
  0xbe   :  { %641 = vmatmul.mubr.f32.gmra.mrb[2].mxu1 %v13041_v10  ;;  %v302_v9 = vld [vmem:[#allocation7 + $0x3b0] sm:$0xff]  ;;  %v13079_v12 = vld [vmem:[#allocation4 + $0xa8] sm:$0xff]  ;;  %v308_v18 = vld [vmem:[#allocation7 + $0x3e0] sm:$0xff] }
  0xbf   :  { %9910 = vmatpush3.bf16.msra.mxu1 %v9907_v3  ;;  %645 = vmatprep.mubr.f32.mxu1 %v13043_v13  ;;  %v327_v3 = vld [vmem:[#allocation7 + $0x478] sm:$0xff]  ;;  %v301_v16 = vld [vmem:[#allocation7 + $0x3a8] sm:$0xff]  ;;  %v13084_v19 = vld [vmem:[#allocation4 + $0x10] sm:$0xff] }
  0xc0   :  { %9822 = vmatpush1.bf16.msra.mxu0 %v9821_v0  ;;  %9912 = vmatprep.subr.bf16.mxu1 %v9911_v14  ;;  %v13071_v0 = vld [vmem:[#allocation4 + $0x90] sm:$0xff]  ;;  %v305_v17 = vld [vmem:[#allocation7 + $0x3c8] sm:$0xff]  ;;  %v13090_v23 = vld [vmem:[#allocation4 + $0x40] sm:$0xff] }
  0xc1   :  { %9824 = vmatprep.subr.bf16.mxu0 %v9823_v4  ;;  %v9845_v4 = vpack.c.bf16 %v289_v58, %v286_v57  ;;  %v810_v20 = vld [vmem:[#allocation9 + $0x28] sm:$0xff]  ;;  %v307_v27 = vld [vmem:[#allocation7 + $0x3d8] sm:$0xff]  ;;  %v314_v30 = vld [vmem:[#allocation7 + $0x410] sm:$0xff] }
  0xc2   :  { %646 = vmatmul.mubr.f32.gmra.mrb[4].mxu1 %v13047_v21  ;;  %v311_v28 = vld [vmem:[#allocation7 + $0x3f8] sm:$0xff]  ;;  %v813_v31 = vld [vmem:[#allocation9 + $0x40] sm:$0xff]  ;;  %v310_v38 = vld [vmem:[#allocation7 + $0x3f0] sm:$0xff] }
  0xc3   :  { %9914 = vmatpush3.bf16.msra.mxu1 %v9911_v14  ;;  %650 = vmatprep.mubr.f32.mxu1 %v13049_v24  ;;  %v298_v14 = vld [vmem:[#allocation7 + $0x390] sm:$0xff]  ;;  %v313_v39 = vld [vmem:[#allocation7 + $0x408] sm:$0xff]  ;;  %v316_v49 = vld [vmem:[#allocation7 + $0x420] sm:$0xff] }
  0xc4   :  { %9826 = vmatpush1.bf16.msra.mxu0 %v9825_v11  ;;  %9916 = vmatprep.subr.bf16.mxu1 %v9915_v25  ;;  %v9931_v11 = vpack.c.bf16 %v327_v3, %v324_v1  ;;  %v317_v40 = vld [vmem:[#allocation7 + $0x428] sm:$0xff]  ;;  %v819_v42 = vld [vmem:[#allocation9 + $0x70] sm:$0xff]  ;;  %v319_v50 = vld [vmem:[#allocation7 + $0x438] sm:$0xff] }
  0xc5   :  { %9828 = vmatprep.subr.bf16.mxu0 %v9827_v15  ;;  %v9851_v15 = vpack.c.bf16 %v302_v9, %v299_v8  ;;  %v323_v51 = vld [vmem:[#allocation7 + $0x458] sm:$0xff]  ;;  %v825_v54 = vld [vmem:[#allocation9 + $0xa0] sm:$0xff]  ;;  %v322_v58 = vld [vmem:[#allocation7 + $0x450] sm:$0xff] }
  0xc6   :  { %651 = vmatmul.mubr.f32.gmra.mrb[6].mxu1 %v13053_v32  ;;  %v325_v59 = vld [vmem:[#allocation7 + $0x468] sm:$0xff]  ;;  %v809_v1 = vld [vmem:[#allocation9 + $0x20] sm:$0xff]  ;;  %v812_v8 = vld [vmem:[#allocation9 + $0x38] sm:$0xff] }
  0xc7   :  { %9918 = vmatpush3.bf16.msra.mxu1 %v9915_v25  ;;  %655 = vmatprep.mubr.f32.mxu1 %v13055_v35  ;;  %v9855_v25 = vpack.c.bf16 %v308_v18, %v305_v17  ;;  %v806_v60 = vld [vmem:[#allocation9 + $0x8] sm:$0xff] }
  0xc8   :  { %9830 = vmatpush1.bf16.msra.mxu0 %v9829_v22  ;;  %9920 = vmatprep.subr.bf16.mxu1 %v9919_v36  ;;  %v9853_v22 = vpack.c.bf16 %v301_v16, %v298_v14  ;;  %v834_v3 = vld [vmem:[#allocation9 + $0xe8] sm:$0xff] }
  0xc9   :  { %9832 = vmatprep.subr.bf16.mxu0 %v9831_v26  ;;  %v304_v26 = vld [vmem:[#allocation7 + $0x3c0] sm:$0xff]  ;;  %v814_v16 = vld [vmem:[#allocation9 + $0x48] sm:$0xff] }
  0xca   :  { %656 = vmatmul.mubr.f32.gmra.mrb[8].mxu1 %v13059_v43  ;;  %v9857_v34 = vpack.c.bf16 %v307_v27, %v304_v26  ;;  %v818_v17 = vld [vmem:[#allocation9 + $0x68] sm:$0xff]  ;;  %v817_v26 = vld [vmem:[#allocation9 + $0x60] sm:$0xff]  ;;  %v820_v27 = vld [vmem:[#allocation9 + $0x78] sm:$0xff] }
  0xcb   :  { %9922 = vmatpush3.bf16.msra.mxu1 %v9919_v36  ;;  %660 = vmatprep.mubr.f32.mxu1 %v13061_v45  ;;  %v13102_v36 = vld [vmem:[#allocation4 + $0x70] sm:$0xff] }
  0xcc   :  { %9834 = vmatpush1.bf16.msra.mxu0 %v9833_v33  ;;  %9924 = vmatprep.subr.bf16.mxu1 %v9923_v46  ;;  %v13099_v33 = vld [vmem:[#allocation4 + $0x58] sm:$0xff] }
  0xcd   :  { %9836 = vmatprep.subr.bf16.mxu0 %v9835_v37  ;;  %v9859_v37 = vpack.c.bf16 %v314_v30, %v311_v28  ;;  %v824_v28 = vld [vmem:[#allocation9 + $0x98] sm:$0xff] }
  0xce   :  { %661 = vmatmul.mubr.f32.gmra.mrb[10].mxu1 %v13065_v52 }
  0xcf   :  { %9926 = vmatpush3.bf16.msra.mxu1 %v9923_v46  ;;  %665 = vmatprep.mubr.f32.mxu1 %v13068_v61  ;;  %v9861_v46 = vpack.c.bf16 %v313_v39, %v310_v38  ;;  %v823_v38 = vld [vmem:[#allocation9 + $0x90] sm:$0xff]  ;;  %v826_v39 = vld [vmem:[#allocation9 + $0xa8] sm:$0xff] }
  0xd0   :  { %9838 = vmatpush1.bf16.msra.mxu0 %v9837_v44  ;;  %9928 = vmatprep.subr.bf16.mxu1 %v9927_v62  ;;  %v822_v44 = vld [vmem:[#allocation9 + $0x88] sm:$0xff] }
  0xd1   :  { %9840 = vmatprep.subr.bf16.mxu0 %v9839_v47  ;;  %v13114_v47 = vld [vmem:[#allocation4 + $0xa0] sm:$0xff]  ;;  %v13117_v53 = vpack.c.bf16 %v822_v44, %v819_v42 }
  0xd2   :  { %666 = vmatmul.mubr.f32.gmra.mrb[12].mxu1 %v13071_v0  ;;  %v833_v42 = vld [vmem:[#allocation9 + $0xe0] sm:$0xff] }
  0xd3   :  { %410 = vmatmul.mubr.f32.vlgmr.msra.gmra.mrb[0].mxu0 %v13035_v63  ;;  %v13076_v63 = vld [vmem:[#allocation4 + $0xb0] sm:$0xff]  ;;  %9930 = vmatpush3.bf16.msra.mxu1 %v9927_v62  ;;  %15491 = vst [vmem:[#allocation27_spill] sm:$0xff] %v13117_v53 }
  0xd4   :  { %9842 = vmatpush1.bf16.msra.mxu0 %v9841_v55  ;;  %415 = vmatprep.mubr.f32.mxu0 %v13037_v2  ;;  %v9849_v2 = vpack.c.bf16 %v295_v7, %v292_v6  ;;  %v828_v55 = vld [vmem:[#allocation9 + $0xb8] sm:$0xff]  ;;  %v805_v6 = vld [vmem:[#allocation9] sm:$0xff] }
  0xd5   :  { %9844 = vmatprep.subr.bf16.mxu0 %v9843_v56  ;;  %670 = vmatprep.mubr.f32.mxu1 %v13076_v63  ;;  %v9865_v56 = vpack.c.bf16 %v319_v50, %v316_v49  ;;  %v13127_v62 = vpack.c.bf16 %v828_v55, %v825_v54  ;;  %v808_v7 = vld [vmem:[#allocation9 + $0x18] sm:$0xff]  ;;  %v839_v50 = vld [vmem:[#allocation9 + $0x110] sm:$0xff]  ;;  %v838_v54 = vld [vmem:[#allocation9 + $0x108] sm:$0xff] }
  0xd6   :  { %671 = vmatmul.mubr.f32.gmra.mrb[14].mxu1 %v13079_v12  ;;  %9932 = vmatprep.subr.bf16.mxu1 %v9931_v11  ;;  %v836_v49 = vld [vmem:[#allocation9 + $0xf8] sm:$0xff]  ;;  %v842_v55 = vld [vmem:[#allocation9 + $0x128] sm:$0xff] }
  0xd7   :  { %416 = vmatmul.mubr.f32.gmra.mrb[2].mxu0 %v13041_v10  ;;  %v807_v10 = vld [vmem:[#allocation9 + $0x10] sm:$0xff]  ;;  %9934 = vmatpush3.bf16.msra.mxu1 %v9931_v11  ;;  %15492 = vst [vmem:[#allocation28_spill] sm:$0xff] %v13127_v62  ;;  %v837_v11 = vld [vmem:[#allocation9 + $0x100] sm:$0xff] }
  0xd8   :  { %9846 = vmatpush1.bf16.msra.mxu0 %v9845_v4  ;;  %421 = vmatprep.mubr.f32.mxu0 %v13043_v13  ;;  %v13087_v13 = vld [vmem:[#allocation4 + $0x28] sm:$0xff]  ;;  %v13093_v29 = vpack.c.bf16 %v810_v20, %v807_v10  ;;  %v9869_v4 = vpack.c.bf16 %v325_v59, %v322_v58  ;;  %v821_v10 = vld [vmem:[#allocation9 + $0x80] sm:$0xff]  ;;  %v844_v59 = vld [vmem:[#allocation9 + $0x138] sm:$0xff] }
  0xd9   :  { %9848 = vmatprep.subr.bf16.mxu0 %v9847_v5  ;;  %8322 = vmatprep.mubr.f32.mxu1 %v13084_v19  ;;  %v13135_v5 = vpack.c.bf16 %v809_v1, %v806_v60  ;;  %v846_v20 = vld [vmem:[#allocation9 + $0x148] sm:$0xff]  ;;  %v841_v58 = vld [vmem:[#allocation9 + $0x120] sm:$0xff]  ;;  %v848_v60 = vld [vmem:[#allocation9 + $0x158] sm:$0xff] }
  0xda   :  { %15489 = vst [vmem:[#allocation25_spill] sm:$0xff] %v13093_v29  ;;  %8323 = vmatmul.mubr.f32.vlgmr.msra.gmra.mrb[16].mxu1 %v13087_v13  ;;  %v851_v1 = vld [vmem:[#allocation9 + $0x170] sm:$0xff] }
  0xdb   :  { %422 = vmatmul.mubr.f32.gmra.mrb[4].mxu0 %v13047_v21  ;;  %v15279_v21 = vmov 0.0|0.0   ;;  %8325 = vmatprep.mubr.f32.mxu1 %v13090_v23  ;;  %15493 = vst [vmem:[#allocation29_spill] sm:$0xff] %v13135_v5 }
  0xdc   :  { %9850 = vmatpush1.bf16.msra.mxu0 %v9849_v2  ;;  %427 = vmatprep.mubr.f32.mxu0 %v13049_v24  ;;  %v816_v24 = vld [vmem:[#allocation9 + $0x58] sm:$0xff] }
  0xdd   :  { %9852 = vmatprep.subr.bf16.mxu0 %v9851_v15  ;;  %9967 = vmatprep.subr.bf16.mxu1 %v15279_v21  ;;  %v13105_v41 = vpack.c.bf16 %v816_v24, %v813_v31  ;;  %v840_v2 = vld [vmem:[#allocation9 + $0x118] sm:$0xff]  ;;  %v811_v15 = vld [vmem:[#allocation9 + $0x30] sm:$0xff] }
  0xde   :  { %9969 = vmatpush3.bf16.msra.mxu1 %v13093_v29  ;;  %v13149_v18 = vpack.c.bf16 %v840_v2, %v837_v11  ;;  %v827_v31 = vld [vmem:[#allocation9 + $0xb0] sm:$0xff]  ;;  %v852_v24 = vld [vmem:[#allocation9 + $0x178] sm:$0xff] }
  0xdf   :  { %428 = vmatmul.mubr.f32.gmra.mrb[6].mxu0 %v13053_v32  ;;  %15490 = vst [vmem:[#allocation26_spill] sm:$0xff] %v13105_v41  ;;  %v320_v32 = vld [vmem:[#allocation7 + $0x440] sm:$0xff]  ;;  %8326 = vmatmul.mubr.f32.gmra.mrb[18].mxu1 %v13099_v33 }
  0xe0   :  { %9854 = vmatpush1.bf16.msra.mxu0 %v9853_v22  ;;  %433 = vmatprep.mubr.f32.mxu0 %v13055_v35  ;;  %v13111_v35 = vld [vmem:[#allocation4 + $0x88] sm:$0xff]  ;;  %v9863_v48 = vpack.c.bf16 %v320_v32, %v317_v40  ;;  %15497 = vst [vmem:[#allocation33_spill] sm:$0xff] %v13149_v18  ;;  %v13155_v22 = vpack.c.bf16 %v814_v16, %v811_v15  ;;  %v328_v16 = vld [vmem:[%s15202_s3] sm:$0x7] }
  0xe1   :  { %9856 = vmatprep.subr.bf16.mxu0 %v9855_v25  ;;  %9970 = vmatprep.subr.bf16.mxu1 %v15279_v21  ;;  %v13158_v25 = vpack.c.bf16 %v821_v10, %v818_v17  ;;  %v830_v32 = vld [vmem:[#allocation9 + $0xc8] sm:$0xff] }
  0xe2   :  { %8328 = vmatprep.mubr.f32.mxu1 %v13102_v36  ;;  %9972 = vmatpush3.bf16.msra.mxu1 %v13105_v41  ;;  %15498 = vst [vmem:[#allocation34_spill] sm:$0xff] %v13155_v22  ;;  %v13182_v44 = vpack.c.bf16 %v833_v42, %v830_v32 }
  0xe3   :  { %434 = vmatmul.mubr.f32.gmra.mrb[8].mxu0 %v13059_v43  ;;  %v326_v43 = vld [vmem:[#allocation7 + $0x470] sm:$0xff]  ;;  %8329 = vmatmul.mubr.f32.gmra.mrb[20].mxu1 %v13111_v35  ;;  %15499 = vst [vmem:[#allocation35_spill] sm:$0xff] %v13158_v25 }
  0xe4   :  { %9858 = vmatpush1.bf16.msra.mxu0 %v9857_v34  ;;  %439 = vmatprep.mubr.f32.mxu0 %v13061_v45  ;;  %v13123_v45 = vld [vmem:[#allocation4 + $0xb8] sm:$0xff]  ;;  %v9867_v57 = vpack.c.bf16 %v326_v43, %v323_v51  ;;  %v13167_v34 = vpack.c.bf16 %v820_v27, %v817_v26  ;;  %15505 = vst [vmem:[#allocation41_spill] sm:$0xff] %v13182_v44  ;;  %v835_v43 = vld [vmem:[#allocation9 + $0xf0] sm:$0xff] }
  0xe5   :  { %9860 = vmatprep.subr.bf16.mxu0 %v9859_v37  ;;  %9973 = vmatprep.subr.bf16.mxu1 %v15279_v21  ;;  %v13170_v37 = vpack.c.bf16 %v827_v31, %v824_v28  ;;  %v13192_v51 = vpack.c.bf16 %v839_v50, %v836_v49 }
  0xe6   :  { %8331 = vmatprep.mubr.f32.mxu1 %v13114_v47  ;;  %9975 = vmatpush3.bf16.msra.mxu1 %v13117_v53  ;;  %15501 = vst [vmem:[#allocation37_spill] sm:$0xff] %v13167_v34 }
  0xe7   :  { %440 = vmatmul.mubr.f32.gmra.mrb[10].mxu0 %v13065_v52  ;;  %8332 = vmatmul.mubr.f32.gmra.mrb[22].mxu1 %v13123_v45  ;;  %v831_v52 = vld [vmem:[#allocation9 + $0xd0] sm:$0xff]  ;;  %15502 = vst [vmem:[#allocation38_spill] sm:$0xff] %v13170_v37  ;;  %15507 = vst [vmem:[#allocation43_spill] sm:$0xff] %v13192_v51 }
  0xe8   :  { %9862 = vmatpush1.bf16.msra.mxu0 %v9861_v46  ;;  %445 = vmatprep.mubr.f32.mxu0 %v13068_v61  ;;  %v15215_v61 = vmov 0.0   ;;  %v13138_v9 = vpack.c.bf16 %v834_v3, %v831_v52  ;;  %v829_v46 = vld [vmem:[#allocation9 + $0xc0] sm:$0xff]  ;;  %v13215_v52 = vpack.c.bf16 %v851_v1, %v848_v60  ;;  %v847_v3 = vld [vmem:[#allocation9 + $0x150] sm:$0xff] }
  0xe9   :  { %9864 = vmatprep.subr.bf16.mxu0 %v9863_v48  ;;  %9976 = vmatprep.subr.bf16.mxu1 %v15279_v21  ;;  %v832_v48 = vld [vmem:[#allocation9 + $0xd8] sm:$0xff] }
  0xea   :  { %8366 = vmatprep.mubr.msk.f32.mxu1 %vm12804_vm0, %v15215_v61  ;;  %9978 = vmatpush3.bf16.msra.mxu1 %v13127_v62  ;;  %15494 = vst [vmem:[#allocation30_spill] sm:$0xff] %v13138_v9  ;;  %15511 = vst [vmem:[#allocation47_spill] sm:$0xff] %v13215_v52 }
  0xeb   :  { %446 = vmatmul.mubr.f32.gmra.mrb[12].mxu0 %v13071_v0  ;;  %v815_v0 = vld [vmem:[#allocation9 + $0x50] sm:$0xff]  ;;  %9979 = vmatprep.subr.bf16.mxu1 %v15279_v21 }
  0xec   :  { %9866 = vmatpush1.bf16.msra.mxu0 %v9865_v56  ;;  %451 = vmatprep.mubr.f32.mxu0 %v13076_v63  ;;  %v13143_v63 = vpack.c.bf16 %v808_v7, %v805_v6  ;;  %v13146_v14 = vpack.c.bf16 %v815_v0, %v812_v8  ;;  %v845_v56 = vld [vmem:[#allocation9 + $0x140] sm:$0xff]  ;;  %v330_v7 = vlaneseq }
  0xed   :  { %9868 = vmatprep.subr.bf16.mxu0 %v9867_v57  ;;  %v13205_v57 = vpack.c.bf16 %v845_v56, %v842_v55 }
  0xee   :  { %15495 = vst [vmem:[#allocation31_spill] sm:$0xff] %v13143_v63  ;;  %15496 = vst [vmem:[#allocation32_spill] sm:$0xff] %v13146_v14  ;;  %9981 = vmatpush3.bf16.msra.mxu1 %v13138_v9  ;;  %v331_v8 = vshrl.u32 %v330_v7, 7 }
  0xef   :  { %452 = vmatmul.mubr.f32.gmra.mrb[14].mxu0 %v13079_v12  ;;  %9982 = vmatprep.subr.bf16.mxu1 %v15279_v21  ;;  %v843_v12 = vld [vmem:[#allocation9 + $0x130] sm:$0xff]  ;;  %15509 = vst [vmem:[#allocation45_spill] sm:$0xff] %v13205_v57 }
  0xf0   :  { %9870 = vmatpush1.bf16.msra.mxu0 %v9869_v4  ;;  %522 = vmatprep.mubr.f32.mxu0 %v15215_v61  ;;  %v13161_v30 = vpack.c.bf16 %v846_v20, %v843_v12  ;;  %v850_v4 = vld [vmem:[#allocation9 + $0x168] sm:$0xff]  ;;  %v13259_v15 = vsub.s32 2, %v331_v8 }
  0xf1   :  { %9936 = vmatprep.subr.bf16.mxu0 %v13135_v5 }
  0xf2   :  { %9984 = vmatpush3.bf16.msra.mxu1 %v13149_v18  ;;  %15500 = vst [vmem:[#allocation36_spill] sm:$0xff] %v13161_v30  ;;  %15514 = vst [vmem:[#allocation50_spill] sm:$0xff] %v13259_v15  ;;  %v341_v20 = vrot.slane %v328_v16, %v13259_v15  ;;  %v996_v15 = vld [vmem:[#allocation10 + $0x178] sm:$0xff] }
  0xf3   :  { %523 = vmatmul.mubr.f32.vlgmr.msra.gmra.mrb[0].mxu0 %v13084_v19  ;;  %9985 = vmatprep.subr.bf16.mxu1 %v15279_v21  ;;  %v849_v19 = vld [vmem:[#allocation9 + $0x160] sm:$0xff] }
  0xf4   :  { %9938 = vmatpush1.bf16.msra.mxu0 %v13143_v63  ;;  %528 = vmatprep.mubr.f32.mxu0 %v15215_v61  ;;  %v13173_v40 = vpack.c.bf16 %v852_v24, %v849_v19 }
  0xf5   :  { %9940 = vmatprep.subr.bf16.mxu0 %v13146_v14 }
  0xf6   :  { %9987 = vmatpush3.bf16.msra.mxu1 %v13161_v30  ;;  %15503 = vst [vmem:[#allocation39_spill] sm:$0xff] %v13173_v40 }
  0xf7   :  { %529 = vmatmul.mubr.f32.gmra.mrb[2].mxu0 %v13087_v13  ;;  %9988 = vmatprep.subr.bf16.mxu1 %v15279_v21  ;;  %v13179_v13 = vpack.c.bf16 %v826_v39, %v823_v38 }
  0xf8   :  { %9942 = vmatpush1.bf16.msra.mxu0 %v13155_v22  ;;  %534 = vmatprep.mubr.f32.mxu0 %v15215_v61 }
  0xf9   :  { %9944 = vmatprep.subr.bf16.mxu0 %v13158_v25  ;;  %15504 = vst [vmem:[#allocation40_spill] sm:$0xff] %v13179_v13 }
  0xfa   :  { %9990 = vmatpush3.bf16.msra.mxu1 %v13173_v40 }
  0xfb   :  { %535 = vmatmul.mubr.f32.gmra.mrb[4].mxu0 %v13090_v23  ;;  %10023 = vmatprep.subr.bf16.mxu1 %v15279_v21  ;;  %v13189_v23 = vpack.c.bf16 %v832_v48, %v829_v46 }
  0xfc   :  { %9946 = vmatpush1.bf16.msra.mxu0 %v13167_v34  ;;  %540 = vmatprep.mubr.f32.mxu0 %v15215_v61 }
  0xfd   :  { %9948 = vmatprep.subr.bf16.mxu0 %v13170_v37  ;;  %15506 = vst [vmem:[#allocation42_spill] sm:$0xff] %v13189_v23  ;;  %8367 = vmatmul.mubr.f32.vlgmr.msra.gmra.mrb[24].mxu1 %v15215_v61 }
  0xfe   :  { %10025 = vmatpush3.bf16.msra.mxu1 %v13093_v29  ;;  %8401 = vmatprep.mubr.msk.f32.mxu1 %vm12804_vm0, %v15215_v61 }
  0xff   :  { %541 = vmatmul.mubr.f32.gmra.mrb[6].mxu0 %v13099_v33  ;;  %10026 = vmatprep.subr.bf16.mxu1 %v15279_v21  ;;  %v13202_v33 = vpack.c.bf16 %v838_v54, %v835_v43 }
 0x100   :  { %9950 = vmatpush1.bf16.msra.mxu0 %v13179_v13  ;;  %546 = vmatprep.mubr.f32.mxu0 %v15215_v61 }
 0x101   :  { %9952 = vmatprep.subr.bf16.mxu0 %v13182_v44  ;;  %15508 = vst [vmem:[#allocation44_spill] sm:$0xff] %v13202_v33 }
 0x102   :  { %10028 = vmatpush3.bf16.msra.mxu1 %v13105_v41 }
 0x103   :  { %547 = vmatmul.mubr.f32.gmra.mrb[8].mxu0 %v13102_v36  ;;  %10029 = vmatprep.subr.bf16.mxu1 %v15279_v21  ;;  %v13212_v36 = vpack.c.bf16 %v844_v59, %v841_v58 }
 0x104   :  { %9954 = vmatpush1.bf16.msra.mxu0 %v13189_v23  ;;  %552 = vmatprep.mubr.f32.mxu0 %v15215_v61 }
 0x105   :  { %9956 = vmatprep.subr.bf16.mxu0 %v13192_v51  ;;  %15510 = vst [vmem:[#allocation46_spill] sm:$0xff] %v13212_v36 }
 0x106   :  { %10031 = vmatpush3.bf16.msra.mxu1 %v13117_v53 }
 0x107   :  { %553 = vmatmul.mubr.f32.gmra.mrb[10].mxu0 %v13111_v35  ;;  %10032 = vmatprep.subr.bf16.mxu1 %v15279_v21  ;;  %v13222_v35 = vpack.c.bf16 %v850_v4, %v847_v3 }
 0x108   :  { %9958 = vmatpush1.bf16.msra.mxu0 %v13202_v33  ;;  %558 = vmatprep.mubr.f32.mxu0 %v15215_v61 }
 0x109   :  { %9960 = vmatprep.subr.bf16.mxu0 %v13205_v57  ;;  %15512 = vst [vmem:[#allocation48_spill] sm:$0xff] %v13222_v35 }
 0x10a   :  { %10034 = vmatpush3.bf16.msra.mxu1 %v13127_v62 }
 0x10b   :  { %559 = vmatmul.mubr.f32.gmra.mrb[12].mxu0 %v13114_v47  ;;  %10035 = vmatprep.subr.bf16.mxu1 %v15279_v21  ;;  %v950_v47 = vld [vmem:[#allocation10 + $0x8] sm:$0xff] }
 0x10c   :  { %9962 = vmatpush1.bf16.msra.mxu0 %v13212_v36  ;;  %564 = vmatprep.mubr.f32.mxu0 %v15215_v61 }
 0x10d   :  { %9964 = vmatprep.subr.bf16.mxu0 %v13215_v52 }
 0x10e   :  { %10037 = vmatpush3.bf16.msra.mxu1 %v13138_v9 }
 0x10f   :  { %565 = vmatmul.mubr.f32.gmra.mrb[14].mxu0 %v13123_v45  ;;  %10038 = vmatprep.subr.bf16.mxu1 %v15279_v21  ;;  %v953_v45 = vld [vmem:[#allocation10 + $0x20] sm:$0xff] }
 0x110   :  { %9966 = vmatpush1.bf16.msra.mxu0 %v13222_v35  ;;  %1170 = vmatprep.mubr.f32.mxu0 %v15215_v61  ;;  %v13256_v6 = vpack.c.bf16 %v953_v45, %v950_v47 }
 0x111   :  { %9992 = vmatprep.subr.bf16.mxu0 %v13135_v5 }
 0x112   :  { %10040 = vmatpush3.bf16.msra.mxu1 %v13149_v18  ;;  %15513 = vst [vmem:[#allocation49_spill] sm:$0xff] %v13256_v6 }
 0x113   :  { %1171 = vmatmul.mubr.f32.vlgmr.msra.gmra.mrb[0].mxu0 %v15215_v61  ;;  %10041 = vmatprep.subr.bf16.mxu1 %v15279_v21 }
 0x114   :  { %9994 = vmatpush1.bf16.msra.mxu0 %v13143_v63  ;;  %1339 = vmatprep.mubr.f32.mxu0 %v15215_v61 }
 0x115   :  { %9996 = vmatprep.subr.bf16.mxu0 %v13146_v14 }
 0x116   :  { %10043 = vmatpush3.bf16.msra.mxu1 %v13161_v30 }
 0x117   :  { %10044 = vmatprep.subr.bf16.mxu1 %v15279_v21 }
 0x118   :  { %9998 = vmatpush1.bf16.msra.mxu0 %v13155_v22 }
 0x119   :  { %10000 = vmatprep.subr.bf16.mxu0 %v13158_v25 }
 0x11a   :  { %10046 = vmatpush3.bf16.msra.mxu1 %v13173_v40 }
 0x11b   :  { %10048 = vmatprep.subr.bf16.mxu1 %v13256_v6 }
 0x11c   :  { %10002 = vmatpush1.bf16.msra.mxu0 %v13167_v34 }
 0x11d   :  { %10004 = vmatprep.subr.bf16.mxu0 %v13170_v37 }
 0x120   :  { %10006 = vmatpush1.bf16.msra.mxu0 %v13179_v13 }
 0x121   :  { %10008 = vmatprep.subr.bf16.mxu0 %v13182_v44 }
 0x124   :  { %10010 = vmatpush1.bf16.msra.mxu0 %v13189_v23 }
 0x125   :  { %10012 = vmatprep.subr.bf16.mxu0 %v13192_v51 }
 0x128   :  { %10014 = vmatpush1.bf16.msra.mxu0 %v13202_v33 }
 0x129   :  { %10016 = vmatprep.subr.bf16.mxu0 %v13205_v57 }
 0x12c   :  { %10018 = vmatpush1.bf16.msra.mxu0 %v13212_v36 }
 0x12d   :  { %10020 = vmatprep.subr.bf16.mxu0 %v13215_v52 }
 0x130   :  { %10022 = vmatpush1.bf16.msra.mxu0 %v13222_v35 }
 0x131   :  { %10079 = vmatprep.subr.bf16.mxu0 %v15279_v21 }
 0x18d   :  { %v7543_v0 = vpop.f32.mrb[0].mxu1 }
 0x18e   :  { %v7544_v11 = vpop.f32.mrb[1].mxu1 }
 0x18f   :  { %v7545_v2 = vadd.f32 %v7544_v11, %v7543_v0 }
 0x191   :  { %v7546_v17 = vpop.f32.mrb[2].mxu1  ;;  %v638_v47 = vadd.f32 %v7545_v2, %v341_v20 }
 0x192   :  { %v7547_v10 = vpop.f32.mrb[3].mxu1 }
 0x193   :  { %v7548_v12 = vadd.f32 %v7547_v10, %v7546_v17 }
 0x195   :  { %v7549_v26 = vpop.f32.mrb[4].mxu1  ;;  %v643_v27 = vadd.f32 %v7548_v12, %v341_v20 }
 0x196   :  { %v7550_v28 = vpop.f32.mrb[5].mxu1 }
 0x197   :  { %v7551_v31 = vadd.f32 %v7550_v28, %v7549_v26 }
 0x199   :  { %v7552_v19 = vpop.f32.mrb[6].mxu1  ;;  %v648_v24 = vadd.f32 %v7551_v31, %v341_v20 }
 0x19a   :  { %v7553_v38 = vpop.f32.mrb[7].mxu1 }
 0x19b   :  { %v7554_v39 = vadd.f32 %v7553_v38, %v7552_v19 }
 0x19d   :  { %v7555_v32 = vpop.f32.mrb[8].mxu1  ;;  %v653_v42 = vadd.f32 %v7554_v39, %v341_v20 }
 0x19e   :  { %v7556_v46 = vpop.f32.mrb[9].mxu1 }
 0x19f   :  { %v7557_v48 = vadd.f32 %v7556_v46, %v7555_v32 }
 0x1a1   :  { %v7558_v49 = vpop.f32.mrb[10].mxu1  ;;  %v658_v50 = vadd.f32 %v7557_v48, %v341_v20 }
 0x1a2   :  { %v7559_v43 = vpop.f32.mrb[11].mxu1 }
 0x1a3   :  { %v7560_v54 = vadd.f32 %v7559_v43, %v7558_v49  ;;  %v13279_v49 = vsub.s32 0, %v331_v8 }
 0x1a5   :  { %v7561_v55 = vpop.f32.mrb[12].mxu1  ;;  %v663_v56 = vadd.f32 %v7560_v54, %v341_v20  ;;  %15521 = vst [vmem:[#allocation57_spill] sm:$0xff] %v13279_v49 }
 0x1a6   :  { %v7562_v58 = vpop.f32.mrb[13].mxu1 }
 0x1a7   :  { %v7563_v59 = vadd.f32 %v7562_v58, %v7561_v55 }
 0x1a9   :  { %v7564_v60 = vpop.f32.mrb[14].mxu1  ;;  %v668_v1 = vadd.f32 %v7563_v59, %v341_v20 }
 0x1aa   :  { %v7565_v3 = vpop.f32.mrb[15].mxu1 }
 0x1ab   :  { %v7566_v4 = vadd.f32 %v7565_v3, %v7564_v60  ;;  %v13294_v3 = vld [vmem:[%s15203_s4] ss:$0 sm:$0xff] }
 0x1ad   :  { %v8324_v45 = vpop.f32.mrb[16].mxu1  ;;  %v673_v7 = vadd.f32 %v7566_v4, %v341_v20 }
 0x1ae   :  { %v13265_v0 = vadd.f32 %v8324_v45, %v643_v27  ;;  %v742_v11 = vpop.f32.mrb[17].mxu1 }
 0x1af   :  { %v743_v17 = vadd.f32 %v742_v11, %v638_v47 }
 0x1b2   :  { %v8327_v10 = vpop.f32.mrb[18].mxu1 }
 0x1b3   :  { %v13267_v12 = vadd.f32 %v8327_v10, %v653_v42  ;;  %v752_v26 = vpop.f32.mrb[19].mxu1  ;;  %v13281_v42 = vsub.s32 1, %v331_v8  ;;  %v949_v10 = vld [vmem:[#allocation10] sm:$0xff] }
 0x1b4   :  { %v13269_v28 = vadd.f32 %v752_v26, %v648_v24  ;;  %v13284_v24 = vrot.slane %v328_v16, %v13279_v49 }
 0x1b5   :  { %15515 = vst [vmem:[#allocation51_spill] sm:$0xff] %v13267_v12  ;;  %15522 = vst [vmem:[#allocation58_spill] sm:$0xff] %v13281_v42  ;;  %v13287_v54 = vrot.slane %v328_v16, %v13281_v42  ;;  %v992_v12 = vld [vmem:[#allocation10 + $0x158] sm:$0xff] }
 0x1b6   :  { %15516 = vst [vmem:[#allocation52_spill] sm:$0xff] %v13269_v28  ;;  %v8330_v31 = vpop.f32.mrb[20].mxu1  ;;  %15523 = vst [vmem:[#allocation59_spill] sm:$0xff] %v13284_v24  ;;  %v995_v28 = vld [vmem:[#allocation10 + $0x170] sm:$0xff] }
 0x1b7   :  { %v13271_v19 = vadd.f32 %v8330_v31, %v663_v56  ;;  %v762_v38 = vpop.f32.mrb[21].mxu1  ;;  %15524 = vst [vmem:[#allocation60_spill] sm:$0xff] %v13287_v54  ;;  %v952_v31 = vld [vmem:[#allocation10 + $0x18] sm:$0xff] }
 0x1b8   :  { %v13273_v39 = vadd.f32 %v762_v38, %v658_v50  ;;  %v951_v38 = vld [vmem:[#allocation10 + $0x10] sm:$0xff] }
 0x1b9   :  { %15517 = vst [vmem:[#allocation53_spill] sm:$0xff] %v13271_v19  ;;  %v989_v19 = vld [vmem:[#allocation10 + $0x140] sm:$0xff] }
 0x1ba   :  { %15518 = vst [vmem:[#allocation54_spill] sm:$0xff] %v13273_v39  ;;  %v8333_v32 = vpop.f32.mrb[22].mxu1  ;;  %v990_v39 = vld [vmem:[#allocation10 + $0x148] sm:$0xff] }
 0x1bb   :  { %v13275_v2 = vadd.f32 %v8333_v32, %v673_v7  ;;  %v772_v20 = vpop.f32.mrb[23].mxu1  ;;  %v954_v32 = vld [vmem:[#allocation10 + $0x28] sm:$0xff] }
 0x1bc   :  { %v13277_v27 = vadd.f32 %v772_v20, %v668_v1 }
 0x1bd   :  { %15519 = vst [vmem:[#allocation55_spill] sm:$0xff] %v13275_v2  ;;  %v984_v2 = vld [vmem:[#allocation10 + $0x118] sm:$0xff] }
 0x1be   :  { %15520 = vst [vmem:[#allocation56_spill] sm:$0xff] %v13277_v27  ;;  %v986_v27 = vld [vmem:[#allocation10 + $0x128] sm:$0xff] }
 0x1d0   :  { %v1243_v46 = vpop.f32.mrb[24].mxu1 }
 0x1d1   :  { %v8368_v48 = vpop.f32.mrb[25].mxu1  ;;  %v1261_v4 = vadd.f32 %v13294_v3, %v1243_v46  ;;  %v955_v46 = vld [vmem:[#allocation10 + $0x30] sm:$0xff] }
 0x1d2   :  { %v956_v48 = vld [vmem:[#allocation10 + $0x38] sm:$0xff] }
 0x1e6   :  { %v1172_v43 = vpop.f32.mrb[0].mxu0 }
 0x1e7   :  { %v12199_v50 = vadd.f32 %v1172_v43, %v13284_v24  ;;  %v1174_v55 = vpop.f32.mrb[1].mxu0  ;;  %v959_v43 = vld [vmem:[#allocation10 + $0x50] sm:$0xff] }
 0x1e8   :  { %v12200_v58 = vadd.f32 %v1174_v55, %v13287_v54 }
 0x1e9   :  { %v7462_v56 = vmul.f32 -1.442695, %v12199_v50 }
 0x1ea   :  { %v7463_v59 = vmul.f32 -1.442695, %v12200_v58  ;;  %v13299_v58 = vpack.c.bf16 %v954_v32, %v951_v38  ;;  %v968_v38 = vld [vmem:[#allocation10 + $0x98] sm:$0xff]  ;;  %v971_v32 = vld [vmem:[#allocation10 + $0xb0] sm:$0xff] }
 0x1eb   :  { %12327 = vpow2.f32 %v7462_v56  ;;  %v13297_v56 = vpack.c.bf16 %v952_v31, %v949_v10  ;;  %v964_v10 = vld [vmem:[#allocation10 + $0x78] sm:$0xff]  ;;  %v966_v31 = vld [vmem:[#allocation10 + $0x88] sm:$0xff] }
 0x1ec   :  { %12329 = vpow2.f32 %v7463_v59 }
 0x1f5   :  { %v12328_v60 = vpop.eup %12327 }
 0x1f6   :  { %v1255_v1 = vadd.f32 1.0, %v12328_v60  ;;  %v12330_v8 = vpop.eup %12329  ;;  %v958_v60 = vld [vmem:[#allocation10 + $0x48] sm:$0xff] }
 0x1f7   :  { %v1256_v16 = vadd.f32 1.0, %v12330_v8  ;;  %v960_v8 = vld [vmem:[#allocation10 + $0x58] sm:$0xff] }
 0x1f8   :  { %12331 = vrcp.f32 %v1255_v1  ;;  %v957_v1 = vld [vmem:[#allocation10 + $0x40] sm:$0xff] }
 0x1f9   :  { %12333 = vrcp.f32 %v1256_v16  ;;  %v962_v16 = vld [vmem:[#allocation10 + $0x68] sm:$0xff] }
 0x202   :  { %v12332_v47 = vpop.eup %12331 }
 0x203   :  { %v1262_v45 = vmul.f32 %v12332_v47, %v1261_v4  ;;  %v12334_v11 = vpop.eup %12333  ;;  %v965_v4 = vld [vmem:[#allocation10 + $0x80] sm:$0xff]  ;;  %v13309_v47 = vpack.c.bf16 %v958_v60, %v955_v46  ;;  %v972_v60 = vld [vmem:[#allocation10 + $0xb8] sm:$0xff] }
 0x204   :  { %v1265_v26 = vsub.f32 1.0, %v12334_v11  ;;  %v1267_v55 = vmul.f32 0.0, %v12334_v11  ;;  %v13315_v11 = vpack.c.bf16 %v965_v4, %v962_v16  ;;  %v969_v46 = vld [vmem:[#allocation10 + $0xa0] sm:$0xff] }
 0x205   :  { %v1263_v7 = vadd.f32 %v1262_v45, %v743_v17  ;;  %v13303_v17 = vpack.c.bf16 %v959_v43, %v956_v48  ;;  %v13311_v45 = vpack.c.bf16 %v960_v8, %v957_v1  ;;  %v967_v43 = vld [vmem:[#allocation10 + $0x90] sm:$0xff]  ;;  %v974_v1 = vld [vmem:[#allocation10 + $0xc8] sm:$0xff]  ;;  %v977_v8 = vld [vmem:[#allocation10 + $0xe0] sm:$0xff]  ;;  %v13334_v4 = vpack.c.bf16 %v972_v60, %v969_v46 }
 0x206   :  { %v979_v46 = vld [vmem:[#allocation10 + $0xf0] sm:$0xff] }
 0x207   :  { %12335 = vtanh.f32 %v1263_v7  ;;  %v961_v7 = vld [vmem:[#allocation10 + $0x60] sm:$0xff] }
 0x211   :  { %v12336_v20 = vpop.eup %12335 }
 0x212   :  { %v1266_v50 = vmul.f32 %v12336_v20, %v1265_v26  ;;  %v963_v26 = vld [vmem:[#allocation10 + $0x70] sm:$0xff]  ;;  %v13322_v20 = vpack.c.bf16 %v964_v10, %v961_v7  ;;  %v973_v7 = vld [vmem:[#allocation10 + $0xc0] sm:$0xff]  ;;  %v13338_v10 = vpack.c.bf16 %v977_v8, %v974_v1  ;;  %v982_v1 = vld [vmem:[#allocation10 + $0x108] sm:$0xff] }
 0x213   :  { %v13324_v48 = vpack.c.bf16 %v966_v31, %v963_v26  ;;  %v976_v26 = vld [vmem:[#allocation10 + $0xd8] sm:$0xff]  ;;  %v975_v31 = vld [vmem:[#allocation10 + $0xd0] sm:$0xff]  ;;  %v981_v8 = vld [vmem:[#allocation10 + $0x100] sm:$0xff] }
 0x214   :  { %v13301_v59 = vadd.f32 %v1267_v55, %v1266_v50  ;;  %v13328_v50 = vpack.c.bf16 %v971_v32, %v968_v38  ;;  %v970_v55 = vld [vmem:[#allocation10 + $0xa8] sm:$0xff]  ;;  %v980_v32 = vld [vmem:[#allocation10 + $0xf8] sm:$0xff] }
 0x215   :  { %v13332_v16 = vpack.c.bf16 %v970_v55, %v967_v43  ;;  %v978_v38 = vld [vmem:[#allocation10 + $0xe8] sm:$0xff]  ;;  %v13342_v43 = vpack.c.bf16 %v976_v26, %v973_v7  ;;  %v13352_v7 = vpack.c.bf16 %v982_v1, %v979_v46  ;;  %v13354_v26 = vpack.c.bf16 %v984_v2, %v981_v8  ;;  %v991_v1 = vld [vmem:[#allocation10 + $0x150] sm:$0xff]  ;;  %v993_v8 = vld [vmem:[#allocation10 + $0x160] sm:$0xff] }
 0x216   :  { %1340 = vmatmul.mubr.f32.vlgmr.msra.gmra.mrb[2].mxu0 %v13301_v59  ;;  %8402 = vmatmul.mubr.f32.vlgmr.msra.gmra.mrb[26].mxu1 %v13301_v59  ;;  %v13344_v55 = vpack.c.bf16 %v978_v38, %v975_v31  ;;  %v985_v31 = vld [vmem:[#allocation10 + $0x120] sm:$0xff]  ;;  %v988_v38 = vld [vmem:[#allocation10 + $0x138] sm:$0xff] }
 0x217   :  { %10050 = vmatpush1.bf16.msra.mxu1 %v13297_v56  ;;  %10081 = vmatpush3.bf16.msra.mxu0 %v13299_v58  ;;  %15525 = vst [vmem:[#allocation61_spill] sm:$0xff] %v13342_v43  ;;  %15528 = vst [vmem:[#allocation64_spill] sm:$0xff] %v13352_v7  ;;  %v13362_v46 = vpack.c.bf16 %v988_v38, %v985_v31  ;;  %v853_v38 = vld [vmem:[#allocation12] sm:$0xff] }
 0x218   :  { %10052 = vmatprep.subr.bf16.mxu1 %v13303_v17  ;;  %10082 = vmatprep.subr.bf16.mxu0 %v15279_v21  ;;  %15526 = vst [vmem:[#allocation62_spill] sm:$0xff] %v13344_v55  ;;  %15529 = vst [vmem:[#allocation65_spill] sm:$0xff] %v13354_v26 }
 0x219   :  { %1502 = vmatprep.mubr.f32.mxu1 %v15215_v61  ;;  %8436 = vmatprep.mubr.msk.f32.mxu0 %vm12804_vm0, %v15215_v61  ;;  %v983_v61 = vld [vmem:[#allocation10 + $0x110] sm:$0xff]  ;;  %15531 = vst [vmem:[#allocation67_spill] sm:$0xff] %v13362_v46 }
 0x21a   :  { %v13348_v60 = vpack.c.bf16 %v983_v61, %v980_v32  ;;  %v13358_v61 = vpack.c.bf16 %v989_v19, %v986_v27  ;;  %v987_v32 = vld [vmem:[#allocation10 + $0x130] sm:$0xff]  ;;  %v13368_v19 = vpack.c.bf16 %v995_v28, %v992_v12  ;;  %v994_v27 = vld [vmem:[#allocation10 + $0x168] sm:$0xff]  ;;  %v856_v28 = vld [vmem:[#allocation12 + $0x18] sm:$0xff] }
 0x21b   :  { %10054 = vmatpush1.bf16.msra.mxu1 %v13309_v47  ;;  %10084 = vmatpush3.bf16.msra.mxu0 %v13311_v45  ;;  %v13364_v2 = vpack.c.bf16 %v990_v39, %v987_v32  ;;  %v13372_v31 = vpack.c.bf16 %v994_v27, %v991_v1  ;;  %v13374_v39 = vpack.c.bf16 %v996_v15, %v993_v8  ;;  %v855_v32 = vld [vmem:[#allocation12 + $0x10] sm:$0xff] }
 0x21c   :  { %10056 = vmatprep.subr.bf16.mxu1 %v13315_v11  ;;  %10085 = vmatprep.subr.bf16.mxu0 %v15279_v21  ;;  %15527 = vst [vmem:[#allocation63_spill] sm:$0xff] %v13348_v60  ;;  %15530 = vst [vmem:[#allocation66_spill] sm:$0xff] %v13358_v61  ;;  %v13382_v1 = vpack.c.bf16 %v856_v28, %v853_v38  ;;  %v859_v15 = vld [vmem:[#allocation12 + $0x30] sm:$0xff]  ;;  %v868_v28 = vld [vmem:[#allocation12 + $0x78] sm:$0xff] }
 0x21d   :  { %15532 = vst [vmem:[#allocation68_spill] sm:$0xff] %v13364_v2  ;;  %15533 = vst [vmem:[#allocation69_spill] sm:$0xff] %v13368_v19 }
 0x21e   :  { %15534 = vst [vmem:[#allocation70_spill] sm:$0xff] %v13372_v31  ;;  %15535 = vst [vmem:[#allocation71_spill] sm:$0xff] %v13374_v39 }
 0x21f   :  { %10058 = vmatpush1.bf16.msra.mxu1 %v13322_v20  ;;  %10087 = vmatpush3.bf16.msra.mxu0 %v13324_v48  ;;  %15537 = vst [vmem:[#allocation73_spill] sm:$0xff] %v13382_v1 }
 0x220   :  { %10060 = vmatprep.subr.bf16.mxu1 %v13328_v50  ;;  %10088 = vmatprep.subr.bf16.mxu0 %v15279_v21 }
 0x223   :  { %10062 = vmatpush1.bf16.msra.mxu1 %v13332_v16  ;;  %10090 = vmatpush3.bf16.msra.mxu0 %v13334_v4 }
 0x224   :  { %10064 = vmatprep.subr.bf16.mxu1 %v13338_v10  ;;  %10091 = vmatprep.subr.bf16.mxu0 %v15279_v21 }
 0x227   :  { %10066 = vmatpush1.bf16.msra.mxu1 %v13342_v43  ;;  %10093 = vmatpush3.bf16.msra.mxu0 %v13344_v55  ;;  %v857_v55 = vld [vmem:[#allocation12 + $0x20] sm:$0xff]  ;;  %v15543_v43 = vmov 0.0  }
 0x228   :  { %10068 = vmatprep.subr.bf16.mxu1 %v13348_v60  ;;  %10094 = vmatprep.subr.bf16.mxu0 %v15279_v21  ;;  %v854_v60 = vld [vmem:[#allocation12 + $0x8] sm:$0xff] }
 0x229   :  { %v13378_v12 = vpack.c.bf16 %v857_v55, %v854_v60  ;;  %v862_v55 = vld [vmem:[#allocation12 + $0x48] sm:$0xff]  ;;  %v861_v60 = vld [vmem:[#allocation12 + $0x40] sm:$0xff] }
 0x22a   :  { %v13393_v38 = vpack.c.bf16 %v862_v55, %v859_v15  ;;  %v871_v15 = vld [vmem:[#allocation12 + $0x90] sm:$0xff]  ;;  %v874_v55 = vld [vmem:[#allocation12 + $0xa8] sm:$0xff] }
 0x22b   :  { %10070 = vmatpush1.bf16.msra.mxu1 %v13352_v7  ;;  %10096 = vmatpush3.bf16.msra.mxu0 %v13354_v26  ;;  %15536 = vst [vmem:[#allocation72_spill] sm:$0xff] %v13378_v12  ;;  %v860_v26 = vld [vmem:[#allocation12 + $0x38] sm:$0xff]  ;;  %v863_v7 = vld [vmem:[#allocation12 + $0x50] sm:$0xff] }
 0x22c   :  { %10072 = vmatprep.subr.bf16.mxu1 %v13358_v61  ;;  %10097 = vmatprep.subr.bf16.mxu0 %v15279_v21  ;;  %v858_v61 = vld [vmem:[#allocation12 + $0x28] sm:$0xff]  ;;  %v13387_v8 = vpack.c.bf16 %v863_v7, %v860_v26  ;;  %15540 = vst [vmem:[#allocation76_spill] sm:$0xff] %v13393_v38 }
 0x22d   :  { %v13384_v27 = vpack.c.bf16 %v858_v61, %v855_v32  ;;  %v865_v61 = vld [vmem:[#allocation12 + $0x60] sm:$0xff]  ;;  %v867_v32 = vld [vmem:[#allocation12 + $0x70] sm:$0xff] }
 0x22e   :  { %15539 = vst [vmem:[#allocation75_spill] sm:$0xff] %v13387_v8 }
 0x22f   :  { %10074 = vmatpush1.bf16.msra.mxu1 %v13362_v46  ;;  %10099 = vmatpush3.bf16.msra.mxu0 %v13364_v2  ;;  %15538 = vst [vmem:[#allocation74_spill] sm:$0xff] %v13384_v27  ;;  %v866_v2 = vld [vmem:[#allocation12 + $0x68] sm:$0xff]  ;;  %v869_v46 = vld [vmem:[#allocation12 + $0x80] sm:$0xff] }
 0x230   :  { %10076 = vmatprep.subr.bf16.mxu1 %v13368_v19  ;;  %10100 = vmatprep.subr.bf16.mxu0 %v15279_v21  ;;  %v864_v19 = vld [vmem:[#allocation12 + $0x58] sm:$0xff]  ;;  %v13399_v26 = vpack.c.bf16 %v869_v46, %v866_v2 }
 0x231   :  { %v13396_v7 = vpack.c.bf16 %v864_v19, %v861_v60  ;;  %v13406_v19 = vpack.c.bf16 %v868_v28, %v865_v61  ;;  %v873_v60 = vld [vmem:[#allocation12 + $0xa0] sm:$0xff]  ;;  %v13416_v61 = vpack.c.bf16 %v874_v55, %v871_v15  ;;  %v883_v55 = vld [vmem:[#allocation12 + $0xf0] sm:$0xff] }
 0x232   :  { %15542 = vst [vmem:[#allocation78_spill] sm:$0xff] %v13399_v26  ;;  %v877_v28 = vld [vmem:[#allocation12 + $0xc0] sm:$0xff] }
 0x233   :  { %10078 = vmatpush1.bf16.msra.mxu1 %v13372_v31  ;;  %10102 = vmatpush3.bf16.msra.mxu0 %v13374_v39  ;;  %15541 = vst [vmem:[#allocation77_spill] sm:$0xff] %v13396_v7  ;;  %v872_v39 = vld [vmem:[#allocation12 + $0x98] sm:$0xff]  ;;  %v875_v31 = vld [vmem:[#allocation12 + $0xb0] sm:$0xff]  ;;  %15544 = vst [vmem:[#allocation79_spill] sm:$0xff] %v13406_v19 }
 0x234   :  { %10104 = vmatprep.subr.bf16.mxu1 %v13378_v12  ;;  %10135 = vmatprep.subr.bf16.mxu0 %v15279_v21  ;;  %v870_v12 = vld [vmem:[#allocation12 + $0x88] sm:$0xff]  ;;  %v13412_v2 = vpack.c.bf16 %v875_v31, %v872_v39  ;;  %15547 = vst [vmem:[#allocation82_spill] sm:$0xff] %v13416_v61  ;;  %v880_v39 = vld [vmem:[#allocation12 + $0xd8] sm:$0xff] }
 0x235   :  { %v13409_v46 = vpack.c.bf16 %v870_v12, %v867_v32  ;;  %v879_v32 = vld [vmem:[#allocation12 + $0xd0] sm:$0xff]  ;;  %v13426_v15 = vpack.c.bf16 %v880_v39, %v877_v28  ;;  %v889_v39 = vld [vmem:[#allocation12 + $0x120] sm:$0xff] }
 0x236   :  { %1503 = vmatmul.mubr.f32.vlgmr.msra.gmra.mrb[28].mxu1 %v13301_v59  ;;  %8437 = vmatmul.mubr.f32.vlgmr.msra.gmra.mrb[16].mxu0 %v13301_v59  ;;  %15546 = vst [vmem:[#allocation81_spill] sm:$0xff] %v13412_v2 }
 0x237   :  { %10106 = vmatpush1.bf16.msra.mxu1 %v13382_v1  ;;  %10137 = vmatpush3.bf16.msra.mxu0 %v13384_v27  ;;  %15545 = vst [vmem:[#allocation80_spill] sm:$0xff] %v13409_v46  ;;  %v878_v27 = vld [vmem:[#allocation12 + $0xc8] sm:$0xff]  ;;  %v881_v1 = vld [vmem:[#allocation12 + $0xe0] sm:$0xff]  ;;  %15550 = vst [vmem:[#allocation85_spill] sm:$0xff] %v13426_v15 }
 0x238   :  { %10108 = vmatprep.subr.bf16.mxu1 %v13387_v8  ;;  %10138 = vmatprep.subr.bf16.mxu0 %v15279_v21  ;;  %v876_v8 = vld [vmem:[#allocation12 + $0xb8] sm:$0xff]  ;;  %v13422_v31 = vpack.c.bf16 %v881_v1, %v878_v27  ;;  %v886_v27 = vld [vmem:[#allocation12 + $0x108] sm:$0xff] }
 0x239   :  { %1643 = vmatprep.mubr.f32.mxu1 %v15543_v43  ;;  %8471 = vmatprep.mubr.msk.f32.mxu0 %vm12804_vm0, %v15543_v43  ;;  %v13419_v12 = vpack.c.bf16 %v876_v8, %v873_v60  ;;  %v885_v60 = vld [vmem:[#allocation12 + $0x100] sm:$0xff]  ;;  %v13436_v28 = vpack.c.bf16 %v886_v27, %v883_v55  ;;  %v895_v27 = vld [vmem:[#allocation12 + $0x150] sm:$0xff] }
 0x23a   :  { %15549 = vst [vmem:[#allocation84_spill] sm:$0xff] %v13422_v31 }
 0x23b   :  { %10110 = vmatpush1.bf16.msra.mxu1 %v13393_v38  ;;  %10140 = vmatpush3.bf16.msra.mxu0 %v13396_v7  ;;  %15548 = vst [vmem:[#allocation83_spill] sm:$0xff] %v13419_v12  ;;  %v884_v7 = vld [vmem:[#allocation12 + $0xf8] sm:$0xff]  ;;  %v887_v38 = vld [vmem:[#allocation12 + $0x110] sm:$0xff]  ;;  %15553 = vst [vmem:[#allocation88_spill] sm:$0xff] %v13436_v28 }
 0x23c   :  { %10112 = vmatprep.subr.bf16.mxu1 %v13399_v26  ;;  %10141 = vmatprep.subr.bf16.mxu0 %v15279_v21  ;;  %v882_v26 = vld [vmem:[#allocation12 + $0xe8] sm:$0xff]  ;;  %v13432_v1 = vpack.c.bf16 %v887_v38, %v884_v7  ;;  %v892_v7 = vld [vmem:[#allocation12 + $0x138] sm:$0xff] }
 0x23d   :  { %v13429_v8 = vpack.c.bf16 %v882_v26, %v879_v32  ;;  %v891_v32 = vld [vmem:[#allocation12 + $0x130] sm:$0xff]  ;;  %v13446_v55 = vpack.c.bf16 %v892_v7, %v889_v39 }
 0x23e   :  { %15552 = vst [vmem:[#allocation87_spill] sm:$0xff] %v13432_v1 }
 0x23f   :  { %10114 = vmatpush1.bf16.msra.mxu1 %v13406_v19  ;;  %10143 = vmatpush3.bf16.msra.mxu0 %v13409_v46  ;;  %15551 = vst [vmem:[#allocation86_spill] sm:$0xff] %v13429_v8  ;;  %v890_v46 = vld [vmem:[#allocation12 + $0x128] sm:$0xff]  ;;  %v893_v19 = vld [vmem:[#allocation12 + $0x140] sm:$0xff]  ;;  %15556 = vst [vmem:[#allocation91_spill] sm:$0xff] %v13446_v55 }
 0x240   :  { %10116 = vmatprep.subr.bf16.mxu1 %v13412_v2  ;;  %10144 = vmatprep.subr.bf16.mxu0 %v15279_v21  ;;  %v888_v2 = vld [vmem:[#allocation12 + $0x118] sm:$0xff]  ;;  %v13442_v38 = vpack.c.bf16 %v893_v19, %v890_v46  ;;  %v898_v46 = vld [vmem:[#allocation12 + $0x168] sm:$0xff] }
 0x241   :  { %v13439_v26 = vpack.c.bf16 %v888_v2, %v885_v60  ;;  %v897_v60 = vld [vmem:[#allocation12 + $0x160] sm:$0xff] }
 0x242   :  { %15555 = vst [vmem:[#allocation90_spill] sm:$0xff] %v13442_v38 }
 0x243   :  { %10118 = vmatpush1.bf16.msra.mxu1 %v13416_v61  ;;  %10146 = vmatpush3.bf16.msra.mxu0 %v13419_v12  ;;  %15554 = vst [vmem:[#allocation89_spill] sm:$0xff] %v13439_v26  ;;  %v896_v12 = vld [vmem:[#allocation12 + $0x158] sm:$0xff]  ;;  %v899_v61 = vld [vmem:[#allocation12 + $0x170] sm:$0xff] }
 0x244   :  { %10120 = vmatprep.subr.bf16.mxu1 %v13422_v31  ;;  %10147 = vmatprep.subr.bf16.mxu0 %v15279_v21  ;;  %v894_v31 = vld [vmem:[#allocation12 + $0x148] sm:$0xff]  ;;  %v13452_v19 = vpack.c.bf16 %v899_v61, %v896_v12 }
 0x245   :  { %v13449_v2 = vpack.c.bf16 %v894_v31, %v891_v32 }
 0x246   :  { %15558 = vst [vmem:[#allocation93_spill] sm:$0xff] %v13452_v19 }
 0x247   :  { %10122 = vmatpush1.bf16.msra.mxu1 %v13426_v15  ;;  %10149 = vmatpush3.bf16.msra.mxu0 %v13429_v8  ;;  %15557 = vst [vmem:[#allocation92_spill] sm:$0xff] %v13449_v2  ;;  %v13456_v8 = vpack.c.bf16 %v898_v46, %v895_v27 }
 0x248   :  { %10124 = vmatprep.subr.bf16.mxu1 %v13432_v1  ;;  %10150 = vmatprep.subr.bf16.mxu0 %v15279_v21  ;;  %v900_v1 = vld [vmem:[#allocation12 + $0x178] sm:$0xff] }
 0x249   :  { %15559 = vst [vmem:[#allocation94_spill] sm:$0xff] %v13456_v8  ;;  %v13459_v39 = vpack.c.bf16 %v900_v1, %v897_v60 }
 0x24b   :  { %10126 = vmatpush1.bf16.msra.mxu1 %v13436_v28  ;;  %10152 = vmatpush3.bf16.msra.mxu0 %v13439_v26  ;;  %15560 = vst [vmem:[#allocation95_spill] sm:$0xff] %v13459_v39 }
 0x24c   :  { %10128 = vmatprep.subr.bf16.mxu1 %v13442_v38  ;;  %10153 = vmatprep.subr.bf16.mxu0 %v15279_v21 }
 0x24f   :  { %10130 = vmatpush1.bf16.msra.mxu1 %v13446_v55  ;;  %10155 = vmatpush3.bf16.msra.mxu0 %v13449_v2 }
 0x250   :  { %10132 = vmatprep.subr.bf16.mxu1 %v13452_v19  ;;  %10156 = vmatprep.subr.bf16.mxu0 %v15279_v21 }
 0x253   :  { %10134 = vmatpush1.bf16.msra.mxu1 %v13456_v8  ;;  %10158 = vmatpush3.bf16.msra.mxu0 %v13459_v39 }
 0x254   :  { %10160 = vmatprep.subr.bf16.mxu0 %v13135_v5  ;;  %10191 = vmatprep.subr.bf16.mxu1 %v15279_v21 }
 0x256   :  { %1644 = vmatmul.mubr.f32.vlgmr.msra.gmra.mrb[28].mxu1 %v15543_v43  ;;  %8472 = vmatmul.mubr.f32.vlgmr.msra.gmra.mrb[18].mxu0 %v15543_v43 }
 0x257   :  { %10162 = vmatpush1.bf16.msra.mxu0 %v13143_v63  ;;  %10193 = vmatpush3.bf16.msra.mxu1 %v13093_v29 }
 0x258   :  { %10164 = vmatprep.subr.bf16.mxu0 %v13146_v14  ;;  %10194 = vmatprep.subr.bf16.mxu1 %v15279_v21 }
 0x259   :  { %1812 = vmatprep.mubr.f32.mxu0 %v15543_v43  ;;  %8506 = vmatprep.mubr.msk.f32.mxu1 %vm12804_vm0, %v15543_v43 }
 0x25b   :  { %10166 = vmatpush1.bf16.msra.mxu0 %v13155_v22  ;;  %10196 = vmatpush3.bf16.msra.mxu1 %v13105_v41 }
 0x25c   :  { %10168 = vmatprep.subr.bf16.mxu0 %v13158_v25  ;;  %10197 = vmatprep.subr.bf16.mxu1 %v15279_v21 }
 0x25f   :  { %10170 = vmatpush1.bf16.msra.mxu0 %v13167_v34  ;;  %10199 = vmatpush3.bf16.msra.mxu1 %v13117_v53 }
 0x260   :  { %10172 = vmatprep.subr.bf16.mxu0 %v13170_v37  ;;  %10200 = vmatprep.subr.bf16.mxu1 %v15279_v21 }
 0x263   :  { %10174 = vmatpush1.bf16.msra.mxu0 %v13179_v13  ;;  %10202 = vmatpush3.bf16.msra.mxu1 %v13127_v62 }
 0x264   :  { %10176 = vmatprep.subr.bf16.mxu0 %v13182_v44  ;;  %10203 = vmatprep.subr.bf16.mxu1 %v15279_v21 }
 0x267   :  { %10178 = vmatpush1.bf16.msra.mxu0 %v13189_v23  ;;  %10205 = vmatpush3.bf16.msra.mxu1 %v13138_v9 }
 0x268   :  { %10180 = vmatprep.subr.bf16.mxu0 %v13192_v51  ;;  %10206 = vmatprep.subr.bf16.mxu1 %v15279_v21 }
 0x26b   :  { %10182 = vmatpush1.bf16.msra.mxu0 %v13202_v33  ;;  %10208 = vmatpush3.bf16.msra.mxu1 %v13149_v18 }
 0x26c   :  { %10184 = vmatprep.subr.bf16.mxu0 %v13205_v57  ;;  %10209 = vmatprep.subr.bf16.mxu1 %v15279_v21 }
 0x26f   :  { %10186 = vmatpush1.bf16.msra.mxu0 %v13212_v36  ;;  %10211 = vmatpush3.bf16.msra.mxu1 %v13161_v30 }
 0x270   :  { %10188 = vmatprep.subr.bf16.mxu0 %v13215_v52  ;;  %10212 = vmatprep.subr.bf16.mxu1 %v15279_v21 }
 0x273   :  { %10190 = vmatpush1.bf16.msra.mxu0 %v13222_v35  ;;  %10214 = vmatpush3.bf16.msra.mxu1 %v13173_v40 }
 0x274   :  { %10216 = vmatprep.subr.bf16.mxu1 %v13256_v6  ;;  %10247 = vmatprep.subr.bf16.mxu0 %v15279_v21 }
 0x2e9   :  { %v1341_v61 = vpop.f32.mrb[2].mxu0  ;;  %v1412_v12 = vpop.f32.mrb[26].mxu1 }
 0x2ea   :  { %v12201_v31 = vadd.f32 %v1341_v61, %v13284_v24  ;;  %v1343_v1 = vpop.f32.mrb[3].mxu0  ;;  %v8403_v7 = vpop.f32.mrb[27].mxu1  ;;  %v1430_v6 = vadd.f32 %v13294_v3, %v1412_v12  ;;  %v15564_v12 = vld [vmem:[#allocation61_spill] sm:$0xff] }
 0x2eb   :  { %v12202_v27 = vadd.f32 %v1343_v1, %v13287_v54 }
 0x2ec   :  { %v7464_v32 = vmul.f32 -1.442695, %v12201_v31 }
 0x2ed   :  { %v7465_v46 = vmul.f32 -1.442695, %v12202_v27 }
 0x2ee   :  { %12337 = vpow2.f32 %v7464_v32 }
 0x2ef   :  { %12339 = vpow2.f32 %v7465_v46 }
 0x2f8   :  { %v12338_v60 = vpop.eup %12337 }
 0x2f9   :  { %v1424_v35 = vadd.f32 1.0, %v12338_v60  ;;  %v12340_v40 = vpop.eup %12339  ;;  %v15565_v60 = vld [vmem:[#allocation62_spill] sm:$0xff] }
 0x2fa   :  { %v1425_v52 = vadd.f32 1.0, %v12340_v40 }
 0x2fb   :  { %12341 = vrcp.f32 %v1424_v35 }
 0x2fc   :  { %12343 = vrcp.f32 %v1425_v52 }
 0x305   :  { %v12342_v21 = vpop.eup %12341 }
 0x306   :  { %v1431_v30 = vmul.f32 %v12342_v21, %v1430_v6  ;;  %v12344_v1 = vpop.eup %12343  ;;  %v15561_v21 = vmov 0.0|0.0  }
 0x307   :  { %v1434_v7 = vsub.f32 1.0, %v12344_v1  ;;  %v1436_v46 = vmul.f32 %v12344_v1, %v13301_v59 }
 0x308   :  { %v1432_v61 = vadd.f32 %v1431_v30, %v13265_v0  ;;  %v1045_v30 = vld [vmem:[%s15206_s7] sm:$0x7] }
 0x309   :  { %v13508_v24 = vpop.f32.mrb[16].mxu0  ;;  %v13536_v40 = vrot.slane %v1045_v30, %v13279_v49  ;;  %v13541_v6 = vrot.slane %v1045_v30, %v13281_v42  ;;  %v15570_v42 = vld [vmem:[#allocation67_spill] sm:$0xff]  ;;  %v15572_v49 = vld [vmem:[#allocation69_spill] sm:$0xff] }
 0x30a   :  { %12345 = vtanh.f32 %v1432_v61  ;;  %v8438_v31 = vpop.f32.mrb[17].mxu0 }
 0x30b   :  { %15562 = vst [vmem:[#allocation96_spill] sm:$0xff] %v13536_v40  ;;  %15563 = vst [vmem:[#allocation97_spill] sm:$0xff] %v13541_v6  ;;  %v15566_v31 = vld [vmem:[#allocation63_spill] sm:$0xff] }
 0x314   :  { %v12346_v32 = vpop.eup %12345 }
 0x315   :  { %v1435_v27 = vmul.f32 %v12346_v32, %v1434_v7  ;;  %v15567_v32 = vld [vmem:[#allocation64_spill] sm:$0xff] }
 0x317   :  { %v13511_v35 = vadd.f32 %v1436_v46, %v1435_v27  ;;  %v15568_v27 = vld [vmem:[#allocation65_spill] sm:$0xff]  ;;  %v15569_v46 = vld [vmem:[#allocation66_spill] sm:$0xff] }
 0x319   :  { %1813 = vmatmul.mubr.f32.vlgmr.msra.gmra.mrb[4].mxu0 %v13511_v35  ;;  %8507 = vmatmul.mubr.f32.vlgmr.msra.gmra.mrb[30].mxu1 %v13511_v35 }
 0x31a   :  { %10218 = vmatpush1.bf16.msra.mxu1 %v13297_v56  ;;  %10249 = vmatpush3.bf16.msra.mxu0 %v13299_v58 }
 0x31b   :  { %10220 = vmatprep.subr.bf16.mxu1 %v13303_v17  ;;  %10250 = vmatprep.subr.bf16.mxu0 %v15561_v21 }
 0x31c   :  { %1975 = vmatprep.mubr.f32.mxu1 %v15543_v43  ;;  %8541 = vmatprep.mubr.msk.f32.mxu0 %vm12804_vm0, %v15543_v43 }
 0x31e   :  { %10222 = vmatpush1.bf16.msra.mxu1 %v13309_v47  ;;  %10252 = vmatpush3.bf16.msra.mxu0 %v13311_v45 }
 0x31f   :  { %10224 = vmatprep.subr.bf16.mxu1 %v13315_v11  ;;  %10253 = vmatprep.subr.bf16.mxu0 %v15561_v21 }
 0x322   :  { %10226 = vmatpush1.bf16.msra.mxu1 %v13322_v20  ;;  %10255 = vmatpush3.bf16.msra.mxu0 %v13324_v48 }
 0x323   :  { %10228 = vmatprep.subr.bf16.mxu1 %v13328_v50  ;;  %10256 = vmatprep.subr.bf16.mxu0 %v15561_v21 }
 0x326   :  { %10230 = vmatpush1.bf16.msra.mxu1 %v13332_v16  ;;  %10258 = vmatpush3.bf16.msra.mxu0 %v13334_v4 }
 0x327   :  { %10232 = vmatprep.subr.bf16.mxu1 %v13338_v10  ;;  %10259 = vmatprep.subr.bf16.mxu0 %v15561_v21 }
 0x329   :  { %v1645_v52 = vpop.f32.mrb[28].mxu1  ;;  %v1716_v0 = vpop.f32.mrb[18].mxu0 }
 0x32a   :  { %v12215_v3 = vadd.f32 %v1645_v52, %v13536_v40  ;;  %v1647_v59 = vpop.f32.mrb[29].mxu1  ;;  %10234 = vmatpush1.bf16.msra.mxu1 %v15564_v12  ;;  %10261 = vmatpush3.bf16.msra.mxu0 %v15565_v60  ;;  %v8473_v61 = vpop.f32.mrb[19].mxu0 }
 0x32b   :  { %10236 = vmatprep.subr.bf16.mxu1 %v15566_v31  ;;  %10262 = vmatprep.subr.bf16.mxu0 %v15561_v21  ;;  %v12216_v7 = vadd.f32 %v1647_v59, %v13541_v6  ;;  %v15571_v61 = vld [vmem:[#allocation68_spill] sm:$0xff]  ;;  %v15574_v59 = vld [vmem:[#allocation71_spill] sm:$0xff]  ;;  %v15588_v31 = vld [vmem:[#allocation82_spill] sm:$0xff] }
 0x32c   :  { %v7466_v1 = vmul.f32 -1.442695, %v12215_v3  ;;  %v15573_v3 = vld [vmem:[#allocation70_spill] sm:$0xff] }
 0x32d   :  { %v7467_v52 = vmul.f32 -1.442695, %v12216_v7  ;;  %v15576_v7 = vld [vmem:[#allocation73_spill] sm:$0xff] }
 0x32e   :  { %12347 = vpow2.f32 %v7466_v1  ;;  %10238 = vmatpush1.bf16.msra.mxu1 %v15567_v32  ;;  %10264 = vmatpush3.bf16.msra.mxu0 %v15568_v27  ;;  %v15575_v1 = vld [vmem:[#allocation72_spill] sm:$0xff] }
 0x32f   :  { %10240 = vmatprep.subr.bf16.mxu1 %v15569_v46  ;;  %10265 = vmatprep.subr.bf16.mxu0 %v15561_v21  ;;  %12349 = vpow2.f32 %v7467_v52  ;;  %v15578_v52 = vld [vmem:[#allocation75_spill] sm:$0xff] }
 0x332   :  { %10242 = vmatpush1.bf16.msra.mxu1 %v15570_v42  ;;  %10267 = vmatpush3.bf16.msra.mxu0 %v15571_v61  ;;  %v15585_v61 = vld [vmem:[#allocation79_spill] sm:$0xff]  ;;  %v15586_v42 = vld [vmem:[#allocation80_spill] sm:$0xff] }
 0x333   :  { %10244 = vmatprep.subr.bf16.mxu1 %v15572_v49  ;;  %10268 = vmatprep.subr.bf16.mxu0 %v15561_v21  ;;  %v15577_v49 = vld [vmem:[#allocation74_spill] sm:$0xff] }
 0x336   :  { %10246 = vmatpush1.bf16.msra.mxu1 %v15573_v3  ;;  %10270 = vmatpush3.bf16.msra.mxu0 %v15574_v59  ;;  %v15581_v3 = vld [vmem:[#allocation78_spill] sm:$0xff] }
 0x337   :  { %10272 = vmatprep.subr.bf16.mxu1 %v15575_v1  ;;  %10303 = vmatprep.subr.bf16.mxu0 %v15561_v21  ;;  %v15579_v1 = vld [vmem:[#allocation76_spill] sm:$0xff] }
 0x338   :  { %v12348_v46 = vpop.eup %12347 }
 0x339   :  { %v1728_v27 = vadd.f32 1.0, %v12348_v46  ;;  %1976 = vmatmul.mubr.f32.vlgmr.msra.gmra.mrb[32].mxu1 %v13511_v35  ;;  %8542 = vmatmul.mubr.f32.vlgmr.msra.gmra.mrb[20].mxu0 %v13511_v35  ;;  %v15580_v46 = vld [vmem:[#allocation77_spill] sm:$0xff]  ;;  %v12350_v59 = vpop.eup %12349 }
 0x33a   :  { %10274 = vmatpush1.bf16.msra.mxu1 %v15576_v7  ;;  %10305 = vmatpush3.bf16.msra.mxu0 %v15577_v49  ;;  %v1729_v7 = vadd.f32 1.0, %v12350_v59  ;;  %v15590_v59 = vld [vmem:[#allocation84_spill] sm:$0xff] }
 0x33b   :  { %12351 = vrcp.f32 %v1728_v27  ;;  %10276 = vmatprep.subr.bf16.mxu1 %v15578_v52  ;;  %10306 = vmatprep.subr.bf16.mxu0 %v15561_v21  ;;  %v13577_v27 = vld [vmem:[%s15207_s8] ss:$0 sm:$0xff] }
 0x33c   :  { %2116 = vmatprep.mubr.f32.mxu1 %v15543_v43  ;;  %8576 = vmatprep.mubr.msk.f32.mxu0 %vm12804_vm0, %v15543_v43  ;;  %15582 = vst [vmem:[#allocation61_spill] sm:$0xff] %v13577_v27  ;;  %v15583_v52 = vld [vmem:[#allocation50_spill] sm:$0xff]  ;;  %12353 = vrcp.f32 %v1729_v7 }
 0x33d   :  { %v13580_v49 = vrot.slane %v1045_v30, %v15583_v52  ;;  %v15589_v30 = vld [vmem:[#allocation83_spill] sm:$0xff] }
 0x33e   :  { %10278 = vmatpush1.bf16.msra.mxu1 %v15579_v1  ;;  %10308 = vmatpush3.bf16.msra.mxu0 %v15580_v46  ;;  %v1734_v46 = vadd.f32 %v13577_v27, %v1716_v0  ;;  %v15587_v1 = vld [vmem:[#allocation81_spill] sm:$0xff]  ;;  %v15591_v0 = vld [vmem:[#allocation86_spill] sm:$0xff]  ;;  %v15592_v27 = vld [vmem:[#allocation87_spill] sm:$0xff] }
 0x33f   :  { %10280 = vmatprep.subr.bf16.mxu1 %v15581_v3  ;;  %10309 = vmatprep.subr.bf16.mxu0 %v15561_v21  ;;  %15584 = vst [vmem:[#allocation62_spill] sm:$0xff] %v13580_v49  ;;  %v1576_v32 = vadd.f32 %v13508_v24, %v13580_v49 }
 0x342   :  { %10282 = vmatpush1.bf16.msra.mxu1 %v15585_v61  ;;  %10311 = vmatpush3.bf16.msra.mxu0 %v15586_v42 }
 0x343   :  { %10284 = vmatprep.subr.bf16.mxu1 %v15587_v1  ;;  %10312 = vmatprep.subr.bf16.mxu0 %v15561_v21 }
 0x345   :  { %v12352_v3 = vpop.eup %12351 }
 0x346   :  { %v1735_v6 = vmul.f32 %v12352_v3, %v1734_v46  ;;  %10286 = vmatpush1.bf16.msra.mxu1 %v15588_v31  ;;  %10314 = vmatpush3.bf16.msra.mxu0 %v15589_v30  ;;  %v12354_v24 = vpop.eup %12353  ;;  %v998_v3 = vld [vmem:[#allocation13 + $0x8] sm:$0xff]  ;;  %v1000_v46 = vld [vmem:[#allocation13 + $0x18] sm:$0xff] }
 0x347   :  { %10288 = vmatprep.subr.bf16.mxu1 %v15590_v59  ;;  %10315 = vmatprep.subr.bf16.mxu0 %v15561_v21  ;;  %v1738_v7 = vsub.f32 1.0, %v12354_v24  ;;  %v1740_v59 = vmul.f32 0.0, %v12354_v24  ;;  %v1008_v24 = vld [vmem:[#allocation13 + $0x58] sm:$0xff] }
 0x348   :  { %v1736_v52 = vadd.f32 %v1735_v6, %v1576_v32  ;;  %v1001_v6 = vld [vmem:[#allocation13 + $0x20] sm:$0xff] }
 0x349   :  { %v997_v32 = vld [vmem:[#allocation13] sm:$0xff] }
 0x34a   :  { %12355 = vtanh.f32 %v1736_v52  ;;  %10290 = vmatpush1.bf16.msra.mxu1 %v13426_v15  ;;  %10317 = vmatpush3.bf16.msra.mxu0 %v15591_v0  ;;  %v13605_v52 = vpack.c.bf16 %v1001_v6, %v998_v3  ;;  %v1007_v0 = vld [vmem:[#allocation13 + $0x50] sm:$0xff]  ;;  %v1006_v6 = vld [vmem:[#allocation13 + $0x48] sm:$0xff] }
 0x34b   :  { %10292 = vmatprep.subr.bf16.mxu1 %v15592_v27  ;;  %10318 = vmatprep.subr.bf16.mxu0 %v15561_v21  ;;  %v1004_v27 = vld [vmem:[#allocation13 + $0x38] sm:$0xff] }
 0x34c   :  { %15593 = vst [vmem:[#allocation98_spill] sm:$0xff] %v13605_v52  ;;  %v13617_v3 = vpack.c.bf16 %v1007_v0, %v1004_v27  ;;  %v1011_v0 = vld [vmem:[#allocation13 + $0x70] sm:$0xff] }
 0x34e   :  { %10294 = vmatpush1.bf16.msra.mxu1 %v13436_v28  ;;  %10320 = vmatpush3.bf16.msra.mxu0 %v13439_v26  ;;  %v999_v26 = vld [vmem:[#allocation13 + $0x10] sm:$0xff]  ;;  %15596 = vst [vmem:[#allocation101_spill] sm:$0xff] %v13617_v3 }
 0x34f   :  { %10296 = vmatprep.subr.bf16.mxu1 %v13442_v38  ;;  %10321 = vmatprep.subr.bf16.mxu0 %v15561_v21  ;;  %v1002_v38 = vld [vmem:[#allocation13 + $0x28] sm:$0xff] }
 0x352   :  { %10298 = vmatpush1.bf16.msra.mxu1 %v13446_v55  ;;  %10323 = vmatpush3.bf16.msra.mxu0 %v13449_v2  ;;  %v13609_v2 = vpack.c.bf16 %v1000_v46, %v997_v32  ;;  %v13611_v55 = vpack.c.bf16 %v1002_v38, %v999_v26  ;;  %v1009_v38 = vld [vmem:[#allocation13 + $0x60] sm:$0xff]  ;;  %v1014_v32 = vld [vmem:[#allocation13 + $0x88] sm:$0xff]  ;;  %v1016_v46 = vld [vmem:[#allocation13 + $0x98] sm:$0xff] }
 0x353   :  { %10300 = vmatprep.subr.bf16.mxu1 %v13452_v19  ;;  %10324 = vmatprep.subr.bf16.mxu0 %v15561_v21  ;;  %v1003_v19 = vld [vmem:[#allocation13 + $0x30] sm:$0xff] }
 0x354   :  { %v12356_v28 = vpop.eup %12355  ;;  %15594 = vst [vmem:[#allocation99_spill] sm:$0xff] %v13609_v2  ;;  %15595 = vst [vmem:[#allocation100_spill] sm:$0xff] %v13611_v55 }
 0x355   :  { %v1739_v15 = vmul.f32 %v12356_v28, %v1738_v7  ;;  %v1005_v28 = vld [vmem:[#allocation13 + $0x40] sm:$0xff]  ;;  %v1010_v7 = vld [vmem:[#allocation13 + $0x68] sm:$0xff] }
 0x356   :  { %10302 = vmatpush1.bf16.msra.mxu1 %v13456_v8  ;;  %10326 = vmatpush3.bf16.msra.mxu0 %v13459_v39  ;;  %v1013_v8 = vld [vmem:[#allocation13 + $0x80] sm:$0xff]  ;;  %v13625_v26 = vpack.c.bf16 %v1008_v24, %v1005_v28  ;;  %v1018_v24 = vld [vmem:[#allocation13 + $0xa8] sm:$0xff] }
 0x357   :  { %v13613_v30 = vadd.f32 %v1740_v59, %v1739_v15  ;;  %10328 = vmatprep.subr.bf16.mxu1 %v13605_v52  ;;  %10359 = vmatprep.subr.bf16.mxu0 %v15561_v21  ;;  %v13623_v15 = vpack.c.bf16 %v1006_v6, %v1003_v19  ;;  %v13629_v27 = vpack.c.bf16 %v1013_v8, %v1010_v7  ;;  %v1012_v59 = vld [vmem:[#allocation13 + $0x78] sm:$0xff]  ;;  %v1019_v52 = vld [vmem:[#allocation13 + $0xb0] sm:$0xff]  ;;  %v1017_v7 = vld [vmem:[#allocation13 + $0xa0] sm:$0xff] }
 0x358   :  { %15598 = vst [vmem:[#allocation103_spill] sm:$0xff] %v13625_v26  ;;  %v13636_v19 = vpack.c.bf16 %v1012_v59, %v1009_v38  ;;  %v13638_v6 = vpack.c.bf16 %v1014_v32, %v1011_v0  ;;  %v1015_v8 = vld [vmem:[#allocation13 + $0x90] sm:$0xff]  ;;  %v13642_v28 = vpack.c.bf16 %v1019_v52, %v1016_v46  ;;  %v1021_v0 = vld [vmem:[#allocation13 + $0xc0] sm:$0xff]  ;;  %v1024_v32 = vld [vmem:[#allocation13 + $0xd8] sm:$0xff] }
 0x359   :  { %2117 = vmatmul.mubr.f32.vlgmr.msra.gmra.mrb[32].mxu1 %v13613_v30  ;;  %8577 = vmatmul.mubr.f32.vlgmr.msra.gmra.mrb[22].mxu0 %v13613_v30  ;;  %15597 = vst [vmem:[#allocation102_spill] sm:$0xff] %v13623_v15  ;;  %15599 = vst [vmem:[#allocation104_spill] sm:$0xff] %v13629_v27  ;;  %v13646_v38 = vpack.c.bf16 %v1018_v24, %v1015_v8  ;;  %v1023_v46 = vld [vmem:[#allocation13 + $0xd0] sm:$0xff]  ;;  %v13656_v8 = vpack.c.bf16 %v1024_v32, %v1021_v0  ;;  %v1033_v32 = vld [vmem:[#allocation13 + $0x120] sm:$0xff] }
 0x35a   :  { %10330 = vmatpush1.bf16.msra.mxu1 %v13609_v2  ;;  %10361 = vmatpush3.bf16.msra.mxu0 %v13611_v55  ;;  %15600 = vst [vmem:[#allocation105_spill] sm:$0xff] %v13636_v19  ;;  %15601 = vst [vmem:[#allocation106_spill] sm:$0xff] %v13638_v6  ;;  %v1022_v55 = vld [vmem:[#allocation13 + $0xc8] sm:$0xff]  ;;  %v1025_v2 = vld [vmem:[#allocation13 + $0xe0] sm:$0xff] }
 0x35b   :  { %10332 = vmatprep.subr.bf16.mxu1 %v13617_v3  ;;  %10362 = vmatprep.subr.bf16.mxu0 %v15561_v21  ;;  %15602 = vst [vmem:[#allocation107_spill] sm:$0xff] %v13642_v28  ;;  %v1020_v3 = vld [vmem:[#allocation13 + $0xb8] sm:$0xff]  ;;  %15603 = vst [vmem:[#allocation108_spill] sm:$0xff] %v13646_v38  ;;  %v13652_v52 = vpack.c.bf16 %v1025_v2, %v1022_v55  ;;  %v1027_v24 = vld [vmem:[#allocation13 + $0xf0] sm:$0xff] }
 0x35c   :  { %2279 = vmatprep.mubr.f32.mxu1 %v15543_v43  ;;  %8611 = vmatprep.mubr.msk.f32.mxu0 %vm12804_vm0, %v15543_v43  ;;  %v13648_v59 = vpack.c.bf16 %v1020_v3, %v1017_v7  ;;  %15606 = vst [vmem:[#allocation111_spill] sm:$0xff] %v13656_v8  ;;  %v1030_v2 = vld [vmem:[#allocation13 + $0x108] sm:$0xff]  ;;  %v1029_v7 = vld [vmem:[#allocation13 + $0x100] sm:$0xff] }
 0x35d   :  { %15605 = vst [vmem:[#allocation110_spill] sm:$0xff] %v13652_v52  ;;  %v13666_v0 = vpack.c.bf16 %v1030_v2, %v1027_v24  ;;  %v1039_v2 = vld [vmem:[#allocation13 + $0x150] sm:$0xff] }
 0x35e   :  { %10334 = vmatpush1.bf16.msra.mxu1 %v13623_v15  ;;  %10364 = vmatpush3.bf16.msra.mxu0 %v13625_v26  ;;  %15604 = vst [vmem:[#allocation109_spill] sm:$0xff] %v13648_v59  ;;  %v1028_v26 = vld [vmem:[#allocation13 + $0xf8] sm:$0xff]  ;;  %v1031_v15 = vld [vmem:[#allocation13 + $0x110] sm:$0xff] }
 0x35f   :  { %10336 = vmatprep.subr.bf16.mxu1 %v13629_v27  ;;  %10365 = vmatprep.subr.bf16.mxu0 %v15561_v21  ;;  %v1026_v27 = vld [vmem:[#allocation13 + $0xe8] sm:$0xff]  ;;  %v13662_v55 = vpack.c.bf16 %v1031_v15, %v1028_v26  ;;  %15609 = vst [vmem:[#allocation114_spill] sm:$0xff] %v13666_v0  ;;  %v1036_v26 = vld [vmem:[#allocation13 + $0x138] sm:$0xff] }
 0x360   :  { %v13658_v3 = vpack.c.bf16 %v1026_v27, %v1023_v46  ;;  %v1035_v46 = vld [vmem:[#allocation13 + $0x130] sm:$0xff]  ;;  %v13676_v24 = vpack.c.bf16 %v1036_v26, %v1033_v32  ;;  %v901_v26 = vld [vmem:[#allocation15] sm:$0xff] }
 0x361   :  { %15608 = vst [vmem:[#allocation113_spill] sm:$0xff] %v13662_v55 }
 0x362   :  { %10338 = vmatpush1.bf16.msra.mxu1 %v13636_v19  ;;  %10367 = vmatpush3.bf16.msra.mxu0 %v13638_v6  ;;  %15607 = vst [vmem:[#allocation112_spill] sm:$0xff] %v13658_v3  ;;  %v1034_v6 = vld [vmem:[#allocation13 + $0x128] sm:$0xff]  ;;  %v1037_v19 = vld [vmem:[#allocation13 + $0x140] sm:$0xff]  ;;  %15612 = vst [vmem:[#allocation117_spill] sm:$0xff] %v13676_v24 }
 0x363   :  { %10340 = vmatprep.subr.bf16.mxu1 %v13642_v28  ;;  %10368 = vmatprep.subr.bf16.mxu0 %v15561_v21  ;;  %v1032_v28 = vld [vmem:[#allocation13 + $0x118] sm:$0xff]  ;;  %v13672_v15 = vpack.c.bf16 %v1037_v19, %v1034_v6  ;;  %v1042_v6 = vld [vmem:[#allocation13 + $0x168] sm:$0xff] }
 0x364   :  { %v13668_v27 = vpack.c.bf16 %v1032_v28, %v1029_v7  ;;  %v1041_v7 = vld [vmem:[#allocation13 + $0x160] sm:$0xff]  ;;  %v13686_v32 = vpack.c.bf16 %v1042_v6, %v1039_v2 }
 0x365   :  { %15611 = vst [vmem:[#allocation116_spill] sm:$0xff] %v13672_v15 }
 0x366   :  { %10342 = vmatpush1.bf16.msra.mxu1 %v13646_v38  ;;  %10370 = vmatpush3.bf16.msra.mxu0 %v13648_v59  ;;  %15610 = vst [vmem:[#allocation115_spill] sm:$0xff] %v13668_v27  ;;  %v1040_v59 = vld [vmem:[#allocation13 + $0x158] sm:$0xff]  ;;  %v1043_v38 = vld [vmem:[#allocation13 + $0x170] sm:$0xff]  ;;  %15615 = vst [vmem:[#allocation120_spill] sm:$0xff] %v13686_v32 }
 0x367   :  { %10344 = vmatprep.subr.bf16.mxu1 %v13652_v52  ;;  %10371 = vmatprep.subr.bf16.mxu0 %v15561_v21  ;;  %v1038_v52 = vld [vmem:[#allocation13 + $0x148] sm:$0xff]  ;;  %v13682_v19 = vpack.c.bf16 %v1043_v38, %v1040_v59  ;;  %v904_v59 = vld [vmem:[#allocation15 + $0x18] sm:$0xff] }
 0x368   :  { %v13678_v28 = vpack.c.bf16 %v1038_v52, %v1035_v46  ;;  %v903_v46 = vld [vmem:[#allocation15 + $0x10] sm:$0xff]  ;;  %v13696_v2 = vpack.c.bf16 %v904_v59, %v901_v26  ;;  %v916_v59 = vld [vmem:[#allocation15 + $0x78] sm:$0xff] }
 0x369   :  { %15614 = vst [vmem:[#allocation119_spill] sm:$0xff] %v13682_v19 }
 0x36a   :  { %10346 = vmatpush1.bf16.msra.mxu1 %v13656_v8  ;;  %10373 = vmatpush3.bf16.msra.mxu0 %v13658_v3  ;;  %15613 = vst [vmem:[#allocation118_spill] sm:$0xff] %v13678_v28  ;;  %v902_v3 = vld [vmem:[#allocation15 + $0x8] sm:$0xff]  ;;  %v905_v8 = vld [vmem:[#allocation15 + $0x20] sm:$0xff]  ;;  %15618 = vst [vmem:[#allocation123_spill] sm:$0xff] %v13696_v2 }
 0x36b   :  { %10348 = vmatprep.subr.bf16.mxu1 %v13662_v55  ;;  %10374 = vmatprep.subr.bf16.mxu0 %v15561_v21  ;;  %v1044_v55 = vld [vmem:[#allocation13 + $0x178] sm:$0xff]  ;;  %v13692_v38 = vpack.c.bf16 %v905_v8, %v902_v3  ;;  %v910_v8 = vld [vmem:[#allocation15 + $0x48] sm:$0xff]  ;;  %v909_v3 = vld [vmem:[#allocation15 + $0x40] sm:$0xff] }
 0x36c   :  { %v13688_v52 = vpack.c.bf16 %v1044_v55, %v1041_v7  ;;  %v907_v55 = vld [vmem:[#allocation15 + $0x30] sm:$0xff] }
 0x36d   :  { %15617 = vst [vmem:[#allocation122_spill] sm:$0xff] %v13692_v38  ;;  %v13707_v26 = vpack.c.bf16 %v910_v8, %v907_v55  ;;  %v919_v55 = vld [vmem:[#allocation15 + $0x90] sm:$0xff]  ;;  %v922_v8 = vld [vmem:[#allocation15 + $0xa8] sm:$0xff] }
 0x36e   :  { %10350 = vmatpush1.bf16.msra.mxu1 %v13666_v0  ;;  %10376 = vmatpush3.bf16.msra.mxu0 %v13668_v27  ;;  %15616 = vst [vmem:[#allocation121_spill] sm:$0xff] %v13688_v52  ;;  %v908_v27 = vld [vmem:[#allocation15 + $0x38] sm:$0xff]  ;;  %v911_v0 = vld [vmem:[#allocation15 + $0x50] sm:$0xff] }
 0x36f   :  { %10352 = vmatprep.subr.bf16.mxu1 %v13672_v15  ;;  %10377 = vmatprep.subr.bf16.mxu0 %v15561_v21  ;;  %v906_v15 = vld [vmem:[#allocation15 + $0x28] sm:$0xff]  ;;  %v13701_v7 = vpack.c.bf16 %v911_v0, %v908_v27  ;;  %15621 = vst [vmem:[#allocation126_spill] sm:$0xff] %v13707_v26 }
 0x370   :  { %v13698_v6 = vpack.c.bf16 %v906_v15, %v903_v46  ;;  %v913_v15 = vld [vmem:[#allocation15 + $0x60] sm:$0xff]  ;;  %v915_v46 = vld [vmem:[#allocation15 + $0x70] sm:$0xff] }
 0x371   :  { %15620 = vst [vmem:[#allocation125_spill] sm:$0xff] %v13701_v7 }
 0x372   :  { %10354 = vmatpush1.bf16.msra.mxu1 %v13676_v24  ;;  %10379 = vmatpush3.bf16.msra.mxu0 %v13678_v28  ;;  %15619 = vst [vmem:[#allocation124_spill] sm:$0xff] %v13698_v6  ;;  %v914_v28 = vld [vmem:[#allocation15 + $0x68] sm:$0xff]  ;;  %v917_v24 = vld [vmem:[#allocation15 + $0x80] sm:$0xff] }
 0x373   :  { %10356 = vmatprep.subr.bf16.mxu1 %v13682_v19  ;;  %10380 = vmatprep.subr.bf16.mxu0 %v15561_v21  ;;  %v912_v19 = vld [vmem:[#allocation15 + $0x58] sm:$0xff]  ;;  %v13713_v27 = vpack.c.bf16 %v917_v24, %v914_v28 }
 0x374   :  { %v13710_v0 = vpack.c.bf16 %v912_v19, %v909_v3  ;;  %v13720_v19 = vpack.c.bf16 %v916_v59, %v913_v15  ;;  %v921_v3 = vld [vmem:[#allocation15 + $0xa0] sm:$0xff]  ;;  %v13730_v15 = vpack.c.bf16 %v922_v8, %v919_v55  ;;  %v931_v8 = vld [vmem:[#allocation15 + $0xf0] sm:$0xff] }
 0x375   :  { %15623 = vst [vmem:[#allocation128_spill] sm:$0xff] %v13713_v27  ;;  %v925_v59 = vld [vmem:[#allocation15 + $0xc0] sm:$0xff] }
 0x376   :  { %10358 = vmatpush1.bf16.msra.mxu1 %v13686_v32  ;;  %10382 = vmatpush3.bf16.msra.mxu0 %v13688_v52  ;;  %15622 = vst [vmem:[#allocation127_spill] sm:$0xff] %v13710_v0  ;;  %v920_v52 = vld [vmem:[#allocation15 + $0x98] sm:$0xff]  ;;  %v923_v32 = vld [vmem:[#allocation15 + $0xb0] sm:$0xff]  ;;  %15624 = vst [vmem:[#allocation129_spill] sm:$0xff] %v13720_v19 }
 0x377   :  { %10384 = vmatprep.subr.bf16.mxu1 %v13692_v38  ;;  %10415 = vmatprep.subr.bf16.mxu0 %v15561_v21  ;;  %v918_v38 = vld [vmem:[#allocation15 + $0x88] sm:$0xff]  ;;  %v13726_v28 = vpack.c.bf16 %v923_v32, %v920_v52  ;;  %15627 = vst [vmem:[#allocation132_spill] sm:$0xff] %v13730_v15  ;;  %v928_v52 = vld [vmem:[#allocation15 + $0xd8] sm:$0xff] }
 0x378   :  { %v13723_v24 = vpack.c.bf16 %v918_v38, %v915_v46  ;;  %v927_v46 = vld [vmem:[#allocation15 + $0xd0] sm:$0xff]  ;;  %v13740_v55 = vpack.c.bf16 %v928_v52, %v925_v59  ;;  %v937_v52 = vld [vmem:[#allocation15 + $0x120] sm:$0xff] }
 0x379   :  { %2280 = vmatmul.mubr.f32.vlgmr.msra.gmra.mrb[34].mxu1 %v13613_v30  ;;  %8612 = vmatmul.mubr.f32.vlgmr.msra.gmra.mrb[24].mxu0 %v13613_v30  ;;  %15626 = vst [vmem:[#allocation131_spill] sm:$0xff] %v13726_v28 }
 0x37a   :  { %10386 = vmatpush1.bf16.msra.mxu1 %v13696_v2  ;;  %10417 = vmatpush3.bf16.msra.mxu0 %v13698_v6  ;;  %15625 = vst [vmem:[#allocation130_spill] sm:$0xff] %v13723_v24  ;;  %v926_v6 = vld [vmem:[#allocation15 + $0xc8] sm:$0xff]  ;;  %v929_v2 = vld [vmem:[#allocation15 + $0xe0] sm:$0xff]  ;;  %15630 = vst [vmem:[#allocation135_spill] sm:$0xff] %v13740_v55 }
 0x37b   :  { %10388 = vmatprep.subr.bf16.mxu1 %v13701_v7  ;;  %10418 = vmatprep.subr.bf16.mxu0 %v15561_v21  ;;  %v924_v7 = vld [vmem:[#allocation15 + $0xb8] sm:$0xff]  ;;  %v13736_v32 = vpack.c.bf16 %v929_v2, %v926_v6  ;;  %v934_v6 = vld [vmem:[#allocation15 + $0x108] sm:$0xff] }
 0x37c   :  { %2420 = vmatprep.mubr.f32.mxu1 %v15543_v43  ;;  %8646 = vmatprep.mubr.msk.f32.mxu0 %vm12804_vm0, %v15543_v43  ;;  %v13733_v38 = vpack.c.bf16 %v924_v7, %v921_v3  ;;  %v933_v3 = vld [vmem:[#allocation15 + $0x100] sm:$0xff]  ;;  %v13750_v59 = vpack.c.bf16 %v934_v6, %v931_v8  ;;  %v943_v6 = vld [vmem:[#allocation15 + $0x150] sm:$0xff] }
 0x37d   :  { %15629 = vst [vmem:[#allocation134_spill] sm:$0xff] %v13736_v32 }
 0x37e   :  { %10390 = vmatpush1.bf16.msra.mxu1 %v13707_v26  ;;  %10420 = vmatpush3.bf16.msra.mxu0 %v13710_v0  ;;  %15628 = vst [vmem:[#allocation133_spill] sm:$0xff] %v13733_v38  ;;  %v932_v0 = vld [vmem:[#allocation15 + $0xf8] sm:$0xff]  ;;  %v935_v26 = vld [vmem:[#allocation15 + $0x110] sm:$0xff]  ;;  %15633 = vst [vmem:[#allocation138_spill] sm:$0xff] %v13750_v59 }
 0x37f   :  { %10392 = vmatprep.subr.bf16.mxu1 %v13713_v27  ;;  %10421 = vmatprep.subr.bf16.mxu0 %v15561_v21  ;;  %v930_v27 = vld [vmem:[#allocation15 + $0xe8] sm:$0xff]  ;;  %v13746_v2 = vpack.c.bf16 %v935_v26, %v932_v0  ;;  %v940_v0 = vld [vmem:[#allocation15 + $0x138] sm:$0xff] }
 0x380   :  { %v13743_v7 = vpack.c.bf16 %v930_v27, %v927_v46  ;;  %v939_v46 = vld [vmem:[#allocation15 + $0x130] sm:$0xff]  ;;  %v13760_v8 = vpack.c.bf16 %v940_v0, %v937_v52  ;;  %v15645_v0 = vld [vmem:[#allocation49_spill] sm:$0xff] }
 0x381   :  { %15632 = vst [vmem:[#allocation137_spill] sm:$0xff] %v13746_v2 }
 0x382   :  { %10394 = vmatpush1.bf16.msra.mxu1 %v13720_v19  ;;  %10423 = vmatpush3.bf16.msra.mxu0 %v13723_v24  ;;  %15631 = vst [vmem:[#allocation136_spill] sm:$0xff] %v13743_v7  ;;  %v938_v24 = vld [vmem:[#allocation15 + $0x128] sm:$0xff]  ;;  %v941_v19 = vld [vmem:[#allocation15 + $0x140] sm:$0xff]  ;;  %15636 = vst [vmem:[#allocation141_spill] sm:$0xff] %v13760_v8 }
 0x383   :  { %10396 = vmatprep.subr.bf16.mxu1 %v13726_v28  ;;  %10424 = vmatprep.subr.bf16.mxu0 %v15561_v21  ;;  %v936_v28 = vld [vmem:[#allocation15 + $0x118] sm:$0xff]  ;;  %v13756_v26 = vpack.c.bf16 %v941_v19, %v938_v24  ;;  %v946_v24 = vld [vmem:[#allocation15 + $0x168] sm:$0xff] }
 0x384   :  { %v13753_v27 = vpack.c.bf16 %v936_v28, %v933_v3  ;;  %v945_v3 = vld [vmem:[#allocation15 + $0x160] sm:$0xff] }
 0x385   :  { %15635 = vst [vmem:[#allocation140_spill] sm:$0xff] %v13756_v26 }
 0x386   :  { %10398 = vmatpush1.bf16.msra.mxu1 %v13730_v15  ;;  %10426 = vmatpush3.bf16.msra.mxu0 %v13733_v38  ;;  %15634 = vst [vmem:[#allocation139_spill] sm:$0xff] %v13753_v27  ;;  %v944_v38 = vld [vmem:[#allocation15 + $0x158] sm:$0xff]  ;;  %v947_v15 = vld [vmem:[#allocation15 + $0x170] sm:$0xff] }
 0x387   :  { %10400 = vmatprep.subr.bf16.mxu1 %v13736_v32  ;;  %10427 = vmatprep.subr.bf16.mxu0 %v15561_v21  ;;  %v942_v32 = vld [vmem:[#allocation15 + $0x148] sm:$0xff]  ;;  %v13766_v19 = vpack.c.bf16 %v947_v15, %v944_v38  ;;  %v15641_v15 = vld [vmem:[#allocation36_spill] sm:$0xff] }
 0x388   :  { %v13763_v28 = vpack.c.bf16 %v942_v32, %v939_v46  ;;  %v15642_v38 = vld [vmem:[#allocation47_spill] sm:$0xff]  ;;  %v15643_v32 = vld [vmem:[#allocation48_spill] sm:$0xff] }
 0x389   :  { %15638 = vst [vmem:[#allocation143_spill] sm:$0xff] %v13766_v19 }
 0x38a   :  { %10402 = vmatpush1.bf16.msra.mxu1 %v13740_v55  ;;  %10429 = vmatpush3.bf16.msra.mxu0 %v13743_v7  ;;  %15637 = vst [vmem:[#allocation142_spill] sm:$0xff] %v13763_v28  ;;  %v13770_v7 = vpack.c.bf16 %v946_v24, %v943_v6  ;;  %v15646_v24 = vld [vmem:[#allocation59_spill] sm:$0xff] }
 0x38b   :  { %10404 = vmatprep.subr.bf16.mxu1 %v13746_v2  ;;  %10430 = vmatprep.subr.bf16.mxu0 %v15561_v21  ;;  %v948_v2 = vld [vmem:[#allocation15 + $0x178] sm:$0xff] }
 0x38c   :  { %15639 = vst [vmem:[#allocation144_spill] sm:$0xff] %v13770_v7  ;;  %v13773_v52 = vpack.c.bf16 %v948_v2, %v945_v3  ;;  %v15644_v2 = vld [vmem:[#allocation39_spill] sm:$0xff] }
 0x38e   :  { %10406 = vmatpush1.bf16.msra.mxu1 %v13750_v59  ;;  %10432 = vmatpush3.bf16.msra.mxu0 %v13753_v27  ;;  %15640 = vst [vmem:[#allocation145_spill] sm:$0xff] %v13773_v52 }
 0x38f   :  { %10408 = vmatprep.subr.bf16.mxu1 %v13756_v26  ;;  %10433 = vmatprep.subr.bf16.mxu0 %v15561_v21 }
 0x392   :  { %10410 = vmatpush1.bf16.msra.mxu1 %v13760_v8  ;;  %10435 = vmatpush3.bf16.msra.mxu0 %v13763_v28 }
 0x393   :  { %10412 = vmatprep.subr.bf16.mxu1 %v13766_v19  ;;  %10436 = vmatprep.subr.bf16.mxu0 %v15561_v21 }
 0x396   :  { %10414 = vmatpush1.bf16.msra.mxu1 %v13770_v7  ;;  %10438 = vmatpush3.bf16.msra.mxu0 %v13773_v52 }
 0x397   :  { %10440 = vmatprep.subr.bf16.mxu0 %v13135_v5  ;;  %10471 = vmatprep.subr.bf16.mxu1 %v15561_v21 }
 0x399   :  { %2421 = vmatmul.mubr.f32.vlgmr.msra.gmra.mrb[34].mxu1 %v15543_v43  ;;  %8647 = vmatmul.mubr.f32.vlgmr.msra.gmra.mrb[26].mxu0 %v15543_v43 }
 0x39a   :  { %10442 = vmatpush1.bf16.msra.mxu0 %v13143_v63  ;;  %10473 = vmatpush3.bf16.msra.mxu1 %v13093_v29 }
 0x39b   :  { %10444 = vmatprep.subr.bf16.mxu0 %v13146_v14  ;;  %10474 = vmatprep.subr.bf16.mxu1 %v15561_v21 }
 0x39c   :  { %2589 = vmatprep.mubr.f32.mxu0 %v15543_v43  ;;  %8681 = vmatprep.mubr.msk.f32.mxu1 %vm12804_vm0, %v15543_v43 }
 0x39e   :  { %10446 = vmatpush1.bf16.msra.mxu0 %v13155_v22  ;;  %10476 = vmatpush3.bf16.msra.mxu1 %v13105_v41 }
 0x39f   :  { %10448 = vmatprep.subr.bf16.mxu0 %v13158_v25  ;;  %10477 = vmatprep.subr.bf16.mxu1 %v15561_v21 }
 0x3a2   :  { %10450 = vmatpush1.bf16.msra.mxu0 %v13167_v34  ;;  %10479 = vmatpush3.bf16.msra.mxu1 %v13117_v53 }
 0x3a3   :  { %10452 = vmatprep.subr.bf16.mxu0 %v13170_v37  ;;  %10480 = vmatprep.subr.bf16.mxu1 %v15561_v21 }
 0x3a6   :  { %10454 = vmatpush1.bf16.msra.mxu0 %v13179_v13  ;;  %10482 = vmatpush3.bf16.msra.mxu1 %v13127_v62 }
 0x3a7   :  { %10456 = vmatprep.subr.bf16.mxu0 %v13182_v44  ;;  %10483 = vmatprep.subr.bf16.mxu1 %v15561_v21 }
 0x3aa   :  { %10458 = vmatpush1.bf16.msra.mxu0 %v13189_v23  ;;  %10485 = vmatpush3.bf16.msra.mxu1 %v13138_v9 }
 0x3ab   :  { %10460 = vmatprep.subr.bf16.mxu0 %v13192_v51  ;;  %10486 = vmatprep.subr.bf16.mxu1 %v15561_v21 }
 0x3ae   :  { %10462 = vmatpush1.bf16.msra.mxu0 %v13202_v33  ;;  %10488 = vmatpush3.bf16.msra.mxu1 %v13149_v18 }
 0x3af   :  { %10464 = vmatprep.subr.bf16.mxu0 %v13205_v57  ;;  %10489 = vmatprep.subr.bf16.mxu1 %v15561_v21 }
 0x3b2   :  { %10466 = vmatpush1.bf16.msra.mxu0 %v13212_v36  ;;  %10491 = vmatpush3.bf16.msra.mxu1 %v15641_v15 }
 0x3b3   :  { %10468 = vmatprep.subr.bf16.mxu0 %v15642_v38  ;;  %10492 = vmatprep.subr.bf16.mxu1 %v15561_v21 }
 0x3b6   :  { %10470 = vmatpush1.bf16.msra.mxu0 %v15643_v32  ;;  %10494 = vmatpush3.bf16.msra.mxu1 %v15644_v2 }
 0x3b7   :  { %10496 = vmatprep.subr.bf16.mxu1 %v15645_v0  ;;  %10527 = vmatprep.subr.bf16.mxu0 %v15561_v21  ;;  %v13823_v0 = vld [vmem:[%s15203_s4] ss:$0 sm:$0xff] }
 0x3ec   :  { %v1814_v46 = vpop.f32.mrb[4].mxu0  ;;  %v1885_v6 = vpop.f32.mrb[30].mxu1 }
 0x3ed   :  { %v12203_v3 = vadd.f32 %v1814_v46, %v15646_v24  ;;  %v1816_v57 = vpop.f32.mrb[5].mxu0  ;;  %v8508_v36 = vpop.f32.mrb[31].mxu1  ;;  %v1903_v46 = vadd.f32 %v13823_v0, %v1885_v6 }
 0x3ee   :  { %v12204_v15 = vadd.f32 %v1816_v57, %v13287_v54 }
 0x3ef   :  { %v7468_v18 = vmul.f32 -1.442695, %v12203_v3  ;;  %v15647_v3 = vld [vmem:[#allocation52_spill] sm:$0xff] }
 0x3f0   :  { %v7469_v38 = vmul.f32 -1.442695, %v12204_v15 }
 0x3f1   :  { %12357 = vpow2.f32 %v7468_v18 }
 0x3f2   :  { %12359 = vpow2.f32 %v7469_v38 }
 0x3fb   :  { %v12358_v33 = vpop.eup %12357 }
 0x3fc   :  { %v1897_v32 = vadd.f32 1.0, %v12358_v33  ;;  %v12360_v2 = vpop.eup %12359 }
 0x3fd   :  { %v1898_v51 = vadd.f32 1.0, %v12360_v2 }
 0x3fe   :  { %12361 = vrcp.f32 %v1897_v32 }
 0x3ff   :  { %12363 = vrcp.f32 %v1898_v51 }
 0x408   :  { %v12362_v24 = vpop.eup %12361 }
 0x409   :  { %v1904_v36 = vmul.f32 %v12362_v24, %v1903_v46  ;;  %v12364_v33 = vpop.eup %12363  ;;  %v15648_v46 = vld [vmem:[#allocation63_spill] sm:$0xff] }
 0x40a   :  { %v1907_v38 = vsub.f32 1.0, %v12364_v33  ;;  %v1909_v54 = vmul.f32 %v12364_v33, %v13511_v35  ;;  %v15651_v33 = vld [vmem:[#allocation65_spill] sm:$0xff] }
 0x40b   :  { %v1905_v57 = vadd.f32 %v1904_v36, %v15647_v3  ;;  %v15649_v3 = vld [vmem:[#allocation97_spill] sm:$0xff] }
 0x40c   :  { %v13827_v18 = vpop.f32.mrb[20].mxu0 }
 0x40d   :  { %12365 = vtanh.f32 %v1905_v57  ;;  %v8543_v15 = vpop.f32.mrb[21].mxu0 }
 0x40e   :  { %v15650_v15 = vld [vmem:[#allocation64_spill] sm:$0xff] }
 0x417   :  { %v12366_v32 = vpop.eup %12365 }
 0x418   :  { %v1908_v2 = vmul.f32 %v12366_v32, %v1907_v38  ;;  %v15652_v38 = vld [vmem:[#allocation66_spill] sm:$0xff] }
 0x41a   :  { %v13830_v9 = vadd.f32 %v1909_v54, %v1908_v2  ;;  %v15653_v2 = vld [vmem:[#allocation67_spill] sm:$0xff] }
 0x41c   :  { %2590 = vmatmul.mubr.f32.vlgmr.msra.gmra.mrb[6].mxu0 %v13830_v9  ;;  %8682 = vmatmul.mubr.f32.vlgmr.msra.gmra.mrb[36].mxu1 %v13830_v9 }
 0x41d   :  { %10498 = vmatpush1.bf16.msra.mxu1 %v13297_v56  ;;  %10529 = vmatpush3.bf16.msra.mxu0 %v13299_v58 }
 0x41e   :  { %10500 = vmatprep.subr.bf16.mxu1 %v13303_v17  ;;  %10530 = vmatprep.subr.bf16.mxu0 %v15561_v21 }
 0x41f   :  { %2752 = vmatprep.mubr.f32.mxu1 %v15543_v43  ;;  %8716 = vmatprep.mubr.msk.f32.mxu0 %vm12804_vm0, %v15543_v43 }
 0x421   :  { %10502 = vmatpush1.bf16.msra.mxu1 %v13309_v47  ;;  %10532 = vmatpush3.bf16.msra.mxu0 %v13311_v45 }
 0x422   :  { %10504 = vmatprep.subr.bf16.mxu1 %v13315_v11  ;;  %10533 = vmatprep.subr.bf16.mxu0 %v15561_v21 }
 0x425   :  { %10506 = vmatpush1.bf16.msra.mxu1 %v13322_v20  ;;  %10535 = vmatpush3.bf16.msra.mxu0 %v13324_v48 }
 0x426   :  { %10508 = vmatprep.subr.bf16.mxu1 %v13328_v50  ;;  %10536 = vmatprep.subr.bf16.mxu0 %v15561_v21 }
 0x429   :  { %10510 = vmatpush1.bf16.msra.mxu1 %v13332_v16  ;;  %10538 = vmatpush3.bf16.msra.mxu0 %v13334_v4 }
 0x42a   :  { %10512 = vmatprep.subr.bf16.mxu1 %v13338_v10  ;;  %10539 = vmatprep.subr.bf16.mxu0 %v15561_v21 }
 0x42c   :  { %v2118_v51 = vpop.f32.mrb[32].mxu1  ;;  %v2189_v54 = vpop.f32.mrb[22].mxu0 }
 0x42d   :  { %v12217_v35 = vadd.f32 %v2118_v51, %v13536_v40  ;;  %v2120_v6 = vpop.f32.mrb[33].mxu1  ;;  %v8578_v24 = vpop.f32.mrb[23].mxu0  ;;  %10514 = vmatpush1.bf16.msra.mxu1 %v15564_v12  ;;  %10541 = vmatpush3.bf16.msra.mxu0 %v15565_v60  ;;  %v15654_v51 = vld [vmem:[#allocation68_spill] sm:$0xff] }
 0x42e   :  { %10516 = vmatprep.subr.bf16.mxu1 %v15648_v46  ;;  %10542 = vmatprep.subr.bf16.mxu0 %v15561_v21  ;;  %v12218_v57 = vadd.f32 %v2120_v6, %v15649_v3  ;;  %v15655_v24 = vld [vmem:[#allocation69_spill] sm:$0xff]  ;;  %v15657_v6 = vld [vmem:[#allocation71_spill] sm:$0xff] }
 0x42f   :  { %v7470_v36 = vmul.f32 -1.442695, %v12217_v35  ;;  %v15656_v35 = vld [vmem:[#allocation70_spill] sm:$0xff] }
 0x430   :  { %v7471_v32 = vmul.f32 -1.442695, %v12218_v57  ;;  %v15659_v57 = vld [vmem:[#allocation73_spill] sm:$0xff] }
 0x431   :  { %12367 = vpow2.f32 %v7470_v36  ;;  %10518 = vmatpush1.bf16.msra.mxu1 %v15650_v15  ;;  %10544 = vmatpush3.bf16.msra.mxu0 %v15651_v33  ;;  %v15658_v36 = vld [vmem:[#allocation72_spill] sm:$0xff] }
 0x432   :  { %10520 = vmatprep.subr.bf16.mxu1 %v15652_v38  ;;  %10545 = vmatprep.subr.bf16.mxu0 %v15561_v21  ;;  %12369 = vpow2.f32 %v7471_v32  ;;  %v15661_v32 = vld [vmem:[#allocation75_spill] sm:$0xff] }
 0x435   :  { %10522 = vmatpush1.bf16.msra.mxu1 %v15653_v2  ;;  %10547 = vmatpush3.bf16.msra.mxu0 %v15654_v51  ;;  %v15699_v51 = vld [vmem:[#allocation116_spill] sm:$0xff] }
 0x436   :  { %10524 = vmatprep.subr.bf16.mxu1 %v15655_v24  ;;  %10548 = vmatprep.subr.bf16.mxu0 %v15561_v21  ;;  %v15660_v24 = vld [vmem:[#allocation74_spill] sm:$0xff] }
 0x439   :  { %10526 = vmatpush1.bf16.msra.mxu1 %v15656_v35  ;;  %10550 = vmatpush3.bf16.msra.mxu0 %v15657_v6  ;;  %v15664_v35 = vld [vmem:[#allocation78_spill] sm:$0xff] }
 0x43a   :  { %10552 = vmatprep.subr.bf16.mxu1 %v15658_v36  ;;  %10583 = vmatprep.subr.bf16.mxu0 %v15561_v21  ;;  %v15662_v36 = vld [vmem:[#allocation76_spill] sm:$0xff] }
 0x43b   :  { %v12368_v38 = vpop.eup %12367 }
 0x43c   :  { %v2201_v33 = vadd.f32 1.0, %v12368_v38  ;;  %2753 = vmatmul.mubr.f32.vlgmr.msra.gmra.mrb[38].mxu1 %v13830_v9  ;;  %8717 = vmatmul.mubr.f32.vlgmr.msra.gmra.mrb[28].mxu0 %v13830_v9  ;;  %v15663_v38 = vld [vmem:[#allocation77_spill] sm:$0xff]  ;;  %v12370_v6 = vpop.eup %12369 }
 0x43d   :  { %10554 = vmatpush1.bf16.msra.mxu1 %v15659_v57  ;;  %10585 = vmatpush3.bf16.msra.mxu0 %v15660_v24  ;;  %v2202_v24 = vadd.f32 1.0, %v12370_v6  ;;  %v15667_v6 = vld [vmem:[#allocation84_spill] sm:$0xff] }
 0x43e   :  { %12371 = vrcp.f32 %v2201_v33  ;;  %10556 = vmatprep.subr.bf16.mxu1 %v15661_v32  ;;  %10586 = vmatprep.subr.bf16.mxu0 %v15561_v21  ;;  %v15665_v33 = vld [vmem:[#allocation61_spill] sm:$0xff] }
 0x43f   :  { %2893 = vmatprep.mubr.f32.mxu1 %v15543_v43  ;;  %8751 = vmatprep.mubr.msk.f32.mxu0 %vm12804_vm0, %v15543_v43  ;;  %v2207_v32 = vadd.f32 %v15665_v33, %v2189_v54  ;;  %12373 = vrcp.f32 %v2202_v24  ;;  %v15668_v54 = vld [vmem:[#allocation85_spill] sm:$0xff]  ;;  %v15669_v33 = vld [vmem:[#allocation86_spill] sm:$0xff]  ;;  %v15671_v24 = vld [vmem:[#allocation88_spill] sm:$0xff] }
 0x441   :  { %10558 = vmatpush1.bf16.msra.mxu1 %v15662_v36  ;;  %10588 = vmatpush3.bf16.msra.mxu0 %v15663_v38  ;;  %v2049_v38 = vadd.f32 %v13827_v18, %v13580_v49  ;;  %v15670_v18 = vld [vmem:[#allocation87_spill] sm:$0xff]  ;;  %v15697_v49 = vld [vmem:[#allocation114_spill] sm:$0xff] }
 0x442   :  { %10560 = vmatprep.subr.bf16.mxu1 %v15664_v35  ;;  %10589 = vmatprep.subr.bf16.mxu0 %v15561_v21  ;;  %v15666_v35 = vld [vmem:[#allocation83_spill] sm:$0xff] }
 0x445   :  { %10562 = vmatpush1.bf16.msra.mxu1 %v15585_v61  ;;  %10591 = vmatpush3.bf16.msra.mxu0 %v15586_v42 }
 0x446   :  { %10564 = vmatprep.subr.bf16.mxu1 %v15587_v1  ;;  %10592 = vmatprep.subr.bf16.mxu0 %v15561_v21 }
 0x448   :  { %v12372_v57 = vpop.eup %12371 }
 0x449   :  { %v2208_v36 = vmul.f32 %v12372_v57, %v2207_v32  ;;  %10566 = vmatpush1.bf16.msra.mxu1 %v15588_v31  ;;  %10594 = vmatpush3.bf16.msra.mxu0 %v15666_v35  ;;  %v15672_v57 = vld [vmem:[#allocation89_spill] sm:$0xff]  ;;  %v15673_v32 = vld [vmem:[#allocation90_spill] sm:$0xff]  ;;  %v15694_v35 = vld [vmem:[#allocation111_spill] sm:$0xff] }
 0x44a   :  { %10568 = vmatprep.subr.bf16.mxu1 %v15667_v6  ;;  %10595 = vmatprep.subr.bf16.mxu0 %v15561_v21  ;;  %v15677_v6 = vld [vmem:[#allocation94_spill] sm:$0xff]  ;;  %v15696_v31 = vld [vmem:[#allocation113_spill] sm:$0xff] }
 0x44b   :  { %v2209_v42 = vadd.f32 %v2208_v36, %v2049_v38  ;;  %v12374_v36 = vpop.eup %12373  ;;  %v15674_v38 = vld [vmem:[#allocation91_spill] sm:$0xff] }
 0x44c   :  { %v13895_v1 = vpop.f32.mrb[24].mxu0 }
 0x44d   :  { %12375 = vtanh.f32 %v2209_v42  ;;  %v8613_v61 = vpop.f32.mrb[25].mxu0  ;;  %10570 = vmatpush1.bf16.msra.mxu1 %v15668_v54  ;;  %10597 = vmatpush3.bf16.msra.mxu0 %v15669_v33  ;;  %v15675_v42 = vld [vmem:[#allocation92_spill] sm:$0xff]  ;;  %v15676_v54 = vld [vmem:[#allocation93_spill] sm:$0xff] }
 0x44e   :  { %10572 = vmatprep.subr.bf16.mxu1 %v15670_v18  ;;  %10598 = vmatprep.subr.bf16.mxu0 %v15561_v21  ;;  %v2211_v61 = vsub.f32 1.0, %v12374_v36 }
 0x451   :  { %10574 = vmatpush1.bf16.msra.mxu1 %v15671_v24  ;;  %10600 = vmatpush3.bf16.msra.mxu0 %v15672_v57  ;;  %v2213_v24 = vmul.f32 %v12374_v36, %v13613_v30  ;;  %v15678_v57 = vld [vmem:[#allocation98_spill] sm:$0xff]  ;;  %v15685_v36 = vld [vmem:[#allocation105_spill] sm:$0xff] }
 0x452   :  { %10576 = vmatprep.subr.bf16.mxu1 %v15673_v32  ;;  %10601 = vmatprep.subr.bf16.mxu0 %v15561_v21  ;;  %v15682_v30 = vld [vmem:[#allocation102_spill] sm:$0xff] }
 0x455   :  { %10578 = vmatpush1.bf16.msra.mxu1 %v15674_v38  ;;  %10603 = vmatpush3.bf16.msra.mxu0 %v15675_v42  ;;  %v15680_v42 = vld [vmem:[#allocation100_spill] sm:$0xff] }
 0x456   :  { %10580 = vmatprep.subr.bf16.mxu1 %v15676_v54  ;;  %10604 = vmatprep.subr.bf16.mxu0 %v15561_v21  ;;  %v15679_v54 = vld [vmem:[#allocation99_spill] sm:$0xff] }
 0x457   :  { %v12376_v18 = vpop.eup %12375 }
 0x458   :  { %v2212_v33 = vmul.f32 %v12376_v18, %v2211_v61  ;;  %v15681_v18 = vld [vmem:[#allocation101_spill] sm:$0xff]  ;;  %v15686_v61 = vld [vmem:[#allocation106_spill] sm:$0xff] }
 0x459   :  { %10582 = vmatpush1.bf16.msra.mxu1 %v15677_v6  ;;  %10606 = vmatpush3.bf16.msra.mxu0 %v13459_v39 }
 0x45a   :  { %v13912_v32 = vadd.f32 %v2213_v24, %v2212_v33  ;;  %10608 = vmatprep.subr.bf16.mxu1 %v15678_v57  ;;  %10639 = vmatprep.subr.bf16.mxu0 %v15561_v21  ;;  %v15683_v33 = vld [vmem:[#allocation103_spill] sm:$0xff]  ;;  %v15684_v24 = vld [vmem:[#allocation104_spill] sm:$0xff]  ;;  %v15691_v57 = vld [vmem:[#allocation110_spill] sm:$0xff] }
 0x45c   :  { %2894 = vmatmul.mubr.f32.vlgmr.msra.gmra.mrb[38].mxu1 %v13912_v32  ;;  %8752 = vmatmul.mubr.f32.vlgmr.msra.gmra.mrb[30].mxu0 %v13912_v32 }
 0x45d   :  { %10610 = vmatpush1.bf16.msra.mxu1 %v15679_v54  ;;  %10641 = vmatpush3.bf16.msra.mxu0 %v15680_v42  ;;  %v1062_v42 = vld [vmem:[%s15210_s11] sm:$0x7]  ;;  %v15688_v54 = vld [vmem:[#allocation108_spill] sm:$0xff] }
 0x45e   :  { %10612 = vmatprep.subr.bf16.mxu1 %v15681_v18  ;;  %10642 = vmatprep.subr.bf16.mxu0 %v15561_v21  ;;  %v15687_v18 = vld [vmem:[#allocation107_spill] sm:$0xff] }
 0x45f   :  { %3056 = vmatprep.mubr.f32.mxu1 %v15543_v43  ;;  %8786 = vmatprep.mubr.msk.f32.mxu0 %vm12804_vm0, %v15543_v43 }
 0x461   :  { %10614 = vmatpush1.bf16.msra.mxu1 %v15682_v30  ;;  %10644 = vmatpush3.bf16.msra.mxu0 %v15683_v33  ;;  %v15689_v30 = vld [vmem:[#allocation109_spill] sm:$0xff] }
 0x462   :  { %10616 = vmatprep.subr.bf16.mxu1 %v15684_v24  ;;  %10645 = vmatprep.subr.bf16.mxu0 %v15561_v21  ;;  %v15690_v33 = vld [vmem:[#allocation57_spill] sm:$0xff] }
 0x463   :  { %v13939_v24 = vrot.slane %v1062_v42, %v15690_v33 }
 0x465   :  { %10618 = vmatpush1.bf16.msra.mxu1 %v15685_v36  ;;  %10647 = vmatpush3.bf16.msra.mxu0 %v15686_v61  ;;  %v15692_v36 = vld [vmem:[#allocation58_spill] sm:$0xff] }
 0x466   :  { %10620 = vmatprep.subr.bf16.mxu1 %v15687_v18  ;;  %10648 = vmatprep.subr.bf16.mxu0 %v15561_v21  ;;  %v13944_v18 = vrot.slane %v1062_v42, %v15692_v36  ;;  %v15698_v36 = vld [vmem:[#allocation115_spill] sm:$0xff] }
 0x468   :  { %15693 = vst [vmem:[#allocation52_spill] sm:$0xff] %v13944_v18 }
 0x469   :  { %10622 = vmatpush1.bf16.msra.mxu1 %v15688_v54  ;;  %10650 = vmatpush3.bf16.msra.mxu0 %v15689_v30  ;;  %v15695_v54 = vld [vmem:[#allocation112_spill] sm:$0xff] }
 0x46a   :  { %10624 = vmatprep.subr.bf16.mxu1 %v15691_v57  ;;  %10651 = vmatprep.subr.bf16.mxu0 %v15561_v21 }
 0x46c   :  { %v2422_v61 = vpop.f32.mrb[34].mxu1  ;;  %v2493_v39 = vpop.f32.mrb[26].mxu0 }
 0x46d   :  { %v12219_v6 = vadd.f32 %v2422_v61, %v13939_v24  ;;  %v2424_v38 = vpop.f32.mrb[35].mxu1  ;;  %10626 = vmatpush1.bf16.msra.mxu1 %v15694_v35  ;;  %10653 = vmatpush3.bf16.msra.mxu0 %v15695_v54  ;;  %v8648_v30 = vpop.f32.mrb[27].mxu0  ;;  %v15700_v35 = vld [vmem:[#allocation117_spill] sm:$0xff]  ;;  %v15718_v54 = vld [vmem:[#allocation132_spill] sm:$0xff] }
 0x46e   :  { %10628 = vmatprep.subr.bf16.mxu1 %v15696_v31  ;;  %10654 = vmatprep.subr.bf16.mxu0 %v15561_v21  ;;  %v12220_v57 = vadd.f32 %v2424_v38, %v13944_v18  ;;  %v15701_v30 = vld [vmem:[#allocation118_spill] sm:$0xff]  ;;  %v15702_v31 = vld [vmem:[#allocation119_spill] sm:$0xff]  ;;  %v15704_v38 = vld [vmem:[#allocation121_spill] sm:$0xff] }
 0x46f   :  { %v7472_v33 = vmul.f32 -1.442695, %v12219_v6  ;;  %v15703_v6 = vld [vmem:[#allocation120_spill] sm:$0xff] }
 0x470   :  { %v7473_v61 = vmul.f32 -1.442695, %v12220_v57  ;;  %v15706_v57 = vld [vmem:[#allocation123_spill] sm:$0xff] }
 0x471   :  { %12377 = vpow2.f32 %v7472_v33  ;;  %10630 = vmatpush1.bf16.msra.mxu1 %v15697_v49  ;;  %10656 = vmatpush3.bf16.msra.mxu0 %v15698_v36  ;;  %v15705_v33 = vld [vmem:[#allocation122_spill] sm:$0xff] }
 0x472   :  { %10632 = vmatprep.subr.bf16.mxu1 %v15699_v51  ;;  %10657 = vmatprep.subr.bf16.mxu0 %v15561_v21  ;;  %12379 = vpow2.f32 %v7473_v61  ;;  %v15708_v61 = vld [vmem:[#allocation125_spill] sm:$0xff] }
 0x475   :  { %10634 = vmatpush1.bf16.msra.mxu1 %v15700_v35  ;;  %10659 = vmatpush3.bf16.msra.mxu0 %v15701_v30  ;;  %v15715_v30 = vld [vmem:[#allocation129_spill] sm:$0xff]  ;;  %v15716_v35 = vld [vmem:[#allocation130_spill] sm:$0xff] }
 0x476   :  { %10636 = vmatprep.subr.bf16.mxu1 %v15702_v31  ;;  %10660 = vmatprep.subr.bf16.mxu0 %v15561_v21  ;;  %v15707_v31 = vld [vmem:[#allocation124_spill] sm:$0xff] }
 0x479   :  { %10638 = vmatpush1.bf16.msra.mxu1 %v15703_v6  ;;  %10662 = vmatpush3.bf16.msra.mxu0 %v15704_v38  ;;  %v15711_v6 = vld [vmem:[#allocation128_spill] sm:$0xff] }
 0x47a   :  { %10664 = vmatprep.subr.bf16.mxu1 %v15705_v33  ;;  %10695 = vmatprep.subr.bf16.mxu0 %v15561_v21  ;;  %v15709_v33 = vld [vmem:[#allocation126_spill] sm:$0xff] }
 0x47b   :  { %v12378_v51 = vpop.eup %12377 }
 0x47c   :  { %v2505_v36 = vadd.f32 1.0, %v12378_v51  ;;  %3057 = vmatmul.mubr.f32.vlgmr.msra.gmra.mrb[40].mxu1 %v13912_v32  ;;  %8787 = vmatmul.mubr.f32.vlgmr.msra.gmra.mrb[32].mxu0 %v13912_v32  ;;  %v15710_v51 = vld [vmem:[#allocation127_spill] sm:$0xff]  ;;  %v12380_v38 = vpop.eup %12379 }
 0x47d   :  { %10666 = vmatpush1.bf16.msra.mxu1 %v15706_v57  ;;  %10697 = vmatpush3.bf16.msra.mxu0 %v15707_v31  ;;  %v2506_v57 = vadd.f32 1.0, %v12380_v38  ;;  %v15720_v38 = vld [vmem:[#allocation134_spill] sm:$0xff] }
 0x47e   :  { %12381 = vrcp.f32 %v2505_v36  ;;  %10668 = vmatprep.subr.bf16.mxu1 %v15708_v61  ;;  %10698 = vmatprep.subr.bf16.mxu0 %v15561_v21  ;;  %v13980_v36 = vld [vmem:[%s15211_s12] ss:$0 sm:$0xff] }
 0x47f   :  { %3197 = vmatprep.mubr.f32.mxu1 %v15543_v43  ;;  %8821 = vmatprep.mubr.msk.f32.mxu0 %vm12804_vm0, %v15543_v43  ;;  %15712 = vst [vmem:[#allocation63_spill] sm:$0xff] %v13980_v36  ;;  %v15713_v61 = vld [vmem:[#allocation50_spill] sm:$0xff]  ;;  %12383 = vrcp.f32 %v2506_v57 }
 0x480   :  { %v13983_v31 = vrot.slane %v1062_v42, %v15713_v61  ;;  %v15719_v42 = vld [vmem:[#allocation133_spill] sm:$0xff] }
 0x481   :  { %10670 = vmatpush1.bf16.msra.mxu1 %v15709_v33  ;;  %10700 = vmatpush3.bf16.msra.mxu0 %v15710_v51  ;;  %v2511_v51 = vadd.f32 %v13980_v36, %v2493_v39  ;;  %v15717_v33 = vld [vmem:[#allocation131_spill] sm:$0xff]  ;;  %v15721_v39 = vld [vmem:[#allocation136_spill] sm:$0xff]  ;;  %v15722_v36 = vld [vmem:[#allocation137_spill] sm:$0xff] }
 0x482   :  { %10672 = vmatprep.subr.bf16.mxu1 %v15711_v6  ;;  %10701 = vmatprep.subr.bf16.mxu0 %v15561_v21  ;;  %15714 = vst [vmem:[#allocation64_spill] sm:$0xff] %v13983_v31  ;;  %v2353_v49 = vadd.f32 %v13895_v1, %v13983_v31 }
 0x485   :  { %10674 = vmatpush1.bf16.msra.mxu1 %v15715_v30  ;;  %10703 = vmatpush3.bf16.msra.mxu0 %v15716_v35 }
 0x486   :  { %10676 = vmatprep.subr.bf16.mxu1 %v15717_v33  ;;  %10704 = vmatprep.subr.bf16.mxu0 %v15561_v21 }
 0x488   :  { %v12382_v6 = vpop.eup %12381 }
 0x489   :  { %v2512_v18 = vmul.f32 %v12382_v6, %v2511_v51  ;;  %10678 = vmatpush1.bf16.msra.mxu1 %v15718_v54  ;;  %10706 = vmatpush3.bf16.msra.mxu0 %v15719_v42  ;;  %v12384_v1 = vpop.eup %12383 }
 0x48a   :  { %10680 = vmatprep.subr.bf16.mxu1 %v15720_v38  ;;  %10707 = vmatprep.subr.bf16.mxu0 %v15561_v21  ;;  %v2517_v57 = vmul.f32 0.0, %v12384_v1 }
 0x48b   :  { %v2513_v61 = vadd.f32 %v2512_v18, %v2353_v49  ;;  %v2515_v49 = vsub.f32 1.0, %v12384_v1  ;;  %v15724_v1 = vld [vmem:[#allocation43_spill] sm:$0xff] }
 0x48d   :  { %12385 = vtanh.f32 %v2513_v61  ;;  %10682 = vmatpush1.bf16.msra.mxu1 %v13740_v55  ;;  %10709 = vmatpush3.bf16.msra.mxu0 %v15721_v39  ;;  %v15723_v61 = vld [vmem:[#allocation30_spill] sm:$0xff] }
 0x48e   :  { %10684 = vmatprep.subr.bf16.mxu1 %v15722_v36  ;;  %10710 = vmatprep.subr.bf16.mxu0 %v15561_v21 }
 0x491   :  { %10686 = vmatpush1.bf16.msra.mxu1 %v13750_v59  ;;  %10712 = vmatpush3.bf16.msra.mxu0 %v13753_v27 }
 0x492   :  { %10688 = vmatprep.subr.bf16.mxu1 %v13756_v26  ;;  %10713 = vmatprep.subr.bf16.mxu0 %v15561_v21 }
 0x495   :  { %10690 = vmatpush1.bf16.msra.mxu1 %v13760_v8  ;;  %10715 = vmatpush3.bf16.msra.mxu0 %v13763_v28 }
 0x496   :  { %10692 = vmatprep.subr.bf16.mxu1 %v13766_v19  ;;  %10716 = vmatprep.subr.bf16.mxu0 %v15561_v21 }
 0x497   :  { %v12386_v18 = vpop.eup %12385 }
 0x498   :  { %v2516_v6 = vmul.f32 %v12386_v18, %v2515_v49  ;;  %v15725_v49 = vld [vmem:[#allocation44_spill] sm:$0xff]  ;;  %v15726_v18 = vld [vmem:[#allocation33_spill] sm:$0xff] }
 0x499   :  { %10694 = vmatpush1.bf16.msra.mxu1 %v13770_v7  ;;  %10718 = vmatpush3.bf16.msra.mxu0 %v13773_v52 }
 0x49a   :  { %v14010_v51 = vadd.f32 %v2517_v57, %v2516_v6  ;;  %10720 = vmatprep.subr.bf16.mxu0 %v13135_v5  ;;  %10751 = vmatprep.subr.bf16.mxu1 %v15561_v21  ;;  %v15727_v6 = vld [vmem:[#allocation45_spill] sm:$0xff]  ;;  %v15728_v57 = vld [vmem:[#allocation46_spill] sm:$0xff] }
 0x49c   :  { %3198 = vmatmul.mubr.f32.vlgmr.msra.gmra.mrb[40].mxu1 %v14010_v51  ;;  %8822 = vmatmul.mubr.f32.vlgmr.msra.gmra.mrb[34].mxu0 %v14010_v51 }
 0x49d   :  { %10722 = vmatpush1.bf16.msra.mxu0 %v13143_v63  ;;  %10753 = vmatpush3.bf16.msra.mxu1 %v13093_v29  ;;  %v15736_v29 = vld [vmem:[#allocation51_spill] sm:$0xff] }
 0x49e   :  { %10724 = vmatprep.subr.bf16.mxu0 %v13146_v14  ;;  %10754 = vmatprep.subr.bf16.mxu1 %v15561_v21 }
 0x49f   :  { %3366 = vmatprep.mubr.f32.mxu0 %v15543_v43  ;;  %8856 = vmatprep.mubr.msk.f32.mxu1 %vm12804_vm0, %v15543_v43 }
 0x4a1   :  { %10726 = vmatpush1.bf16.msra.mxu0 %v13155_v22  ;;  %10756 = vmatpush3.bf16.msra.mxu1 %v13105_v41 }
 0x4a2   :  { %10728 = vmatprep.subr.bf16.mxu0 %v13158_v25  ;;  %10757 = vmatprep.subr.bf16.mxu1 %v15561_v21 }
 0x4a5   :  { %10730 = vmatpush1.bf16.msra.mxu0 %v13167_v34  ;;  %10759 = vmatpush3.bf16.msra.mxu1 %v13117_v53 }
 0x4a6   :  { %10732 = vmatprep.subr.bf16.mxu0 %v13170_v37  ;;  %10760 = vmatprep.subr.bf16.mxu1 %v15561_v21 }
 0x4a9   :  { %10734 = vmatpush1.bf16.msra.mxu0 %v13179_v13  ;;  %10762 = vmatpush3.bf16.msra.mxu1 %v13127_v62  ;;  %v15730_v62 = vld [vmem:[#allocation47_spill] sm:$0xff] }
 0x4aa   :  { %10736 = vmatprep.subr.bf16.mxu0 %v13182_v44  ;;  %10763 = vmatprep.subr.bf16.mxu1 %v15561_v21  ;;  %v15729_v44 = vld [vmem:[#allocation36_spill] sm:$0xff] }
 0x4ad   :  { %10738 = vmatpush1.bf16.msra.mxu0 %v13189_v23  ;;  %10765 = vmatpush3.bf16.msra.mxu1 %v15723_v61  ;;  %v15731_v61 = vld [vmem:[#allocation48_spill] sm:$0xff]  ;;  %v15733_v23 = vld [vmem:[#allocation49_spill] sm:$0xff] }
 0x4ae   :  { %10740 = vmatprep.subr.bf16.mxu0 %v15724_v1  ;;  %10766 = vmatprep.subr.bf16.mxu1 %v15561_v21  ;;  %v15732_v1 = vld [vmem:[#allocation39_spill] sm:$0xff] }
 0x4b1   :  { %10742 = vmatpush1.bf16.msra.mxu0 %v15725_v49  ;;  %10768 = vmatpush3.bf16.msra.mxu1 %v15726_v18  ;;  %v15734_v49 = vld [vmem:[#allocation59_spill] sm:$0xff] }
 0x4b2   :  { %10744 = vmatprep.subr.bf16.mxu0 %v15727_v6  ;;  %10769 = vmatprep.subr.bf16.mxu1 %v15561_v21 }
 0x4b5   :  { %10746 = vmatpush1.bf16.msra.mxu0 %v15728_v57  ;;  %10771 = vmatpush3.bf16.msra.mxu1 %v15729_v44  ;;  %v15735_v44 = vld [vmem:[#allocation60_spill] sm:$0xff] }
 0x4b6   :  { %10748 = vmatprep.subr.bf16.mxu0 %v15730_v62  ;;  %10772 = vmatprep.subr.bf16.mxu1 %v15561_v21 }
 0x4b9   :  { %10750 = vmatpush1.bf16.msra.mxu0 %v15731_v61  ;;  %10774 = vmatpush3.bf16.msra.mxu1 %v15732_v1 }
 0x4ba   :  { %10776 = vmatprep.subr.bf16.mxu1 %v15733_v23  ;;  %10807 = vmatprep.subr.bf16.mxu0 %v15561_v21 }
 0x4ef   :  { %v2591_v18 = vpop.f32.mrb[6].mxu0  ;;  %v2662_v6 = vpop.f32.mrb[36].mxu1 }
 0x4f0   :  { %v12205_v13 = vadd.f32 %v2591_v18, %v15734_v49  ;;  %v2593_v37 = vpop.f32.mrb[7].mxu0  ;;  %v8683_v57 = vpop.f32.mrb[37].mxu1  ;;  %v2680_v23 = vadd.f32 %v13823_v0, %v2662_v6  ;;  %v15738_v6 = vld [vmem:[#allocation66_spill] sm:$0xff] }
 0x4f1   :  { %v12206_v34 = vadd.f32 %v2593_v37, %v15735_v44 }
 0x4f2   :  { %v7474_v53 = vmul.f32 -1.442695, %v12205_v13 }
 0x4f3   :  { %v7475_v62 = vmul.f32 -1.442695, %v12206_v34 }
 0x4f4   :  { %12387 = vpow2.f32 %v7474_v53 }
 0x4f5   :  { %12389 = vpow2.f32 %v7475_v62 }
 0x4fe   :  { %v12388_v25 = vpop.eup %12387 }
 0x4ff   :  { %v2674_v61 = vadd.f32 1.0, %v12388_v25  ;;  %v12390_v1 = vpop.eup %12389 }
 0x500   :  { %v2675_v41 = vadd.f32 1.0, %v12390_v1  ;;  %v15737_v1 = vld [vmem:[#allocation65_spill] sm:$0xff] }
 0x501   :  { %12391 = vrcp.f32 %v2674_v61 }
 0x502   :  { %12393 = vrcp.f32 %v2675_v41 }
 0x50b   :  { %v12392_v22 = vpop.eup %12391 }
 0x50c   :  { %v2681_v14 = vmul.f32 %v12392_v22, %v2680_v23  ;;  %v12394_v37 = vpop.eup %12393 }
 0x50d   :  { %v2684_v53 = vsub.f32 1.0, %v12394_v37  ;;  %v2686_v25 = vmul.f32 %v12394_v37, %v13830_v9  ;;  %v15741_v37 = vld [vmem:[#allocation70_spill] sm:$0xff] }
 0x50e   :  { %v2682_v18 = vadd.f32 %v2681_v14, %v15736_v29 }
 0x50f   :  { %v14055_v49 = vpop.f32.mrb[28].mxu0 }
 0x510   :  { %12395 = vtanh.f32 %v2682_v18  ;;  %v8718_v13 = vpop.f32.mrb[29].mxu0  ;;  %v15739_v18 = vld [vmem:[#allocation68_spill] sm:$0xff] }
 0x511   :  { %v15740_v13 = vld [vmem:[#allocation69_spill] sm:$0xff] }
 0x51a   :  { %v12396_v34 = vpop.eup %12395 }
 0x51b   :  { %v2685_v62 = vmul.f32 %v12396_v34, %v2684_v53  ;;  %v15742_v53 = vld [vmem:[#allocation71_spill] sm:$0xff]  ;;  %v15743_v34 = vld [vmem:[#allocation72_spill] sm:$0xff] }
 0x51d   :  { %v14058_v61 = vadd.f32 %v2686_v25, %v2685_v62 }
 0x51f   :  { %3367 = vmatmul.mubr.f32.vlgmr.msra.gmra.mrb[8].mxu0 %v14058_v61  ;;  %8857 = vmatmul.mubr.f32.vlgmr.msra.gmra.mrb[42].mxu1 %v14058_v61 }
 0x520   :  { %10778 = vmatpush1.bf16.msra.mxu1 %v13297_v56  ;;  %10809 = vmatpush3.bf16.msra.mxu0 %v13299_v58 }
 0x521   :  { %10780 = vmatprep.subr.bf16.mxu1 %v13303_v17  ;;  %10810 = vmatprep.subr.bf16.mxu0 %v15561_v21 }
 0x522   :  { %3529 = vmatprep.mubr.f32.mxu1 %v15543_v43  ;;  %8891 = vmatprep.mubr.msk.f32.mxu0 %vm12804_vm0, %v15543_v43 }
 0x524   :  { %10782 = vmatpush1.bf16.msra.mxu1 %v13309_v47  ;;  %10812 = vmatpush3.bf16.msra.mxu0 %v13311_v45 }
 0x525   :  { %10784 = vmatprep.subr.bf16.mxu1 %v13315_v11  ;;  %10813 = vmatprep.subr.bf16.mxu0 %v15561_v21 }
 0x528   :  { %10786 = vmatpush1.bf16.msra.mxu1 %v13322_v20  ;;  %10815 = vmatpush3.bf16.msra.mxu0 %v13324_v48 }
 0x529   :  { %10788 = vmatprep.subr.bf16.mxu1 %v13328_v50  ;;  %10816 = vmatprep.subr.bf16.mxu0 %v15561_v21 }
 0x52c   :  { %10790 = vmatpush1.bf16.msra.mxu1 %v13332_v16  ;;  %10818 = vmatpush3.bf16.msra.mxu0 %v13334_v4 }
 0x52d   :  { %10792 = vmatprep.subr.bf16.mxu1 %v13338_v10  ;;  %10819 = vmatprep.subr.bf16.mxu0 %v15561_v21 }
 0x52f   :  { %v2895_v29 = vpop.f32.mrb[38].mxu1  ;;  %v2966_v41 = vpop.f32.mrb[30].mxu0 }
 0x530   :  { %v12221_v9 = vadd.f32 %v2895_v29, %v13536_v40  ;;  %v2897_v14 = vpop.f32.mrb[39].mxu1  ;;  %v8753_v22 = vpop.f32.mrb[31].mxu0  ;;  %10794 = vmatpush1.bf16.msra.mxu1 %v15564_v12  ;;  %10821 = vmatpush3.bf16.msra.mxu0 %v15565_v60  ;;  %v15744_v29 = vld [vmem:[#allocation73_spill] sm:$0xff] }
 0x531   :  { %10796 = vmatprep.subr.bf16.mxu1 %v15648_v46  ;;  %10822 = vmatprep.subr.bf16.mxu0 %v15561_v21  ;;  %v12222_v0 = vadd.f32 %v2897_v14, %v15649_v3  ;;  %v15746_v14 = vld [vmem:[#allocation75_spill] sm:$0xff]  ;;  %v15747_v22 = vld [vmem:[#allocation76_spill] sm:$0xff] }
 0x532   :  { %v7476_v23 = vmul.f32 -1.442695, %v12221_v9  ;;  %v15745_v9 = vld [vmem:[#allocation74_spill] sm:$0xff] }
 0x533   :  { %v7477_v57 = vmul.f32 -1.442695, %v12222_v0 }
 0x534   :  { %12397 = vpow2.f32 %v7476_v23  ;;  %10798 = vmatpush1.bf16.msra.mxu1 %v15650_v15  ;;  %10824 = vmatpush3.bf16.msra.mxu0 %v15737_v1  ;;  %v15748_v23 = vld [vmem:[#allocation77_spill] sm:$0xff] }
 0x535   :  { %10800 = vmatprep.subr.bf16.mxu1 %v15738_v6  ;;  %10825 = vmatprep.subr.bf16.mxu0 %v15561_v21  ;;  %12399 = vpow2.f32 %v7477_v57  ;;  %v15749_v57 = vld [vmem:[#allocation78_spill] sm:$0xff] }
 0x538   :  { %10802 = vmatpush1.bf16.msra.mxu1 %v15653_v2  ;;  %10827 = vmatpush3.bf16.msra.mxu0 %v15739_v18 }
 0x539   :  { %10804 = vmatprep.subr.bf16.mxu1 %v15740_v13  ;;  %10828 = vmatprep.subr.bf16.mxu0 %v15561_v21 }
 0x53c   :  { %10806 = vmatpush1.bf16.msra.mxu1 %v15741_v37  ;;  %10830 = vmatpush3.bf16.msra.mxu0 %v15742_v53 }
 0x53d   :  { %10832 = vmatprep.subr.bf16.mxu1 %v15743_v34  ;;  %10863 = vmatprep.subr.bf16.mxu0 %v15561_v21 }
 0x53e   :  { %v12398_v62 = vpop.eup %12397 }
 0x53f   :  { %v2978_v25 = vadd.f32 1.0, %v12398_v62  ;;  %3530 = vmatmul.mubr.f32.vlgmr.msra.gmra.mrb[44].mxu1 %v14058_v61  ;;  %8892 = vmatmul.mubr.f32.vlgmr.msra.gmra.mrb[36].mxu0 %v14058_v61  ;;  %v12400_v0 = vpop.eup %12399 }
 0x540   :  { %10834 = vmatpush1.bf16.msra.mxu1 %v15744_v29  ;;  %10865 = vmatpush3.bf16.msra.mxu0 %v15745_v9  ;;  %v2979_v62 = vadd.f32 1.0, %v12400_v0  ;;  %v15752_v9 = vld [vmem:[#allocation81_spill] sm:$0xff] }
 0x541   :  { %12401 = vrcp.f32 %v2978_v25  ;;  %10836 = vmatprep.subr.bf16.mxu1 %v15746_v14  ;;  %10866 = vmatprep.subr.bf16.mxu0 %v15561_v21  ;;  %v15750_v25 = vld [vmem:[#allocation79_spill] sm:$0xff]  ;;  %v15751_v14 = vld [vmem:[#allocation80_spill] sm:$0xff] }
 0x542   :  { %3670 = vmatprep.mubr.f32.mxu1 %v15543_v43  ;;  %8926 = vmatprep.mubr.msk.f32.mxu0 %vm12804_vm0, %v15543_v43  ;;  %12403 = vrcp.f32 %v2979_v62  ;;  %v15763_v62 = vld [vmem:[#allocation90_spill] sm:$0xff] }
 0x544   :  { %10838 = vmatpush1.bf16.msra.mxu1 %v15747_v22  ;;  %10868 = vmatpush3.bf16.msra.mxu0 %v15748_v23  ;;  %v14119_v22 = vld [vmem:[%s15207_s8] ss:$0 sm:$0xff] }
 0x545   :  { %10840 = vmatprep.subr.bf16.mxu1 %v15749_v57  ;;  %10869 = vmatprep.subr.bf16.mxu0 %v15561_v21  ;;  %15753 = vst [vmem:[#allocation67_spill] sm:$0xff] %v14119_v22  ;;  %v2984_v23 = vadd.f32 %v14119_v22, %v2966_v41  ;;  %v15754_v57 = vld [vmem:[#allocation62_spill] sm:$0xff]  ;;  %v15758_v41 = vld [vmem:[#allocation85_spill] sm:$0xff] }
 0x546   :  { %v2826_v34 = vadd.f32 %v14055_v49, %v15754_v57  ;;  %v15759_v22 = vld [vmem:[#allocation86_spill] sm:$0xff]  ;;  %v15760_v49 = vld [vmem:[#allocation87_spill] sm:$0xff]  ;;  %v15788_v57 = vld [vmem:[#allocation116_spill] sm:$0xff] }
 0x548   :  { %10842 = vmatpush1.bf16.msra.mxu1 %v15750_v25  ;;  %10871 = vmatpush3.bf16.msra.mxu0 %v15751_v14  ;;  %v15755_v25 = vld [vmem:[#allocation82_spill] sm:$0xff]  ;;  %v15756_v14 = vld [vmem:[#allocation83_spill] sm:$0xff] }
 0x549   :  { %10844 = vmatprep.subr.bf16.mxu1 %v15752_v9  ;;  %10872 = vmatprep.subr.bf16.mxu0 %v15561_v21  ;;  %v15757_v9 = vld [vmem:[#allocation84_spill] sm:$0xff] }
 0x54b   :  { %v12402_v29 = vpop.eup %12401 }
 0x54c   :  { %v2985_v0 = vmul.f32 %v12402_v29, %v2984_v23  ;;  %10846 = vmatpush1.bf16.msra.mxu1 %v15755_v25  ;;  %10874 = vmatpush3.bf16.msra.mxu0 %v15756_v14  ;;  %v15761_v29 = vld [vmem:[#allocation88_spill] sm:$0xff]  ;;  %v15762_v23 = vld [vmem:[#allocation89_spill] sm:$0xff]  ;;  %v15769_v14 = vld [vmem:[#allocation98_spill] sm:$0xff] }
 0x54d   :  { %10848 = vmatprep.subr.bf16.mxu1 %v15757_v9  ;;  %10875 = vmatprep.subr.bf16.mxu0 %v15561_v21  ;;  %v15767_v9 = vld [vmem:[#allocation94_spill] sm:$0xff]  ;;  %v15787_v25 = vld [vmem:[#allocation115_spill] sm:$0xff] }
 0x54e   :  { %v2986_v53 = vadd.f32 %v2985_v0, %v2826_v34  ;;  %v12404_v34 = vpop.eup %12403  ;;  %v15764_v0 = vld [vmem:[#allocation91_spill] sm:$0xff] }
 0x54f   :  { %v14128_v37 = vpop.f32.mrb[32].mxu0 }
 0x550   :  { %12405 = vtanh.f32 %v2986_v53  ;;  %v8788_v13 = vpop.f32.mrb[33].mxu0  ;;  %10850 = vmatpush1.bf16.msra.mxu1 %v15758_v41  ;;  %10877 = vmatpush3.bf16.msra.mxu0 %v15759_v22  ;;  %v2988_v53 = vsub.f32 1.0, %v12404_v34  ;;  %v15766_v41 = vld [vmem:[#allocation93_spill] sm:$0xff] }
 0x551   :  { %10852 = vmatprep.subr.bf16.mxu1 %v15760_v49  ;;  %10878 = vmatprep.subr.bf16.mxu0 %v15561_v21  ;;  %v15765_v13 = vld [vmem:[#allocation92_spill] sm:$0xff] }
 0x554   :  { %10854 = vmatpush1.bf16.msra.mxu1 %v15761_v29  ;;  %10880 = vmatpush3.bf16.msra.mxu0 %v15762_v23  ;;  %v2990_v29 = vmul.f32 %v12404_v34, %v13912_v32  ;;  %v15768_v23 = vld [vmem:[#allocation95_spill] sm:$0xff]  ;;  %v15773_v32 = vld [vmem:[#allocation102_spill] sm:$0xff]  ;;  %v15776_v34 = vld [vmem:[#allocation105_spill] sm:$0xff] }
 0x555   :  { %10856 = vmatprep.subr.bf16.mxu1 %v15763_v62  ;;  %10881 = vmatprep.subr.bf16.mxu0 %v15561_v21 }
 0x558   :  { %10858 = vmatpush1.bf16.msra.mxu1 %v15764_v0  ;;  %10883 = vmatpush3.bf16.msra.mxu0 %v15765_v13  ;;  %v15771_v13 = vld [vmem:[#allocation100_spill] sm:$0xff] }
 0x559   :  { %10860 = vmatprep.subr.bf16.mxu1 %v15766_v41  ;;  %10884 = vmatprep.subr.bf16.mxu0 %v15561_v21  ;;  %v15770_v41 = vld [vmem:[#allocation99_spill] sm:$0xff] }
 0x55a   :  { %v12406_v49 = vpop.eup %12405 }
 0x55b   :  { %v2989_v22 = vmul.f32 %v12406_v49, %v2988_v53  ;;  %v15772_v49 = vld [vmem:[#allocation101_spill] sm:$0xff]  ;;  %v15777_v53 = vld [vmem:[#allocation106_spill] sm:$0xff] }
 0x55c   :  { %10862 = vmatpush1.bf16.msra.mxu1 %v15767_v9  ;;  %10886 = vmatpush3.bf16.msra.mxu0 %v15768_v23  ;;  %v15782_v9 = vld [vmem:[#allocation111_spill] sm:$0xff] }
 0x55d   :  { %v14145_v62 = vadd.f32 %v2990_v29, %v2989_v22  ;;  %10888 = vmatprep.subr.bf16.mxu1 %v15769_v14  ;;  %10919 = vmatprep.subr.bf16.mxu0 %v15561_v21  ;;  %v15774_v22 = vld [vmem:[#allocation103_spill] sm:$0xff]  ;;  %v15775_v29 = vld [vmem:[#allocation104_spill] sm:$0xff]  ;;  %v15781_v14 = vld [vmem:[#allocation110_spill] sm:$0xff] }
 0x55f   :  { %3671 = vmatmul.mubr.f32.vlgmr.msra.gmra.mrb[44].mxu1 %v14145_v62  ;;  %8927 = vmatmul.mubr.f32.vlgmr.msra.gmra.mrb[38].mxu0 %v14145_v62 }
 0x560   :  { %10890 = vmatpush1.bf16.msra.mxu1 %v15770_v41  ;;  %10921 = vmatpush3.bf16.msra.mxu0 %v15771_v13  ;;  %v15779_v13 = vld [vmem:[#allocation108_spill] sm:$0xff]  ;;  %v15780_v41 = vld [vmem:[#allocation109_spill] sm:$0xff] }
 0x561   :  { %10892 = vmatprep.subr.bf16.mxu1 %v15772_v49  ;;  %10922 = vmatprep.subr.bf16.mxu0 %v15561_v21  ;;  %v15778_v49 = vld [vmem:[#allocation107_spill] sm:$0xff] }
 0x562   :  { %3833 = vmatprep.mubr.f32.mxu1 %v15543_v43  ;;  %8961 = vmatprep.mubr.msk.f32.mxu0 %vm12804_vm0, %v15543_v43 }
 0x564   :  { %10894 = vmatpush1.bf16.msra.mxu1 %v15773_v32  ;;  %10924 = vmatpush3.bf16.msra.mxu0 %v15774_v22 }
 0x565   :  { %10896 = vmatprep.subr.bf16.mxu1 %v15775_v29  ;;  %10925 = vmatprep.subr.bf16.mxu0 %v15561_v21 }
 0x568   :  { %10898 = vmatpush1.bf16.msra.mxu1 %v15776_v34  ;;  %10927 = vmatpush3.bf16.msra.mxu0 %v15777_v53  ;;  %v15783_v53 = vld [vmem:[#allocation112_spill] sm:$0xff] }
 0x569   :  { %10900 = vmatprep.subr.bf16.mxu1 %v15778_v49  ;;  %10928 = vmatprep.subr.bf16.mxu0 %v15561_v21  ;;  %v15784_v49 = vld [vmem:[#allocation113_spill] sm:$0xff] }
 0x56c   :  { %10902 = vmatpush1.bf16.msra.mxu1 %v15779_v13  ;;  %10930 = vmatpush3.bf16.msra.mxu0 %v15780_v41  ;;  %v15785_v41 = vld [vmem:[#allocation52_spill] sm:$0xff] }
 0x56d   :  { %10904 = vmatprep.subr.bf16.mxu1 %v15781_v14  ;;  %10931 = vmatprep.subr.bf16.mxu0 %v15561_v21  ;;  %v15786_v14 = vld [vmem:[#allocation114_spill] sm:$0xff] }
 0x56f   :  { %v3199_v22 = vpop.f32.mrb[40].mxu1  ;;  %v3270_v29 = vpop.f32.mrb[34].mxu0 }
 0x570   :  { %v12223_v32 = vadd.f32 %v3199_v22, %v13939_v24  ;;  %v3201_v23 = vpop.f32.mrb[41].mxu1  ;;  %v8823_v34 = vpop.f32.mrb[35].mxu0  ;;  %10906 = vmatpush1.bf16.msra.mxu1 %v15782_v9  ;;  %10933 = vmatpush3.bf16.msra.mxu0 %v15783_v53  ;;  %v15790_v53 = vld [vmem:[#allocation118_spill] sm:$0xff] }
 0x571   :  { %10908 = vmatprep.subr.bf16.mxu1 %v15784_v49  ;;  %10934 = vmatprep.subr.bf16.mxu0 %v15561_v21  ;;  %v12224_v0 = vadd.f32 %v3201_v23, %v15785_v41  ;;  %v15789_v34 = vld [vmem:[#allocation117_spill] sm:$0xff]  ;;  %v15791_v49 = vld [vmem:[#allocation119_spill] sm:$0xff]  ;;  %v15792_v23 = vld [vmem:[#allocation120_spill] sm:$0xff] }
 0x572   :  { %v7478_v13 = vmul.f32 -1.442695, %v12223_v32  ;;  %v15794_v32 = vld [vmem:[#allocation122_spill] sm:$0xff] }
 0x573   :  { %v7479_v22 = vmul.f32 -1.442695, %v12224_v0  ;;  %v15795_v0 = vld [vmem:[#allocation123_spill] sm:$0xff] }
 0x574   :  { %12407 = vpow2.f32 %v7478_v13  ;;  %10910 = vmatpush1.bf16.msra.mxu1 %v15786_v14  ;;  %10936 = vmatpush3.bf16.msra.mxu0 %v15787_v25  ;;  %v15793_v13 = vld [vmem:[#allocation121_spill] sm:$0xff] }
 0x575   :  { %10912 = vmatprep.subr.bf16.mxu1 %v15788_v57  ;;  %10937 = vmatprep.subr.bf16.mxu0 %v15561_v21  ;;  %12409 = vpow2.f32 %v7479_v22  ;;  %v15797_v22 = vld [vmem:[#allocation125_spill] sm:$0xff] }
 0x578   :  { %10914 = vmatpush1.bf16.msra.mxu1 %v15789_v34  ;;  %10939 = vmatpush3.bf16.msra.mxu0 %v15790_v53 }
 0x579   :  { %10916 = vmatprep.subr.bf16.mxu1 %v15791_v49  ;;  %10940 = vmatprep.subr.bf16.mxu0 %v15561_v21  ;;  %v15796_v49 = vld [vmem:[#allocation124_spill] sm:$0xff] }
 0x57c   :  { %10918 = vmatpush1.bf16.msra.mxu1 %v15792_v23  ;;  %10942 = vmatpush3.bf16.msra.mxu0 %v15793_v13  ;;  %v15800_v23 = vld [vmem:[#allocation128_spill] sm:$0xff] }
 0x57d   :  { %10944 = vmatprep.subr.bf16.mxu1 %v15794_v32  ;;  %10975 = vmatprep.subr.bf16.mxu0 %v15561_v21  ;;  %v15798_v32 = vld [vmem:[#allocation126_spill] sm:$0xff] }
 0x57e   :  { %v12408_v57 = vpop.eup %12407 }
 0x57f   :  { %v3282_v25 = vadd.f32 1.0, %v12408_v57  ;;  %3834 = vmatmul.mubr.f32.vlgmr.msra.gmra.mrb[46].mxu1 %v14145_v62  ;;  %8962 = vmatmul.mubr.f32.vlgmr.msra.gmra.mrb[40].mxu0 %v14145_v62  ;;  %v15799_v57 = vld [vmem:[#allocation127_spill] sm:$0xff]  ;;  %v12410_v13 = vpop.eup %12409 }
 0x580   :  { %10946 = vmatpush1.bf16.msra.mxu1 %v15795_v0  ;;  %10977 = vmatpush3.bf16.msra.mxu0 %v15796_v49  ;;  %v3283_v49 = vadd.f32 1.0, %v12410_v13 }
 0x581   :  { %12411 = vrcp.f32 %v3282_v25  ;;  %10948 = vmatprep.subr.bf16.mxu1 %v15797_v22  ;;  %10978 = vmatprep.subr.bf16.mxu0 %v15561_v21  ;;  %v15801_v25 = vld [vmem:[#allocation63_spill] sm:$0xff] }
 0x582   :  { %3974 = vmatprep.mubr.f32.mxu1 %v15543_v43  ;;  %8996 = vmatprep.mubr.msk.f32.mxu0 %vm12804_vm0, %v15543_v43  ;;  %v3288_v22 = vadd.f32 %v15801_v25, %v3270_v29  ;;  %12413 = vrcp.f32 %v3283_v49  ;;  %v15804_v25 = vld [vmem:[#allocation32_spill] sm:$0xff] }
 0x584   :  { %10950 = vmatpush1.bf16.msra.mxu1 %v15798_v32  ;;  %10980 = vmatpush3.bf16.msra.mxu0 %v15799_v57  ;;  %v3130_v57 = vadd.f32 %v14128_v37, %v13983_v31 }
 0x585   :  { %10952 = vmatprep.subr.bf16.mxu1 %v15800_v23  ;;  %10981 = vmatprep.subr.bf16.mxu0 %v15561_v21 }
 0x588   :  { %10954 = vmatpush1.bf16.msra.mxu1 %v15715_v30  ;;  %10983 = vmatpush3.bf16.msra.mxu0 %v15716_v35 }
 0x589   :  { %10956 = vmatprep.subr.bf16.mxu1 %v15717_v33  ;;  %10984 = vmatprep.subr.bf16.mxu0 %v15561_v21 }
 0x58b   :  { %v12412_v0 = vpop.eup %12411 }
 0x58c   :  { %v3289_v32 = vmul.f32 %v12412_v0, %v3288_v22  ;;  %10958 = vmatpush1.bf16.msra.mxu1 %v15718_v54  ;;  %10986 = vmatpush3.bf16.msra.mxu0 %v15719_v42  ;;  %v12414_v37 = vpop.eup %12413 }
 0x58d   :  { %10960 = vmatprep.subr.bf16.mxu1 %v15720_v38  ;;  %10987 = vmatprep.subr.bf16.mxu0 %v15561_v21  ;;  %v3292_v49 = vsub.f32 1.0, %v12414_v37  ;;  %v3294_v0 = vmul.f32 %v12414_v37, %v14010_v51  ;;  %v15805_v51 = vld [vmem:[#allocation34_spill] sm:$0xff]  ;;  %v15807_v37 = vld [vmem:[#allocation35_spill] sm:$0xff] }
 0x58e   :  { %v3290_v13 = vadd.f32 %v3289_v32, %v3130_v57  ;;  %v15803_v57 = vld [vmem:[#allocation25_spill] sm:$0xff] }
 0x590   :  { %12415 = vtanh.f32 %v3290_v13  ;;  %10962 = vmatpush1.bf16.msra.mxu1 %v13740_v55  ;;  %10989 = vmatpush3.bf16.msra.mxu0 %v15721_v39  ;;  %v15806_v13 = vld [vmem:[#allocation26_spill] sm:$0xff] }
 0x591   :  { %10964 = vmatprep.subr.bf16.mxu1 %v15722_v36  ;;  %10990 = vmatprep.subr.bf16.mxu0 %v15561_v21 }
 0x594   :  { %10966 = vmatpush1.bf16.msra.mxu1 %v13750_v59  ;;  %10992 = vmatpush3.bf16.msra.mxu0 %v13753_v27 }
 0x595   :  { %10968 = vmatprep.subr.bf16.mxu1 %v13756_v26  ;;  %10993 = vmatprep.subr.bf16.mxu0 %v15561_v21 }
 0x598   :  { %10970 = vmatpush1.bf16.msra.mxu1 %v13760_v8  ;;  %10995 = vmatpush3.bf16.msra.mxu0 %v13763_v28 }
 0x599   :  { %10972 = vmatprep.subr.bf16.mxu1 %v13766_v19  ;;  %10996 = vmatprep.subr.bf16.mxu0 %v15561_v21 }
 0x59a   :  { %v12416_v29 = vpop.eup %12415 }
 0x59b   :  { %v3293_v32 = vmul.f32 %v12416_v29, %v3292_v49  ;;  %v15808_v49 = vld [vmem:[#allocation37_spill] sm:$0xff]  ;;  %v15809_v29 = vld [vmem:[#allocation27_spill] sm:$0xff] }
 0x59c   :  { %10974 = vmatpush1.bf16.msra.mxu1 %v13770_v7  ;;  %10998 = vmatpush3.bf16.msra.mxu0 %v13773_v52 }
 0x59d   :  { %v14227_v22 = vadd.f32 %v3294_v0, %v3293_v32  ;;  %11000 = vmatprep.subr.bf16.mxu0 %v13135_v5  ;;  %11031 = vmatprep.subr.bf16.mxu1 %v15561_v21  ;;  %v15810_v32 = vld [vmem:[#allocation38_spill] sm:$0xff]  ;;  %v15811_v0 = vld [vmem:[#allocation40_spill] sm:$0xff] }
 0x59f   :  { %15802 = vst [vmem:[#allocation61_spill] sm:$0xff] %v14227_v22  ;;  %3975 = vmatmul.mubr.f32.vlgmr.msra.gmra.mrb[46].mxu1 %v14227_v22  ;;  %8997 = vmatmul.mubr.f32.vlgmr.msra.gmra.mrb[42].mxu0 %v14227_v22 }
 0x5a0   :  { %11002 = vmatpush1.bf16.msra.mxu0 %v13143_v63  ;;  %11033 = vmatpush3.bf16.msra.mxu1 %v15803_v57  ;;  %v15813_v57 = vld [vmem:[#allocation41_spill] sm:$0xff] }
 0x5a1   :  { %11004 = vmatprep.subr.bf16.mxu0 %v15804_v25  ;;  %11034 = vmatprep.subr.bf16.mxu1 %v15561_v21  ;;  %v15812_v25 = vld [vmem:[#allocation28_spill] sm:$0xff] }
 0x5a2   :  { %4143 = vmatprep.mubr.f32.mxu0 %v15543_v43  ;;  %9031 = vmatprep.mubr.msk.f32.mxu1 %vm12804_vm0, %v15543_v43 }
 0x5a4   :  { %11006 = vmatpush1.bf16.msra.mxu0 %v15805_v51  ;;  %11036 = vmatpush3.bf16.msra.mxu1 %v15806_v13  ;;  %v15814_v13 = vld [vmem:[#allocation42_spill] sm:$0xff]  ;;  %v15816_v51 = vld [vmem:[#allocation43_spill] sm:$0xff] }
 0x5a5   :  { %11008 = vmatprep.subr.bf16.mxu0 %v15807_v37  ;;  %11037 = vmatprep.subr.bf16.mxu1 %v15561_v21  ;;  %v15815_v37 = vld [vmem:[#allocation30_spill] sm:$0xff] }
 0x5a8   :  { %11010 = vmatpush1.bf16.msra.mxu0 %v15808_v49  ;;  %11039 = vmatpush3.bf16.msra.mxu1 %v15809_v29  ;;  %v15817_v29 = vld [vmem:[#allocation44_spill] sm:$0xff]  ;;  %v15819_v49 = vld [vmem:[#allocation45_spill] sm:$0xff] }
 0x5a9   :  { %11012 = vmatprep.subr.bf16.mxu0 %v15810_v32  ;;  %11040 = vmatprep.subr.bf16.mxu1 %v15561_v21  ;;  %v15818_v32 = vld [vmem:[#allocation33_spill] sm:$0xff] }
 0x5ac   :  { %11014 = vmatpush1.bf16.msra.mxu0 %v15811_v0  ;;  %11042 = vmatpush3.bf16.msra.mxu1 %v15812_v25  ;;  %v15820_v25 = vld [vmem:[#allocation46_spill] sm:$0xff]  ;;  %v15822_v0 = vld [vmem:[#allocation47_spill] sm:$0xff] }
 0x5ad   :  { %11016 = vmatprep.subr.bf16.mxu0 %v15813_v57  ;;  %11043 = vmatprep.subr.bf16.mxu1 %v15561_v21  ;;  %v15821_v57 = vld [vmem:[#allocation36_spill] sm:$0xff] }
 0x5b0   :  { %11018 = vmatpush1.bf16.msra.mxu0 %v15814_v13  ;;  %11045 = vmatpush3.bf16.msra.mxu1 %v15815_v37  ;;  %v15823_v37 = vld [vmem:[#allocation48_spill] sm:$0xff]  ;;  %v15825_v13 = vld [vmem:[#allocation49_spill] sm:$0xff] }
 0x5b1   :  { %11020 = vmatprep.subr.bf16.mxu0 %v15816_v51  ;;  %11046 = vmatprep.subr.bf16.mxu1 %v15561_v21  ;;  %v15824_v51 = vld [vmem:[#allocation39_spill] sm:$0xff] }
 0x5b4   :  { %11022 = vmatpush1.bf16.msra.mxu0 %v15817_v29  ;;  %11048 = vmatpush3.bf16.msra.mxu1 %v15818_v32  ;;  %v15826_v29 = vld [vmem:[#allocation59_spill] sm:$0xff] }
 0x5b5   :  { %11024 = vmatprep.subr.bf16.mxu0 %v15819_v49  ;;  %11049 = vmatprep.subr.bf16.mxu1 %v15561_v21 }
 0x5b8   :  { %11026 = vmatpush1.bf16.msra.mxu0 %v15820_v25  ;;  %11051 = vmatpush3.bf16.msra.mxu1 %v15821_v57 }
 0x5b9   :  { %11028 = vmatprep.subr.bf16.mxu0 %v15822_v0  ;;  %11052 = vmatprep.subr.bf16.mxu1 %v15561_v21 }
 0x5bc   :  { %11030 = vmatpush1.bf16.msra.mxu0 %v15823_v37  ;;  %11054 = vmatpush3.bf16.msra.mxu1 %v15824_v51 }
 0x5bd   :  { %11056 = vmatprep.subr.bf16.mxu1 %v15825_v13  ;;  %11087 = vmatprep.subr.bf16.mxu0 %v15561_v21  ;;  %v14273_v13 = vld [vmem:[%s15203_s4] ss:$0 sm:$0xff] }
 0x5f2   :  { %v3368_v32 = vpop.f32.mrb[8].mxu0  ;;  %v3439_v49 = vpop.f32.mrb[42].mxu1 }
 0x5f3   :  { %v12207_v63 = vadd.f32 %v3368_v32, %v15826_v29  ;;  %v3370_v5 = vpop.f32.mrb[9].mxu0  ;;  %v8858_v25 = vpop.f32.mrb[43].mxu1  ;;  %v3457_v32 = vadd.f32 %v14273_v13, %v3439_v49 }
 0x5f4   :  { %v12208_v57 = vadd.f32 %v3370_v5, %v15735_v44 }
 0x5f5   :  { %v7480_v52 = vmul.f32 -1.442695, %v12207_v63  ;;  %v15827_v63 = vld [vmem:[#allocation54_spill] sm:$0xff] }
 0x5f6   :  { %v7481_v0 = vmul.f32 -1.442695, %v12208_v57 }
 0x5f7   :  { %12417 = vpow2.f32 %v7480_v52 }
 0x5f8   :  { %12419 = vpow2.f32 %v7481_v0 }
 0x601   :  { %v12418_v7 = vpop.eup %12417 }
 0x602   :  { %v3451_v37 = vadd.f32 1.0, %v12418_v7  ;;  %v12420_v51 = vpop.eup %12419 }
 0x603   :  { %v3452_v22 = vadd.f32 1.0, %v12420_v51 }
 0x604   :  { %12421 = vrcp.f32 %v3451_v37 }
 0x605   :  { %12423 = vrcp.f32 %v3452_v22 }
 0x60e   :  { %v12422_v29 = vpop.eup %12421 }
 0x60f   :  { %v3458_v25 = vmul.f32 %v12422_v29, %v3457_v32  ;;  %v12424_v7 = vpop.eup %12423 }
 0x610   :  { %v3461_v37 = vsub.f32 1.0, %v12424_v7  ;;  %v3463_v44 = vmul.f32 %v12424_v7, %v14058_v61  ;;  %v15830_v7 = vld [vmem:[#allocation71_spill] sm:$0xff] }
 0x611   :  { %v3459_v5 = vadd.f32 %v3458_v25, %v15827_v63 }
 0x612   :  { %v14277_v52 = vpop.f32.mrb[36].mxu0 }
 0x613   :  { %12425 = vtanh.f32 %v3459_v5  ;;  %v8893_v57 = vpop.f32.mrb[37].mxu0  ;;  %v15828_v5 = vld [vmem:[#allocation69_spill] sm:$0xff] }
 0x614   :  { %v15829_v57 = vld [vmem:[#allocation70_spill] sm:$0xff] }
 0x61d   :  { %v12426_v0 = vpop.eup %12425 }
 0x61e   :  { %v3462_v51 = vmul.f32 %v12426_v0, %v3461_v37  ;;  %v15831_v37 = vld [vmem:[#allocation72_spill] sm:$0xff] }
 0x620   :  { %v14280_v19 = vadd.f32 %v3463_v44, %v3462_v51 }
 0x622   :  { %4144 = vmatmul.mubr.f32.vlgmr.msra.gmra.mrb[10].mxu0 %v14280_v19  ;;  %9032 = vmatmul.mubr.f32.vlgmr.msra.gmra.mrb[48].mxu1 %v14280_v19 }
 0x623   :  { %11058 = vmatpush1.bf16.msra.mxu1 %v13297_v56  ;;  %11089 = vmatpush3.bf16.msra.mxu0 %v13299_v58 }
 0x624   :  { %11060 = vmatprep.subr.bf16.mxu1 %v13303_v17  ;;  %11090 = vmatprep.subr.bf16.mxu0 %v15561_v21 }
 0x625   :  { %4306 = vmatprep.mubr.f32.mxu1 %v15543_v43  ;;  %9066 = vmatprep.mubr.msk.f32.mxu0 %vm12804_vm0, %v15543_v43 }
 0x627   :  { %11062 = vmatpush1.bf16.msra.mxu1 %v13309_v47  ;;  %11092 = vmatpush3.bf16.msra.mxu0 %v13311_v45 }
 0x628   :  { %11064 = vmatprep.subr.bf16.mxu1 %v13315_v11  ;;  %11093 = vmatprep.subr.bf16.mxu0 %v15561_v21 }
 0x62b   :  { %11066 = vmatpush1.bf16.msra.mxu1 %v13322_v20  ;;  %11095 = vmatpush3.bf16.msra.mxu0 %v13324_v48 }
 0x62c   :  { %11068 = vmatprep.subr.bf16.mxu1 %v13328_v50  ;;  %11096 = vmatprep.subr.bf16.mxu0 %v15561_v21 }
 0x62f   :  { %11070 = vmatpush1.bf16.msra.mxu1 %v13332_v16  ;;  %11098 = vmatpush3.bf16.msra.mxu0 %v13334_v4 }
 0x630   :  { %11072 = vmatprep.subr.bf16.mxu1 %v13338_v10  ;;  %11099 = vmatprep.subr.bf16.mxu0 %v15561_v21 }
 0x632   :  { %v3672_v44 = vpop.f32.mrb[44].mxu1  ;;  %v3743_v61 = vpop.f32.mrb[38].mxu0 }
 0x633   :  { %v12225_v22 = vadd.f32 %v3672_v44, %v13536_v40  ;;  %v3674_v49 = vpop.f32.mrb[45].mxu1  ;;  %v8928_v29 = vpop.f32.mrb[39].mxu0  ;;  %11074 = vmatpush1.bf16.msra.mxu1 %v15564_v12  ;;  %11101 = vmatpush3.bf16.msra.mxu0 %v15565_v60  ;;  %v15832_v44 = vld [vmem:[#allocation73_spill] sm:$0xff] }
 0x634   :  { %11076 = vmatprep.subr.bf16.mxu1 %v15648_v46  ;;  %11102 = vmatprep.subr.bf16.mxu0 %v15561_v21  ;;  %v12226_v25 = vadd.f32 %v3674_v49, %v15649_v3  ;;  %v15834_v49 = vld [vmem:[#allocation75_spill] sm:$0xff]  ;;  %v15835_v29 = vld [vmem:[#allocation76_spill] sm:$0xff] }
 0x635   :  { %v7482_v32 = vmul.f32 -1.442695, %v12225_v22  ;;  %v15833_v22 = vld [vmem:[#allocation74_spill] sm:$0xff] }
 0x636   :  { %v7483_v63 = vmul.f32 -1.442695, %v12226_v25 }
 0x637   :  { %12427 = vpow2.f32 %v7482_v32  ;;  %11078 = vmatpush1.bf16.msra.mxu1 %v15650_v15  ;;  %11104 = vmatpush3.bf16.msra.mxu0 %v15737_v1  ;;  %v15836_v32 = vld [vmem:[#allocation77_spill] sm:$0xff] }
 0x638   :  { %11080 = vmatprep.subr.bf16.mxu1 %v15738_v6  ;;  %11105 = vmatprep.subr.bf16.mxu0 %v15561_v21  ;;  %12429 = vpow2.f32 %v7483_v63  ;;  %v15837_v63 = vld [vmem:[#allocation78_spill] sm:$0xff] }
 0x63b   :  { %11082 = vmatpush1.bf16.msra.mxu1 %v15653_v2  ;;  %11107 = vmatpush3.bf16.msra.mxu0 %v15739_v18 }
 0x63c   :  { %11084 = vmatprep.subr.bf16.mxu1 %v15828_v5  ;;  %11108 = vmatprep.subr.bf16.mxu0 %v15561_v21  ;;  %v15844_v5 = vld [vmem:[#allocation83_spill] sm:$0xff] }
 0x63f   :  { %11086 = vmatpush1.bf16.msra.mxu1 %v15829_v57  ;;  %11110 = vmatpush3.bf16.msra.mxu0 %v15830_v7 }
 0x640   :  { %11112 = vmatprep.subr.bf16.mxu1 %v15831_v37  ;;  %11143 = vmatprep.subr.bf16.mxu0 %v15561_v21 }
 0x641   :  { %v12428_v0 = vpop.eup %12427 }
 0x642   :  { %v3755_v51 = vadd.f32 1.0, %v12428_v0  ;;  %4307 = vmatmul.mubr.f32.vlgmr.msra.gmra.mrb[50].mxu1 %v14280_v19  ;;  %9067 = vmatmul.mubr.f32.vlgmr.msra.gmra.mrb[44].mxu0 %v14280_v19  ;;  %v12430_v25 = vpop.eup %12429 }
 0x643   :  { %11114 = vmatpush1.bf16.msra.mxu1 %v15832_v44  ;;  %11145 = vmatpush3.bf16.msra.mxu0 %v15833_v22  ;;  %v3756_v0 = vadd.f32 1.0, %v12430_v25  ;;  %v15840_v22 = vld [vmem:[#allocation81_spill] sm:$0xff]  ;;  %v15841_v44 = vld [vmem:[#allocation67_spill] sm:$0xff]  ;;  %v15845_v25 = vld [vmem:[#allocation84_spill] sm:$0xff] }
 0x644   :  { %12431 = vrcp.f32 %v3755_v51  ;;  %11116 = vmatprep.subr.bf16.mxu1 %v15834_v49  ;;  %11146 = vmatprep.subr.bf16.mxu0 %v15561_v21  ;;  %v15838_v51 = vld [vmem:[#allocation79_spill] sm:$0xff]  ;;  %v15839_v49 = vld [vmem:[#allocation80_spill] sm:$0xff]  ;;  %v3761_v37 = vadd.f32 %v15841_v44, %v3743_v61  ;;  %v15846_v61 = vld [vmem:[#allocation85_spill] sm:$0xff] }
 0x645   :  { %4447 = vmatprep.mubr.f32.mxu1 %v15543_v43  ;;  %9101 = vmatprep.mubr.msk.f32.mxu0 %vm12804_vm0, %v15543_v43  ;;  %12433 = vrcp.f32 %v3756_v0  ;;  %v15847_v44 = vld [vmem:[#allocation86_spill] sm:$0xff] }
 0x646   :  { %v15851_v0 = vld [vmem:[#allocation90_spill] sm:$0xff] }
 0x647   :  { %11118 = vmatpush1.bf16.msra.mxu1 %v15835_v29  ;;  %11148 = vmatpush3.bf16.msra.mxu0 %v15836_v32  ;;  %v15842_v29 = vld [vmem:[#allocation62_spill] sm:$0xff] }
 0x648   :  { %11120 = vmatprep.subr.bf16.mxu1 %v15837_v63  ;;  %11149 = vmatprep.subr.bf16.mxu0 %v15561_v21  ;;  %v3603_v32 = vadd.f32 %v14277_v52, %v15842_v29  ;;  %v15843_v63 = vld [vmem:[#allocation82_spill] sm:$0xff]  ;;  %v15848_v52 = vld [vmem:[#allocation87_spill] sm:$0xff] }
 0x64b   :  { %11122 = vmatpush1.bf16.msra.mxu1 %v15838_v51  ;;  %11151 = vmatpush3.bf16.msra.mxu0 %v15839_v49 }
 0x64c   :  { %11124 = vmatprep.subr.bf16.mxu1 %v15840_v22  ;;  %11152 = vmatprep.subr.bf16.mxu0 %v15561_v21 }
 0x64e   :  { %v12432_v7 = vpop.eup %12431 }
 0x64f   :  { %v3762_v57 = vmul.f32 %v12432_v7, %v3761_v37  ;;  %11126 = vmatpush1.bf16.msra.mxu1 %v15843_v63  ;;  %11154 = vmatpush3.bf16.msra.mxu0 %v15844_v5  ;;  %v15849_v7 = vld [vmem:[#allocation88_spill] sm:$0xff]  ;;  %v15850_v37 = vld [vmem:[#allocation89_spill] sm:$0xff]  ;;  %v15857_v5 = vld [vmem:[#allocation98_spill] sm:$0xff] }
 0x650   :  { %11128 = vmatprep.subr.bf16.mxu1 %v15845_v25  ;;  %11155 = vmatprep.subr.bf16.mxu0 %v15561_v21  ;;  %v15855_v25 = vld [vmem:[#allocation94_spill] sm:$0xff] }
 0x651   :  { %v3763_v49 = vadd.f32 %v3762_v57, %v3603_v32  ;;  %v12434_v57 = vpop.eup %12433  ;;  %v15852_v32 = vld [vmem:[#allocation91_spill] sm:$0xff] }
 0x652   :  { %v14345_v22 = vpop.f32.mrb[40].mxu0 }
 0x653   :  { %12435 = vtanh.f32 %v3763_v49  ;;  %v8963_v51 = vpop.f32.mrb[41].mxu0  ;;  %11130 = vmatpush1.bf16.msra.mxu1 %v15846_v61  ;;  %11157 = vmatpush3.bf16.msra.mxu0 %v15847_v44  ;;  %v15853_v49 = vld [vmem:[#allocation92_spill] sm:$0xff]  ;;  %v15854_v61 = vld [vmem:[#allocation93_spill] sm:$0xff] }
 0x654   :  { %11132 = vmatprep.subr.bf16.mxu1 %v15848_v52  ;;  %11158 = vmatprep.subr.bf16.mxu0 %v15561_v21  ;;  %v3765_v51 = vsub.f32 1.0, %v12434_v57 }
 0x657   :  { %11134 = vmatpush1.bf16.msra.mxu1 %v15849_v7  ;;  %11160 = vmatpush3.bf16.msra.mxu0 %v15850_v37  ;;  %v3767_v7 = vmul.f32 %v12434_v57, %v14145_v62  ;;  %v15856_v37 = vld [vmem:[#allocation95_spill] sm:$0xff]  ;;  %v15861_v62 = vld [vmem:[#allocation102_spill] sm:$0xff]  ;;  %v15864_v57 = vld [vmem:[#allocation105_spill] sm:$0xff] }
 0x658   :  { %11136 = vmatprep.subr.bf16.mxu1 %v15851_v0  ;;  %11161 = vmatprep.subr.bf16.mxu0 %v15561_v21 }
 0x65b   :  { %11138 = vmatpush1.bf16.msra.mxu1 %v15852_v32  ;;  %11163 = vmatpush3.bf16.msra.mxu0 %v15853_v49  ;;  %v15859_v49 = vld [vmem:[#allocation100_spill] sm:$0xff] }
 0x65c   :  { %11140 = vmatprep.subr.bf16.mxu1 %v15854_v61  ;;  %11164 = vmatprep.subr.bf16.mxu0 %v15561_v21  ;;  %v15858_v61 = vld [vmem:[#allocation99_spill] sm:$0xff] }
 0x65d   :  { %v12436_v52 = vpop.eup %12435 }
 0x65e   :  { %v3766_v44 = vmul.f32 %v12436_v52, %v3765_v51  ;;  %v15860_v52 = vld [vmem:[#allocation101_spill] sm:$0xff]  ;;  %v15865_v51 = vld [vmem:[#allocation106_spill] sm:$0xff] }
 0x65f   :  { %11142 = vmatpush1.bf16.msra.mxu1 %v15855_v25  ;;  %11166 = vmatpush3.bf16.msra.mxu0 %v15856_v37  ;;  %v15873_v25 = vld [vmem:[#allocation116_spill] sm:$0xff] }
 0x660   :  { %v14362_v0 = vadd.f32 %v3767_v7, %v3766_v44  ;;  %11168 = vmatprep.subr.bf16.mxu1 %v15857_v5  ;;  %11199 = vmatprep.subr.bf16.mxu0 %v15561_v21  ;;  %v15862_v44 = vld [vmem:[#allocation103_spill] sm:$0xff]  ;;  %v15863_v7 = vld [vmem:[#allocation104_spill] sm:$0xff]  ;;  %v15869_v5 = vld [vmem:[#allocation110_spill] sm:$0xff] }
 0x662   :  { %4448 = vmatmul.mubr.f32.vlgmr.msra.gmra.mrb[50].mxu1 %v14362_v0  ;;  %9102 = vmatmul.mubr.f32.vlgmr.msra.gmra.mrb[46].mxu0 %v14362_v0 }
 0x663   :  { %11170 = vmatpush1.bf16.msra.mxu1 %v15858_v61  ;;  %11201 = vmatpush3.bf16.msra.mxu0 %v15859_v49  ;;  %v15867_v49 = vld [vmem:[#allocation108_spill] sm:$0xff]  ;;  %v15868_v61 = vld [vmem:[#allocation109_spill] sm:$0xff] }
 0x664   :  { %11172 = vmatprep.subr.bf16.mxu1 %v15860_v52  ;;  %11202 = vmatprep.subr.bf16.mxu0 %v15561_v21  ;;  %v15866_v52 = vld [vmem:[#allocation107_spill] sm:$0xff] }
 0x665   :  { %4610 = vmatprep.mubr.f32.mxu1 %v15543_v43  ;;  %9136 = vmatprep.mubr.msk.f32.mxu0 %vm12804_vm0, %v15543_v43 }
 0x667   :  { %11174 = vmatpush1.bf16.msra.mxu1 %v15861_v62  ;;  %11204 = vmatpush3.bf16.msra.mxu0 %v15862_v44 }
 0x668   :  { %11176 = vmatprep.subr.bf16.mxu1 %v15863_v7  ;;  %11205 = vmatprep.subr.bf16.mxu0 %v15561_v21 }
 0x66b   :  { %11178 = vmatpush1.bf16.msra.mxu1 %v15864_v57  ;;  %11207 = vmatpush3.bf16.msra.mxu0 %v15865_v51  ;;  %v15870_v51 = vld [vmem:[#allocation112_spill] sm:$0xff] }
 0x66c   :  { %11180 = vmatprep.subr.bf16.mxu1 %v15866_v52  ;;  %11208 = vmatprep.subr.bf16.mxu0 %v15561_v21  ;;  %v15871_v52 = vld [vmem:[#allocation113_spill] sm:$0xff] }
 0x66f   :  { %11182 = vmatpush1.bf16.msra.mxu1 %v15867_v49  ;;  %11210 = vmatpush3.bf16.msra.mxu0 %v15868_v61 }
 0x670   :  { %11184 = vmatprep.subr.bf16.mxu1 %v15869_v5  ;;  %11211 = vmatprep.subr.bf16.mxu0 %v15561_v21  ;;  %v15872_v5 = vld [vmem:[#allocation115_spill] sm:$0xff] }
 0x672   :  { %v3976_v44 = vpop.f32.mrb[46].mxu1  ;;  %v4047_v7 = vpop.f32.mrb[42].mxu0 }
 0x673   :  { %v12227_v62 = vadd.f32 %v3976_v44, %v13939_v24  ;;  %v3978_v37 = vpop.f32.mrb[47].mxu1  ;;  %v8998_v57 = vpop.f32.mrb[43].mxu0  ;;  %11186 = vmatpush1.bf16.msra.mxu1 %v15782_v9  ;;  %11213 = vmatpush3.bf16.msra.mxu0 %v15870_v51 }
 0x674   :  { %11188 = vmatprep.subr.bf16.mxu1 %v15871_v52  ;;  %11214 = vmatprep.subr.bf16.mxu0 %v15561_v21  ;;  %v12228_v61 = vadd.f32 %v3978_v37, %v15785_v41  ;;  %v15874_v57 = vld [vmem:[#allocation119_spill] sm:$0xff]  ;;  %v15875_v37 = vld [vmem:[#allocation120_spill] sm:$0xff] }
 0x675   :  { %v7484_v49 = vmul.f32 -1.442695, %v12227_v62  ;;  %v15877_v62 = vld [vmem:[#allocation122_spill] sm:$0xff] }
 0x676   :  { %v7485_v44 = vmul.f32 -1.442695, %v12228_v61  ;;  %v15878_v61 = vld [vmem:[#allocation123_spill] sm:$0xff] }
 0x677   :  { %12437 = vpow2.f32 %v7484_v49  ;;  %11190 = vmatpush1.bf16.msra.mxu1 %v15786_v14  ;;  %11216 = vmatpush3.bf16.msra.mxu0 %v15872_v5  ;;  %v15876_v49 = vld [vmem:[#allocation121_spill] sm:$0xff] }
 0x678   :  { %11192 = vmatprep.subr.bf16.mxu1 %v15873_v25  ;;  %11217 = vmatprep.subr.bf16.mxu0 %v15561_v21  ;;  %12439 = vpow2.f32 %v7485_v44  ;;  %v15880_v44 = vld [vmem:[#allocation125_spill] sm:$0xff] }
 0x67b   :  { %11194 = vmatpush1.bf16.msra.mxu1 %v15789_v34  ;;  %11219 = vmatpush3.bf16.msra.mxu0 %v15790_v53 }
 0x67c   :  { %11196 = vmatprep.subr.bf16.mxu1 %v15874_v57  ;;  %11220 = vmatprep.subr.bf16.mxu0 %v15561_v21  ;;  %v15879_v57 = vld [vmem:[#allocation124_spill] sm:$0xff] }
 0x67f   :  { %11198 = vmatpush1.bf16.msra.mxu1 %v15875_v37  ;;  %11222 = vmatpush3.bf16.msra.mxu0 %v15876_v49 }
 0x680   :  { %11224 = vmatprep.subr.bf16.mxu1 %v15877_v62  ;;  %11255 = vmatprep.subr.bf16.mxu0 %v15561_v21  ;;  %v15881_v62 = vld [vmem:[#allocation126_spill] sm:$0xff] }
 0x681   :  { %v12438_v25 = vpop.eup %12437 }
 0x682   :  { %v4059_v5 = vadd.f32 1.0, %v12438_v25  ;;  %4611 = vmatmul.mubr.f32.vlgmr.msra.gmra.mrb[52].mxu1 %v14362_v0  ;;  %9137 = vmatmul.mubr.f32.vlgmr.msra.gmra.mrb[48].mxu0 %v14362_v0  ;;  %v15882_v25 = vld [vmem:[#allocation127_spill] sm:$0xff]  ;;  %v12440_v49 = vpop.eup %12439 }
 0x683   :  { %11226 = vmatpush1.bf16.msra.mxu1 %v15878_v61  ;;  %11257 = vmatpush3.bf16.msra.mxu0 %v15879_v57  ;;  %v4060_v57 = vadd.f32 1.0, %v12440_v49 }
 0x684   :  { %12441 = vrcp.f32 %v4059_v5  ;;  %11228 = vmatprep.subr.bf16.mxu1 %v15880_v44  ;;  %11258 = vmatprep.subr.bf16.mxu0 %v15561_v21  ;;  %v14425_v5 = vld [vmem:[%s15211_s12] ss:$0 sm:$0xff] }
 0x685   :  { %4751 = vmatprep.mubr.f32.mxu1 %v15543_v43  ;;  %9171 = vmatprep.mubr.msk.f32.mxu0 %vm12804_vm0, %v15543_v43  ;;  %12443 = vrcp.f32 %v4060_v57 }
 0x687   :  { %11230 = vmatpush1.bf16.msra.mxu1 %v15881_v62  ;;  %11260 = vmatpush3.bf16.msra.mxu0 %v15882_v25  ;;  %v4065_v25 = vadd.f32 %v14425_v5, %v4047_v7 }
 0x688   :  { %11232 = vmatprep.subr.bf16.mxu1 %v15800_v23  ;;  %11261 = vmatprep.subr.bf16.mxu0 %v15561_v21  ;;  %v3907_v23 = vadd.f32 %v14345_v22, %v13983_v31 }
 0x68b   :  { %11234 = vmatpush1.bf16.msra.mxu1 %v15715_v30  ;;  %11263 = vmatpush3.bf16.msra.mxu0 %v15716_v35 }
 0x68c   :  { %11236 = vmatprep.subr.bf16.mxu1 %v15717_v33  ;;  %11264 = vmatprep.subr.bf16.mxu0 %v15561_v21 }
 0x68e   :  { %v12442_v62 = vpop.eup %12441 }
 0x68f   :  { %v4066_v49 = vmul.f32 %v12442_v62, %v4065_v25  ;;  %11238 = vmatpush1.bf16.msra.mxu1 %v15718_v54  ;;  %11266 = vmatpush3.bf16.msra.mxu0 %v15719_v42  ;;  %v12444_v22 = vpop.eup %12443  ;;  %v15884_v62 = vld [vmem:[#allocation61_spill] sm:$0xff] }
 0x690   :  { %11240 = vmatprep.subr.bf16.mxu1 %v15720_v38  ;;  %11267 = vmatprep.subr.bf16.mxu0 %v15561_v21  ;;  %v4071_v25 = vmul.f32 %v12444_v22, %v15884_v62  ;;  %v15895_v62 = vld [vmem:[#allocation37_spill] sm:$0xff] }
 0x691   :  { %v4067_v33 = vadd.f32 %v4066_v49, %v3907_v23  ;;  %v4069_v23 = vsub.f32 1.0, %v12444_v22  ;;  %v15885_v49 = vld [vmem:[#allocation144_spill] sm:$0xff]  ;;  %v15892_v22 = vld [vmem:[#allocation34_spill] sm:$0xff]  ;;  %v15915_v42 = vld [vmem:[#allocation53_spill] sm:$0xff] }
 0x693   :  { %12445 = vtanh.f32 %v4067_v33  ;;  %11242 = vmatpush1.bf16.msra.mxu1 %v13740_v55  ;;  %11269 = vmatpush3.bf16.msra.mxu0 %v15721_v39  ;;  %v15883_v33 = vld [vmem:[#allocation143_spill] sm:$0xff] }
 0x694   :  { %11244 = vmatprep.subr.bf16.mxu1 %v15722_v36  ;;  %11270 = vmatprep.subr.bf16.mxu0 %v15561_v21 }
 0x697   :  { %11246 = vmatpush1.bf16.msra.mxu1 %v13750_v59  ;;  %11272 = vmatpush3.bf16.msra.mxu0 %v13753_v27  ;;  %v15886_v27 = vld [vmem:[#allocation145_spill] sm:$0xff] }
 0x698   :  { %11248 = vmatprep.subr.bf16.mxu1 %v13756_v26  ;;  %11273 = vmatprep.subr.bf16.mxu0 %v15561_v21  ;;  %v15888_v59 = vld [vmem:[#allocation29_spill] sm:$0xff] }
 0x69b   :  { %11250 = vmatpush1.bf16.msra.mxu1 %v13760_v8  ;;  %11275 = vmatpush3.bf16.msra.mxu0 %v13763_v28  ;;  %v15890_v28 = vld [vmem:[#allocation25_spill] sm:$0xff] }
 0x69c   :  { %11252 = vmatprep.subr.bf16.mxu1 %v15883_v33  ;;  %11276 = vmatprep.subr.bf16.mxu0 %v15561_v21  ;;  %v15889_v33 = vld [vmem:[#allocation31_spill] sm:$0xff] }
 0x69d   :  { %v12446_v7 = vpop.eup %12445 }
 0x69e   :  { %v4070_v57 = vmul.f32 %v12446_v7, %v4069_v23  ;;  %v15891_v23 = vld [vmem:[#allocation32_spill] sm:$0xff]  ;;  %v15893_v7 = vld [vmem:[#allocation26_spill] sm:$0xff] }
 0x69f   :  { %11254 = vmatpush1.bf16.msra.mxu1 %v15885_v49  ;;  %11278 = vmatpush3.bf16.msra.mxu0 %v15886_v27 }
 0x6a0   :  { %v14449_v26 = vadd.f32 %v4071_v25, %v4070_v57  ;;  %11280 = vmatprep.subr.bf16.mxu0 %v15888_v59  ;;  %11311 = vmatprep.subr.bf16.mxu1 %v15561_v21  ;;  %v15894_v57 = vld [vmem:[#allocation35_spill] sm:$0xff]  ;;  %v15900_v59 = vld [vmem:[#allocation41_spill] sm:$0xff] }
 0x6a1   :  { %v15896_v25 = vld [vmem:[#allocation27_spill] sm:$0xff] }
 0x6a2   :  { %15887 = vst [vmem:[#allocation57_spill] sm:$0xff] %v14449_v26  ;;  %4752 = vmatmul.mubr.f32.vlgmr.msra.gmra.mrb[52].mxu1 %v14449_v26  ;;  %9172 = vmatmul.mubr.f32.vlgmr.msra.gmra.mrb[50].mxu0 %v14449_v26 }
 0x6a3   :  { %11282 = vmatpush1.bf16.msra.mxu0 %v15889_v33  ;;  %11313 = vmatpush3.bf16.msra.mxu1 %v15890_v28  ;;  %v15898_v28 = vld [vmem:[#allocation40_spill] sm:$0xff] }
 0x6a4   :  { %11284 = vmatprep.subr.bf16.mxu0 %v15891_v23  ;;  %11314 = vmatprep.subr.bf16.mxu1 %v15561_v21  ;;  %v15897_v23 = vld [vmem:[#allocation38_spill] sm:$0xff]  ;;  %v15899_v33 = vld [vmem:[#allocation28_spill] sm:$0xff] }
 0x6a5   :  { %4920 = vmatprep.mubr.f32.mxu0 %v15543_v43  ;;  %9206 = vmatprep.mubr.msk.f32.mxu1 %vm12804_vm0, %v15543_v43 }
 0x6a7   :  { %11286 = vmatpush1.bf16.msra.mxu0 %v15892_v22  ;;  %11316 = vmatpush3.bf16.msra.mxu1 %v15893_v7  ;;  %v15901_v7 = vld [vmem:[#allocation42_spill] sm:$0xff]  ;;  %v15903_v22 = vld [vmem:[#allocation43_spill] sm:$0xff] }
 0x6a8   :  { %11288 = vmatprep.subr.bf16.mxu0 %v15894_v57  ;;  %11317 = vmatprep.subr.bf16.mxu1 %v15561_v21  ;;  %v15902_v57 = vld [vmem:[#allocation30_spill] sm:$0xff] }
 0x6ab   :  { %11290 = vmatpush1.bf16.msra.mxu0 %v15895_v62  ;;  %11319 = vmatpush3.bf16.msra.mxu1 %v15896_v25  ;;  %v15904_v25 = vld [vmem:[#allocation44_spill] sm:$0xff]  ;;  %v15906_v62 = vld [vmem:[#allocation45_spill] sm:$0xff] }
 0x6ac   :  { %11292 = vmatprep.subr.bf16.mxu0 %v15897_v23  ;;  %11320 = vmatprep.subr.bf16.mxu1 %v15561_v21  ;;  %v15905_v23 = vld [vmem:[#allocation33_spill] sm:$0xff] }
 0x6af   :  { %11294 = vmatpush1.bf16.msra.mxu0 %v15898_v28  ;;  %11322 = vmatpush3.bf16.msra.mxu1 %v15899_v33  ;;  %v15907_v33 = vld [vmem:[#allocation46_spill] sm:$0xff]  ;;  %v15909_v28 = vld [vmem:[#allocation47_spill] sm:$0xff] }
 0x6b0   :  { %11296 = vmatprep.subr.bf16.mxu0 %v15900_v59  ;;  %11323 = vmatprep.subr.bf16.mxu1 %v15561_v21  ;;  %v15908_v59 = vld [vmem:[#allocation36_spill] sm:$0xff] }
 0x6b3   :  { %11298 = vmatpush1.bf16.msra.mxu0 %v15901_v7  ;;  %11325 = vmatpush3.bf16.msra.mxu1 %v15902_v57  ;;  %v15910_v57 = vld [vmem:[#allocation48_spill] sm:$0xff]  ;;  %v15912_v7 = vld [vmem:[#allocation49_spill] sm:$0xff] }
 0x6b4   :  { %11300 = vmatprep.subr.bf16.mxu0 %v15903_v22  ;;  %11326 = vmatprep.subr.bf16.mxu1 %v15561_v21  ;;  %v15911_v22 = vld [vmem:[#allocation39_spill] sm:$0xff] }
 0x6b7   :  { %11302 = vmatpush1.bf16.msra.mxu0 %v15904_v25  ;;  %11328 = vmatpush3.bf16.msra.mxu1 %v15905_v23  ;;  %v15913_v25 = vld [vmem:[#allocation59_spill] sm:$0xff] }
 0x6b8   :  { %11304 = vmatprep.subr.bf16.mxu0 %v15906_v62  ;;  %11329 = vmatprep.subr.bf16.mxu1 %v15561_v21 }
 0x6bb   :  { %11306 = vmatpush1.bf16.msra.mxu0 %v15907_v33  ;;  %11331 = vmatpush3.bf16.msra.mxu1 %v15908_v59  ;;  %v15914_v59 = vld [vmem:[#allocation60_spill] sm:$0xff] }
 0x6bc   :  { %11308 = vmatprep.subr.bf16.mxu0 %v15909_v28  ;;  %11332 = vmatprep.subr.bf16.mxu1 %v15561_v21 }
 0x6bf   :  { %11310 = vmatpush1.bf16.msra.mxu0 %v15910_v57  ;;  %11334 = vmatpush3.bf16.msra.mxu1 %v15911_v22 }
 0x6c0   :  { %11336 = vmatprep.subr.bf16.mxu1 %v15912_v7  ;;  %11367 = vmatprep.subr.bf16.mxu0 %v15561_v21 }
 0x6f5   :  { %v4145_v23 = vpop.f32.mrb[10].mxu0  ;;  %v4216_v62 = vpop.f32.mrb[48].mxu1 }
 0x6f6   :  { %v12209_v27 = vadd.f32 %v4145_v23, %v15913_v25  ;;  %v4147_v49 = vpop.f32.mrb[11].mxu0  ;;  %v9033_v33 = vpop.f32.mrb[49].mxu1  ;;  %v4234_v7 = vadd.f32 %v14273_v13, %v4216_v62  ;;  %v15917_v62 = vld [vmem:[#allocation70_spill] sm:$0xff] }
 0x6f7   :  { %v12210_v8 = vadd.f32 %v4147_v49, %v15914_v59 }
 0x6f8   :  { %v7486_v26 = vmul.f32 -1.442695, %v12209_v27 }
 0x6f9   :  { %v7487_v28 = vmul.f32 -1.442695, %v12210_v8 }
 0x6fa   :  { %12447 = vpow2.f32 %v7486_v26 }
 0x6fb   :  { %12449 = vpow2.f32 %v7487_v28 }
 0x704   :  { %v12448_v36 = vpop.eup %12447 }
 0x705   :  { %v4228_v57 = vadd.f32 1.0, %v12448_v36  ;;  %v12450_v22 = vpop.eup %12449 }
 0x706   :  { %v4229_v39 = vadd.f32 1.0, %v12450_v22 }
 0x707   :  { %12451 = vrcp.f32 %v4228_v57  ;;  %v15916_v57 = vld [vmem:[#allocation69_spill] sm:$0xff] }
 0x708   :  { %12453 = vrcp.f32 %v4229_v39 }
 0x711   :  { %v12452_v55 = vpop.eup %12451 }
 0x712   :  { %v4235_v38 = vmul.f32 %v12452_v55, %v4234_v7  ;;  %v12454_v33 = vpop.eup %12453 }
 0x713   :  { %v4238_v26 = vsub.f32 1.0, %v12454_v33  ;;  %v4240_v36 = vmul.f32 %v12454_v33, %v14280_v19 }
 0x714   :  { %v4236_v23 = vadd.f32 %v4235_v38, %v15915_v42 }
 0x715   :  { %v14494_v25 = vpop.f32.mrb[44].mxu0 }
 0x716   :  { %12455 = vtanh.f32 %v4236_v23  ;;  %v9068_v27 = vpop.f32.mrb[45].mxu0  ;;  %v15918_v23 = vld [vmem:[#allocation71_spill] sm:$0xff] }
 0x717   :  { %v15919_v27 = vld [vmem:[#allocation72_spill] sm:$0xff] }
 0x720   :  { %v12456_v8 = vpop.eup %12455 }
 0x721   :  { %v4239_v28 = vmul.f32 %v12456_v8, %v4238_v26  ;;  %v15920_v8 = vld [vmem:[#allocation73_spill] sm:$0xff] }
 0x723   :  { %v14497_v49 = vadd.f32 %v4240_v36, %v4239_v28  ;;  %v15921_v28 = vld [vmem:[#allocation74_spill] sm:$0xff]  ;;  %v15922_v36 = vld [vmem:[#allocation75_spill] sm:$0xff] }
 0x725   :  { %4921 = vmatmul.mubr.f32.vlgmr.msra.gmra.mrb[12].mxu0 %v14497_v49  ;;  %9207 = vmatmul.mubr.f32.vlgmr.msra.gmra.mrb[54].mxu1 %v14497_v49 }
 0x726   :  { %11338 = vmatpush1.bf16.msra.mxu1 %v13297_v56  ;;  %11369 = vmatpush3.bf16.msra.mxu0 %v13299_v58 }
 0x727   :  { %11340 = vmatprep.subr.bf16.mxu1 %v13303_v17  ;;  %11370 = vmatprep.subr.bf16.mxu0 %v15561_v21 }
 0x728   :  { %5083 = vmatprep.mubr.f32.mxu1 %v15543_v43  ;;  %9241 = vmatprep.mubr.msk.f32.mxu0 %vm12804_vm0, %v15543_v43 }
 0x72a   :  { %11342 = vmatpush1.bf16.msra.mxu1 %v13309_v47  ;;  %11372 = vmatpush3.bf16.msra.mxu0 %v13311_v45 }
 0x72b   :  { %11344 = vmatprep.subr.bf16.mxu1 %v13315_v11  ;;  %11373 = vmatprep.subr.bf16.mxu0 %v15561_v21 }
 0x72e   :  { %11346 = vmatpush1.bf16.msra.mxu1 %v13322_v20  ;;  %11375 = vmatpush3.bf16.msra.mxu0 %v13324_v48 }
 0x72f   :  { %11348 = vmatprep.subr.bf16.mxu1 %v13328_v50  ;;  %11376 = vmatprep.subr.bf16.mxu0 %v15561_v21 }
 0x732   :  { %11350 = vmatpush1.bf16.msra.mxu1 %v13332_v16  ;;  %11378 = vmatpush3.bf16.msra.mxu0 %v13334_v4 }
 0x733   :  { %11352 = vmatprep.subr.bf16.mxu1 %v13338_v10  ;;  %11379 = vmatprep.subr.bf16.mxu0 %v15561_v21 }
 0x735   :  { %v4449_v55 = vpop.f32.mrb[50].mxu1  ;;  %v4520_v19 = vpop.f32.mrb[46].mxu0 }
 0x736   :  { %v12229_v42 = vadd.f32 %v4449_v55, %v13536_v40  ;;  %v4451_v38 = vpop.f32.mrb[51].mxu1  ;;  %v9103_v39 = vpop.f32.mrb[47].mxu0  ;;  %11354 = vmatpush1.bf16.msra.mxu1 %v15564_v12  ;;  %11381 = vmatpush3.bf16.msra.mxu0 %v15565_v60  ;;  %v15923_v55 = vld [vmem:[#allocation76_spill] sm:$0xff] }
 0x737   :  { %11356 = vmatprep.subr.bf16.mxu1 %v15648_v46  ;;  %11382 = vmatprep.subr.bf16.mxu0 %v15561_v21  ;;  %v12230_v22 = vadd.f32 %v4451_v38, %v15649_v3  ;;  %v15925_v39 = vld [vmem:[#allocation78_spill] sm:$0xff] }
 0x738   :  { %v7488_v13 = vmul.f32 -1.442695, %v12229_v42  ;;  %v15924_v42 = vld [vmem:[#allocation77_spill] sm:$0xff] }
 0x739   :  { %v7489_v7 = vmul.f32 -1.442695, %v12230_v22  ;;  %v15926_v22 = vld [vmem:[#allocation79_spill] sm:$0xff] }
 0x73a   :  { %12457 = vpow2.f32 %v7488_v13  ;;  %11358 = vmatpush1.bf16.msra.mxu1 %v15650_v15  ;;  %11384 = vmatpush3.bf16.msra.mxu0 %v15737_v1 }
 0x73b   :  { %11360 = vmatprep.subr.bf16.mxu1 %v15738_v6  ;;  %11385 = vmatprep.subr.bf16.mxu0 %v15561_v21  ;;  %12459 = vpow2.f32 %v7489_v7  ;;  %v15927_v7 = vld [vmem:[#allocation80_spill] sm:$0xff] }
 0x73e   :  { %11362 = vmatpush1.bf16.msra.mxu1 %v15653_v2  ;;  %11387 = vmatpush3.bf16.msra.mxu0 %v15739_v18 }
 0x73f   :  { %11364 = vmatprep.subr.bf16.mxu1 %v15916_v57  ;;  %11388 = vmatprep.subr.bf16.mxu0 %v15561_v21 }
 0x742   :  { %11366 = vmatpush1.bf16.msra.mxu1 %v15917_v62  ;;  %11390 = vmatpush3.bf16.msra.mxu0 %v15918_v23 }
 0x743   :  { %11392 = vmatprep.subr.bf16.mxu1 %v15919_v27  ;;  %11423 = vmatprep.subr.bf16.mxu0 %v15561_v21 }
 0x744   :  { %v12458_v33 = vpop.eup %12457 }
 0x745   :  { %v4532_v26 = vadd.f32 1.0, %v12458_v33  ;;  %5084 = vmatmul.mubr.f32.vlgmr.msra.gmra.mrb[56].mxu1 %v14497_v49  ;;  %9242 = vmatmul.mubr.f32.vlgmr.msra.gmra.mrb[52].mxu0 %v14497_v49  ;;  %v12460_v38 = vpop.eup %12459  ;;  %v15928_v33 = vld [vmem:[#allocation81_spill] sm:$0xff] }
 0x746   :  { %11394 = vmatpush1.bf16.msra.mxu1 %v15920_v8  ;;  %11425 = vmatpush3.bf16.msra.mxu0 %v15921_v28  ;;  %v4533_v13 = vadd.f32 1.0, %v12460_v38 }
 0x747   :  { %12461 = vrcp.f32 %v4532_v26  ;;  %11396 = vmatprep.subr.bf16.mxu1 %v15922_v36  ;;  %11426 = vmatprep.subr.bf16.mxu0 %v15561_v21  ;;  %v14558_v26 = vld [vmem:[%s15207_s8] ss:$0 sm:$0xff] }
 0x748   :  { %5224 = vmatprep.mubr.f32.mxu1 %v15543_v43  ;;  %9276 = vmatprep.mubr.msk.f32.mxu0 %vm12804_vm0, %v15543_v43  ;;  %15929 = vst [vmem:[#allocation58_spill] sm:$0xff] %v14558_v26  ;;  %12463 = vrcp.f32 %v4533_v13  ;;  %v15937_v13 = vld [vmem:[#allocation90_spill] sm:$0xff] }
 0x74a   :  { %11398 = vmatpush1.bf16.msra.mxu1 %v15923_v55  ;;  %11428 = vmatpush3.bf16.msra.mxu0 %v15924_v42  ;;  %v4538_v42 = vadd.f32 %v14558_v26, %v4520_v19  ;;  %v15932_v19 = vld [vmem:[#allocation85_spill] sm:$0xff]  ;;  %v15933_v26 = vld [vmem:[#allocation86_spill] sm:$0xff] }
 0x74b   :  { %11400 = vmatprep.subr.bf16.mxu1 %v15925_v39  ;;  %11429 = vmatprep.subr.bf16.mxu0 %v15561_v21  ;;  %v4380_v39 = vadd.f32 %v14494_v25, %v15842_v29  ;;  %v15934_v25 = vld [vmem:[#allocation87_spill] sm:$0xff] }
 0x74e   :  { %11402 = vmatpush1.bf16.msra.mxu1 %v15926_v22  ;;  %11431 = vmatpush3.bf16.msra.mxu0 %v15927_v7  ;;  %v15930_v7 = vld [vmem:[#allocation83_spill] sm:$0xff] }
 0x74f   :  { %11404 = vmatprep.subr.bf16.mxu1 %v15928_v33  ;;  %11432 = vmatprep.subr.bf16.mxu0 %v15561_v21  ;;  %v15931_v33 = vld [vmem:[#allocation84_spill] sm:$0xff] }
 0x751   :  { %v12462_v55 = vpop.eup %12461 }
 0x752   :  { %v4539_v38 = vmul.f32 %v12462_v55, %v4538_v42  ;;  %11406 = vmatpush1.bf16.msra.mxu1 %v15843_v63  ;;  %11434 = vmatpush3.bf16.msra.mxu0 %v15930_v7  ;;  %v15935_v55 = vld [vmem:[#allocation88_spill] sm:$0xff]  ;;  %v15936_v42 = vld [vmem:[#allocation89_spill] sm:$0xff] }
 0x753   :  { %11408 = vmatprep.subr.bf16.mxu1 %v15931_v33  ;;  %11435 = vmatprep.subr.bf16.mxu0 %v15561_v21  ;;  %v15942_v33 = vld [vmem:[#allocation98_spill] sm:$0xff] }
 0x754   :  { %v4540_v22 = vadd.f32 %v4539_v38, %v4380_v39  ;;  %v12464_v39 = vpop.eup %12463  ;;  %v15939_v38 = vld [vmem:[#allocation93_spill] sm:$0xff] }
 0x755   :  { %v14567_v36 = vpop.f32.mrb[48].mxu0 }
 0x756   :  { %12465 = vtanh.f32 %v4540_v22  ;;  %v9138_v28 = vpop.f32.mrb[49].mxu0  ;;  %11410 = vmatpush1.bf16.msra.mxu1 %v15932_v19  ;;  %11437 = vmatpush3.bf16.msra.mxu0 %v15933_v26  ;;  %v4542_v22 = vsub.f32 1.0, %v12464_v39  ;;  %v15940_v19 = vld [vmem:[#allocation94_spill] sm:$0xff] }
 0x757   :  { %11412 = vmatprep.subr.bf16.mxu1 %v15934_v25  ;;  %11438 = vmatprep.subr.bf16.mxu0 %v15561_v21  ;;  %v15938_v28 = vld [vmem:[#allocation92_spill] sm:$0xff] }
 0x75a   :  { %11414 = vmatpush1.bf16.msra.mxu1 %v15935_v55  ;;  %11440 = vmatpush3.bf16.msra.mxu0 %v15936_v42  ;;  %v4544_v55 = vmul.f32 %v12464_v39, %v14362_v0  ;;  %v15941_v42 = vld [vmem:[#allocation95_spill] sm:$0xff]  ;;  %v15946_v0 = vld [vmem:[#allocation102_spill] sm:$0xff]  ;;  %v15949_v39 = vld [vmem:[#allocation105_spill] sm:$0xff] }
 0x75b   :  { %11416 = vmatprep.subr.bf16.mxu1 %v15937_v13  ;;  %11441 = vmatprep.subr.bf16.mxu0 %v15561_v21 }
 0x75e   :  { %11418 = vmatpush1.bf16.msra.mxu1 %v15852_v32  ;;  %11443 = vmatpush3.bf16.msra.mxu0 %v15938_v28  ;;  %v15944_v28 = vld [vmem:[#allocation100_spill] sm:$0xff] }
 0x75f   :  { %11420 = vmatprep.subr.bf16.mxu1 %v15939_v38  ;;  %11444 = vmatprep.subr.bf16.mxu0 %v15561_v21  ;;  %v15943_v38 = vld [vmem:[#allocation99_spill] sm:$0xff] }
 0x760   :  { %v12466_v25 = vpop.eup %12465 }
 0x761   :  { %v4543_v26 = vmul.f32 %v12466_v25, %v4542_v22  ;;  %v15945_v25 = vld [vmem:[#allocation101_spill] sm:$0xff]  ;;  %v15950_v22 = vld [vmem:[#allocation106_spill] sm:$0xff] }
 0x762   :  { %11422 = vmatpush1.bf16.msra.mxu1 %v15940_v19  ;;  %11446 = vmatpush3.bf16.msra.mxu0 %v15941_v42 }
 0x763   :  { %v14584_v13 = vadd.f32 %v4544_v55, %v4543_v26  ;;  %11448 = vmatprep.subr.bf16.mxu1 %v15942_v33  ;;  %11479 = vmatprep.subr.bf16.mxu0 %v15561_v21  ;;  %v15947_v26 = vld [vmem:[#allocation103_spill] sm:$0xff]  ;;  %v15948_v55 = vld [vmem:[#allocation104_spill] sm:$0xff]  ;;  %v15954_v33 = vld [vmem:[#allocation110_spill] sm:$0xff] }
 0x765   :  { %5225 = vmatmul.mubr.f32.vlgmr.msra.gmra.mrb[56].mxu1 %v14584_v13  ;;  %9277 = vmatmul.mubr.f32.vlgmr.msra.gmra.mrb[54].mxu0 %v14584_v13 }
 0x766   :  { %11450 = vmatpush1.bf16.msra.mxu1 %v15943_v38  ;;  %11481 = vmatpush3.bf16.msra.mxu0 %v15944_v28  ;;  %v15952_v28 = vld [vmem:[#allocation108_spill] sm:$0xff]  ;;  %v15953_v38 = vld [vmem:[#allocation109_spill] sm:$0xff] }
 0x767   :  { %11452 = vmatprep.subr.bf16.mxu1 %v15945_v25  ;;  %11482 = vmatprep.subr.bf16.mxu0 %v15561_v21  ;;  %v15951_v25 = vld [vmem:[#allocation107_spill] sm:$0xff] }
 0x768   :  { %5387 = vmatprep.mubr.f32.mxu1 %v15543_v43  ;;  %9311 = vmatprep.mubr.msk.f32.mxu0 %vm12804_vm0, %v15543_v43 }
 0x76a   :  { %11454 = vmatpush1.bf16.msra.mxu1 %v15946_v0  ;;  %11484 = vmatpush3.bf16.msra.mxu0 %v15947_v26 }
 0x76b   :  { %11456 = vmatprep.subr.bf16.mxu1 %v15948_v55  ;;  %11485 = vmatprep.subr.bf16.mxu0 %v15561_v21 }
 0x76e   :  { %11458 = vmatpush1.bf16.msra.mxu1 %v15949_v39  ;;  %11487 = vmatpush3.bf16.msra.mxu0 %v15950_v22 }
 0x76f   :  { %11460 = vmatprep.subr.bf16.mxu1 %v15951_v25  ;;  %11488 = vmatprep.subr.bf16.mxu0 %v15561_v21  ;;  %v15956_v25 = vld [vmem:[#allocation116_spill] sm:$0xff] }
 0x772   :  { %11462 = vmatpush1.bf16.msra.mxu1 %v15952_v28  ;;  %11490 = vmatpush3.bf16.msra.mxu0 %v15953_v38 }
 0x773   :  { %11464 = vmatprep.subr.bf16.mxu1 %v15954_v33  ;;  %11491 = vmatprep.subr.bf16.mxu0 %v15561_v21  ;;  %v15955_v33 = vld [vmem:[#allocation115_spill] sm:$0xff] }
 0x775   :  { %v4753_v26 = vpop.f32.mrb[52].mxu1  ;;  %v4824_v55 = vpop.f32.mrb[50].mxu0 }
 0x776   :  { %v12231_v0 = vadd.f32 %v4753_v26, %v13939_v24  ;;  %v4755_v42 = vpop.f32.mrb[53].mxu1  ;;  %v9173_v39 = vpop.f32.mrb[51].mxu0  ;;  %11466 = vmatpush1.bf16.msra.mxu1 %v15782_v9  ;;  %11493 = vmatpush3.bf16.msra.mxu0 %v15870_v51 }
 0x777   :  { %11468 = vmatprep.subr.bf16.mxu1 %v15871_v52  ;;  %11494 = vmatprep.subr.bf16.mxu0 %v15561_v21  ;;  %v12232_v38 = vadd.f32 %v4755_v42, %v15785_v41  ;;  %v15957_v39 = vld [vmem:[#allocation119_spill] sm:$0xff]  ;;  %v15958_v42 = vld [vmem:[#allocation121_spill] sm:$0xff] }
 0x778   :  { %v7490_v28 = vmul.f32 -1.442695, %v12231_v0 }
 0x779   :  { %v7491_v26 = vmul.f32 -1.442695, %v12232_v38  ;;  %v15960_v38 = vld [vmem:[#allocation124_spill] sm:$0xff] }
 0x77a   :  { %12467 = vpow2.f32 %v7490_v28  ;;  %11470 = vmatpush1.bf16.msra.mxu1 %v15786_v14  ;;  %11496 = vmatpush3.bf16.msra.mxu0 %v15955_v33  ;;  %v15959_v28 = vld [vmem:[#allocation122_spill] sm:$0xff] }
 0x77b   :  { %11472 = vmatprep.subr.bf16.mxu1 %v15956_v25  ;;  %11497 = vmatprep.subr.bf16.mxu0 %v15561_v21  ;;  %12469 = vpow2.f32 %v7491_v26  ;;  %v15961_v26 = vld [vmem:[#allocation126_spill] sm:$0xff] }
 0x77e   :  { %11474 = vmatpush1.bf16.msra.mxu1 %v15789_v34  ;;  %11499 = vmatpush3.bf16.msra.mxu0 %v15790_v53 }
 0x77f   :  { %11476 = vmatprep.subr.bf16.mxu1 %v15957_v39  ;;  %11500 = vmatprep.subr.bf16.mxu0 %v15561_v21 }
 0x782   :  { %11478 = vmatpush1.bf16.msra.mxu1 %v15875_v37  ;;  %11502 = vmatpush3.bf16.msra.mxu0 %v15958_v42  ;;  %v15963_v42 = vld [vmem:[#allocation128_spill] sm:$0xff] }
 0x783   :  { %11504 = vmatprep.subr.bf16.mxu1 %v15959_v28  ;;  %11535 = vmatprep.subr.bf16.mxu0 %v15561_v21 }
 0x784   :  { %v12468_v0 = vpop.eup %12467 }
 0x785   :  { %v4836_v25 = vadd.f32 1.0, %v12468_v0  ;;  %5388 = vmatmul.mubr.f32.vlgmr.msra.gmra.mrb[58].mxu1 %v14584_v13  ;;  %9312 = vmatmul.mubr.f32.vlgmr.msra.gmra.mrb[56].mxu0 %v14584_v13  ;;  %v15962_v0 = vld [vmem:[#allocation127_spill] sm:$0xff]  ;;  %v12470_v28 = vpop.eup %12469 }
 0x786   :  { %11506 = vmatpush1.bf16.msra.mxu1 %v15878_v61  ;;  %11537 = vmatpush3.bf16.msra.mxu0 %v15960_v38  ;;  %v4837_v38 = vadd.f32 1.0, %v12470_v28  ;;  %v15966_v28 = vld [vmem:[#allocation134_spill] sm:$0xff] }
 0x787   :  { %12471 = vrcp.f32 %v4836_v25  ;;  %11508 = vmatprep.subr.bf16.mxu1 %v15880_v44  ;;  %11538 = vmatprep.subr.bf16.mxu0 %v15561_v21  ;;  %v15964_v25 = vld [vmem:[#allocation131_spill] sm:$0xff]  ;;  %v4842_v44 = vadd.f32 %v14425_v5, %v4824_v55  ;;  %v15969_v5 = vld [vmem:[#allocation137_spill] sm:$0xff] }
 0x788   :  { %5528 = vmatprep.mubr.f32.mxu1 %v15543_v43  ;;  %9346 = vmatprep.mubr.msk.f32.mxu0 %vm12804_vm0, %v15543_v43  ;;  %12473 = vrcp.f32 %v4837_v38  ;;  %v15973_v38 = vld [vmem:[#allocation141_spill] sm:$0xff] }
 0x78a   :  { %11510 = vmatpush1.bf16.msra.mxu1 %v15961_v26  ;;  %11540 = vmatpush3.bf16.msra.mxu0 %v15962_v0  ;;  %v4684_v0 = vadd.f32 %v14567_v36, %v13983_v31  ;;  %v15972_v36 = vld [vmem:[#allocation140_spill] sm:$0xff] }
 0x78b   :  { %11512 = vmatprep.subr.bf16.mxu1 %v15963_v42  ;;  %11541 = vmatprep.subr.bf16.mxu0 %v15561_v21  ;;  %v15965_v42 = vld [vmem:[#allocation133_spill] sm:$0xff] }
 0x78e   :  { %11514 = vmatpush1.bf16.msra.mxu1 %v15715_v30  ;;  %11543 = vmatpush3.bf16.msra.mxu0 %v15716_v35  ;;  %v15968_v30 = vld [vmem:[#allocation136_spill] sm:$0xff] }
 0x78f   :  { %11516 = vmatprep.subr.bf16.mxu1 %v15964_v25  ;;  %11544 = vmatprep.subr.bf16.mxu0 %v15561_v21  ;;  %v15967_v25 = vld [vmem:[#allocation135_spill] sm:$0xff] }
 0x791   :  { %v12472_v61 = vpop.eup %12471 }
 0x792   :  { %v4843_v26 = vmul.f32 %v12472_v61, %v4842_v44  ;;  %11518 = vmatpush1.bf16.msra.mxu1 %v15718_v54  ;;  %11546 = vmatpush3.bf16.msra.mxu0 %v15965_v42  ;;  %v15970_v61 = vld [vmem:[#allocation138_spill] sm:$0xff]  ;;  %v15971_v44 = vld [vmem:[#allocation139_spill] sm:$0xff]  ;;  %v12474_v55 = vpop.eup %12473  ;;  %v15980_v42 = vld [vmem:[#allocation29_spill] sm:$0xff] }
 0x793   :  { %11520 = vmatprep.subr.bf16.mxu1 %v15966_v28  ;;  %11547 = vmatprep.subr.bf16.mxu0 %v15561_v21  ;;  %v15977_v28 = vld [vmem:[#allocation144_spill] sm:$0xff] }
 0x794   :  { %v4844_v35 = vadd.f32 %v4843_v26, %v4684_v0  ;;  %v15975_v26 = vld [vmem:[#allocation143_spill] sm:$0xff]  ;;  %v4846_v0 = vsub.f32 1.0, %v12474_v55 }
 0x796   :  { %12475 = vtanh.f32 %v4844_v35  ;;  %11522 = vmatpush1.bf16.msra.mxu1 %v15967_v25  ;;  %11549 = vmatpush3.bf16.msra.mxu0 %v15968_v30  ;;  %v15974_v35 = vld [vmem:[#allocation142_spill] sm:$0xff]  ;;  %v15976_v25 = vld [vmem:[#allocation57_spill] sm:$0xff] }
 0x797   :  { %11524 = vmatprep.subr.bf16.mxu1 %v15969_v5  ;;  %11550 = vmatprep.subr.bf16.mxu0 %v15561_v21 }
 0x79a   :  { %11526 = vmatpush1.bf16.msra.mxu1 %v15970_v61  ;;  %11552 = vmatpush3.bf16.msra.mxu0 %v15971_v44  ;;  %v4848_v61 = vmul.f32 %v12474_v55, %v15976_v25  ;;  %v15978_v44 = vld [vmem:[#allocation145_spill] sm:$0xff]  ;;  %v15986_v25 = vld [vmem:[#allocation35_spill] sm:$0xff] }
 0x79b   :  { %11528 = vmatprep.subr.bf16.mxu1 %v15972_v36  ;;  %11553 = vmatprep.subr.bf16.mxu0 %v15561_v21  ;;  %v15988_v55 = vld [vmem:[#allocation27_spill] sm:$0xff] }
 0x79e   :  { %11530 = vmatpush1.bf16.msra.mxu1 %v15973_v38  ;;  %11555 = vmatpush3.bf16.msra.mxu0 %v15974_v35  ;;  %v15982_v35 = vld [vmem:[#allocation25_spill] sm:$0xff] }
 0x79f   :  { %11532 = vmatprep.subr.bf16.mxu1 %v15975_v26  ;;  %11556 = vmatprep.subr.bf16.mxu0 %v15561_v21  ;;  %v15981_v26 = vld [vmem:[#allocation31_spill] sm:$0xff] }
 0x7a0   :  { %v12476_v5 = vpop.eup %12475 }
 0x7a1   :  { %v4847_v30 = vmul.f32 %v12476_v5, %v4846_v0  ;;  %v15983_v5 = vld [vmem:[#allocation32_spill] sm:$0xff] }
 0x7a2   :  { %11534 = vmatpush1.bf16.msra.mxu1 %v15977_v28  ;;  %11558 = vmatpush3.bf16.msra.mxu0 %v15978_v44  ;;  %v15991_v0 = vld [vmem:[#allocation28_spill] sm:$0xff] }
 0x7a3   :  { %v14666_v36 = vadd.f32 %v4848_v61, %v4847_v30  ;;  %11560 = vmatprep.subr.bf16.mxu0 %v15980_v42  ;;  %11591 = vmatprep.subr.bf16.mxu1 %v15561_v21  ;;  %v15984_v30 = vld [vmem:[#allocation34_spill] sm:$0xff]  ;;  %v15987_v61 = vld [vmem:[#allocation37_spill] sm:$0xff] }
 0x7a4   :  { %v15985_v42 = vld [vmem:[#allocation26_spill] sm:$0xff] }
 0x7a5   :  { %15979 = vst [vmem:[#allocation50_spill] sm:$0xff] %v14666_v36  ;;  %5529 = vmatmul.mubr.f32.vlgmr.msra.gmra.mrb[58].mxu1 %v14666_v36  ;;  %9347 = vmatmul.mubr.f32.vlgmr.msra.gmra.mrb[58].mxu0 %v14666_v36 }
 0x7a6   :  { %11562 = vmatpush1.bf16.msra.mxu0 %v15981_v26  ;;  %11593 = vmatpush3.bf16.msra.mxu1 %v15982_v35  ;;  %v15989_v35 = vld [vmem:[#allocation38_spill] sm:$0xff]  ;;  %v15990_v26 = vld [vmem:[#allocation40_spill] sm:$0xff] }
 0x7a7   :  { %11564 = vmatprep.subr.bf16.mxu0 %v15983_v5  ;;  %11594 = vmatprep.subr.bf16.mxu1 %v15561_v21  ;;  %v15992_v5 = vld [vmem:[#allocation41_spill] sm:$0xff] }
 0x7a8   :  { %5697 = vmatprep.mubr.f32.mxu0 %v15543_v43  ;;  %9381 = vmatprep.mubr.msk.f32.mxu1 %vm12804_vm0, %v15543_v43 }
 0x7aa   :  { %11566 = vmatpush1.bf16.msra.mxu0 %v15984_v30  ;;  %11596 = vmatpush3.bf16.msra.mxu1 %v15985_v42  ;;  %v15993_v30 = vld [vmem:[#allocation42_spill] sm:$0xff] }
 0x7ab   :  { %11568 = vmatprep.subr.bf16.mxu0 %v15986_v25  ;;  %11597 = vmatprep.subr.bf16.mxu1 %v15561_v21  ;;  %v15994_v42 = vld [vmem:[#allocation30_spill] sm:$0xff]  ;;  %v15995_v25 = vld [vmem:[#allocation43_spill] sm:$0xff] }
 0x7ae   :  { %11570 = vmatpush1.bf16.msra.mxu0 %v15987_v61  ;;  %11599 = vmatpush3.bf16.msra.mxu1 %v15988_v55  ;;  %v15996_v61 = vld [vmem:[#allocation44_spill] sm:$0xff]  ;;  %v15997_v55 = vld [vmem:[#allocation33_spill] sm:$0xff] }
 0x7af   :  { %11572 = vmatprep.subr.bf16.mxu0 %v15989_v35  ;;  %11600 = vmatprep.subr.bf16.mxu1 %v15561_v21  ;;  %v15998_v35 = vld [vmem:[#allocation45_spill] sm:$0xff] }
 0x7b2   :  { %11574 = vmatpush1.bf16.msra.mxu0 %v15990_v26  ;;  %11602 = vmatpush3.bf16.msra.mxu1 %v15991_v0  ;;  %v15999_v26 = vld [vmem:[#allocation46_spill] sm:$0xff]  ;;  %v16000_v0 = vld [vmem:[#allocation36_spill] sm:$0xff] }
 0x7b3   :  { %11576 = vmatprep.subr.bf16.mxu0 %v15992_v5  ;;  %11603 = vmatprep.subr.bf16.mxu1 %v15561_v21  ;;  %v16001_v5 = vld [vmem:[#allocation47_spill] sm:$0xff] }
 0x7b6   :  { %11578 = vmatpush1.bf16.msra.mxu0 %v15993_v30  ;;  %11605 = vmatpush3.bf16.msra.mxu1 %v15994_v42  ;;  %v16002_v30 = vld [vmem:[#allocation48_spill] sm:$0xff]  ;;  %v16003_v42 = vld [vmem:[#allocation39_spill] sm:$0xff] }
 0x7b7   :  { %11580 = vmatprep.subr.bf16.mxu0 %v15995_v25  ;;  %11606 = vmatprep.subr.bf16.mxu1 %v15561_v21  ;;  %v16004_v25 = vld [vmem:[#allocation49_spill] sm:$0xff] }
 0x7ba   :  { %11582 = vmatpush1.bf16.msra.mxu0 %v15996_v61  ;;  %11608 = vmatpush3.bf16.msra.mxu1 %v15997_v55 }
 0x7bb   :  { %11584 = vmatprep.subr.bf16.mxu0 %v15998_v35  ;;  %11609 = vmatprep.subr.bf16.mxu1 %v15561_v21  ;;  %v16005_v35 = vld [vmem:[#allocation59_spill] sm:$0xff] }
 0x7be   :  { %11586 = vmatpush1.bf16.msra.mxu0 %v15999_v26  ;;  %11611 = vmatpush3.bf16.msra.mxu1 %v16000_v0 }
 0x7bf   :  { %11588 = vmatprep.subr.bf16.mxu0 %v16001_v5  ;;  %11612 = vmatprep.subr.bf16.mxu1 %v15561_v21 }
 0x7c2   :  { %11590 = vmatpush1.bf16.msra.mxu0 %v16002_v30  ;;  %11614 = vmatpush3.bf16.msra.mxu1 %v16003_v42 }
 0x7c3   :  { %11616 = vmatprep.subr.bf16.mxu1 %v16004_v25  ;;  %11647 = vmatprep.subr.bf16.mxu0 %v15561_v21  ;;  %v14712_v25 = vld [vmem:[%s15203_s4] ss:$0 sm:$0xff] }
 0x7f8   :  { %v4922_v61 = vpop.f32.mrb[12].mxu0  ;;  %v4993_v55 = vpop.f32.mrb[54].mxu1 }
 0x7f9   :  { %v12211_v44 = vadd.f32 %v4922_v61, %v16005_v35  ;;  %v4924_v28 = vpop.f32.mrb[13].mxu0  ;;  %v9208_v26 = vpop.f32.mrb[55].mxu1  ;;  %v5011_v61 = vadd.f32 %v14712_v25, %v4993_v55 }
 0x7fa   :  { %v12212_v0 = vadd.f32 %v4924_v28, %v15914_v59 }
 0x7fb   :  { %v7492_v36 = vmul.f32 -1.442695, %v12211_v44  ;;  %v16006_v44 = vld [vmem:[#allocation56_spill] sm:$0xff] }
 0x7fc   :  { %v7493_v5 = vmul.f32 -1.442695, %v12212_v0 }
 0x7fd   :  { %12477 = vpow2.f32 %v7492_v36 }
 0x7fe   :  { %12479 = vpow2.f32 %v7493_v5 }
 0x807   :  { %v12478_v38 = vpop.eup %12477 }
 0x808   :  { %v5005_v30 = vadd.f32 1.0, %v12478_v38  ;;  %v12480_v42 = vpop.eup %12479 }
 0x809   :  { %v5006_v54 = vadd.f32 1.0, %v12480_v42 }
 0x80a   :  { %12481 = vrcp.f32 %v5005_v30 }
 0x80b   :  { %12483 = vrcp.f32 %v5006_v54 }
 0x814   :  { %v12482_v35 = vpop.eup %12481 }
 0x815   :  { %v5012_v26 = vmul.f32 %v12482_v35, %v5011_v61  ;;  %v12484_v38 = vpop.eup %12483 }
 0x816   :  { %v5015_v5 = vsub.f32 1.0, %v12484_v38  ;;  %v5017_v59 = vmul.f32 %v12484_v38, %v14497_v49  ;;  %v16007_v38 = vld [vmem:[#allocation74_spill] sm:$0xff] }
 0x817   :  { %v5013_v28 = vadd.f32 %v5012_v26, %v16006_v44 }
 0x818   :  { %v14716_v36 = vpop.f32.mrb[52].mxu0 }
 0x819   :  { %12485 = vtanh.f32 %v5013_v28  ;;  %v9243_v0 = vpop.f32.mrb[53].mxu0 }
 0x823   :  { %v12486_v30 = vpop.eup %12485 }
 0x824   :  { %v5016_v42 = vmul.f32 %v12486_v30, %v5015_v5  ;;  %v16008_v5 = vld [vmem:[#allocation75_spill] sm:$0xff]  ;;  %v16009_v30 = vld [vmem:[#allocation76_spill] sm:$0xff] }
 0x826   :  { %v14719_v31 = vadd.f32 %v5017_v59, %v5016_v42  ;;  %v16010_v42 = vld [vmem:[#allocation77_spill] sm:$0xff] }
 0x828   :  { %5698 = vmatmul.mubr.f32.vlgmr.msra.gmra.mrb[14].mxu0 %v14719_v31  ;;  %9382 = vmatmul.mubr.f32.vlgmr.msra.gmra.mrb[60].mxu1 %v14719_v31 }
 0x829   :  { %11618 = vmatpush1.bf16.msra.mxu1 %v13297_v56  ;;  %11649 = vmatpush3.bf16.msra.mxu0 %v13299_v58 }
 0x82a   :  { %11620 = vmatprep.subr.bf16.mxu1 %v13303_v17  ;;  %11650 = vmatprep.subr.bf16.mxu0 %v15561_v21 }
 0x82b   :  { %5860 = vmatprep.mubr.f32.mxu1 %v15543_v43  ;;  %9416 = vmatprep.mubr.msk.f32.mxu0 %vm12804_vm0, %v15543_v43 }
 0x82d   :  { %11622 = vmatpush1.bf16.msra.mxu1 %v13309_v47  ;;  %11652 = vmatpush3.bf16.msra.mxu0 %v13311_v45 }
 0x82e   :  { %11624 = vmatprep.subr.bf16.mxu1 %v13315_v11  ;;  %11653 = vmatprep.subr.bf16.mxu0 %v15561_v21 }
 0x831   :  { %11626 = vmatpush1.bf16.msra.mxu1 %v13322_v20  ;;  %11655 = vmatpush3.bf16.msra.mxu0 %v13324_v48 }
 0x832   :  { %11628 = vmatprep.subr.bf16.mxu1 %v13328_v50  ;;  %11656 = vmatprep.subr.bf16.mxu0 %v15561_v21 }
 0x835   :  { %11630 = vmatpush1.bf16.msra.mxu1 %v13332_v16  ;;  %11658 = vmatpush3.bf16.msra.mxu0 %v13334_v4 }
 0x836   :  { %11632 = vmatprep.subr.bf16.mxu1 %v13338_v10  ;;  %11659 = vmatprep.subr.bf16.mxu0 %v15561_v21 }
 0x838   :  { %v5226_v59 = vpop.f32.mrb[56].mxu1  ;;  %v5297_v54 = vpop.f32.mrb[54].mxu0 }
 0x839   :  { %v12233_v49 = vadd.f32 %v5226_v59, %v13536_v40  ;;  %v5228_v55 = vpop.f32.mrb[57].mxu1  ;;  %v9278_v35 = vpop.f32.mrb[55].mxu0  ;;  %11634 = vmatpush1.bf16.msra.mxu1 %v15564_v12  ;;  %11661 = vmatpush3.bf16.msra.mxu0 %v15565_v60 }
 0x83a   :  { %11636 = vmatprep.subr.bf16.mxu1 %v15648_v46  ;;  %11662 = vmatprep.subr.bf16.mxu0 %v15561_v21  ;;  %v12234_v26 = vadd.f32 %v5228_v55, %v15649_v3  ;;  %v16012_v35 = vld [vmem:[#allocation79_spill] sm:$0xff]  ;;  %v5157_v3 = vadd.f32 %v14716_v36, %v15842_v29 }
 0x83b   :  { %v7494_v61 = vmul.f32 -1.442695, %v12233_v49  ;;  %v16011_v49 = vld [vmem:[#allocation78_spill] sm:$0xff]  ;;  %v16019_v36 = vld [vmem:[#allocation87_spill] sm:$0xff] }
 0x83c   :  { %v7495_v44 = vmul.f32 -1.442695, %v12234_v26  ;;  %v16014_v26 = vld [vmem:[#allocation81_spill] sm:$0xff] }
 0x83d   :  { %12487 = vpow2.f32 %v7494_v61  ;;  %11638 = vmatpush1.bf16.msra.mxu1 %v15650_v15  ;;  %11664 = vmatpush3.bf16.msra.mxu0 %v15737_v1  ;;  %v16013_v61 = vld [vmem:[#allocation80_spill] sm:$0xff] }
 0x83e   :  { %11640 = vmatprep.subr.bf16.mxu1 %v15738_v6  ;;  %11665 = vmatprep.subr.bf16.mxu0 %v15561_v21  ;;  %12489 = vpow2.f32 %v7495_v44  ;;  %v16015_v44 = vld [vmem:[#allocation58_spill] sm:$0xff] }
 0x841   :  { %11642 = vmatpush1.bf16.msra.mxu1 %v15653_v2  ;;  %11667 = vmatpush3.bf16.msra.mxu0 %v15739_v18 }
 0x842   :  { %11644 = vmatprep.subr.bf16.mxu1 %v15916_v57  ;;  %11668 = vmatprep.subr.bf16.mxu0 %v15561_v21 }
 0x845   :  { %11646 = vmatpush1.bf16.msra.mxu1 %v15917_v62  ;;  %11670 = vmatpush3.bf16.msra.mxu0 %v15918_v23 }
 0x846   :  { %11672 = vmatprep.subr.bf16.mxu1 %v15919_v27  ;;  %11703 = vmatprep.subr.bf16.mxu0 %v15561_v21 }
 0x847   :  { %v12488_v28 = vpop.eup %12487 }
 0x848   :  { %v5309_v0 = vadd.f32 1.0, %v12488_v28  ;;  %5861 = vmatmul.mubr.f32.vlgmr.msra.gmra.mrb[62].mxu1 %v14719_v31  ;;  %9417 = vmatmul.mubr.f32.vlgmr.msra.gmra.mrb[60].mxu0 %v14719_v31  ;;  %v12490_v59 = vpop.eup %12489  ;;  %v5315_v28 = vadd.f32 %v16015_v44, %v5297_v54  ;;  %v16017_v54 = vld [vmem:[#allocation85_spill] sm:$0xff]  ;;  %v16018_v44 = vld [vmem:[#allocation86_spill] sm:$0xff] }
 0x849   :  { %11674 = vmatpush1.bf16.msra.mxu1 %v15920_v8  ;;  %11705 = vmatpush3.bf16.msra.mxu0 %v16007_v38  ;;  %v5310_v55 = vadd.f32 1.0, %v12490_v59  ;;  %v16016_v59 = vld [vmem:[#allocation84_spill] sm:$0xff] }
 0x84a   :  { %12491 = vrcp.f32 %v5309_v0  ;;  %11676 = vmatprep.subr.bf16.mxu1 %v16008_v5  ;;  %11706 = vmatprep.subr.bf16.mxu0 %v15561_v21 }
 0x84b   :  { %6001 = vmatprep.mubr.f32.mxu1 %v15543_v43  ;;  %9451 = vmatprep.mubr.msk.f32.mxu0 %vm12804_vm0, %v15543_v43  ;;  %12493 = vrcp.f32 %v5310_v55  ;;  %v16020_v55 = vld [vmem:[#allocation88_spill] sm:$0xff] }
 0x84d   :  { %11678 = vmatpush1.bf16.msra.mxu1 %v16009_v30  ;;  %11708 = vmatpush3.bf16.msra.mxu0 %v16010_v42 }
 0x84e   :  { %11680 = vmatprep.subr.bf16.mxu1 %v16011_v49  ;;  %11709 = vmatprep.subr.bf16.mxu0 %v15561_v21 }
 0x851   :  { %11682 = vmatpush1.bf16.msra.mxu1 %v16012_v35  ;;  %11711 = vmatpush3.bf16.msra.mxu0 %v16013_v61 }
 0x852   :  { %11684 = vmatprep.subr.bf16.mxu1 %v16014_v26  ;;  %11712 = vmatprep.subr.bf16.mxu0 %v15561_v21 }
 0x854   :  { %v12492_v0 = vpop.eup %12491 }
 0x855   :  { %v5316_v40 = vmul.f32 %v12492_v0, %v5315_v28  ;;  %11686 = vmatpush1.bf16.msra.mxu1 %v15843_v63  ;;  %11714 = vmatpush3.bf16.msra.mxu0 %v15930_v7  ;;  %v16021_v28 = vld [vmem:[#allocation89_spill] sm:$0xff]  ;;  %v16022_v0 = vld [vmem:[#allocation90_spill] sm:$0xff] }
 0x856   :  { %11688 = vmatprep.subr.bf16.mxu1 %v16016_v59  ;;  %11715 = vmatprep.subr.bf16.mxu0 %v15561_v21 }
 0x857   :  { %v5317_v61 = vadd.f32 %v5316_v40, %v5157_v3  ;;  %v12494_v40 = vpop.eup %12493  ;;  %v16023_v3 = vld [vmem:[#allocation92_spill] sm:$0xff] }
 0x858   :  { %v14784_v26 = vpop.f32.mrb[56].mxu0 }
 0x859   :  { %12495 = vtanh.f32 %v5317_v61  ;;  %v9313_v35 = vpop.f32.mrb[57].mxu0  ;;  %11690 = vmatpush1.bf16.msra.mxu1 %v16017_v54  ;;  %11717 = vmatpush3.bf16.msra.mxu0 %v16018_v44  ;;  %v16024_v61 = vld [vmem:[#allocation93_spill] sm:$0xff]  ;;  %v16026_v44 = vld [vmem:[#allocation98_spill] sm:$0xff] }
 0x85a   :  { %11692 = vmatprep.subr.bf16.mxu1 %v16019_v36  ;;  %11718 = vmatprep.subr.bf16.mxu0 %v15561_v21  ;;  %v5319_v35 = vsub.f32 1.0, %v12494_v40 }
 0x85d   :  { %11694 = vmatpush1.bf16.msra.mxu1 %v16020_v55  ;;  %11720 = vmatpush3.bf16.msra.mxu0 %v16021_v28  ;;  %v5321_v55 = vmul.f32 %v12494_v40, %v14584_v13  ;;  %v16025_v28 = vld [vmem:[#allocation95_spill] sm:$0xff]  ;;  %v16030_v13 = vld [vmem:[#allocation102_spill] sm:$0xff]  ;;  %v16033_v40 = vld [vmem:[#allocation105_spill] sm:$0xff] }
 0x85e   :  { %11696 = vmatprep.subr.bf16.mxu1 %v16022_v0  ;;  %11721 = vmatprep.subr.bf16.mxu0 %v15561_v21 }
 0x861   :  { %11698 = vmatpush1.bf16.msra.mxu1 %v15852_v32  ;;  %11723 = vmatpush3.bf16.msra.mxu0 %v16023_v3  ;;  %v16028_v3 = vld [vmem:[#allocation100_spill] sm:$0xff] }
 0x862   :  { %11700 = vmatprep.subr.bf16.mxu1 %v16024_v61  ;;  %11724 = vmatprep.subr.bf16.mxu0 %v15561_v21  ;;  %v16027_v61 = vld [vmem:[#allocation99_spill] sm:$0xff] }
 0x863   :  { %v12496_v29 = vpop.eup %12495 }
 0x864   :  { %v5320_v36 = vmul.f32 %v12496_v29, %v5319_v35  ;;  %v16029_v29 = vld [vmem:[#allocation101_spill] sm:$0xff]  ;;  %v16034_v35 = vld [vmem:[#allocation107_spill] sm:$0xff] }
 0x865   :  { %11702 = vmatpush1.bf16.msra.mxu1 %v15940_v19  ;;  %11726 = vmatpush3.bf16.msra.mxu0 %v16025_v28 }
 0x866   :  { %v14801_v0 = vadd.f32 %v5321_v55, %v5320_v36  ;;  %11728 = vmatprep.subr.bf16.mxu1 %v16026_v44  ;;  %11759 = vmatprep.subr.bf16.mxu0 %v15561_v21  ;;  %v16031_v36 = vld [vmem:[#allocation103_spill] sm:$0xff]  ;;  %v16032_v55 = vld [vmem:[#allocation104_spill] sm:$0xff] }
 0x868   :  { %6002 = vmatmul.mubr.f32.vlgmr.msra.gmra.mrb[62].mxu1 %v14801_v0  ;;  %9452 = vmatmul.mubr.f32.vlgmr.msra.gmra.mrb[62].mxu0 %v14801_v0 }
 0x869   :  { %11730 = vmatpush1.bf16.msra.mxu1 %v16027_v61  ;;  %11761 = vmatpush3.bf16.msra.mxu0 %v16028_v3  ;;  %v16036_v3 = vld [vmem:[#allocation109_spill] sm:$0xff]  ;;  %v16037_v61 = vld [vmem:[#allocation110_spill] sm:$0xff] }
 0x86a   :  { %11732 = vmatprep.subr.bf16.mxu1 %v16029_v29  ;;  %11762 = vmatprep.subr.bf16.mxu0 %v15561_v21  ;;  %v16035_v29 = vld [vmem:[#allocation108_spill] sm:$0xff] }
 0x86b   :  { %6164 = vmatprep.mubr.f32.mxu1 %v15543_v43  ;;  %9486 = vmatprep.mubr.msk.f32.mxu0 %vm12804_vm0, %v15543_v43 }
 0x86d   :  { %11734 = vmatpush1.bf16.msra.mxu1 %v16030_v13  ;;  %11764 = vmatpush3.bf16.msra.mxu0 %v16031_v36 }
 0x86e   :  { %11736 = vmatprep.subr.bf16.mxu1 %v16032_v55  ;;  %11765 = vmatprep.subr.bf16.mxu0 %v15561_v21 }
 0x871   :  { %11738 = vmatpush1.bf16.msra.mxu1 %v16033_v40  ;;  %11767 = vmatpush3.bf16.msra.mxu0 %v15950_v22 }
 0x872   :  { %11740 = vmatprep.subr.bf16.mxu1 %v16034_v35  ;;  %11768 = vmatprep.subr.bf16.mxu0 %v15561_v21 }
 0x875   :  { %11742 = vmatpush1.bf16.msra.mxu1 %v16035_v29  ;;  %11770 = vmatpush3.bf16.msra.mxu0 %v16036_v3 }
 0x876   :  { %11744 = vmatprep.subr.bf16.mxu1 %v16037_v61  ;;  %11771 = vmatprep.subr.bf16.mxu0 %v15561_v21  ;;  %v16038_v61 = vld [vmem:[#allocation116_spill] sm:$0xff] }
 0x878   :  { %v5530_v36 = vpop.f32.mrb[58].mxu1  ;;  %v5601_v55 = vpop.f32.mrb[58].mxu0 }
 0x879   :  { %v12235_v13 = vadd.f32 %v5530_v36, %v13939_v24  ;;  %v5532_v44 = vpop.f32.mrb[59].mxu1  ;;  %v9348_v40 = vpop.f32.mrb[59].mxu0  ;;  %11746 = vmatpush1.bf16.msra.mxu1 %v15782_v9  ;;  %11773 = vmatpush3.bf16.msra.mxu0 %v15870_v51 }
 0x87a   :  { %11748 = vmatprep.subr.bf16.mxu1 %v15871_v52  ;;  %11774 = vmatprep.subr.bf16.mxu0 %v15561_v21  ;;  %v12236_v3 = vadd.f32 %v5532_v44, %v15785_v41  ;;  %v16039_v44 = vld [vmem:[#allocation121_spill] sm:$0xff] }
 0x87b   :  { %v7496_v29 = vmul.f32 -1.442695, %v12235_v13 }
 0x87c   :  { %v7497_v36 = vmul.f32 -1.442695, %v12236_v3  ;;  %v16041_v3 = vld [vmem:[#allocation123_spill] sm:$0xff] }
 0x87d   :  { %12497 = vpow2.f32 %v7496_v29  ;;  %11750 = vmatpush1.bf16.msra.mxu1 %v15786_v14  ;;  %11776 = vmatpush3.bf16.msra.mxu0 %v15955_v33  ;;  %v16040_v29 = vld [vmem:[#allocation122_spill] sm:$0xff]  ;;  %v16055_v33 = vld [vmem:[#allocation135_spill] sm:$0xff]  ;;  %v16056_v14 = vld [vmem:[#allocation136_spill] sm:$0xff] }
 0x87e   :  { %11752 = vmatprep.subr.bf16.mxu1 %v16038_v61  ;;  %11777 = vmatprep.subr.bf16.mxu0 %v15561_v21  ;;  %12499 = vpow2.f32 %v7497_v36  ;;  %v16043_v36 = vld [vmem:[#allocation125_spill] sm:$0xff] }
 0x881   :  { %11754 = vmatpush1.bf16.msra.mxu1 %v15789_v34  ;;  %11779 = vmatpush3.bf16.msra.mxu0 %v15790_v53 }
 0x882   :  { %11756 = vmatprep.subr.bf16.mxu1 %v15957_v39  ;;  %11780 = vmatprep.subr.bf16.mxu0 %v15561_v21  ;;  %v16042_v39 = vld [vmem:[#allocation124_spill] sm:$0xff] }
 0x885   :  { %11758 = vmatpush1.bf16.msra.mxu1 %v15875_v37  ;;  %11782 = vmatpush3.bf16.msra.mxu0 %v16039_v44  ;;  %v16046_v37 = vld [vmem:[#allocation128_spill] sm:$0xff] }
 0x886   :  { %11784 = vmatprep.subr.bf16.mxu1 %v16040_v29  ;;  %11815 = vmatprep.subr.bf16.mxu0 %v15561_v21  ;;  %v16044_v29 = vld [vmem:[#allocation126_spill] sm:$0xff] }
 0x887   :  { %v12498_v13 = vpop.eup %12497 }
 0x888   :  { %v5613_v40 = vadd.f32 1.0, %v12498_v13  ;;  %6165 = vmatmul.mubr.f32.vlgmr.msra.gmra.mrb[64].mxu1 %v14801_v0  ;;  %9487 = vmatmul.mubr.f32.vlgmr.msra.gmra.mrb[64].mxu0 %v14801_v0  ;;  %v16045_v13 = vld [vmem:[#allocation127_spill] sm:$0xff]  ;;  %v12500_v44 = vpop.eup %12499 }
 0x889   :  { %11786 = vmatpush1.bf16.msra.mxu1 %v16041_v3  ;;  %11817 = vmatpush3.bf16.msra.mxu0 %v16042_v39  ;;  %v5614_v39 = vadd.f32 1.0, %v12500_v44  ;;  %v16049_v3 = vld [vmem:[#allocation131_spill] sm:$0xff] }
 0x88a   :  { %12501 = vrcp.f32 %v5613_v40  ;;  %11788 = vmatprep.subr.bf16.mxu1 %v16043_v36  ;;  %11818 = vmatprep.subr.bf16.mxu0 %v15561_v21  ;;  %v16047_v40 = vld [vmem:[#allocation129_spill] sm:$0xff]  ;;  %v16048_v36 = vld [vmem:[#allocation130_spill] sm:$0xff] }
 0x88b   :  { %6305 = vmatprep.mubr.f32.mxu1 %v15543_v43  ;;  %9521 = vmatprep.mubr.msk.f32.mxu0 %vm12804_vm0, %v15543_v43  ;;  %12503 = vrcp.f32 %v5614_v39  ;;  %v16059_v39 = vld [vmem:[#allocation139_spill] sm:$0xff] }
 0x88d   :  { %11790 = vmatpush1.bf16.msra.mxu1 %v16044_v29  ;;  %11820 = vmatpush3.bf16.msra.mxu0 %v16045_v13  ;;  %v14864_v29 = vld [vmem:[%s15211_s12] ss:$0 sm:$0xff] }
 0x88e   :  { %11792 = vmatprep.subr.bf16.mxu1 %v16046_v37  ;;  %11821 = vmatprep.subr.bf16.mxu0 %v15561_v21  ;;  %16050 = vst [vmem:[#allocation51_spill] sm:$0xff] %v14864_v29  ;;  %v5619_v13 = vadd.f32 %v14864_v29, %v5601_v55  ;;  %v16051_v37 = vld [vmem:[#allocation64_spill] sm:$0xff]  ;;  %v16057_v55 = vld [vmem:[#allocation137_spill] sm:$0xff] }
 0x88f   :  { %v5461_v34 = vadd.f32 %v14784_v26, %v16051_v37  ;;  %v16060_v26 = vld [vmem:[#allocation140_spill] sm:$0xff] }
 0x891   :  { %11794 = vmatpush1.bf16.msra.mxu1 %v16047_v40  ;;  %11823 = vmatpush3.bf16.msra.mxu0 %v16048_v36  ;;  %v16052_v40 = vld [vmem:[#allocation132_spill] sm:$0xff]  ;;  %v16053_v36 = vld [vmem:[#allocation133_spill] sm:$0xff] }
 0x892   :  { %11796 = vmatprep.subr.bf16.mxu1 %v16049_v3  ;;  %11824 = vmatprep.subr.bf16.mxu0 %v15561_v21  ;;  %v16054_v3 = vld [vmem:[#allocation134_spill] sm:$0xff] }
 0x894   :  { %v12502_v53 = vpop.eup %12501 }
 0x895   :  { %v5620_v44 = vmul.f32 %v12502_v53, %v5619_v13  ;;  %11798 = vmatpush1.bf16.msra.mxu1 %v16052_v40  ;;  %11826 = vmatpush3.bf16.msra.mxu0 %v16053_v36  ;;  %v16058_v53 = vld [vmem:[#allocation138_spill] sm:$0xff]  ;;  %v12504_v13 = vpop.eup %12503  ;;  %v16065_v36 = vld [vmem:[#allocation144_spill] sm:$0xff]  ;;  %v16067_v40 = vld [vmem:[#allocation49_spill] sm:$0xff] }
 0x896   :  { %11800 = vmatprep.subr.bf16.mxu1 %v16054_v3  ;;  %11827 = vmatprep.subr.bf16.mxu0 %v15561_v21  ;;  %v16061_v3 = vld [vmem:[#allocation141_spill] sm:$0xff] }
 0x897   :  { %v5621_v61 = vadd.f32 %v5620_v44, %v5461_v34  ;;  %v16062_v34 = vld [vmem:[#allocation142_spill] sm:$0xff]  ;;  %v5623_v44 = vsub.f32 1.0, %v12504_v13 }
 0x899   :  { %12505 = vtanh.f32 %v5621_v61  ;;  %11802 = vmatpush1.bf16.msra.mxu1 %v16055_v33  ;;  %11829 = vmatpush3.bf16.msra.mxu0 %v16056_v14  ;;  %v16063_v61 = vld [vmem:[#allocation143_spill] sm:$0xff]  ;;  %v16064_v33 = vld [vmem:[#allocation50_spill] sm:$0xff] }
 0x89a   :  { %11804 = vmatprep.subr.bf16.mxu1 %v16057_v55  ;;  %11830 = vmatprep.subr.bf16.mxu0 %v15561_v21 }
 0x89d   :  { %11806 = vmatpush1.bf16.msra.mxu1 %v16058_v53  ;;  %11832 = vmatpush3.bf16.msra.mxu0 %v16059_v39  ;;  %v5625_v53 = vmul.f32 %v12504_v13, %v16064_v33  ;;  %v16066_v39 = vld [vmem:[#allocation145_spill] sm:$0xff]  ;;  %v16077_v13 = vld [vmem:[#allocation87_spill] sm:$0xff] }
 0x89e   :  { %11808 = vmatprep.subr.bf16.mxu1 %v16060_v26  ;;  %11833 = vmatprep.subr.bf16.mxu0 %v15561_v21 }
 0x8a1   :  { %11810 = vmatpush1.bf16.msra.mxu1 %v16061_v3  ;;  %11835 = vmatpush3.bf16.msra.mxu0 %v16062_v34 }
 0x8a2   :  { %11812 = vmatprep.subr.bf16.mxu1 %v16063_v61  ;;  %11836 = vmatprep.subr.bf16.mxu0 %v15561_v21 }
 0x8a3   :  { %v12506_v55 = vpop.eup %12505 }
 0x8a4   :  { %v5624_v14 = vmul.f32 %v12506_v55, %v5623_v44 }
 0x8a5   :  { %11814 = vmatpush1.bf16.msra.mxu1 %v16065_v36  ;;  %11838 = vmatpush3.bf16.msra.mxu0 %v16066_v39 }
 0x8a6   :  { %v14888_v26 = vadd.f32 %v5625_v53, %v5624_v14  ;;  %11840 = vmatprep.subr.bf16.mxu1 %v16067_v40  ;;  %11871 = vmatprep.subr.bf16.mxu0 %v15561_v21  ;;  %v16076_v53 = vld [vmem:[#allocation86_spill] sm:$0xff] }
 0x8a8   :  { %6306 = vmatmul.mubr.f32.vlgmr.msra.gmra.mrb[64].mxu1 %v14888_v26  ;;  %9522 = vmatmul.mubr.f32.vlgmr.msra.gmra.mrb[66].mxu0 %v14888_v26 }
 0x8a9   :  { %11842 = vmatpush1.bf16.msra.mxu1 %v13297_v56  ;;  %11873 = vmatpush3.bf16.msra.mxu0 %v13299_v58 }
 0x8aa   :  { %11844 = vmatprep.subr.bf16.mxu1 %v13303_v17  ;;  %11874 = vmatprep.subr.bf16.mxu0 %v15561_v21  ;;  %v16068_v17 = vld [vmem:[#allocation59_spill] sm:$0xff] }
 0x8ab   :  { %6468 = vmatprep.mubr.f32.mxu1 %v15543_v43  ;;  %9556 = vmatprep.mubr.msk.f32.mxu0 %vm12804_vm0, %v15543_v43 }
 0x8ad   :  { %11846 = vmatpush1.bf16.msra.mxu1 %v13309_v47  ;;  %11876 = vmatpush3.bf16.msra.mxu0 %v13311_v45 }
 0x8ae   :  { %11848 = vmatprep.subr.bf16.mxu1 %v13315_v11  ;;  %11877 = vmatprep.subr.bf16.mxu0 %v15561_v21 }
 0x8b1   :  { %11850 = vmatpush1.bf16.msra.mxu1 %v13322_v20  ;;  %11879 = vmatpush3.bf16.msra.mxu0 %v13324_v48  ;;  %v16069_v48 = vld [vmem:[#allocation60_spill] sm:$0xff] }
 0x8b2   :  { %11852 = vmatprep.subr.bf16.mxu1 %v13328_v50  ;;  %11880 = vmatprep.subr.bf16.mxu0 %v15561_v21 }
 0x8b5   :  { %11854 = vmatpush1.bf16.msra.mxu1 %v13332_v16  ;;  %11882 = vmatpush3.bf16.msra.mxu0 %v13334_v4 }
 0x8b6   :  { %11856 = vmatprep.subr.bf16.mxu1 %v13338_v10  ;;  %11883 = vmatprep.subr.bf16.mxu0 %v15561_v21 }
 0x8b9   :  { %11858 = vmatpush1.bf16.msra.mxu1 %v15564_v12  ;;  %11885 = vmatpush3.bf16.msra.mxu0 %v15565_v60 }
 0x8ba   :  { %11860 = vmatprep.subr.bf16.mxu1 %v15648_v46  ;;  %11886 = vmatprep.subr.bf16.mxu0 %v15561_v21 }
 0x8bd   :  { %11862 = vmatpush1.bf16.msra.mxu1 %v15650_v15  ;;  %11888 = vmatpush3.bf16.msra.mxu0 %v15737_v1  ;;  %v16070_v1 = vld [vmem:[#allocation55_spill] sm:$0xff] }
 0x8be   :  { %11864 = vmatprep.subr.bf16.mxu1 %v15738_v6  ;;  %11889 = vmatprep.subr.bf16.mxu0 %v15561_v21 }
 0x8c1   :  { %11866 = vmatpush1.bf16.msra.mxu1 %v15653_v2  ;;  %11891 = vmatpush3.bf16.msra.mxu0 %v15739_v18 }
 0x8c2   :  { %11868 = vmatprep.subr.bf16.mxu1 %v15916_v57  ;;  %11892 = vmatprep.subr.bf16.mxu0 %v15561_v21 }
 0x8c5   :  { %11870 = vmatpush1.bf16.msra.mxu1 %v15917_v62  ;;  %11894 = vmatpush3.bf16.msra.mxu0 %v15918_v23 }
 0x8c6   :  { %11896 = vmatprep.subr.bf16.mxu1 %v15919_v27  ;;  %11927 = vmatprep.subr.bf16.mxu0 %v15561_v21 }
 0x8fb   :  { %v5699_v56 = vpop.f32.mrb[14].mxu0  ;;  %v5770_v58 = vpop.f32.mrb[60].mxu1 }
 0x8fc   :  { %v12213_v47 = vadd.f32 %v5699_v56, %v16068_v17  ;;  %v5701_v45 = vpop.f32.mrb[15].mxu0  ;;  %v9383_v11 = vpop.f32.mrb[61].mxu1  ;;  %v5788_v46 = vadd.f32 %v14712_v25, %v5770_v58  ;;  %v16074_v25 = vld [vmem:[#allocation81_spill] sm:$0xff]  ;;  %v16081_v58 = vld [vmem:[#allocation90_spill] sm:$0xff] }
 0x8fd   :  { %v12214_v50 = vadd.f32 %v5701_v45, %v16069_v48  ;;  %v16080_v56 = vld [vmem:[#allocation89_spill] sm:$0xff]  ;;  %v16084_v45 = vld [vmem:[#allocation98_spill] sm:$0xff] }
 0x8fe   :  { %v7498_v20 = vmul.f32 -1.442695, %v12213_v47  ;;  %v16083_v47 = vld [vmem:[#allocation93_spill] sm:$0xff] }
 0x8ff   :  { %v7499_v16 = vmul.f32 -1.442695, %v12214_v50  ;;  %v14980_v50 = vld [vmem:[%s15207_s8] ss:$0 sm:$0xff] }
 0x900   :  { %12507 = vpow2.f32 %v7498_v20 }
 0x901   :  { %12509 = vpow2.f32 %v7499_v16 }
 0x90a   :  { %v12508_v4 = vpop.eup %12507 }
 0x90b   :  { %v5782_v10 = vadd.f32 1.0, %v12508_v4  ;;  %v12510_v12 = vpop.eup %12509 }
 0x90c   :  { %v5783_v60 = vadd.f32 1.0, %v12510_v12 }
 0x90d   :  { %12511 = vrcp.f32 %v5782_v10 }
 0x90e   :  { %12513 = vrcp.f32 %v5783_v60 }
 0x917   :  { %v12512_v15 = vpop.eup %12511 }
 0x918   :  { %v5789_v2 = vmul.f32 %v12512_v15, %v5788_v46  ;;  %v12514_v57 = vpop.eup %12513 }
 0x919   :  { %v5792_v62 = vsub.f32 1.0, %v12514_v57  ;;  %v5794_v33 = vmul.f32 %v12514_v57, %v14719_v31  ;;  %v16072_v31 = vld [vmem:[#allocation79_spill] sm:$0xff] }
 0x91a   :  { %v5790_v6 = vadd.f32 %v5789_v2, %v16070_v1 }
 0x91b   :  { %v14933_v18 = vpop.f32.mrb[60].mxu0 }
 0x91c   :  { %12515 = vtanh.f32 %v5790_v6  ;;  %v9418_v14 = vpop.f32.mrb[61].mxu0 }
 0x926   :  { %v12516_v23 = vpop.eup %12515 }
 0x927   :  { %v5793_v27 = vmul.f32 %v12516_v23, %v5792_v62  ;;  %v16087_v62 = vld [vmem:[#allocation100_spill] sm:$0xff]  ;;  %v16088_v23 = vld [vmem:[#allocation101_spill] sm:$0xff] }
 0x929   :  { %v14936_v40 = vadd.f32 %v5794_v33, %v5793_v27  ;;  %v16090_v27 = vld [vmem:[#allocation103_spill] sm:$0xff]  ;;  %v16091_v33 = vld [vmem:[#allocation104_spill] sm:$0xff] }
 0x92b   :  { %16071 = vst [vmem:[#allocation65_spill] sm:$0xff] %v14936_v40  ;;  %6469 = vmatmul.mubr.f32.vlgmr.msra.gmra.mrb[66].mxu1 %v14936_v40  ;;  %9557 = vmatmul.mubr.f32.vlgmr.msra.gmra.mrb[68].mxu0 %v14936_v40  ;;  %v16118_v40 = vld [vmem:[#allocation136_spill] sm:$0xff] }
 0x92c   :  { %11898 = vmatpush1.bf16.msra.mxu1 %v15920_v8  ;;  %11929 = vmatpush3.bf16.msra.mxu0 %v16007_v38  ;;  %v16073_v8 = vld [vmem:[#allocation80_spill] sm:$0xff] }
 0x92d   :  { %11900 = vmatprep.subr.bf16.mxu1 %v16008_v5  ;;  %11930 = vmatprep.subr.bf16.mxu0 %v15561_v21 }
 0x92e   :  { %6609 = vmatprep.mubr.f32.mxu1 %v15543_v43  ;;  %9591 = vmatprep.mubr.msk.f32.mxu0 %vm12804_vm0, %v15543_v43 }
 0x930   :  { %11902 = vmatpush1.bf16.msra.mxu1 %v16009_v30  ;;  %11932 = vmatpush3.bf16.msra.mxu0 %v16010_v42  ;;  %v16075_v30 = vld [vmem:[#allocation96_spill] sm:$0xff] }
 0x931   :  { %11904 = vmatprep.subr.bf16.mxu1 %v16011_v49  ;;  %11933 = vmatprep.subr.bf16.mxu0 %v15561_v21 }
 0x934   :  { %11906 = vmatpush1.bf16.msra.mxu1 %v16072_v31  ;;  %11935 = vmatpush3.bf16.msra.mxu0 %v16073_v8  ;;  %v16092_v31 = vld [vmem:[#allocation105_spill] sm:$0xff]  ;;  %v16093_v8 = vld [vmem:[#allocation108_spill] sm:$0xff] }
 0x935   :  { %11908 = vmatprep.subr.bf16.mxu1 %v16074_v25  ;;  %11936 = vmatprep.subr.bf16.mxu0 %v15561_v21  ;;  %v16094_v25 = vld [vmem:[#allocation109_spill] sm:$0xff] }
 0x938   :  { %11910 = vmatpush1.bf16.msra.mxu1 %v15843_v63  ;;  %11938 = vmatpush3.bf16.msra.mxu0 %v15930_v7  ;;  %v16078_v7 = vld [vmem:[#allocation97_spill] sm:$0xff] }
 0x939   :  { %11912 = vmatprep.subr.bf16.mxu1 %v16016_v59  ;;  %11939 = vmatprep.subr.bf16.mxu0 %v15561_v21  ;;  %v16079_v59 = vld [vmem:[#allocation88_spill] sm:$0xff] }
 0x93b   :  { %v6003_v38 = vpop.f32.mrb[62].mxu1  ;;  %v6074_v5 = vpop.f32.mrb[62].mxu0 }
 0x93c   :  { %v12237_v42 = vadd.f32 %v6003_v38, %v16075_v30  ;;  %v6005_v49 = vpop.f32.mrb[63].mxu1  ;;  %v9453_v55 = vpop.f32.mrb[63].mxu0  ;;  %11914 = vmatpush1.bf16.msra.mxu1 %v16017_v54  ;;  %11941 = vmatpush3.bf16.msra.mxu0 %v16076_v53  ;;  %v16082_v54 = vld [vmem:[#allocation92_spill] sm:$0xff]  ;;  %v6092_v16 = vadd.f32 %v14980_v50, %v6074_v5  ;;  %v16095_v38 = vld [vmem:[#allocation110_spill] sm:$0xff] }
 0x93d   :  { %11916 = vmatprep.subr.bf16.mxu1 %v16077_v13  ;;  %11942 = vmatprep.subr.bf16.mxu0 %v15561_v21  ;;  %v12238_v44 = vadd.f32 %v6005_v49, %v16078_v7 }
 0x93e   :  { %v7500_v63 = vmul.f32 -1.442695, %v12237_v42 }
 0x93f   :  { %v7501_v17 = vmul.f32 -1.442695, %v12238_v44  ;;  %v16096_v44 = vld [vmem:[#allocation114_spill] sm:$0xff] }
 0x940   :  { %12517 = vpow2.f32 %v7500_v63  ;;  %11918 = vmatpush1.bf16.msra.mxu1 %v16079_v59  ;;  %11944 = vmatpush3.bf16.msra.mxu0 %v16080_v56  ;;  %v16097_v59 = vld [vmem:[#allocation115_spill] sm:$0xff]  ;;  %v16098_v56 = vld [vmem:[#allocation116_spill] sm:$0xff] }
 0x941   :  { %11920 = vmatprep.subr.bf16.mxu1 %v16081_v58  ;;  %11945 = vmatprep.subr.bf16.mxu0 %v15561_v21  ;;  %12519 = vpow2.f32 %v7501_v17  ;;  %v16099_v17 = vld [vmem:[#allocation117_spill] sm:$0xff] }
 0x944   :  { %11922 = vmatpush1.bf16.msra.mxu1 %v15852_v32  ;;  %11947 = vmatpush3.bf16.msra.mxu0 %v16082_v54  ;;  %v16100_v54 = vld [vmem:[#allocation118_spill] sm:$0xff] }
 0x945   :  { %11924 = vmatprep.subr.bf16.mxu1 %v16083_v47  ;;  %11948 = vmatprep.subr.bf16.mxu0 %v15561_v21  ;;  %v16101_v47 = vld [vmem:[#allocation119_spill] sm:$0xff] }
 0x948   :  { %11926 = vmatpush1.bf16.msra.mxu1 %v15940_v19  ;;  %11950 = vmatpush3.bf16.msra.mxu0 %v16025_v28  ;;  %v16085_v19 = vld [vmem:[#allocation62_spill] sm:$0xff] }
 0x949   :  { %11952 = vmatprep.subr.bf16.mxu1 %v16084_v45  ;;  %11983 = vmatprep.subr.bf16.mxu0 %v15561_v21  ;;  %v5934_v28 = vadd.f32 %v14933_v18, %v16085_v19  ;;  %v16086_v18 = vld [vmem:[#allocation99_spill] sm:$0xff] }
 0x94a   :  { %v12518_v11 = vpop.eup %12517 }
 0x94b   :  { %v6086_v20 = vadd.f32 1.0, %v12518_v11  ;;  %v12520_v48 = vpop.eup %12519  ;;  %v16102_v11 = vld [vmem:[#allocation120_spill] sm:$0xff] }
 0x94c   :  { %v6087_v32 = vadd.f32 1.0, %v12520_v48  ;;  %v16104_v48 = vld [vmem:[#allocation122_spill] sm:$0xff] }
 0x94d   :  { %12521 = vrcp.f32 %v6086_v20  ;;  %v16103_v20 = vld [vmem:[#allocation121_spill] sm:$0xff] }
 0x94e   :  { %12523 = vrcp.f32 %v6087_v32 }
 0x957   :  { %v12522_v4 = vpop.eup %12521 }
 0x958   :  { %v6093_v10 = vmul.f32 %v12522_v4, %v6092_v16  ;;  %v12524_v15 = vpop.eup %12523  ;;  %v16105_v4 = vld [vmem:[#allocation123_spill] sm:$0xff] }
 0x959   :  { %v6096_v2 = vsub.f32 1.0, %v12524_v15  ;;  %v6098_v14 = vmul.f32 %v12524_v15, %v14801_v0  ;;  %v16089_v0 = vld [vmem:[#allocation102_spill] sm:$0xff] }
 0x95a   :  { %v6094_v12 = vadd.f32 %v6093_v10, %v5934_v28  ;;  %v16106_v28 = vld [vmem:[#allocation124_spill] sm:$0xff]  ;;  %v16107_v10 = vld [vmem:[#allocation125_spill] sm:$0xff] }
 0x95b   :  { %v14985_v60 = vpop.f32.mrb[64].mxu0 }
 0x95c   :  { %12525 = vtanh.f32 %v6094_v12  ;;  %v9488_v46 = vpop.f32.mrb[65].mxu0  ;;  %v16108_v12 = vld [vmem:[#allocation126_spill] sm:$0xff] }
 0x95d   :  { %v16109_v46 = vld [vmem:[#allocation127_spill] sm:$0xff] }
 0x966   :  { %v12526_v1 = vpop.eup %12525 }
 0x967   :  { %v6097_v6 = vmul.f32 %v12526_v1, %v6096_v2  ;;  %v16110_v2 = vld [vmem:[#allocation128_spill] sm:$0xff] }
 0x969   :  { %v14988_v57 = vadd.f32 %v6098_v14, %v6097_v6  ;;  %v16111_v6 = vld [vmem:[#allocation129_spill] sm:$0xff]  ;;  %v16112_v14 = vld [vmem:[#allocation130_spill] sm:$0xff] }
 0x96b   :  { %6610 = vmatmul.mubr.f32.vlgmr.msra.gmra.mrb[66].mxu1 %v14988_v57  ;;  %9592 = vmatmul.mubr.f32.vlgmr.msra.gmra.mrb[70].mxu0 %v14988_v57 }
 0x96c   :  { %11954 = vmatpush1.bf16.msra.mxu1 %v16086_v18  ;;  %11985 = vmatpush3.bf16.msra.mxu0 %v16087_v62 }
 0x96d   :  { %11956 = vmatprep.subr.bf16.mxu1 %v16088_v23  ;;  %11986 = vmatprep.subr.bf16.mxu0 %v15561_v21 }
 0x96e   :  { %6772 = vmatprep.mubr.f32.mxu1 %v15543_v43  ;;  %9626 = vmatprep.mubr.msk.f32.mxu0 %vm12804_vm0, %v15543_v43 }
 0x970   :  { %11958 = vmatpush1.bf16.msra.mxu1 %v16089_v0  ;;  %11988 = vmatpush3.bf16.msra.mxu0 %v16090_v27 }
 0x971   :  { %11960 = vmatprep.subr.bf16.mxu1 %v16091_v33  ;;  %11989 = vmatprep.subr.bf16.mxu0 %v15561_v21 }
 0x974   :  { %11962 = vmatpush1.bf16.msra.mxu1 %v16092_v31  ;;  %11991 = vmatpush3.bf16.msra.mxu0 %v15950_v22 }
 0x975   :  { %11964 = vmatprep.subr.bf16.mxu1 %v16034_v35  ;;  %11992 = vmatprep.subr.bf16.mxu0 %v15561_v21 }
 0x978   :  { %11966 = vmatpush1.bf16.msra.mxu1 %v16093_v8  ;;  %11994 = vmatpush3.bf16.msra.mxu0 %v16094_v25 }
 0x979   :  { %11968 = vmatprep.subr.bf16.mxu1 %v16095_v38  ;;  %11995 = vmatprep.subr.bf16.mxu0 %v15561_v21 }
 0x97b   :  { %v6307_v5 = vpop.f32.mrb[64].mxu1  ;;  %v6378_v42 = vpop.f32.mrb[66].mxu0 }
 0x97c   :  { %v12239_v49 = vadd.f32 %v6307_v5, %v13939_v24  ;;  %11970 = vmatpush1.bf16.msra.mxu1 %v15782_v9  ;;  %11997 = vmatpush3.bf16.msra.mxu0 %v15870_v51  ;;  %v6309_v55 = vpop.f32.mrb[65].mxu1  ;;  %v9523_v53 = vpop.f32.mrb[67].mxu0  ;;  %v16113_v5 = vld [vmem:[#allocation131_spill] sm:$0xff] }
 0x97d   :  { %11972 = vmatprep.subr.bf16.mxu1 %v15871_v52  ;;  %11998 = vmatprep.subr.bf16.mxu0 %v15561_v21  ;;  %v12240_v63 = vadd.f32 %v6309_v55, %v15785_v41  ;;  %v6238_v53 = vadd.f32 %v14985_v60, %v16051_v37  ;;  %v16120_v60 = vld [vmem:[#allocation138_spill] sm:$0xff] }
 0x97e   :  { %v7502_v13 = vmul.f32 -1.442695, %v12239_v49  ;;  %v6396_v49 = vadd.f32 %v14864_v29, %v6378_v42  ;;  %v16119_v42 = vld [vmem:[#allocation137_spill] sm:$0xff] }
 0x97f   :  { %v7503_v58 = vmul.f32 -1.442695, %v12240_v63  ;;  %v16114_v63 = vld [vmem:[#allocation132_spill] sm:$0xff] }
 0x980   :  { %12527 = vpow2.f32 %v7502_v13  ;;  %11974 = vmatpush1.bf16.msra.mxu1 %v16096_v44  ;;  %12000 = vmatpush3.bf16.msra.mxu0 %v16097_v59 }
 0x981   :  { %11976 = vmatprep.subr.bf16.mxu1 %v16098_v56  ;;  %12001 = vmatprep.subr.bf16.mxu0 %v15561_v21  ;;  %12529 = vpow2.f32 %v7503_v58  ;;  %v16115_v58 = vld [vmem:[#allocation133_spill] sm:$0xff] }
 0x984   :  { %11978 = vmatpush1.bf16.msra.mxu1 %v16099_v17  ;;  %12003 = vmatpush3.bf16.msra.mxu0 %v16100_v54 }
 0x985   :  { %11980 = vmatprep.subr.bf16.mxu1 %v16101_v47  ;;  %12004 = vmatprep.subr.bf16.mxu0 %v15561_v21 }
 0x988   :  { %11982 = vmatpush1.bf16.msra.mxu1 %v16102_v11  ;;  %12006 = vmatpush3.bf16.msra.mxu0 %v16103_v20 }
 0x989   :  { %12008 = vmatprep.subr.bf16.mxu1 %v16104_v48  ;;  %12039 = vmatprep.subr.bf16.mxu0 %v15561_v21 }
 0x98a   :  { %v12528_v32 = vpop.eup %12527 }
 0x98b   :  { %v6390_v16 = vadd.f32 1.0, %v12528_v32  ;;  %6773 = vmatmul.mubr.f32.vlgmr.msra.gmra.mrb[68].mxu1 %v14988_v57  ;;  %9627 = vmatmul.mubr.f32.vlgmr.msra.gmra.mrb[72].mxu0 %v14988_v57  ;;  %v12530_v15 = vpop.eup %12529  ;;  %v16116_v32 = vld [vmem:[#allocation134_spill] sm:$0xff] }
 0x98c   :  { %12010 = vmatpush1.bf16.msra.mxu1 %v16105_v4  ;;  %12041 = vmatpush3.bf16.msra.mxu0 %v16106_v28  ;;  %v6391_v1 = vadd.f32 1.0, %v12530_v15  ;;  %v16117_v15 = vld [vmem:[#allocation135_spill] sm:$0xff] }
 0x98d   :  { %12531 = vrcp.f32 %v6390_v16  ;;  %12012 = vmatprep.subr.bf16.mxu1 %v16107_v10  ;;  %12042 = vmatprep.subr.bf16.mxu0 %v15561_v21 }
 0x98e   :  { %6913 = vmatprep.mubr.f32.mxu1 %v15543_v43  ;;  %9661 = vmatprep.mubr.msk.f32.mxu0 %vm12804_vm0, %v15543_v43  ;;  %12533 = vrcp.f32 %v6391_v1  ;;  %v16121_v1 = vld [vmem:[#allocation139_spill] sm:$0xff] }
 0x990   :  { %12014 = vmatpush1.bf16.msra.mxu1 %v16108_v12  ;;  %12044 = vmatpush3.bf16.msra.mxu0 %v16109_v46 }
 0x991   :  { %12016 = vmatprep.subr.bf16.mxu1 %v16110_v2  ;;  %12045 = vmatprep.subr.bf16.mxu0 %v15561_v21 }
 0x994   :  { %12018 = vmatpush1.bf16.msra.mxu1 %v16111_v6  ;;  %12047 = vmatpush3.bf16.msra.mxu0 %v16112_v14 }
 0x995   :  { %12020 = vmatprep.subr.bf16.mxu1 %v16113_v5  ;;  %12048 = vmatprep.subr.bf16.mxu0 %v15561_v21 }
 0x997   :  { %v12532_v55 = vpop.eup %12531 }
 0x998   :  { %v6397_v13 = vmul.f32 %v12532_v55, %v6396_v49  ;;  %12022 = vmatpush1.bf16.msra.mxu1 %v16114_v63  ;;  %12050 = vmatpush3.bf16.msra.mxu0 %v16115_v58  ;;  %v16122_v49 = vld [vmem:[#allocation140_spill] sm:$0xff]  ;;  %v12534_v55 = vpop.eup %12533 }
 0x999   :  { %12024 = vmatprep.subr.bf16.mxu1 %v16116_v32  ;;  %12051 = vmatprep.subr.bf16.mxu0 %v15561_v21  ;;  %v6402_v37 = vmul.f32 %v12534_v55, %v14888_v26 }
 0x99a   :  { %v6398_v16 = vadd.f32 %v6397_v13, %v6238_v53  ;;  %v6400_v53 = vsub.f32 1.0, %v12534_v55  ;;  %v7324_v55 = vld [vmem:[#allocation16 + $0x10] sm:$0xff] }
 0x99c   :  { %12535 = vtanh.f32 %v6398_v16  ;;  %12026 = vmatpush1.bf16.msra.mxu1 %v16117_v15  ;;  %12053 = vmatpush3.bf16.msra.mxu0 %v16118_v40 }
 0x99d   :  { %12028 = vmatprep.subr.bf16.mxu1 %v16119_v42  ;;  %12054 = vmatprep.subr.bf16.mxu0 %v15561_v21 }
 0x9a0   :  { %12030 = vmatpush1.bf16.msra.mxu1 %v16120_v60  ;;  %12056 = vmatpush3.bf16.msra.mxu0 %v16121_v1 }
 0x9a1   :  { %12032 = vmatprep.subr.bf16.mxu1 %v16122_v49  ;;  %12057 = vmatprep.subr.bf16.mxu0 %v15561_v21 }
 0x9a4   :  { %12034 = vmatpush1.bf16.msra.mxu1 %v16061_v3  ;;  %12059 = vmatpush3.bf16.msra.mxu0 %v16062_v34 }
 0x9a5   :  { %12036 = vmatprep.subr.bf16.mxu1 %v16063_v61  ;;  %12060 = vmatprep.subr.bf16.mxu0 %v15561_v21 }
 0x9a6   :  { %v12536_v13 = vpop.eup %12535 }
 0x9a7   :  { %v6401_v16 = vmul.f32 %v12536_v13, %v6400_v53  ;;  %v7325_v53 = vld [vmem:[#allocation16 + $0x18] sm:$0xff] }
 0x9a8   :  { %12038 = vmatpush1.bf16.msra.mxu1 %v16065_v36  ;;  %12062 = vmatpush3.bf16.msra.mxu0 %v16066_v39  ;;  %v12179_v13 = vpack.c.bf16 %v7325_v53, %v7324_v55 }
 0x9a9   :  { %v15068_v29 = vadd.f32 %v6402_v37, %v6401_v16  ;;  %12064 = vmatprep.subr.bf16.mxu1 %v16084_v45  ;;  %12095 = vmatprep.subr.bf16.mxu0 %v15561_v21  ;;  %v7326_v16 = vld [vmem:[#allocation16 + $0x20] sm:$0xff] }
 0x9ab   :  { %6914 = vmatmul.mubr.f32.vlgmr.msra.gmra.mrb[68].mxu1 %v15068_v29  ;;  %9662 = vmatmul.mubr.f32.vlgmr.msra.gmra.mrb[74].mxu0 %v15068_v29 }
 0x9ac   :  { %12066 = vmatpush1.bf16.msra.mxu1 %v16086_v18  ;;  %12097 = vmatpush3.bf16.msra.mxu0 %v16087_v62 }
 0x9ad   :  { %12068 = vmatprep.subr.bf16.mxu1 %v16088_v23  ;;  %12098 = vmatprep.subr.bf16.mxu0 %v15561_v21 }
 0x9ae   :  { %7076 = vmatprep.mubr.f32.mxu1 %v15543_v43  ;;  %9696 = vmatprep.mubr.msk.f32.mxu0 %vm12804_vm0, %v15543_v43 }
 0x9b0   :  { %12070 = vmatpush1.bf16.msra.mxu1 %v16089_v0  ;;  %12100 = vmatpush3.bf16.msra.mxu0 %v16090_v27 }
 0x9b1   :  { %12072 = vmatprep.subr.bf16.mxu1 %v16091_v33  ;;  %12101 = vmatprep.subr.bf16.mxu0 %v15561_v21 }
 0x9b4   :  { %12074 = vmatpush1.bf16.msra.mxu1 %v16092_v31  ;;  %12103 = vmatpush3.bf16.msra.mxu0 %v15950_v22 }
 0x9b5   :  { %12076 = vmatprep.subr.bf16.mxu1 %v16034_v35  ;;  %12104 = vmatprep.subr.bf16.mxu0 %v15561_v21 }
 0x9b8   :  { %12078 = vmatpush1.bf16.msra.mxu1 %v16093_v8  ;;  %12106 = vmatpush3.bf16.msra.mxu0 %v16094_v25 }
 0x9b9   :  { %12080 = vmatprep.subr.bf16.mxu1 %v16095_v38  ;;  %12107 = vmatprep.subr.bf16.mxu0 %v15561_v21 }
 0x9bc   :  { %12082 = vmatpush1.bf16.msra.mxu1 %v15782_v9  ;;  %12109 = vmatpush3.bf16.msra.mxu0 %v15870_v51 }
 0x9bd   :  { %12084 = vmatprep.subr.bf16.mxu1 %v15871_v52  ;;  %12110 = vmatprep.subr.bf16.mxu0 %v15561_v21 }
 0x9c0   :  { %12086 = vmatpush1.bf16.msra.mxu1 %v16096_v44  ;;  %12112 = vmatpush3.bf16.msra.mxu0 %v16097_v59 }
 0x9c1   :  { %12088 = vmatprep.subr.bf16.mxu1 %v16098_v56  ;;  %12113 = vmatprep.subr.bf16.mxu0 %v15561_v21 }
 0x9c4   :  { %12090 = vmatpush1.bf16.msra.mxu1 %v16099_v17  ;;  %12115 = vmatpush3.bf16.msra.mxu0 %v16100_v54 }
 0x9c5   :  { %12092 = vmatprep.subr.bf16.mxu1 %v16101_v47  ;;  %12116 = vmatprep.subr.bf16.mxu0 %v15561_v21 }
 0x9c8   :  { %12094 = vmatpush1.bf16.msra.mxu1 %v16102_v11  ;;  %12118 = vmatpush3.bf16.msra.mxu0 %v16103_v20 }
 0x9c9   :  { %12120 = vmatprep.subr.bf16.mxu1 %v16104_v48  ;;  %12151 = vmatprep.subr.bf16.mxu0 %v15561_v21 }
 0x9fe   :  { %v6541_v9 = vpop.f32.mrb[68].mxu0 }
 0x9ff   :  { %v9558_v52 = vpop.f32.mrb[69].mxu0  ;;  %v6542_v25 = vadd.f32 %v6541_v9, %v16085_v19  ;;  %v7327_v9 = vld [vmem:[#allocation16 + $0x28] sm:$0xff] }
 0xa00   :  { %v7328_v52 = vld [vmem:[#allocation16 + $0x30] sm:$0xff] }
 0xa3e   :  { %v6611_v51 = vpop.f32.mrb[66].mxu1  ;;  %v6682_v37 = vpop.f32.mrb[70].mxu0 }
 0xa3f   :  { %v12241_v22 = vadd.f32 %v6611_v51, %v16075_v30  ;;  %v6613_v35 = vpop.f32.mrb[67].mxu1  ;;  %v9593_v26 = vpop.f32.mrb[71].mxu0  ;;  %v6700_v31 = vadd.f32 %v14980_v50, %v6682_v37  ;;  %v7329_v51 = vld [vmem:[#allocation16 + $0x38] sm:$0xff] }
 0xa40   :  { %v12242_v18 = vadd.f32 %v6613_v35, %v16078_v7  ;;  %v12185_v37 = vpack.c.bf16 %v7329_v51, %v7328_v52  ;;  %v7331_v35 = vld [vmem:[#allocation16 + $0x48] sm:$0xff] }
 0xa41   :  { %v7504_v45 = vmul.f32 -1.442695, %v12241_v22  ;;  %v7330_v22 = vld [vmem:[#allocation16 + $0x40] sm:$0xff] }
 0xa42   :  { %v7505_v62 = vmul.f32 -1.442695, %v12242_v18  ;;  %v12188_v26 = vpack.c.bf16 %v7331_v35, %v7330_v22  ;;  %v7333_v18 = vld [vmem:[#allocation16 + $0x58] sm:$0xff] }
 0xa43   :  { %12537 = vpow2.f32 %v7504_v45  ;;  %v7332_v45 = vld [vmem:[#allocation16 + $0x50] sm:$0xff] }
 0xa44   :  { %12539 = vpow2.f32 %v7505_v62  ;;  %v12191_v62 = vpack.c.bf16 %v7333_v18, %v7332_v45 }
 0xa4d   :  { %v12538_v23 = vpop.eup %12537 }
 0xa4e   :  { %v6694_v0 = vadd.f32 1.0, %v12538_v23  ;;  %v12540_v27 = vpop.eup %12539  ;;  %v7334_v23 = vld [vmem:[#allocation16 + $0x60] sm:$0xff] }
 0xa4f   :  { %v6695_v33 = vadd.f32 1.0, %v12540_v27 }
 0xa50   :  { %12541 = vrcp.f32 %v6694_v0  ;;  %v7335_v0 = vld [vmem:[#allocation16 + $0x68] sm:$0xff] }
 0xa51   :  { %12543 = vrcp.f32 %v6695_v33  ;;  %v12194_v27 = vpack.c.bf16 %v7335_v0, %v7334_v23  ;;  %v7336_v33 = vld [vmem:[#allocation16 + $0x70] sm:$0xff] }
 0xa5a   :  { %v12542_v8 = vpop.eup %12541 }
 0xa5b   :  { %v6701_v38 = vmul.f32 %v12542_v8, %v6700_v31  ;;  %v12544_v7 = vpop.eup %12543  ;;  %v7337_v31 = vld [vmem:[#allocation16 + $0x78] sm:$0xff] }
 0xa5c   :  { %v6704_v56 = vsub.f32 1.0, %v12544_v7  ;;  %v6706_v47 = vmul.f32 %v12544_v7, %v14988_v57  ;;  %v12197_v8 = vpack.c.bf16 %v7337_v31, %v7336_v33 }
 0xa5d   :  { %v6702_v30 = vadd.f32 %v6701_v38, %v6542_v25  ;;  %v16125_v25 = vld [vmem:[#allocation65_spill] sm:$0xff] }
 0xa5e   :  { %v6845_v44 = vpop.f32.mrb[72].mxu0 }
 0xa5f   :  { %12545 = vtanh.f32 %v6702_v30  ;;  %v9628_v59 = vpop.f32.mrb[73].mxu0 }
 0xa69   :  { %v12546_v17 = vpop.eup %12545 }
 0xa6a   :  { %v6705_v54 = vmul.f32 %v12546_v17, %v6704_v56 }
 0xa6c   :  { %v15114_v11 = vadd.f32 %v6706_v47, %v6705_v54 }
 0xa6e   :  { %7077 = vmatmul.mubr.f32.vlgmr.msra.gmra.mrb[70].mxu1 %v15114_v11  ;;  %9697 = vmatmul.mubr.f32.vlgmr.msra.gmra.mrb[76].mxu0 %v15114_v11 }
 0xa6f   :  { %12122 = vmatpush1.bf16.msra.mxu1 %v16105_v4  ;;  %12153 = vmatpush3.bf16.msra.mxu0 %v16106_v28 }
 0xa70   :  { %12124 = vmatprep.subr.bf16.mxu1 %v16107_v10  ;;  %12154 = vmatprep.subr.bf16.mxu0 %v15561_v21 }
 0xa71   :  { %7217 = vmatprep.mubr.f32.mxu1 %v15543_v43  ;;  %9731 = vmatprep.mubr.msk.f32.mxu0 %vm12804_vm0, %v15543_v43 }
 0xa73   :  { %12126 = vmatpush1.bf16.msra.mxu1 %v16108_v12  ;;  %12156 = vmatpush3.bf16.msra.mxu0 %v16109_v46 }
 0xa74   :  { %12128 = vmatprep.subr.bf16.mxu1 %v16110_v2  ;;  %12157 = vmatprep.subr.bf16.mxu0 %v15561_v21 }
 0xa77   :  { %12130 = vmatpush1.bf16.msra.mxu1 %v16111_v6  ;;  %12159 = vmatpush3.bf16.msra.mxu0 %v16112_v14  ;;  %v16123_v6 = vld [vmem:[#allocation51_spill] sm:$0xff] }
 0xa78   :  { %12132 = vmatprep.subr.bf16.mxu1 %v16113_v5  ;;  %12160 = vmatprep.subr.bf16.mxu0 %v15561_v21 }
 0xa7b   :  { %12134 = vmatpush1.bf16.msra.mxu1 %v16114_v63  ;;  %12162 = vmatpush3.bf16.msra.mxu0 %v16115_v58 }
 0xa7c   :  { %12136 = vmatprep.subr.bf16.mxu1 %v16116_v32  ;;  %12163 = vmatprep.subr.bf16.mxu0 %v15561_v21  ;;  %v7322_v32 = vld [vmem:[#allocation16] sm:$0xff] }
 0xa7e   :  { %v6915_v50 = vpop.f32.mrb[68].mxu1  ;;  %v6986_v19 = vpop.f32.mrb[74].mxu0 }
 0xa7f   :  { %v12243_v57 = vadd.f32 %v6915_v50, %v13939_v24  ;;  %v6917_v20 = vpop.f32.mrb[69].mxu1  ;;  %v9663_v48 = vpop.f32.mrb[75].mxu0  ;;  %12138 = vmatpush1.bf16.msra.mxu1 %v16117_v15  ;;  %12165 = vmatpush3.bf16.msra.mxu0 %v16118_v40 }
 0xa80   :  { %12140 = vmatprep.subr.bf16.mxu1 %v16119_v42  ;;  %12166 = vmatprep.subr.bf16.mxu0 %v15561_v21  ;;  %v12244_v28 = vadd.f32 %v6917_v20, %v15785_v41 }
 0xa81   :  { %v7506_v4 = vmul.f32 -1.442695, %v12243_v57 }
 0xa82   :  { %v7507_v10 = vmul.f32 -1.442695, %v12244_v28 }
 0xa83   :  { %12547 = vpow2.f32 %v7506_v4  ;;  %12142 = vmatpush1.bf16.msra.mxu1 %v16120_v60  ;;  %12168 = vmatpush3.bf16.msra.mxu0 %v16121_v1 }
 0xa84   :  { %12144 = vmatprep.subr.bf16.mxu1 %v16122_v49  ;;  %12169 = vmatprep.subr.bf16.mxu0 %v15561_v21  ;;  %12549 = vpow2.f32 %v7507_v10 }
 0xa87   :  { %12146 = vmatpush1.bf16.msra.mxu1 %v16061_v3  ;;  %12171 = vmatpush3.bf16.msra.mxu0 %v16062_v34  ;;  %v7004_v3 = vadd.f32 %v16123_v6, %v6986_v19  ;;  %v16124_v34 = vld [vmem:[#allocation64_spill] sm:$0xff] }
 0xa88   :  { %12148 = vmatprep.subr.bf16.mxu1 %v16063_v61  ;;  %12172 = vmatprep.subr.bf16.mxu0 %v15561_v21  ;;  %v6846_v5 = vadd.f32 %v6845_v44, %v16124_v34 }
 0xa8b   :  { %12150 = vmatpush1.bf16.msra.mxu1 %v16065_v36  ;;  %12174 = vmatpush3.bf16.msra.mxu0 %v16066_v39  ;;  %v7323_v39 = vld [vmem:[#allocation16 + $0x8] sm:$0xff] }
 0xa8c   :  { %12175 = vmatprep.subr.bf16.mxu1 %v15561_v21  ;;  %v12176_v1 = vpack.c.bf16 %v7323_v39, %v7322_v32 }
 0xa8d   :  { %v12548_v40 = vpop.eup %12547 }
 0xa8e   :  { %v6998_v12 = vadd.f32 1.0, %v12548_v40  ;;  %v12550_v46 = vpop.eup %12549 }
 0xa8f   :  { %v6999_v2 = vadd.f32 1.0, %v12550_v46 }
 0xa90   :  { %12551 = vrcp.f32 %v6998_v12 }
 0xa91   :  { %12553 = vrcp.f32 %v6999_v2 }
 0xa9a   :  { %v12552_v14 = vpop.eup %12551 }
 0xa9b   :  { %v7005_v61 = vmul.f32 %v12552_v14, %v7004_v3  ;;  %v12554_v58 = vpop.eup %12553 }
 0xa9c   :  { %v7008_v36 = vsub.f32 1.0, %v12554_v58  ;;  %v7010_v60 = vmul.f32 %v12554_v58, %v15068_v29  ;;  %v12182_v29 = vpack.c.bf16 %v7327_v9, %v7326_v16 }
 0xa9d   :  { %v7006_v63 = vadd.f32 %v7005_v61, %v6846_v5 }
 0xa9f   :  { %12555 = vtanh.f32 %v7006_v63 }
 0xaa9   :  { %v12556_v15 = vpop.eup %12555 }
 0xaaa   :  { %v7009_v42 = vmul.f32 %v12556_v15, %v7008_v36 }
 0xaac   :  { %v15157_v49 = vadd.f32 %v7010_v60, %v7009_v42 }
 0xaae   :  { %7218 = vmatmul.mubr.f32.vlgmr.msra.gmra.mrb[70].mxu1 %v15157_v49  ;;  %9732 = vmatmul.mubr.f32.vlgmr.msra.gmra.mrb[78].mxu0 %v15157_v49 }
 0xaaf   :  { %12177 = vmatpush3.bf16.msra.mxu1 %v12176_v1  ;;  %9766 = vmatprep.mubr.msk.f32.mxu1 %vm12804_vm0, %v15543_v43 }
 0xab0   :  { %12178 = vmatprep.subr.bf16.mxu1 %v15561_v21 }
 0xab3   :  { %12180 = vmatpush3.bf16.msra.mxu1 %v12179_v13 }
 0xab4   :  { %12181 = vmatprep.subr.bf16.mxu1 %v15561_v21 }
 0xab7   :  { %12183 = vmatpush3.bf16.msra.mxu1 %v12182_v29 }
 0xab8   :  { %12184 = vmatprep.subr.bf16.mxu1 %v15561_v21 }
 0xabb   :  { %12186 = vmatpush3.bf16.msra.mxu1 %v12185_v37 }
 0xabc   :  { %12187 = vmatprep.subr.bf16.mxu1 %v15561_v21 }
 0xabf   :  { %12189 = vmatpush3.bf16.msra.mxu1 %v12188_v26 }
 0xac0   :  { %12190 = vmatprep.subr.bf16.mxu1 %v15561_v21 }
 0xac3   :  { %12192 = vmatpush3.bf16.msra.mxu1 %v12191_v62 }
 0xac4   :  { %12193 = vmatprep.subr.bf16.mxu1 %v15561_v21 }
 0xac7   :  { %12195 = vmatpush3.bf16.msra.mxu1 %v12194_v27 }
 0xac8   :  { %12196 = vmatprep.subr.bf16.mxu1 %v15561_v21 }
 0xacb   :  { %12198 = vmatpush3.bf16.msra.mxu1 %v12197_v8 }
 0xace   :  { %9767 = vmatmul.mubr.f32.vlgmr.msra.gmra.mrb[72].mxu1 %v16125_v25 }
 0xacf   :  { %9769 = vmatprep.mubr.msk.f32.mxu1 %vm12804_vm0, %v15543_v43 }
 0xad2   :  { %9770 = vmatmul.mubr.f32.gmra.mrb[74].mxu1 %v15114_v11 }
 0xad3   :  { %9772 = vmatprep.mubr.msk.f32.mxu1 %vm12804_vm0, %v15543_v43 }
 0xb41   :  { %v7149_v38 = vpop.f32.mrb[76].mxu0 }
 0xb42   :  { %v9698_v30 = vpop.f32.mrb[77].mxu0  ;;  %v7150_v48 = vadd.f32 %v7149_v38, %v16124_v34 }
 0xb81   :  { %v7219_v44 = vpop.f32.mrb[70].mxu1  ;;  %v7290_v59 = vpop.f32.mrb[78].mxu0 }
 0xb82   :  { %v12245_v7 = vadd.f32 %v7219_v44, %v13939_v24  ;;  %v7221_v56 = vpop.f32.mrb[71].mxu1  ;;  %v9733_v17 = vpop.f32.mrb[79].mxu0  ;;  %v7308_v43 = vadd.f32 %v16123_v6, %v7290_v59  ;;  %v7510_v24 = vld [vmem:[%s15213_s14] ss:$0 sm:$0xff]  ;;  %s12806_s14 = smov [#allocation18]  }
 0xb83   :  { %v12246_v54 = vadd.f32 %v7221_v56, %v15785_v41  ;;  %s7436_s20 = sshll.u32 %s12806_s14, 4  ;;  %s7437_s20 = int_to_ptr.vmem [resolvable:$true] %s7436_s20 }
 0xb84   :  { %v7508_v21 = vmul.f32 -1.442695, %v12245_v7  ;;  %s12757_s25 = scalar_lea.vmem %s7437_s20, 384  ;;  %p12762_p9 = scmp.lt.s32.totalorder %s7437_s20, %s7437_s20 }
 0xb85   :  { %v7509_v47 = vmul.f32 -1.442695, %v12246_v54  ;;  %p12758_p8 = scmp.ne.s32.totalorder %s7437_s20, %s12757_s25  ;;  %p12763_p10 = scmp.lt.s32.totalorder %s12757_s25, %s12757_s25 }
 0xb86   :  { %12557 = vpow2.f32 %v7508_v21 }
 0xb87   :  { %12559 = vpow2.f32 %v7509_v47  ;;  %p12764_p11 = por %p12763_p10, %p12762_p9 }
 0xb89   :  { %p12765_p12 = pnand %p12764_p11, %p12758_p8 }
 0xb90   :  { %v12558_v50 = vpop.eup %12557 }
 0xb91   :  { %v7302_v19 = vadd.f32 1.0, %v12558_v50  ;;  %v12560_v11 = vpop.eup %12559 }
 0xb92   :  { %v7303_v57 = vadd.f32 1.0, %v12560_v11 }
 0xb93   :  { %12561 = vrcp.f32 %v7302_v19 }
 0xb94   :  { %12563 = vrcp.f32 %v7303_v57 }
 0xb9d   :  { %v12562_v20 = vpop.eup %12561 }
 0xb9e   :  { %v7309_v4 = vmul.f32 %v12562_v20, %v7308_v43  ;;  %v12564_v3 = vpop.eup %12563 }
 0xb9f   :  { %v7312_v6 = vsub.f32 1.0, %v12564_v3  ;;  %v7314_v5 = vmul.f32 %v12564_v3, %v15157_v49 }
 0xba0   :  { %v7310_v41 = vadd.f32 %v7309_v4, %v7150_v48 }
 0xba1   :  { %v7411_v28 = vpop.f32.mrb[72].mxu1 }
 0xba2   :  { %12565 = vtanh.f32 %v7310_v41  ;;  %v7412_v10 = vadd.f32 %v7510_v24, %v7411_v28  ;;  %v9768_v40 = vpop.f32.mrb[73].mxu1 }
 0xba4   :  { %12567 = vtanh.f32 %v7412_v10 }
 0xba5   :  { %v7416_v12 = vpop.f32.mrb[74].mxu1 }
 0xba6   :  { %v7417_v46 = vadd.f32 %v7510_v24, %v7416_v12  ;;  %v9771_v2 = vpop.f32.mrb[75].mxu1 }
 0xba8   :  { %12569 = vtanh.f32 %v7417_v46 }
 0xbac   :  { %v12566_v14 = vpop.eup %12565 }
 0xbad   :  { %v7313_v34 = vmul.f32 %v12566_v14, %v7312_v6 }
 0xbae   :  { %v12568_v61 = vpop.eup %12567 }
 0xbaf   :  { %7428 = vst [vmem:[#allocation18] sm:$0xff] %v12568_v61  ;;  %v7315_v63 = vadd.f32 %v7314_v5, %v7313_v34 }
 0xbb1   :  { %9773 = vmatmul.mubr.f32.gmra.mrb[76].mxu1 %v7315_v63 }
 0xbb2   :  { %v12570_v58 = vpop.eup %12569 }
 0xbb3   :  { %7429 = vst [vmem:[#allocation18 + $0x8] sm:$0xff] %v12570_v58 }
 0xc84   :  { %v7421_v36 = vpop.f32.mrb[76].mxu1 }
 0xc85   :  { %v7422_v32 = vadd.f32 %v7510_v24, %v7421_v36  ;;  %v9774_v39 = vpop.f32.mrb[77].mxu1 }
 0xc87   :  { %12571 = vtanh.f32 %v7422_v32 }
 0xc91   :  { %v12572_v15 = vpop.eup %12571 }
 0xc92   :  { %7430 = vst [vmem:[#allocation18 + $0x10] sm:$0xff] %v12572_v15 }
 0xc93   :  { %12768 = shalt.err (!%p12765_p12)
}
 0xc94   :  { %s12769_s9 = scalar_lea.hbm %s15214_s15, 384 }
 0xc95   :  { %p12770_p13 = scmp.ne.s32.totalorder %s15214_s15, %s12769_s9  ;;  %p12773_p0 = scmp.lt.u32.totalorder %s12769_s9, %s15214_s15 }
 0xc97   :  { %p12775_p1 = pnand %p12773_p0, %p12770_p13 }
 0xc99   :  { %12778 = shalt.err (!%p12775_p1)
}
 0xc9a   :  { %7442 = dma.vmem_to_hbm [thread:$0]  %s7437_s20, 384, %s15214_s15, [#allocation6], %s12801_s10, %s12801_s10, %s12802_s30  }
 0xc9b   :  { %12789 = dma.done.wait [#allocation6], 384  }
 0xc9c   :  { %12790 = vsyncadd [#allocation6], 4294966912 }
 0xc9d   :  { %7446 = vsyncpa [#allocation5], 1 }
 0xc9e   :  { %7447 = vsyncpa [#allocation8], 1 }
 0xc9f   :  { %7448 = vsyncpa [#allocation11], 1 }
 0xca0   :  { %7449 = vsyncpa [#allocation14], 1 }
 0xca1   :  { %7450 = vsyncpa [#allocation17], 1 }
 0xca2   :  { %7451 = vsyncpa [#allocation6], 1 }

</bundles_post_ra>
